<compile_context>
chip_gen: v7x
topology: tpu7x:2x2x1
jax: 0.10.0
libtpu: 0.0.40
codegen_flags: <defaults>
</compile_context>

<pallas_src>
import jax
import jax.numpy as jnp
from jax.experimental import pallas as pl
from jax.experimental.pallas import tpu as pltpu


def _round_up(n, m):
    return ((n + m - 1) // m) * m


def _pad2(a, rows, cols):
    return jnp.pad(a, ((0, rows - a.shape[0]), (0, cols - a.shape[1])))


def _vmem_capacity_bytes():
    try:
        return int(pltpu.get_tpu_info().vmem_capacity_bytes)
    except Exception:
        return 64 << 20  # conservative (v7x-sized) fallback


# ---------------------------------------------------------------------------
# Parameter init (mirrors nn.Linear's U(-1/sqrt(fan_in), 1/sqrt(fan_in)));
# weights stored transposed as [in, out] so layers compute x @ W + b.
# Dropout (p=0) and batch_norm=False of F_fully_connected are identities.
# ---------------------------------------------------------------------------
def init_subnet_params(key, size_in, size, internal_size=None):
    if not internal_size:
        internal_size = 2 * size
    dims = [
        ("w1", "b1", size_in, internal_size),
        ("w2", "b2", internal_size, internal_size),
        ("w2b", "b2b", internal_size, internal_size),
        ("w3", "b3", internal_size, size),
    ]
    params = {}
    for wname, bname, fan_in, fan_out in dims:
        key, kw, kb = jax.random.split(key, 3)
        bound = 1.0 / (fan_in ** 0.5)
        params[wname] = jax.random.uniform(
            kw, (fan_in, fan_out), jnp.float32, -bound, bound)
        params[bname] = jax.random.uniform(
            kb, (fan_out,), jnp.float32, -bound, bound)
    return params


# ---------------------------------------------------------------------------
# Pad/cast one subnet's params: feature dims -> multiples of 128, weights to
# the compute dtype (bf16).  fc3 is a single merged [I, 2*P_half] matrix with
# the s-half in lanes [0,P_half) and the t-half in lanes [P_half,2*P_half) so
# one matmul produces both outputs lane-densely.
# ---------------------------------------------------------------------------
def _prepare_subnet(p, compute_dtype):
    size_in, internal = p["w1"].shape
    size_out = p["w3"].shape[1]
    half = size_out // 2

    P_in = _round_up(size_in, 128)
    I = _round_up(internal, 128)
    P_half = _round_up(half, 128)
    cd = compute_dtype

    w3m = jnp.concatenate(
        [_pad2(p["w3"][:, :half], I, P_half),
         _pad2(p["w3"][:, half:], I, P_half)], axis=1).astype(cd)
    b3m = jnp.concatenate(
        [_pad2(p["b3"][:half].reshape(1, -1), 1, P_half),
         _pad2(p["b3"][half:].reshape(1, -1), 1, P_half)], axis=1)

    prep = [
        _pad2(p["w1"], P_in, I).astype(cd),
        _pad2(p["b1"].reshape(1, -1), 1, I),
        _pad2(p["w2"], I, I).astype(cd),
        _pad2(p["b2"].reshape(1, -1), 1, I),
        _pad2(p["w2b"], I, I).astype(cd),
        _pad2(p["b2b"].reshape(1, -1), 1, I),
        w3m, b3m,
    ]
    return prep, (P_in, I, P_half)


# ---------------------------------------------------------------------------
# In-kernel math helpers (pure VPU/EUP ops -- no jnp.arctan inside Mosaic).
# ---------------------------------------------------------------------------
_TAN_PI_8 = 0.41421356237309503
_TAN_3PI_8 = 2.414213562373095
_PI_2 = 1.5707963267948966
_PI_4 = 0.7853981633974483


def _atan_f32(x):
    """Cephes atanf: range-reduce to |t|<=tan(pi/8) + degree-4 poly in t^2."""
    ax = jnp.abs(x)
    hi = ax > _TAN_3PI_8
    mid = ax > _TAN_PI_8
    safe = jnp.maximum(ax, 1e-30)
    t = jnp.where(hi, -1.0 / safe,
                  jnp.where(mid, (ax - 1.0) / (ax + 1.0), ax))
    offs = jnp.where(hi, _PI_2, jnp.where(mid, _PI_4, 0.0))
    z = t * t
    p = (((8.05374449538e-2 * z - 1.38776856032e-1) * z
          + 1.99777106478e-1) * z - 3.33329491539e-1)
    r = offs + (p * z * t + t)
    return jnp.where(x < 0, -r, r)


def _e_clamped(s, clamp):
    return jnp.exp((clamp * 0.636) * _atan_f32(s * (1.0 / clamp)))


def _mlp_st(x, w1, b1, w2, b2, w2b, b2b, w3, b3, cd):
    """fc1->ReLU->fc2->ReLU->fc2b->ReLU->fc3 with bf16 operands / f32 acc."""
    h = jnp.maximum(
        jnp.dot(x.astype(cd), w1[...], preferred_element_type=jnp.float32)
        + b1[...], 0.0)
    h = jnp.maximum(
        jnp.dot(h.astype(cd), w2[...], preferred_element_type=jnp.float32)
        + b2[...], 0.0)
    h = jnp.maximum(
        jnp.dot(h.astype(cd), w2b[...], preferred_element_type=jnp.float32)
        + b2b[...], 0.0)
    r = jnp.dot(h.astype(cd), w3[...], preferred_element_type=jnp.float32) + b3[...]
    ph = w3.shape[1] // 2
    return r[:, :ph], r[:, ph:]


# ---------------------------------------------------------------------------
# glow_coupling_layer.forward (rev=False), fully fused.
# ---------------------------------------------------------------------------
def glow_coupling_forward(x, params_s1, params_s2, *, clamp=5.0,
                          block_b=None, compute_dtype=jnp.bfloat16):
    B, C = x.shape
    split1 = C // 2
    split2 = C - split1
    cd = compute_dtype

    # s2: x2 (split2) -> (s2, t2) each split1 wide;  s1: y1 (split1) -> (s1, t1).
    prep2, (pin2, I2, ph2) = _prepare_subnet(params_s2, cd)
    prep1, (pin1, I1, ph1) = _prepare_subnet(params_s1, cd)
    P1, P2 = pin1, pin2                 # padded widths of x1/y1 and x2/y2
    assert ph2 == P1 and ph1 == P2

    weights = tuple(prep2) + tuple(prep1)
    w_bytes = sum(int(a.size) * a.dtype.itemsize for a in weights)

    cap = _vmem_capacity_bytes()
    # Per-batch-row VMEM footprint: double-buffered f32 x1/x2 in + y1/y2 out,
    # plus live f32/bf16 activations of the dependent 4-matmul chain.
    io_per_row = 2 * 2 * (P1 + P2) * 4
    act_per_row = 4 * (3 * (P1 + P2) + 4 * max(I1, I2))
    per_row = io_per_row + act_per_row

    if block_b is None:
        budget = int(0.55 * cap) - w_bytes - (8 << 20)
        bb = max(8, min(1024, budget // max(per_row, 1)))
        bb = min(bb, _round_up(B, 8))
        block_b = max(8, (bb // 8) * 8)
    block_b = max(8, _round_up(min(block_b, _round_up(B, 8)), 8))
    Bp = _round_up(B, block_b)
    # Keep >= 2 grid steps so ("parallel",) can shard batch across TCs (v7x).
    if Bp // block_b < 2 and B >= 16:
        block_b = _round_up(max(8, Bp // 2), 8)
        Bp = _round_up(B, block_b)

    x1p = _pad2(x[:, :split1].astype(jnp.float32), Bp, P1)
    x2p = _pad2(x[:, split1:].astype(jnp.float32), Bp, P2)

    def kernel(x1_ref, x2_ref,
               w1_2, b1_2, w2_2, b2_2, w2b_2, b2b_2, w3_2, b3_2,
               w1_1, b1_1, w2_1, b2_1, w2b_1, b2b_1, w3_1, b3_1,
               y1_ref, y2_ref):
        x1 = x1_ref[...]
        x2 = x2_ref[...]
        s2v, t2v = _mlp_st(x2, w1_2, b1_2, w2_2, b2_2, w2b_2, b2b_2,
                           w3_2, b3_2, cd)
        y1 = _e_clamped(s2v, clamp) * x1 + t2v      # padded cols: 1*0 + 0 = 0
        y1_ref[...] = y1
        s1v, t1v = _mlp_st(y1, w1_1, b1_1, w2_1, b2_1, w2b_1, b2b_1,
                           w3_1, b3_1, cd)
        y2_ref[...] = _e_clamped(s1v, clamp) * x2 + t1v

    row = lambda i: (i, 0)
    rep = lambda i: (0, 0)

    def run(weight_pipeline):
        if weight_pipeline is None:
            wspec = lambda a: pl.BlockSpec(a.shape, rep)
            wbuf = 2
        else:
            wspec = lambda a: pl.BlockSpec(a.shape, rep,
                                           pipeline_mode=weight_pipeline)
            wbuf = 1
        in_specs = ([pl.BlockSpec((block_b, P1), row),
                     pl.BlockSpec((block_b, P2), row)]
                    + [wspec(a) for a in weights])
        out_specs = [pl.BlockSpec((block_b, P1), row),
                     pl.BlockSpec((block_b, P2), row)]
        out_shape = [jax.ShapeDtypeStruct((Bp, P1), jnp.float32),
                     jax.ShapeDtypeStruct((Bp, P2), jnp.float32)]
        est = wbuf * w_bytes + block_b * per_row + (8 << 20)
        vmem_limit = int(min(int(0.7 * cap), max(est, 32 << 20)))
        call = pl.pallas_call(
            kernel,
            out_shape=out_shape,
            grid_spec=pltpu.PrefetchScalarGridSpec(
                num_scalar_prefetch=0,
                grid=(Bp // block_b,),
                in_specs=in_specs,
                out_specs=out_specs,
            ),
            compiler_params=pltpu.CompilerParams(
                dimension_semantics=("parallel",),
                vmem_limit_bytes=vmem_limit,
            ),
        )
        return call(x1p, x2p, *weights)

    try:
        # Constant index_map -> single-buffer the weight/bias blocks.
        y1p, y2p = run(pl.Buffered(1))
    except Exception:
        # Fallback: default double buffering (still correct, more VMEM).
        y1p, y2p = run(None)

    y1 = y1p[:B, :split1]
    y2 = y2p[:B, :split2]
    return jnp.concatenate([y1, y2], axis=1).astype(x.dtype)


# ---------------------------------------------------------------------------
# Pure-JAX references (matched bf16 recipe and plain f32) for validation.
# ---------------------------------------------------------------------------
def _reference_forward(x, p1, p2, clamp, compute_dtype):
    def lin(a, w, b):
        return jnp.dot(a.astype(compute_dtype), w.astype(compute_dtype),
                       preferred_element_type=jnp.float32) + b

    def mlp(h, p):
        h = jnp.maximum(lin(h, p["w1"], p["b1"]), 0.0)
        h = jnp.maximum(lin(h, p["w2"], p["b2"]), 0.0)
        h = jnp.maximum(lin(h, p["w2b"], p["b2b"]), 0.0)
        return lin(h, p["w3"], p["b3"])

    def e(s):
        return jnp.exp(clamp * 0.636 * jnp.arctan(s / clamp))

    C = x.shape[1]
    s1l = C // 2
    s2l = C - s1l
    x1, x2 = x[:, :s1l], x[:, s1l:]
    r2 = mlp(x2, p2)
    s2, t2 = r2[:, :s1l], r2[:, s1l:]
    y1 = e(s2) * x1 + t2
    r1 = mlp(y1, p1)
    s1, t1 = r1[:, :s2l], r1[:, s2l:]
    y2 = e(s1) * x2 + t1
    return jnp.concatenate([y1, y2], axis=1)


if __name__ == "__main__":
    # channels=6 -> split 3/3; subnets internal size 2*(2*3)=12; batch 256.
    B, C = 256, 6
    CLAMP = 5.0
    split1, split2 = C // 2, C - C // 2

    key = jax.random.PRNGKey(0)
    kx, k1, k2 = jax.random.split(key, 3)
    x = jax.random.normal(kx, (B, C), jnp.float32)
    p_s1 = init_subnet_params(k1, split1, 2 * split2)   # s1: split1 -> 2*split2
    p_s2 = init_subnet_params(k2, split2, 2 * split1)   # s2: split2 -> 2*split1

    y = glow_coupling_forward(x, p_s1, p_s2, clamp=CLAMP,
                              compute_dtype=jnp.bfloat16)
    y = jax.block_until_ready(y)
    assert y.shape == (B, C)

    # The in-kernel atan polynomial must track jnp.arctan tightly (it gets
    # exponentiated); check it on a wide range outside the kernel.
    s_test = jnp.linspace(-50.0, 50.0, 4097, dtype=jnp.float32)
    atan_err = jnp.max(jnp.abs(_atan_f32(s_test) - jnp.arctan(s_test)))
    assert float(atan_err) < 1e-5, "atan polynomial drift too large"

    ref_bf16 = _reference_forward(x, p_s1, p_s2, CLAMP, jnp.bfloat16)
    ref_f32 = _reference_forward(x, p_s1, p_s2, CLAMP, jnp.float32)
    assert jnp.allclose(y, ref_bf16, atol=2e-2, rtol=2e-2), \
        "mismatch vs matched-precision reference"
    assert jnp.allclose(y, ref_f32, atol=1e-1, rtol=1e-1), \
        "mismatch vs f32 reference (bf16 drift too large)"

    print("KERNEL_OK")
</pallas_src>

<mosaic_0001>
module attributes {stable_mosaic.version = 11 : i64} {
  func.func @kernel(%arg0: i32, %arg1: memref<128x128xf32, #tpu.memory_space<vmem>>, %arg2: memref<128x128xf32, #tpu.memory_space<vmem>>, %arg3: memref<128x128xbf16, #tpu.memory_space<vmem>>, %arg4: memref<1x128xf32, #tpu.memory_space<vmem>>, %arg5: memref<128x128xbf16, #tpu.memory_space<vmem>>, %arg6: memref<1x128xf32, #tpu.memory_space<vmem>>, %arg7: memref<128x128xbf16, #tpu.memory_space<vmem>>, %arg8: memref<1x128xf32, #tpu.memory_space<vmem>>, %arg9: memref<128x256xbf16, #tpu.memory_space<vmem>>, %arg10: memref<1x256xf32, #tpu.memory_space<vmem>>, %arg11: memref<128x128xbf16, #tpu.memory_space<vmem>>, %arg12: memref<1x128xf32, #tpu.memory_space<vmem>>, %arg13: memref<128x128xbf16, #tpu.memory_space<vmem>>, %arg14: memref<1x128xf32, #tpu.memory_space<vmem>>, %arg15: memref<128x128xbf16, #tpu.memory_space<vmem>>, %arg16: memref<1x128xf32, #tpu.memory_space<vmem>>, %arg17: memref<128x256xbf16, #tpu.memory_space<vmem>>, %arg18: memref<1x256xf32, #tpu.memory_space<vmem>>, %arg19: memref<128x128xf32, #tpu.memory_space<vmem>>, %arg20: memref<128x128xf32, #tpu.memory_space<vmem>>) attributes {dimension_semantics = [#tpu.dimension_semantics<parallel>], iteration_bounds = array<i64: 2>, scalar_prefetch = 0 : i64, scratch_operands = 0 : i64, tpu.core_type = #tpu.core_type<tc>, window_params = [{transform_indices = @transform_0, window_bounds = array<i64: 128, 128>}, {transform_indices = @transform_1, window_bounds = array<i64: 128, 128>}, {pipeline_mode = #tpu.pipeline_mode<synchronous>, transform_indices = @transform_2, window_bounds = array<i64: 128, 128>}, {pipeline_mode = #tpu.pipeline_mode<synchronous>, transform_indices = @transform_3, window_bounds = array<i64: 1, 128>}, {pipeline_mode = #tpu.pipeline_mode<synchronous>, transform_indices = @transform_4, window_bounds = array<i64: 128, 128>}, {pipeline_mode = #tpu.pipeline_mode<synchronous>, transform_indices = @transform_5, window_bounds = array<i64: 1, 128>}, {pipeline_mode = #tpu.pipeline_mode<synchronous>, transform_indices = @transform_6, window_bounds = array<i64: 128, 128>}, {pipeline_mode = #tpu.pipeline_mode<synchronous>, transform_indices = @transform_7, window_bounds = array<i64: 1, 128>}, {pipeline_mode = #tpu.pipeline_mode<synchronous>, transform_indices = @transform_8, window_bounds = array<i64: 128, 256>}, {pipeline_mode = #tpu.pipeline_mode<synchronous>, transform_indices = @transform_9, window_bounds = array<i64: 1, 256>}, {pipeline_mode = #tpu.pipeline_mode<synchronous>, transform_indices = @transform_10, window_bounds = array<i64: 128, 128>}, {pipeline_mode = #tpu.pipeline_mode<synchronous>, transform_indices = @transform_11, window_bounds = array<i64: 1, 128>}, {pipeline_mode = #tpu.pipeline_mode<synchronous>, transform_indices = @transform_12, window_bounds = array<i64: 128, 128>}, {pipeline_mode = #tpu.pipeline_mode<synchronous>, transform_indices = @transform_13, window_bounds = array<i64: 1, 128>}, {pipeline_mode = #tpu.pipeline_mode<synchronous>, transform_indices = @transform_14, window_bounds = array<i64: 128, 128>}, {pipeline_mode = #tpu.pipeline_mode<synchronous>, transform_indices = @transform_15, window_bounds = array<i64: 1, 128>}, {pipeline_mode = #tpu.pipeline_mode<synchronous>, transform_indices = @transform_16, window_bounds = array<i64: 128, 256>}, {pipeline_mode = #tpu.pipeline_mode<synchronous>, transform_indices = @transform_17, window_bounds = array<i64: 1, 256>}, {transform_indices = @transform_18, window_bounds = array<i64: 128, 128>}, {transform_indices = @transform_19, window_bounds = array<i64: 128, 128>}]} {
    %c0 = arith.constant 0 : index
    %c0_0 = arith.constant 0 : index
    %0 = vector.load %arg1[%c0, %c0_0] : memref<128x128xf32, #tpu.memory_space<vmem>>, vector<128x128xf32>
    %c0_1 = arith.constant 0 : index
    %c0_2 = arith.constant 0 : index
    %1 = vector.load %arg2[%c0_1, %c0_2] : memref<128x128xf32, #tpu.memory_space<vmem>>, vector<128x128xf32>
    %2 = arith.truncf %1 : vector<128x128xf32> to vector<128x128xbf16>
    %c0_3 = arith.constant 0 : index
    %c0_4 = arith.constant 0 : index
    %3 = vector.load %arg3[%c0_3, %c0_4] : memref<128x128xbf16, #tpu.memory_space<vmem>>, vector<128x128xbf16>
    %cst = arith.constant dense<0.000000e+00> : vector<128x128xf32>
    %4 = tpu.matmul %2, %3, %cst {dimension_numbers = #tpu.dot_dimension_numbers<[1], [0], [0], [1], [0, 0, 1, 1], [], []>} : vector<128x128xbf16>, vector<128x128xbf16>, vector<128x128xf32> -> vector<128x128xf32>
    %c0_5 = arith.constant 0 : index
    %c0_6 = arith.constant 0 : index
    %5 = vector.load %arg4[%c0_5, %c0_6] : memref<1x128xf32, #tpu.memory_space<vmem>>, vector<1x128xf32>
    %6 = vector.broadcast %5 : vector<1x128xf32> to vector<128x128xf32>
    %7 = arith.addf %4, %6 : vector<128x128xf32>
    %cst_7 = arith.constant 0.000000e+00 : f32
    %8 = vector.broadcast %cst_7 : f32 to vector<128x128xf32>
    %9 = arith.maximumf %7, %8 : vector<128x128xf32>
    %10 = arith.truncf %9 : vector<128x128xf32> to vector<128x128xbf16>
    %c0_8 = arith.constant 0 : index
    %c0_9 = arith.constant 0 : index
    %11 = vector.load %arg5[%c0_8, %c0_9] : memref<128x128xbf16, #tpu.memory_space<vmem>>, vector<128x128xbf16>
    %cst_10 = arith.constant dense<0.000000e+00> : vector<128x128xf32>
    %12 = tpu.matmul %10, %11, %cst_10 {dimension_numbers = #tpu.dot_dimension_numbers<[1], [0], [0], [1], [0, 0, 1, 1], [], []>} : vector<128x128xbf16>, vector<128x128xbf16>, vector<128x128xf32> -> vector<128x128xf32>
    %c0_11 = arith.constant 0 : index
    %c0_12 = arith.constant 0 : index
    %13 = vector.load %arg6[%c0_11, %c0_12] : memref<1x128xf32, #tpu.memory_space<vmem>>, vector<1x128xf32>
    %14 = vector.broadcast %13 : vector<1x128xf32> to vector<128x128xf32>
    %15 = arith.addf %12, %14 : vector<128x128xf32>
    %cst_13 = arith.constant 0.000000e+00 : f32
    %16 = vector.broadcast %cst_13 : f32 to vector<128x128xf32>
    %17 = arith.maximumf %15, %16 : vector<128x128xf32>
    %18 = arith.truncf %17 : vector<128x128xf32> to vector<128x128xbf16>
    %c0_14 = arith.constant 0 : index
    %c0_15 = arith.constant 0 : index
    %19 = vector.load %arg7[%c0_14, %c0_15] : memref<128x128xbf16, #tpu.memory_space<vmem>>, vector<128x128xbf16>
    %cst_16 = arith.constant dense<0.000000e+00> : vector<128x128xf32>
    %20 = tpu.matmul %18, %19, %cst_16 {dimension_numbers = #tpu.dot_dimension_numbers<[1], [0], [0], [1], [0, 0, 1, 1], [], []>} : vector<128x128xbf16>, vector<128x128xbf16>, vector<128x128xf32> -> vector<128x128xf32>
    %c0_17 = arith.constant 0 : index
    %c0_18 = arith.constant 0 : index
    %21 = vector.load %arg8[%c0_17, %c0_18] : memref<1x128xf32, #tpu.memory_space<vmem>>, vector<1x128xf32>
    %22 = vector.broadcast %21 : vector<1x128xf32> to vector<128x128xf32>
    %23 = arith.addf %20, %22 : vector<128x128xf32>
    %cst_19 = arith.constant 0.000000e+00 : f32
    %24 = vector.broadcast %cst_19 : f32 to vector<128x128xf32>
    %25 = arith.maximumf %23, %24 : vector<128x128xf32>
    %26 = arith.truncf %25 : vector<128x128xf32> to vector<128x128xbf16>
    %c0_20 = arith.constant 0 : index
    %c0_21 = arith.constant 0 : index
    %27 = vector.load %arg9[%c0_20, %c0_21] : memref<128x256xbf16, #tpu.memory_space<vmem>>, vector<128x256xbf16>
    %cst_22 = arith.constant dense<0.000000e+00> : vector<128x256xf32>
    %28 = tpu.matmul %26, %27, %cst_22 {dimension_numbers = #tpu.dot_dimension_numbers<[1], [0], [0], [1], [0, 0, 1, 1], [], []>} : vector<128x128xbf16>, vector<128x256xbf16>, vector<128x256xf32> -> vector<128x256xf32>
    %c0_23 = arith.constant 0 : index
    %c0_24 = arith.constant 0 : index
    %29 = vector.load %arg10[%c0_23, %c0_24] : memref<1x256xf32, #tpu.memory_space<vmem>>, vector<1x256xf32>
    %30 = vector.broadcast %29 : vector<1x256xf32> to vector<128x256xf32>
    %31 = arith.addf %28, %30 : vector<128x256xf32>
    %32 = vector.extract_strided_slice %31 {offsets = [0, 0], sizes = [128, 128], strides = [1, 1]} : vector<128x256xf32> to vector<128x128xf32>
    %33 = vector.extract_strided_slice %31 {offsets = [0, 128], sizes = [128, 128], strides = [1, 1]} : vector<128x256xf32> to vector<128x128xf32>
    %cst_25 = arith.constant 2.000000e-01 : f32
    %34 = vector.broadcast %cst_25 : f32 to vector<128x128xf32>
    %35 = arith.mulf %32, %34 : vector<128x128xf32>
    %36 = math.absf %35 : vector<128x128xf32>
    %cst_26 = arith.constant 2.41421366 : f32
    %37 = vector.broadcast %cst_26 : f32 to vector<128x128xf32>
    %38 = arith.cmpf ogt, %36, %37 : vector<128x128xf32>
    %cst_27 = arith.constant 0.414213568 : f32
    %39 = vector.broadcast %cst_27 : f32 to vector<128x128xf32>
    %40 = arith.cmpf ogt, %36, %39 : vector<128x128xf32>
    %cst_28 = arith.constant 1.000000e-30 : f32
    %41 = vector.broadcast %cst_28 : f32 to vector<128x128xf32>
    %42 = arith.maximumf %36, %41 : vector<128x128xf32>
    %cst_29 = arith.constant -1.000000e+00 : f32
    %43 = vector.broadcast %cst_29 : f32 to vector<128x128xf32>
    %44 = arith.divf %43, %42 : vector<128x128xf32>
    %cst_30 = arith.constant 1.000000e+00 : f32
    %45 = vector.broadcast %cst_30 : f32 to vector<128x128xf32>
    %46 = arith.subf %36, %45 : vector<128x128xf32>
    %cst_31 = arith.constant 1.000000e+00 : f32
    %47 = vector.broadcast %cst_31 : f32 to vector<128x128xf32>
    %48 = arith.addf %36, %47 : vector<128x128xf32>
    %49 = arith.divf %46, %48 : vector<128x128xf32>
    %50 = arith.select %40, %49, %36 : vector<128x128xi1>, vector<128x128xf32>
    %51 = arith.select %38, %44, %50 : vector<128x128xi1>, vector<128x128xf32>
    %cst_32 = arith.constant 0.785398185 : f32
    %cst_33 = arith.constant 0.000000e+00 : f32
    %52 = vector.broadcast %cst_32 : f32 to vector<128x128xf32>
    %53 = vector.broadcast %cst_33 : f32 to vector<128x128xf32>
    %54 = arith.select %40, %52, %53 : vector<128x128xi1>, vector<128x128xf32>
    %cst_34 = arith.constant 1.57079637 : f32
    %55 = vector.broadcast %cst_34 : f32 to vector<128x128xf32>
    %56 = arith.select %38, %55, %54 : vector<128x128xi1>, vector<128x128xf32>
    %57 = arith.mulf %51, %51 : vector<128x128xf32>
    %cst_35 = arith.constant 0.0805374458 : f32
    %58 = vector.broadcast %cst_35 : f32 to vector<128x128xf32>
    %59 = arith.mulf %58, %57 : vector<128x128xf32>
    %cst_36 = arith.constant 0.138776854 : f32
    %60 = vector.broadcast %cst_36 : f32 to vector<128x128xf32>
    %61 = arith.subf %59, %60 : vector<128x128xf32>
    %62 = arith.mulf %61, %57 : vector<128x128xf32>
    %cst_37 = arith.constant 0.199777111 : f32
    %63 = vector.broadcast %cst_37 : f32 to vector<128x128xf32>
    %64 = arith.addf %62, %63 : vector<128x128xf32>
    %65 = arith.mulf %64, %57 : vector<128x128xf32>
    %cst_38 = arith.constant 0.333329499 : f32
    %66 = vector.broadcast %cst_38 : f32 to vector<128x128xf32>
    %67 = arith.subf %65, %66 : vector<128x128xf32>
    %68 = arith.mulf %67, %57 : vector<128x128xf32>
    %69 = arith.mulf %68, %51 : vector<128x128xf32>
    %70 = arith.addf %69, %51 : vector<128x128xf32>
    %71 = arith.addf %56, %70 : vector<128x128xf32>
    %cst_39 = arith.constant 0.000000e+00 : f32
    %72 = vector.broadcast %cst_39 : f32 to vector<128x128xf32>
    %73 = arith.cmpf olt, %35, %72 : vector<128x128xf32>
    %cst_40 = arith.constant 0.000000e+00 : f32
    %74 = vector.broadcast %cst_40 : f32 to vector<128x128xf32>
    %75 = arith.subf %74, %71 : vector<128x128xf32>
    %76 = arith.select %73, %75, %71 : vector<128x128xi1>, vector<128x128xf32>
    %cst_41 = arith.constant 3.180000e+00 : f32
    %77 = vector.broadcast %cst_41 : f32 to vector<128x128xf32>
    %78 = arith.mulf %77, %76 : vector<128x128xf32>
    %79 = math.exp %78 : vector<128x128xf32>
    %80 = arith.mulf %79, %0 : vector<128x128xf32>
    %81 = arith.addf %80, %33 : vector<128x128xf32>
    %c0_42 = arith.constant 0 : index
    %c0_43 = arith.constant 0 : index
    %82 = vector.load %arg19[%c0_42, %c0_43] : memref<128x128xf32, #tpu.memory_space<vmem>>, vector<128x128xf32>
    tpu.vector_store %arg19[%c0_42, %c0_43], %81 {strides = array<i32>} : memref<128x128xf32, #tpu.memory_space<vmem>>, vector<128x128xf32>,
    %83 = arith.truncf %81 : vector<128x128xf32> to vector<128x128xbf16>
    %c0_44 = arith.constant 0 : index
    %c0_45 = arith.constant 0 : index
    %84 = vector.load %arg11[%c0_44, %c0_45] : memref<128x128xbf16, #tpu.memory_space<vmem>>, vector<128x128xbf16>
    %cst_46 = arith.constant dense<0.000000e+00> : vector<128x128xf32>
    %85 = tpu.matmul %83, %84, %cst_46 {dimension_numbers = #tpu.dot_dimension_numbers<[1], [0], [0], [1], [0, 0, 1, 1], [], []>} : vector<128x128xbf16>, vector<128x128xbf16>, vector<128x128xf32> -> vector<128x128xf32>
    %c0_47 = arith.constant 0 : index
    %c0_48 = arith.constant 0 : index
    %86 = vector.load %arg12[%c0_47, %c0_48] : memref<1x128xf32, #tpu.memory_space<vmem>>, vector<1x128xf32>
    %87 = vector.broadcast %86 : vector<1x128xf32> to vector<128x128xf32>
    %88 = arith.addf %85, %87 : vector<128x128xf32>
    %cst_49 = arith.constant 0.000000e+00 : f32
    %89 = vector.broadcast %cst_49 : f32 to vector<128x128xf32>
    %90 = arith.maximumf %88, %89 : vector<128x128xf32>
    %91 = arith.truncf %90 : vector<128x128xf32> to vector<128x128xbf16>
    %c0_50 = arith.constant 0 : index
    %c0_51 = arith.constant 0 : index
    %92 = vector.load %arg13[%c0_50, %c0_51] : memref<128x128xbf16, #tpu.memory_space<vmem>>, vector<128x128xbf16>
    %cst_52 = arith.constant dense<0.000000e+00> : vector<128x128xf32>
    %93 = tpu.matmul %91, %92, %cst_52 {dimension_numbers = #tpu.dot_dimension_numbers<[1], [0], [0], [1], [0, 0, 1, 1], [], []>} : vector<128x128xbf16>, vector<128x128xbf16>, vector<128x128xf32> -> vector<128x128xf32>
    %c0_53 = arith.constant 0 : index
    %c0_54 = arith.constant 0 : index
    %94 = vector.load %arg14[%c0_53, %c0_54] : memref<1x128xf32, #tpu.memory_space<vmem>>, vector<1x128xf32>
    %95 = vector.broadcast %94 : vector<1x128xf32> to vector<128x128xf32>
    %96 = arith.addf %93, %95 : vector<128x128xf32>
    %cst_55 = arith.constant 0.000000e+00 : f32
    %97 = vector.broadcast %cst_55 : f32 to vector<128x128xf32>
    %98 = arith.maximumf %96, %97 : vector<128x128xf32>
    %99 = arith.truncf %98 : vector<128x128xf32> to vector<128x128xbf16>
    %c0_56 = arith.constant 0 : index
    %c0_57 = arith.constant 0 : index
    %100 = vector.load %arg15[%c0_56, %c0_57] : memref<128x128xbf16, #tpu.memory_space<vmem>>, vector<128x128xbf16>
    %cst_58 = arith.constant dense<0.000000e+00> : vector<128x128xf32>
    %101 = tpu.matmul %99, %100, %cst_58 {dimension_numbers = #tpu.dot_dimension_numbers<[1], [0], [0], [1], [0, 0, 1, 1], [], []>} : vector<128x128xbf16>, vector<128x128xbf16>, vector<128x128xf32> -> vector<128x128xf32>
    %c0_59 = arith.constant 0 : index
    %c0_60 = arith.constant 0 : index
    %102 = vector.load %arg16[%c0_59, %c0_60] : memref<1x128xf32, #tpu.memory_space<vmem>>, vector<1x128xf32>
    %103 = vector.broadcast %102 : vector<1x128xf32> to vector<128x128xf32>
    %104 = arith.addf %101, %103 : vector<128x128xf32>
    %cst_61 = arith.constant 0.000000e+00 : f32
    %105 = vector.broadcast %cst_61 : f32 to vector<128x128xf32>
    %106 = arith.maximumf %104, %105 : vector<128x128xf32>
    %107 = arith.truncf %106 : vector<128x128xf32> to vector<128x128xbf16>
    %c0_62 = arith.constant 0 : index
    %c0_63 = arith.constant 0 : index
    %108 = vector.load %arg17[%c0_62, %c0_63] : memref<128x256xbf16, #tpu.memory_space<vmem>>, vector<128x256xbf16>
    %cst_64 = arith.constant dense<0.000000e+00> : vector<128x256xf32>
    %109 = tpu.matmul %107, %108, %cst_64 {dimension_numbers = #tpu.dot_dimension_numbers<[1], [0], [0], [1], [0, 0, 1, 1], [], []>} : vector<128x128xbf16>, vector<128x256xbf16>, vector<128x256xf32> -> vector<128x256xf32>
    %c0_65 = arith.constant 0 : index
    %c0_66 = arith.constant 0 : index
    %110 = vector.load %arg18[%c0_65, %c0_66] : memref<1x256xf32, #tpu.memory_space<vmem>>, vector<1x256xf32>
    %111 = vector.broadcast %110 : vector<1x256xf32> to vector<128x256xf32>
    %112 = arith.addf %109, %111 : vector<128x256xf32>
    %113 = vector.extract_strided_slice %112 {offsets = [0, 0], sizes = [128, 128], strides = [1, 1]} : vector<128x256xf32> to vector<128x128xf32>
    %114 = vector.extract_strided_slice %112 {offsets = [0, 128], sizes = [128, 128], strides = [1, 1]} : vector<128x256xf32> to vector<128x128xf32>
    %cst_67 = arith.constant 2.000000e-01 : f32
    %115 = vector.broadcast %cst_67 : f32 to vector<128x128xf32>
    %116 = arith.mulf %113, %115 : vector<128x128xf32>
    %117 = math.absf %116 : vector<128x128xf32>
    %cst_68 = arith.constant 2.41421366 : f32
    %118 = vector.broadcast %cst_68 : f32 to vector<128x128xf32>
    %119 = arith.cmpf ogt, %117, %118 : vector<128x128xf32>
    %cst_69 = arith.constant 0.414213568 : f32
    %120 = vector.broadcast %cst_69 : f32 to vector<128x128xf32>
    %121 = arith.cmpf ogt, %117, %120 : vector<128x128xf32>
    %cst_70 = arith.constant 1.000000e-30 : f32
    %122 = vector.broadcast %cst_70 : f32 to vector<128x128xf32>
    %123 = arith.maximumf %117, %122 : vector<128x128xf32>
    %cst_71 = arith.constant -1.000000e+00 : f32
    %124 = vector.broadcast %cst_71 : f32 to vector<128x128xf32>
    %125 = arith.divf %124, %123 : vector<128x128xf32>
    %cst_72 = arith.constant 1.000000e+00 : f32
    %126 = vector.broadcast %cst_72 : f32 to vector<128x128xf32>
    %127 = arith.subf %117, %126 : vector<128x128xf32>
    %cst_73 = arith.constant 1.000000e+00 : f32
    %128 = vector.broadcast %cst_73 : f32 to vector<128x128xf32>
    %129 = arith.addf %117, %128 : vector<128x128xf32>
    %130 = arith.divf %127, %129 : vector<128x128xf32>
    %131 = arith.select %121, %130, %117 : vector<128x128xi1>, vector<128x128xf32>
    %132 = arith.select %119, %125, %131 : vector<128x128xi1>, vector<128x128xf32>
    %cst_74 = arith.constant 0.785398185 : f32
    %cst_75 = arith.constant 0.000000e+00 : f32
    %133 = vector.broadcast %cst_74 : f32 to vector<128x128xf32>
    %134 = vector.broadcast %cst_75 : f32 to vector<128x128xf32>
    %135 = arith.select %121, %133, %134 : vector<128x128xi1>, vector<128x128xf32>
    %cst_76 = arith.constant 1.57079637 : f32
    %136 = vector.broadcast %cst_76 : f32 to vector<128x128xf32>
    %137 = arith.select %119, %136, %135 : vector<128x128xi1>, vector<128x128xf32>
    %138 = arith.mulf %132, %132 : vector<128x128xf32>
    %cst_77 = arith.constant 0.0805374458 : f32
    %139 = vector.broadcast %cst_77 : f32 to vector<128x128xf32>
    %140 = arith.mulf %139, %138 : vector<128x128xf32>
    %cst_78 = arith.constant 0.138776854 : f32
    %141 = vector.broadcast %cst_78 : f32 to vector<128x128xf32>
    %142 = arith.subf %140, %141 : vector<128x128xf32>
    %143 = arith.mulf %142, %138 : vector<128x128xf32>
    %cst_79 = arith.constant 0.199777111 : f32
    %144 = vector.broadcast %cst_79 : f32 to vector<128x128xf32>
    %145 = arith.addf %143, %144 : vector<128x128xf32>
    %146 = arith.mulf %145, %138 : vector<128x128xf32>
    %cst_80 = arith.constant 0.333329499 : f32
    %147 = vector.broadcast %cst_80 : f32 to vector<128x128xf32>
    %148 = arith.subf %146, %147 : vector<128x128xf32>
    %149 = arith.mulf %148, %138 : vector<128x128xf32>
    %150 = arith.mulf %149, %132 : vector<128x128xf32>
    %151 = arith.addf %150, %132 : vector<128x128xf32>
    %152 = arith.addf %137, %151 : vector<128x128xf32>
    %cst_81 = arith.constant 0.000000e+00 : f32
    %153 = vector.broadcast %cst_81 : f32 to vector<128x128xf32>
    %154 = arith.cmpf olt, %116, %153 : vector<128x128xf32>
    %cst_82 = arith.constant 0.000000e+00 : f32
    %155 = vector.broadcast %cst_82 : f32 to vector<128x128xf32>
    %156 = arith.subf %155, %152 : vector<128x128xf32>
    %157 = arith.select %154, %156, %152 : vector<128x128xi1>, vector<128x128xf32>
    %cst_83 = arith.constant 3.180000e+00 : f32
    %158 = vector.broadcast %cst_83 : f32 to vector<128x128xf32>
    %159 = arith.mulf %158, %157 : vector<128x128xf32>
    %160 = math.exp %159 : vector<128x128xf32>
    %161 = arith.mulf %160, %1 : vector<128x128xf32>
    %162 = arith.addf %161, %114 : vector<128x128xf32>
    %c0_84 = arith.constant 0 : index
    %c0_85 = arith.constant 0 : index
    %163 = vector.load %arg20[%c0_84, %c0_85] : memref<128x128xf32, #tpu.memory_space<vmem>>, vector<128x128xf32>
    tpu.vector_store %arg20[%c0_84, %c0_85], %162 {strides = array<i32>} : memref<128x128xf32, #tpu.memory_space<vmem>>, vector<128x128xf32>,
    return
  }
  func.func @transform_0(%arg0: i32) -> (i32, i32) {
    %c0_i32 = arith.constant 0 : i32
    %c0_i32_0 = arith.constant 0 : i32
    return %arg0, %c0_i32 : i32, i32
  }
  func.func @transform_1(%arg0: i32) -> (i32, i32) {
    %c0_i32 = arith.constant 0 : i32
    %c0_i32_0 = arith.constant 0 : i32
    return %arg0, %c0_i32 : i32, i32
  }
  func.func @transform_2(%arg0: i32) -> (i32, i32) {
    %c0_i32 = arith.constant 0 : i32
    %c0_i32_0 = arith.constant 0 : i32
    %c0_i32_1 = arith.constant 0 : i32
    return %c0_i32, %c0_i32_0 : i32, i32
  }
  func.func @transform_3(%arg0: i32) -> (i32, i32) {
    %c0_i32 = arith.constant 0 : i32
    %c0_i32_0 = arith.constant 0 : i32
    %c0_i32_1 = arith.constant 0 : i32
    return %c0_i32, %c0_i32_0 : i32, i32
  }
  func.func @transform_4(%arg0: i32) -> (i32, i32) {
    %c0_i32 = arith.constant 0 : i32
    %c0_i32_0 = arith.constant 0 : i32
    %c0_i32_1 = arith.constant 0 : i32
    return %c0_i32, %c0_i32_0 : i32, i32
  }
  func.func @transform_5(%arg0: i32) -> (i32, i32) {
    %c0_i32 = arith.constant 0 : i32
    %c0_i32_0 = arith.constant 0 : i32
    %c0_i32_1 = arith.constant 0 : i32
    return %c0_i32, %c0_i32_0 : i32, i32
  }
  func.func @transform_6(%arg0: i32) -> (i32, i32) {
    %c0_i32 = arith.constant 0 : i32
    %c0_i32_0 = arith.constant 0 : i32
    %c0_i32_1 = arith.constant 0 : i32
    return %c0_i32, %c0_i32_0 : i32, i32
  }
  func.func @transform_7(%arg0: i32) -> (i32, i32) {
    %c0_i32 = arith.constant 0 : i32
    %c0_i32_0 = arith.constant 0 : i32
    %c0_i32_1 = arith.constant 0 : i32
    return %c0_i32, %c0_i32_0 : i32, i32
  }
  func.func @transform_8(%arg0: i32) -> (i32, i32) {
    %c0_i32 = arith.constant 0 : i32
    %c0_i32_0 = arith.constant 0 : i32
    %c0_i32_1 = arith.constant 0 : i32
    return %c0_i32, %c0_i32_0 : i32, i32
  }
  func.func @transform_9(%arg0: i32) -> (i32, i32) {
    %c0_i32 = arith.constant 0 : i32
    %c0_i32_0 = arith.constant 0 : i32
    %c0_i32_1 = arith.constant 0 : i32
    return %c0_i32, %c0_i32_0 : i32, i32
  }
  func.func @transform_10(%arg0: i32) -> (i32, i32) {
    %c0_i32 = arith.constant 0 : i32
    %c0_i32_0 = arith.constant 0 : i32
    %c0_i32_1 = arith.constant 0 : i32
    return %c0_i32, %c0_i32_0 : i32, i32
  }
  func.func @transform_11(%arg0: i32) -> (i32, i32) {
    %c0_i32 = arith.constant 0 : i32
    %c0_i32_0 = arith.constant 0 : i32
    %c0_i32_1 = arith.constant 0 : i32
    return %c0_i32, %c0_i32_0 : i32, i32
  }
  func.func @transform_12(%arg0: i32) -> (i32, i32) {
    %c0_i32 = arith.constant 0 : i32
    %c0_i32_0 = arith.constant 0 : i32
    %c0_i32_1 = arith.constant 0 : i32
    return %c0_i32, %c0_i32_0 : i32, i32
  }
  func.func @transform_13(%arg0: i32) -> (i32, i32) {
    %c0_i32 = arith.constant 0 : i32
    %c0_i32_0 = arith.constant 0 : i32
    %c0_i32_1 = arith.constant 0 : i32
    return %c0_i32, %c0_i32_0 : i32, i32
  }
  func.func @transform_14(%arg0: i32) -> (i32, i32) {
    %c0_i32 = arith.constant 0 : i32
    %c0_i32_0 = arith.constant 0 : i32
    %c0_i32_1 = arith.constant 0 : i32
    return %c0_i32, %c0_i32_0 : i32, i32
  }
  func.func @transform_15(%arg0: i32) -> (i32, i32) {
    %c0_i32 = arith.constant 0 : i32
    %c0_i32_0 = arith.constant 0 : i32
    %c0_i32_1 = arith.constant 0 : i32
    return %c0_i32, %c0_i32_0 : i32, i32
  }
  func.func @transform_16(%arg0: i32) -> (i32, i32) {
    %c0_i32 = arith.constant 0 : i32
    %c0_i32_0 = arith.constant 0 : i32
    %c0_i32_1 = arith.constant 0 : i32
    return %c0_i32, %c0_i32_0 : i32, i32
  }
  func.func @transform_17(%arg0: i32) -> (i32, i32) {
    %c0_i32 = arith.constant 0 : i32
    %c0_i32_0 = arith.constant 0 : i32
    %c0_i32_1 = arith.constant 0 : i32
    return %c0_i32, %c0_i32_0 : i32, i32
  }
  func.func @transform_18(%arg0: i32) -> (i32, i32) {
    %c0_i32 = arith.constant 0 : i32
    %c0_i32_0 = arith.constant 0 : i32
    return %arg0, %c0_i32 : i32, i32
  }
  func.func @transform_19(%arg0: i32) -> (i32, i32) {
    %c0_i32 = arith.constant 0 : i32
    %c0_i32_0 = arith.constant 0 : i32
    return %arg0, %c0_i32 : i32, i32
  }
}

module attributes {stable_mosaic.version = 11 : i64} {
  func.func @kernel(%arg0: i32, %arg1: memref<128x128xf32, #tpu.memory_space<vmem>>, %arg2: memref<128x128xf32, #tpu.memory_space<vmem>>, %arg3: memref<128x128xbf16, #tpu.memory_space<vmem>>, %arg4: memref<1x128xf32, #tpu.memory_space<vmem>>, %arg5: memref<128x128xbf16, #tpu.memory_space<vmem>>, %arg6: memref<1x128xf32, #tpu.memory_space<vmem>>, %arg7: memref<128x128xbf16, #tpu.memory_space<vmem>>, %arg8: memref<1x128xf32, #tpu.memory_space<vmem>>, %arg9: memref<128x256xbf16, #tpu.memory_space<vmem>>, %arg10: memref<1x256xf32, #tpu.memory_space<vmem>>, %arg11: memref<128x128xbf16, #tpu.memory_space<vmem>>, %arg12: memref<1x128xf32, #tpu.memory_space<vmem>>, %arg13: memref<128x128xbf16, #tpu.memory_space<vmem>>, %arg14: memref<1x128xf32, #tpu.memory_space<vmem>>, %arg15: memref<128x128xbf16, #tpu.memory_space<vmem>>, %arg16: memref<1x128xf32, #tpu.memory_space<vmem>>, %arg17: memref<128x256xbf16, #tpu.memory_space<vmem>>, %arg18: memref<1x256xf32, #tpu.memory_space<vmem>>, %arg19: memref<128x128xf32, #tpu.memory_space<vmem>>, %arg20: memref<128x128xf32, #tpu.memory_space<vmem>>) attributes {dimension_semantics = [#tpu.dimension_semantics<parallel>], iteration_bounds = array<i64: 2>, scalar_prefetch = 0 : i64, scratch_operands = 0 : i64, tpu.core_type = #tpu.core_type<tc>, window_params = [{transform_indices = @transform_0, window_bounds = array<i64: 128, 128>}, {transform_indices = @transform_1, window_bounds = array<i64: 128, 128>}, {pipeline_mode = #tpu.pipeline_mode<synchronous>, transform_indices = @transform_2, window_bounds = array<i64: 128, 128>}, {pipeline_mode = #tpu.pipeline_mode<synchronous>, transform_indices = @transform_3, window_bounds = array<i64: 1, 128>}, {pipeline_mode = #tpu.pipeline_mode<synchronous>, transform_indices = @transform_4, window_bounds = array<i64: 128, 128>}, {pipeline_mode = #tpu.pipeline_mode<synchronous>, transform_indices = @transform_5, window_bounds = array<i64: 1, 128>}, {pipeline_mode = #tpu.pipeline_mode<synchronous>, transform_indices = @transform_6, window_bounds = array<i64: 128, 128>}, {pipeline_mode = #tpu.pipeline_mode<synchronous>, transform_indices = @transform_7, window_bounds = array<i64: 1, 128>}, {pipeline_mode = #tpu.pipeline_mode<synchronous>, transform_indices = @transform_8, window_bounds = array<i64: 128, 256>}, {pipeline_mode = #tpu.pipeline_mode<synchronous>, transform_indices = @transform_9, window_bounds = array<i64: 1, 256>}, {pipeline_mode = #tpu.pipeline_mode<synchronous>, transform_indices = @transform_10, window_bounds = array<i64: 128, 128>}, {pipeline_mode = #tpu.pipeline_mode<synchronous>, transform_indices = @transform_11, window_bounds = array<i64: 1, 128>}, {pipeline_mode = #tpu.pipeline_mode<synchronous>, transform_indices = @transform_12, window_bounds = array<i64: 128, 128>}, {pipeline_mode = #tpu.pipeline_mode<synchronous>, transform_indices = @transform_13, window_bounds = array<i64: 1, 128>}, {pipeline_mode = #tpu.pipeline_mode<synchronous>, transform_indices = @transform_14, window_bounds = array<i64: 128, 128>}, {pipeline_mode = #tpu.pipeline_mode<synchronous>, transform_indices = @transform_15, window_bounds = array<i64: 1, 128>}, {pipeline_mode = #tpu.pipeline_mode<synchronous>, transform_indices = @transform_16, window_bounds = array<i64: 128, 256>}, {pipeline_mode = #tpu.pipeline_mode<synchronous>, transform_indices = @transform_17, window_bounds = array<i64: 1, 256>}, {transform_indices = @transform_18, window_bounds = array<i64: 128, 128>}, {transform_indices = @transform_19, window_bounds = array<i64: 128, 128>}]} {
    %c0 = arith.constant 0 : index
    %c0_0 = arith.constant 0 : index
    %0 = vector.load %arg1[%c0, %c0_0] : memref<128x128xf32, #tpu.memory_space<vmem>>, vector<128x128xf32>
    %c0_1 = arith.constant 0 : index
    %c0_2 = arith.constant 0 : index
    %1 = vector.load %arg2[%c0_1, %c0_2] : memref<128x128xf32, #tpu.memory_space<vmem>>, vector<128x128xf32>
    %2 = arith.truncf %1 : vector<128x128xf32> to vector<128x128xbf16>
    %c0_3 = arith.constant 0 : index
    %c0_4 = arith.constant 0 : index
    %3 = vector.load %arg3[%c0_3, %c0_4] : memref<128x128xbf16, #tpu.memory_space<vmem>>, vector<128x128xbf16>
    %cst = arith.constant dense<0.000000e+00> : vector<128x128xf32>
    %4 = tpu.matmul %2, %3, %cst {dimension_numbers = #tpu.dot_dimension_numbers<[1], [0], [0], [1], [0, 0, 1, 1], [], []>} : vector<128x128xbf16>, vector<128x128xbf16>, vector<128x128xf32> -> vector<128x128xf32>
    %c0_5 = arith.constant 0 : index
    %c0_6 = arith.constant 0 : index
    %5 = vector.load %arg4[%c0_5, %c0_6] : memref<1x128xf32, #tpu.memory_space<vmem>>, vector<1x128xf32>
    %6 = vector.broadcast %5 : vector<1x128xf32> to vector<128x128xf32>
    %7 = arith.addf %4, %6 : vector<128x128xf32>
    %cst_7 = arith.constant 0.000000e+00 : f32
    %8 = vector.broadcast %cst_7 : f32 to vector<128x128xf32>
    %9 = arith.maximumf %7, %8 : vector<128x128xf32>
    %10 = arith.truncf %9 : vector<128x128xf32> to vector<128x128xbf16>
    %c0_8 = arith.constant 0 : index
    %c0_9 = arith.constant 0 : index
    %11 = vector.load %arg5[%c0_8, %c0_9] : memref<128x128xbf16, #tpu.memory_space<vmem>>, vector<128x128xbf16>
    %cst_10 = arith.constant dense<0.000000e+00> : vector<128x128xf32>
    %12 = tpu.matmul %10, %11, %cst_10 {dimension_numbers = #tpu.dot_dimension_numbers<[1], [0], [0], [1], [0, 0, 1, 1], [], []>} : vector<128x128xbf16>, vector<128x128xbf16>, vector<128x128xf32> -> vector<128x128xf32>
    %c0_11 = arith.constant 0 : index
    %c0_12 = arith.constant 0 : index
    %13 = vector.load %arg6[%c0_11, %c0_12] : memref<1x128xf32, #tpu.memory_space<vmem>>, vector<1x128xf32>
    %14 = vector.broadcast %13 : vector<1x128xf32> to vector<128x128xf32>
    %15 = arith.addf %12, %14 : vector<128x128xf32>
    %cst_13 = arith.constant 0.000000e+00 : f32
    %16 = vector.broadcast %cst_13 : f32 to vector<128x128xf32>
    %17 = arith.maximumf %15, %16 : vector<128x128xf32>
    %18 = arith.truncf %17 : vector<128x128xf32> to vector<128x128xbf16>
    %c0_14 = arith.constant 0 : index
    %c0_15 = arith.constant 0 : index
    %19 = vector.load %arg7[%c0_14, %c0_15] : memref<128x128xbf16, #tpu.memory_space<vmem>>, vector<128x128xbf16>
    %cst_16 = arith.constant dense<0.000000e+00> : vector<128x128xf32>
    %20 = tpu.matmul %18, %19, %cst_16 {dimension_numbers = #tpu.dot_dimension_numbers<[1], [0], [0], [1], [0, 0, 1, 1], [], []>} : vector<128x128xbf16>, vector<128x128xbf16>, vector<128x128xf32> -> vector<128x128xf32>
    %c0_17 = arith.constant 0 : index
    %c0_18 = arith.constant 0 : index
    %21 = vector.load %arg8[%c0_17, %c0_18] : memref<1x128xf32, #tpu.memory_space<vmem>>, vector<1x128xf32>
    %22 = vector.broadcast %21 : vector<1x128xf32> to vector<128x128xf32>
    %23 = arith.addf %20, %22 : vector<128x128xf32>
    %cst_19 = arith.constant 0.000000e+00 : f32
    %24 = vector.broadcast %cst_19 : f32 to vector<128x128xf32>
    %25 = arith.maximumf %23, %24 : vector<128x128xf32>
    %26 = arith.truncf %25 : vector<128x128xf32> to vector<128x128xbf16>
    %c0_20 = arith.constant 0 : index
    %c0_21 = arith.constant 0 : index
    %27 = vector.load %arg9[%c0_20, %c0_21] : memref<128x256xbf16, #tpu.memory_space<vmem>>, vector<128x256xbf16>
    %cst_22 = arith.constant dense<0.000000e+00> : vector<128x256xf32>
    %28 = tpu.matmul %26, %27, %cst_22 {dimension_numbers = #tpu.dot_dimension_numbers<[1], [0], [0], [1], [0, 0, 1, 1], [], []>} : vector<128x128xbf16>, vector<128x256xbf16>, vector<128x256xf32> -> vector<128x256xf32>
    %c0_23 = arith.constant 0 : index
    %c0_24 = arith.constant 0 : index
    %29 = vector.load %arg10[%c0_23, %c0_24] : memref<1x256xf32, #tpu.memory_space<vmem>>, vector<1x256xf32>
    %30 = vector.broadcast %29 : vector<1x256xf32> to vector<128x256xf32>
    %31 = arith.addf %28, %30 : vector<128x256xf32>
    %32 = vector.extract_strided_slice %31 {offsets = [0, 0], sizes = [128, 128], strides = [1, 1]} : vector<128x256xf32> to vector<128x128xf32>
    %33 = vector.extract_strided_slice %31 {offsets = [0, 128], sizes = [128, 128], strides = [1, 1]} : vector<128x256xf32> to vector<128x128xf32>
    %cst_25 = arith.constant 2.000000e-01 : f32
    %34 = vector.broadcast %cst_25 : f32 to vector<128x128xf32>
    %35 = arith.mulf %32, %34 : vector<128x128xf32>
    %36 = math.absf %35 : vector<128x128xf32>
    %cst_26 = arith.constant 2.41421366 : f32
    %37 = vector.broadcast %cst_26 : f32 to vector<128x128xf32>
    %38 = arith.cmpf ogt, %36, %37 : vector<128x128xf32>
    %cst_27 = arith.constant 0.414213568 : f32
    %39 = vector.broadcast %cst_27 : f32 to vector<128x128xf32>
    %40 = arith.cmpf ogt, %36, %39 : vector<128x128xf32>
    %cst_28 = arith.constant 1.000000e-30 : f32
    %41 = vector.broadcast %cst_28 : f32 to vector<128x128xf32>
    %42 = arith.maximumf %36, %41 : vector<128x128xf32>
    %cst_29 = arith.constant -1.000000e+00 : f32
    %43 = vector.broadcast %cst_29 : f32 to vector<128x128xf32>
    %44 = arith.divf %43, %42 : vector<128x128xf32>
    %cst_30 = arith.constant 1.000000e+00 : f32
    %45 = vector.broadcast %cst_30 : f32 to vector<128x128xf32>
    %46 = arith.subf %36, %45 : vector<128x128xf32>
    %cst_31 = arith.constant 1.000000e+00 : f32
    %47 = vector.broadcast %cst_31 : f32 to vector<128x128xf32>
    %48 = arith.addf %36, %47 : vector<128x128xf32>
    %49 = arith.divf %46, %48 : vector<128x128xf32>
    %50 = arith.select %40, %49, %36 : vector<128x128xi1>, vector<128x128xf32>
    %51 = arith.select %38, %44, %50 : vector<128x128xi1>, vector<128x128xf32>
    %cst_32 = arith.constant 0.785398185 : f32
    %cst_33 = arith.constant 0.000000e+00 : f32
    %52 = vector.broadcast %cst_32 : f32 to vector<128x128xf32>
    %53 = vector.broadcast %cst_33 : f32 to vector<128x128xf32>
    %54 = arith.select %40, %52, %53 : vector<128x128xi1>, vector<128x128xf32>
    %cst_34 = arith.constant 1.57079637 : f32
    %55 = vector.broadcast %cst_34 : f32 to vector<128x128xf32>
    %56 = arith.select %38, %55, %54 : vector<128x128xi1>, vector<128x128xf32>
    %57 = arith.mulf %51, %51 : vector<128x128xf32>
    %cst_35 = arith.constant 0.0805374458 : f32
    %58 = vector.broadcast %cst_35 : f32 to vector<128x128xf32>
    %59 = arith.mulf %58, %57 : vector<128x128xf32>
    %cst_36 = arith.constant 0.138776854 : f32
    %60 = vector.broadcast %cst_36 : f32 to vector<128x128xf32>
    %61 = arith.subf %59, %60 : vector<128x128xf32>
    %62 = arith.mulf %61, %57 : vector<128x128xf32>
    %cst_37 = arith.constant 0.199777111 : f32
    %63 = vector.broadcast %cst_37 : f32 to vector<128x128xf32>
    %64 = arith.addf %62, %63 : vector<128x128xf32>
    %65 = arith.mulf %64, %57 : vector<128x128xf32>
    %cst_38 = arith.constant 0.333329499 : f32
    %66 = vector.broadcast %cst_38 : f32 to vector<128x128xf32>
    %67 = arith.subf %65, %66 : vector<128x128xf32>
    %68 = arith.mulf %67, %57 : vector<128x128xf32>
    %69 = arith.mulf %68, %51 : vector<128x128xf32>
    %70 = arith.addf %69, %51 : vector<128x128xf32>
    %71 = arith.addf %56, %70 : vector<128x128xf32>
    %cst_39 = arith.constant 0.000000e+00 : f32
    %72 = vector.broadcast %cst_39 : f32 to vector<128x128xf32>
    %73 = arith.cmpf olt, %35, %72 : vector<128x128xf32>
    %cst_40 = arith.constant 0.000000e+00 : f32
    %74 = vector.broadcast %cst_40 : f32 to vector<128x128xf32>
    %75 = arith.subf %74, %71 : vector<128x128xf32>
    %76 = arith.select %73, %75, %71 : vector<128x128xi1>, vector<128x128xf32>
    %cst_41 = arith.constant 3.180000e+00 : f32
    %77 = vector.broadcast %cst_41 : f32 to vector<128x128xf32>
    %78 = arith.mulf %77, %76 : vector<128x128xf32>
    %79 = math.exp %78 : vector<128x128xf32>
    %80 = arith.mulf %79, %0 : vector<128x128xf32>
    %81 = arith.addf %80, %33 : vector<128x128xf32>
    %c0_42 = arith.constant 0 : index
    %c0_43 = arith.constant 0 : index
    %82 = vector.load %arg19[%c0_42, %c0_43] : memref<128x128xf32, #tpu.memory_space<vmem>>, vector<128x128xf32>
    tpu.vector_store %arg19[%c0_42, %c0_43], %81 {strides = array<i32>} : memref<128x128xf32, #tpu.memory_space<vmem>>, vector<128x128xf32>,
    %83 = arith.truncf %81 : vector<128x128xf32> to vector<128x128xbf16>
    %c0_44 = arith.constant 0 : index
    %c0_45 = arith.constant 0 : index
    %84 = vector.load %arg11[%c0_44, %c0_45] : memref<128x128xbf16, #tpu.memory_space<vmem>>, vector<128x128xbf16>
    %cst_46 = arith.constant dense<0.000000e+00> : vector<128x128xf32>
    %85 = tpu.matmul %83, %84, %cst_46 {dimension_numbers = #tpu.dot_dimension_numbers<[1], [0], [0], [1], [0, 0, 1, 1], [], []>} : vector<128x128xbf16>, vector<128x128xbf16>, vector<128x128xf32> -> vector<128x128xf32>
    %c0_47 = arith.constant 0 : index
    %c0_48 = arith.constant 0 : index
    %86 = vector.load %arg12[%c0_47, %c0_48] : memref<1x128xf32, #tpu.memory_space<vmem>>, vector<1x128xf32>
    %87 = vector.broadcast %86 : vector<1x128xf32> to vector<128x128xf32>
    %88 = arith.addf %85, %87 : vector<128x128xf32>
    %cst_49 = arith.constant 0.000000e+00 : f32
    %89 = vector.broadcast %cst_49 : f32 to vector<128x128xf32>
    %90 = arith.maximumf %88, %89 : vector<128x128xf32>
    %91 = arith.truncf %90 : vector<128x128xf32> to vector<128x128xbf16>
    %c0_50 = arith.constant 0 : index
    %c0_51 = arith.constant 0 : index
    %92 = vector.load %arg13[%c0_50, %c0_51] : memref<128x128xbf16, #tpu.memory_space<vmem>>, vector<128x128xbf16>
    %cst_52 = arith.constant dense<0.000000e+00> : vector<128x128xf32>
    %93 = tpu.matmul %91, %92, %cst_52 {dimension_numbers = #tpu.dot_dimension_numbers<[1], [0], [0], [1], [0, 0, 1, 1], [], []>} : vector<128x128xbf16>, vector<128x128xbf16>, vector<128x128xf32> -> vector<128x128xf32>
    %c0_53 = arith.constant 0 : index
    %c0_54 = arith.constant 0 : index
    %94 = vector.load %arg14[%c0_53, %c0_54] : memref<1x128xf32, #tpu.memory_space<vmem>>, vector<1x128xf32>
    %95 = vector.broadcast %94 : vector<1x128xf32> to vector<128x128xf32>
    %96 = arith.addf %93, %95 : vector<128x128xf32>
    %cst_55 = arith.constant 0.000000e+00 : f32
    %97 = vector.broadcast %cst_55 : f32 to vector<128x128xf32>
    %98 = arith.maximumf %96, %97 : vector<128x128xf32>
    %99 = arith.truncf %98 : vector<128x128xf32> to vector<128x128xbf16>
    %c0_56 = arith.constant 0 : index
    %c0_57 = arith.constant 0 : index
    %100 = vector.load %arg15[%c0_56, %c0_57] : memref<128x128xbf16, #tpu.memory_space<vmem>>, vector<128x128xbf16>
    %cst_58 = arith.constant dense<0.000000e+00> : vector<128x128xf32>
    %101 = tpu.matmul %99, %100, %cst_58 {dimension_numbers = #tpu.dot_dimension_numbers<[1], [0], [0], [1], [0, 0, 1, 1], [], []>} : vector<128x128xbf16>, vector<128x128xbf16>, vector<128x128xf32> -> vector<128x128xf32>
    %c0_59 = arith.constant 0 : index
    %c0_60 = arith.constant 0 : index
    %102 = vector.load %arg16[%c0_59, %c0_60] : memref<1x128xf32, #tpu.memory_space<vmem>>, vector<1x128xf32>
    %103 = vector.broadcast %102 : vector<1x128xf32> to vector<128x128xf32>
    %104 = arith.addf %101, %103 : vector<128x128xf32>
    %cst_61 = arith.constant 0.000000e+00 : f32
    %105 = vector.broadcast %cst_61 : f32 to vector<128x128xf32>
    %106 = arith.maximumf %104, %105 : vector<128x128xf32>
    %107 = arith.truncf %106 : vector<128x128xf32> to vector<128x128xbf16>
    %c0_62 = arith.constant 0 : index
    %c0_63 = arith.constant 0 : index
    %108 = vector.load %arg17[%c0_62, %c0_63] : memref<128x256xbf16, #tpu.memory_space<vmem>>, vector<128x256xbf16>
    %cst_64 = arith.constant dense<0.000000e+00> : vector<128x256xf32>
    %109 = tpu.matmul %107, %108, %cst_64 {dimension_numbers = #tpu.dot_dimension_numbers<[1], [0], [0], [1], [0, 0, 1, 1], [], []>} : vector<128x128xbf16>, vector<128x256xbf16>, vector<128x256xf32> -> vector<128x256xf32>
    %c0_65 = arith.constant 0 : index
    %c0_66 = arith.constant 0 : index
    %110 = vector.load %arg18[%c0_65, %c0_66] : memref<1x256xf32, #tpu.memory_space<vmem>>, vector<1x256xf32>
    %111 = vector.broadcast %110 : vector<1x256xf32> to vector<128x256xf32>
    %112 = arith.addf %109, %111 : vector<128x256xf32>
    %113 = vector.extract_strided_slice %112 {offsets = [0, 0], sizes = [128, 128], strides = [1, 1]} : vector<128x256xf32> to vector<128x128xf32>
    %114 = vector.extract_strided_slice %112 {offsets = [0, 128], sizes = [128, 128], strides = [1, 1]} : vector<128x256xf32> to vector<128x128xf32>
    %cst_67 = arith.constant 2.000000e-01 : f32
    %115 = vector.broadcast %cst_67 : f32 to vector<128x128xf32>
    %116 = arith.mulf %113, %115 : vector<128x128xf32>
    %117 = math.absf %116 : vector<128x128xf32>
    %cst_68 = arith.constant 2.41421366 : f32
    %118 = vector.broadcast %cst_68 : f32 to vector<128x128xf32>
    %119 = arith.cmpf ogt, %117, %118 : vector<128x128xf32>
    %cst_69 = arith.constant 0.414213568 : f32
    %120 = vector.broadcast %cst_69 : f32 to vector<128x128xf32>
    %121 = arith.cmpf ogt, %117, %120 : vector<128x128xf32>
    %cst_70 = arith.constant 1.000000e-30 : f32
    %122 = vector.broadcast %cst_70 : f32 to vector<128x128xf32>
    %123 = arith.maximumf %117, %122 : vector<128x128xf32>
    %cst_71 = arith.constant -1.000000e+00 : f32
    %124 = vector.broadcast %cst_71 : f32 to vector<128x128xf32>
    %125 = arith.divf %124, %123 : vector<128x128xf32>
    %cst_72 = arith.constant 1.000000e+00 : f32
    %126 = vector.broadcast %cst_72 : f32 to vector<128x128xf32>
    %127 = arith.subf %117, %126 : vector<128x128xf32>
    %cst_73 = arith.constant 1.000000e+00 : f32
    %128 = vector.broadcast %cst_73 : f32 to vector<128x128xf32>
    %129 = arith.addf %117, %128 : vector<128x128xf32>
    %130 = arith.divf %127, %129 : vector<128x128xf32>
    %131 = arith.select %121, %130, %117 : vector<128x128xi1>, vector<128x128xf32>
    %132 = arith.select %119, %125, %131 : vector<128x128xi1>, vector<128x128xf32>
    %cst_74 = arith.constant 0.785398185 : f32
    %cst_75 = arith.constant 0.000000e+00 : f32
    %133 = vector.broadcast %cst_74 : f32 to vector<128x128xf32>
    %134 = vector.broadcast %cst_75 : f32 to vector<128x128xf32>
    %135 = arith.select %121, %133, %134 : vector<128x128xi1>, vector<128x128xf32>
    %cst_76 = arith.constant 1.57079637 : f32
    %136 = vector.broadcast %cst_76 : f32 to vector<128x128xf32>
    %137 = arith.select %119, %136, %135 : vector<128x128xi1>, vector<128x128xf32>
    %138 = arith.mulf %132, %132 : vector<128x128xf32>
    %cst_77 = arith.constant 0.0805374458 : f32
    %139 = vector.broadcast %cst_77 : f32 to vector<128x128xf32>
    %140 = arith.mulf %139, %138 : vector<128x128xf32>
    %cst_78 = arith.constant 0.138776854 : f32
    %141 = vector.broadcast %cst_78 : f32 to vector<128x128xf32>
    %142 = arith.subf %140, %141 : vector<128x128xf32>
    %143 = arith.mulf %142, %138 : vector<128x128xf32>
    %cst_79 = arith.constant 0.199777111 : f32
    %144 = vector.broadcast %cst_79 : f32 to vector<128x128xf32>
    %145 = arith.addf %143, %144 : vector<128x128xf32>
    %146 = arith.mulf %145, %138 : vector<128x128xf32>
    %cst_80 = arith.constant 0.333329499 : f32
    %147 = vector.broadcast %cst_80 : f32 to vector<128x128xf32>
    %148 = arith.subf %146, %147 : vector<128x128xf32>
    %149 = arith.mulf %148, %138 : vector<128x128xf32>
    %150 = arith.mulf %149, %132 : vector<128x128xf32>
    %151 = arith.addf %150, %132 : vector<128x128xf32>
    %152 = arith.addf %137, %151 : vector<128x128xf32>
    %cst_81 = arith.constant 0.000000e+00 : f32
    %153 = vector.broadcast %cst_81 : f32 to vector<128x128xf32>
    %154 = arith.cmpf olt, %116, %153 : vector<128x128xf32>
    %cst_82 = arith.constant 0.000000e+00 : f32
    %155 = vector.broadcast %cst_82 : f32 to vector<128x128xf32>
    %156 = arith.subf %155, %152 : vector<128x128xf32>
    %157 = arith.select %154, %156, %152 : vector<128x128xi1>, vector<128x128xf32>
    %cst_83 = arith.constant 3.180000e+00 : f32
    %158 = vector.broadcast %cst_83 : f32 to vector<128x128xf32>
    %159 = arith.mulf %158, %157 : vector<128x128xf32>
    %160 = math.exp %159 : vector<128x128xf32>
    %161 = arith.mulf %160, %1 : vector<128x128xf32>
    %162 = arith.addf %161, %114 : vector<128x128xf32>
    %c0_84 = arith.constant 0 : index
    %c0_85 = arith.constant 0 : index
    %163 = vector.load %arg20[%c0_84, %c0_85] : memref<128x128xf32, #tpu.memory_space<vmem>>, vector<128x128xf32>
    tpu.vector_store %arg20[%c0_84, %c0_85], %162 {strides = array<i32>} : memref<128x128xf32, #tpu.memory_space<vmem>>, vector<128x128xf32>,
    return
  }
  func.func @transform_0(%arg0: i32) -> (i32, i32) {
    %c0_i32 = arith.constant 0 : i32
    %c0_i32_0 = arith.constant 0 : i32
    return %arg0, %c0_i32 : i32, i32
  }
  func.func @transform_1(%arg0: i32) -> (i32, i32) {
    %c0_i32 = arith.constant 0 : i32
    %c0_i32_0 = arith.constant 0 : i32
    return %arg0, %c0_i32 : i32, i32
  }
  func.func @transform_2(%arg0: i32) -> (i32, i32) {
    %c0_i32 = arith.constant 0 : i32
    %c0_i32_0 = arith.constant 0 : i32
    %c0_i32_1 = arith.constant 0 : i32
    return %c0_i32, %c0_i32_0 : i32, i32
  }
  func.func @transform_3(%arg0: i32) -> (i32, i32) {
    %c0_i32 = arith.constant 0 : i32
    %c0_i32_0 = arith.constant 0 : i32
    %c0_i32_1 = arith.constant 0 : i32
    return %c0_i32, %c0_i32_0 : i32, i32
  }
  func.func @transform_4(%arg0: i32) -> (i32, i32) {
    %c0_i32 = arith.constant 0 : i32
    %c0_i32_0 = arith.constant 0 : i32
    %c0_i32_1 = arith.constant 0 : i32
    return %c0_i32, %c0_i32_0 : i32, i32
  }
  func.func @transform_5(%arg0: i32) -> (i32, i32) {
    %c0_i32 = arith.constant 0 : i32
    %c0_i32_0 = arith.constant 0 : i32
    %c0_i32_1 = arith.constant 0 : i32
    return %c0_i32, %c0_i32_0 : i32, i32
  }
  func.func @transform_6(%arg0: i32) -> (i32, i32) {
    %c0_i32 = arith.constant 0 : i32
    %c0_i32_0 = arith.constant 0 : i32
    %c0_i32_1 = arith.constant 0 : i32
    return %c0_i32, %c0_i32_0 : i32, i32
  }
  func.func @transform_7(%arg0: i32) -> (i32, i32) {
    %c0_i32 = arith.constant 0 : i32
    %c0_i32_0 = arith.constant 0 : i32
    %c0_i32_1 = arith.constant 0 : i32
    return %c0_i32, %c0_i32_0 : i32, i32
  }
  func.func @transform_8(%arg0: i32) -> (i32, i32) {
    %c0_i32 = arith.constant 0 : i32
    %c0_i32_0 = arith.constant 0 : i32
    %c0_i32_1 = arith.constant 0 : i32
    return %c0_i32, %c0_i32_0 : i32, i32
  }
  func.func @transform_9(%arg0: i32) -> (i32, i32) {
    %c0_i32 = arith.constant 0 : i32
    %c0_i32_0 = arith.constant 0 : i32
    %c0_i32_1 = arith.constant 0 : i32
    return %c0_i32, %c0_i32_0 : i32, i32
  }
  func.func @transform_10(%arg0: i32) -> (i32, i32) {
    %c0_i32 = arith.constant 0 : i32
    %c0_i32_0 = arith.constant 0 : i32
    %c0_i32_1 = arith.constant 0 : i32
    return %c0_i32, %c0_i32_0 : i32, i32
  }
  func.func @transform_11(%arg0: i32) -> (i32, i32) {
    %c0_i32 = arith.constant 0 : i32
    %c0_i32_0 = arith.constant 0 : i32
    %c0_i32_1 = arith.constant 0 : i32
    return %c0_i32, %c0_i32_0 : i32, i32
  }
  func.func @transform_12(%arg0: i32) -> (i32, i32) {
    %c0_i32 = arith.constant 0 : i32
    %c0_i32_0 = arith.constant 0 : i32
    %c0_i32_1 = arith.constant 0 : i32
    return %c0_i32, %c0_i32_0 : i32, i32
  }
  func.func @transform_13(%arg0: i32) -> (i32, i32) {
    %c0_i32 = arith.constant 0 : i32
    %c0_i32_0 = arith.constant 0 : i32
    %c0_i32_1 = arith.constant 0 : i32
    return %c0_i32, %c0_i32_0 : i32, i32
  }
  func.func @transform_14(%arg0: i32) -> (i32, i32) {
    %c0_i32 = arith.constant 0 : i32
    %c0_i32_0 = arith.constant 0 : i32
    %c0_i32_1 = arith.constant 0 : i32
    return %c0_i32, %c0_i32_0 : i32, i32
  }
  func.func @transform_15(%arg0: i32) -> (i32, i32) {
    %c0_i32 = arith.constant 0 : i32
    %c0_i32_0 = arith.constant 0 : i32
    %c0_i32_1 = arith.constant 0 : i32
    return %c0_i32, %c0_i32_0 : i32, i32
  }
  func.func @transform_16(%arg0: i32) -> (i32, i32) {
    %c0_i32 = arith.constant 0 : i32
    %c0_i32_0 = arith.constant 0 : i32
    %c0_i32_1 = arith.constant 0 : i32
    return %c0_i32, %c0_i32_0 : i32, i32
  }
  func.func @transform_17(%arg0: i32) -> (i32, i32) {
    %c0_i32 = arith.constant 0 : i32
    %c0_i32_0 = arith.constant 0 : i32
    %c0_i32_1 = arith.constant 0 : i32
    return %c0_i32, %c0_i32_0 : i32, i32
  }
  func.func @transform_18(%arg0: i32) -> (i32, i32) {
    %c0_i32 = arith.constant 0 : i32
    %c0_i32_0 = arith.constant 0 : i32
    return %arg0, %c0_i32 : i32, i32
  }
  func.func @transform_19(%arg0: i32) -> (i32, i32) {
    %c0_i32 = arith.constant 0 : i32
    %c0_i32_0 = arith.constant 0 : i32
    return %arg0, %c0_i32 : i32, i32
  }
}

</mosaic_0001>

<bundles_post_ra>
// kernel: tpu_custom_call.1
= control target key start
LH: loop header
LB: loop body
LE: loop exit
PB: predicated region body
PF: predicated region fallthrough
CT: control target
= control target key end

     0   :  { %s7228_s0 = inlined_call_operand.hbm [shape: f32[256,128], index: 0, kind: input, shape index: {}]   ;;  %s7229_s1 = inlined_call_operand.hbm [shape: f32[256,128], index: 1, kind: input, shape index: {}]   ;;  %s7230_s2 = inlined_call_operand.hbm [shape: bf16[128,128], index: 2, kind: input, shape index: {}]   ;;  %s7231_s3 = inlined_call_operand.vmem [shape: f32[1,128], index: 3, kind: input, shape index: {}]   ;;  %s7232_s4 = inlined_call_operand.hbm [shape: bf16[128,128], index: 4, kind: input, shape index: {}]   ;;  %s7233_s5 = inlined_call_operand.vmem [shape: f32[1,128], index: 5, kind: input, shape index: {}]   ;;  %s7234_s6 = inlined_call_operand.hbm [shape: bf16[128,128], index: 6, kind: input, shape index: {}]   ;;  %s7235_s7 = inlined_call_operand.vmem [shape: f32[1,128], index: 7, kind: input, shape index: {}]   ;;  %s7236_s8 = inlined_call_operand.hbm [shape: bf16[128,256], index: 8, kind: input, shape index: {}]   ;;  %s7237_s9 = inlined_call_operand.vmem [shape: f32[1,256], index: 9, kind: input, shape index: {}]   ;;  %s7238_s10 = inlined_call_operand.hbm [shape: bf16[128,128], index: 10, kind: input, shape index: {}]   ;;  %s7239_s11 = inlined_call_operand.vmem [shape: f32[1,128], index: 11, kind: input, shape index: {}]   ;;  %s7240_s12 = inlined_call_operand.hbm [shape: bf16[128,128], index: 12, kind: input, shape index: {}]   ;;  %s7241_s13 = inlined_call_operand.vmem [shape: f32[1,128], index: 13, kind: input, shape index: {}]   ;;  %s7242_s14 = inlined_call_operand.hbm [shape: bf16[128,128], index: 14, kind: input, shape index: {}]   ;;  %s7243_s15 = inlined_call_operand.vmem [shape: f32[1,128], index: 15, kind: input, shape index: {}]   ;;  %s7244_s16 = inlined_call_operand.hbm [shape: bf16[128,256], index: 16, kind: input, shape index: {}]   ;;  %s7245_s17 = inlined_call_operand.vmem [shape: f32[1,256], index: 17, kind: input, shape index: {}]   ;;  %s7246_s18 = inlined_call_operand.hbm [shape: f32[256,128], index: 18, kind: output, shape index: {0}]   ;;  %s7247_s19 = inlined_call_operand.hbm [shape: f32[256,128], index: 19, kind: output, shape index: {1}]  }
   0x1   :  { %7266 = sst [smem:[#allocation31_spill]] %s7228_s0 }
   0x2   :  { %7267 = sst [smem:[#allocation32_spill]] %s7229_s1 }
   0x3   :  { %7268 = sst [smem:[#allocation33_spill]] %s7230_s2 }
   0x4   :  { %7269 = sst [smem:[#allocation34_spill]] %s7231_s3 }
   0x5   :  { %7270 = sst [smem:[#allocation35_spill]] %s7232_s4 }
   0x6   :  { %7271 = sst [smem:[#allocation36_spill]] %s7234_s6 }
   0x7   :  { %7272 = sst [smem:[#allocation37_spill]] %s7235_s7 }
   0x8   :  { %7273 = sst [smem:[#allocation38_spill]] %s7236_s8 }
   0x9   :  { %7274 = sst [smem:[#allocation39_spill]] %s7237_s9 }
   0xa   :  { %7275 = sst [smem:[#allocation40_spill]] %s7238_s10 }
   0xb   :  { %7276 = sst [smem:[#allocation41_spill]] %s7239_s11 }
   0xc   :  { %7277 = sst [smem:[#allocation42_spill]] %s7240_s12 }
   0xd   :  { %7278 = sst [smem:[#allocation43_spill]] %s7241_s13 }
   0xe   :  { %7279 = sst [smem:[#allocation44_spill]] %s7242_s14 }
   0xf   :  { %7280 = sst [smem:[#allocation45_spill]] %s7243_s15 }
  0x10   :  { %7281 = sst [smem:[#allocation46_spill]] %s7245_s17 }
  0x11   :  { %7282 = sst [smem:[#allocation47_spill]] %s7246_s18 }
  0x12   :  { %7283 = sst [smem:[#allocation48_spill]] %s7247_s19 }
  0x13   :  { %25 = vsyncpa [#allocation3], 0 }
  0x14   :  { %27 = vsyncpa [#allocation3 + $0x1], 0 }
  0x15   :  { %28 = vsyncpa [#allocation6], 0 }
  0x16   :  { %30 = vsyncpa [#allocation6 + $0x1], 0 }
  0x17   :  { %31 = vsyncpa [#allocation9], 0 }
  0x18   :  { %32 = vsyncpa [#allocation12], 0 }
  0x19   :  { %33 = vsyncpa [#allocation15], 0 }
  0x1a   :  { %34 = vsyncpa [#allocation18], 0 }
  0x1b   :  { %35 = vsyncpa [#allocation4], 0 }
  0x1c   :  { %37 = vsyncpa [#allocation4 + $0x1], 0 }
  0x1d   :  { %38 = vsyncpa [#allocation21], 0 }
  0x1e   :  { %40 = vsyncpa [#allocation21 + $0x1], 0  ;;  %s5283_s0 = smov 0   ;;  %s5285_s30 = smov 0  }
  0x1f   :  { %s5287_s20 = smov 0   ;;  %s5289_s21 = smov 0  }
  0x20 LB: > { %s5163_s1 = smov [#allocation7]   ;;  %s5304_s2 = sadd.s32 4294967295, %s5161_s21   ;;  %s5161_s21 = sphi %s5289_s21, %s7333_s21   ;;  %s5157_s20 = sphi %s5287_s20, %s7332_s20   ;;  %s5153_s30 = sphi %s5285_s30, %s7331_s30   ;;  %s5149_s0 = sphi %s5283_s0, %s7330_s0  }
  0x21   : > { %s503_s22 = sshll.u32 %s5163_s1, 4  ;;  %p3795_p0 = scmp.ge.s32.totalorder %s5161_s21, 1  ;;  %s5309_s22 = int_to_ptr.vmem [resolvable:$true] %s503_s22 }
  0x22   : > { %p7258_p1 = scmp.eq.s32.totalorder %s5304_s2, 0  ;;  %p491_p2 = scmp.lt.s32.totalorder %s5161_s21, 3 }
  0x23   : > { %s5164_s24 = smov [#allocation8]   ;;  %s5165_s26 = smov [#allocation11]  }
  0x24   : > { %p5311_p3 = pnand %p3795_p0, %p491_p2  ;;  %s519_s25 = sshll.u32 %s5164_s24, 4  ;;  %s5324_s25 = int_to_ptr.vmem [resolvable:$true] %s519_s25 }
  0x25   : > { %s551_s27 = sshll.u32 %s5165_s26, 4  ;;  %s7286_s1 = sld [smem:[#allocation33_spill]]  ;;  %s5326_s27 = int_to_ptr.vmem [resolvable:$true] %s551_s27 }
  0x26   : > { %s7284_s23 = scalar_select %p5311_p3, 1, 0 }
  0x27   : > { %p4346_p5 = pneg %p5311_p3 }
  0x29   : > { %p5320_p6 = pnand %p4346_p5, %p7258_p1 }
  0x2b   : > { %s4755_s19 = scalar_lea.hbm %s7286_s1, 1024  ;;  %p5336_p8 = pneg %p5320_p6 }
  0x2c   : > { %p4756_p7 = scmp.ne.s32.totalorder %s7286_s1, %s4755_s19  ;;  %p4762_p11 = scmp.lt.u32.totalorder %s4755_s19, %s7286_s1 }
  0x2e   : > { %p4758_p9 = pnand %p5336_p8, %p4756_p7 }
  0x30   : > { %p4759_p10 = pneg %p4758_p9 }
  0x32   : > { %p4764_p12 = pnand %p4762_p11, %p4759_p10 }
  0x34   : > { %4767 = shalt.err (!%p4764_p12)
}
  0x35   : > { %s4768_s17 = scalar_lea.vmem %s5309_s22, 1024  ;;  %p4776_p5 = scmp.lt.s32.totalorder %s5309_s22, %s5309_s22 }
  0x36   : > { %p4769_p13 = scmp.ne.s32.totalorder %s5309_s22, %s4768_s17  ;;  %p4777_p4 = scmp.lt.s32.totalorder %s4768_s17, %s4768_s17 }
  0x38   : > { %p4771_p0 = pnand %p4769_p13, %p5336_p8  ;;  %p4778_p7 = por %p4777_p4, %p4776_p5 }
  0x3a   : > { %p4772_p2 = pneg %p4771_p0 }
  0x3c   : > { %p4779_p9 = pnand %p4778_p7, %p4772_p2 }
  0x3e   : > { %4782 = shalt.err (!%p4779_p9)
}
  0x3f   : > { %s7253_s18 = smov 64   ;;  %s7255_s15 = smov 4  }
  0x40   : > { %4349 = dma.hbm_to_vmem [thread:$0]  (!%p5320_p6), %s7286_s1, 1024, %s5309_s22, [#allocation6], %s7253_s18, %s7253_s18, %s7255_s15  }
  0x41   : > { %s7288_s4 = sld [smem:[#allocation35_spill]] }
  0x47   : > { %s4783_s17 = scalar_lea.hbm %s7288_s4, 1024 }
  0x48   : > { %p4784_p4 = scmp.ne.s32.totalorder %s7288_s4, %s4783_s17  ;;  %p4790_p12 = scmp.lt.u32.totalorder %s4783_s17, %s7288_s4 }
  0x4a   : > { %p4786_p10 = pnand %p4784_p4, %p5336_p8 }
  0x4c   : > { %p4787_p11 = pneg %p4786_p10 }
  0x4e   : > { %p4792_p13 = pnand %p4790_p12, %p4787_p11 }
  0x50   : > { %4795 = shalt.err (!%p4792_p13)
}
  0x51   : > { %s4796_s22 = scalar_lea.vmem %s5324_s25, 1024  ;;  %p4804_p7 = scmp.lt.s32.totalorder %s5324_s25, %s5324_s25 }
  0x52   : > { %p4797_p0 = scmp.ne.s32.totalorder %s5324_s25, %s4796_s22  ;;  %p4805_p9 = scmp.lt.s32.totalorder %s4796_s22, %s4796_s22 }
  0x54   : > { %p4799_p2 = pnand %p4797_p0, %p5336_p8  ;;  %p4806_p4 = por %p4805_p9, %p4804_p7 }
  0x56   : > { %p4800_p5 = pneg %p4799_p2 }
  0x58   : > { %p4807_p10 = pnand %p4806_p4, %p4800_p5 }
  0x5a   : > { %4810 = shalt.err (!%p4807_p10)
}
  0x5b   : > { %4352 = dma.hbm_to_vmem [thread:$0]  (!%p5320_p6), %s7288_s4, 1024, %s5324_s25, [#allocation9], %s7253_s18, %s7253_s18, %s7255_s15  }
  0x5c   : > { %s7289_s8 = sld [smem:[#allocation38_spill]] }
  0x62   : > { %s4811_s19 = scalar_lea.hbm %s7289_s8, 2048 }
  0x63   : > { %p4812_p11 = scmp.ne.s32.totalorder %s7289_s8, %s4811_s19  ;;  %p4818_p0 = scmp.lt.u32.totalorder %s4811_s19, %s7289_s8 }
  0x65   : > { %p4814_p12 = pnand %p4812_p11, %p5336_p8 }
  0x67   : > { %p4815_p13 = pneg %p4814_p12 }
  0x69   : > { %p4820_p2 = pnand %p4818_p0, %p4815_p13 }
  0x6b   : > { %4823 = shalt.err (!%p4820_p2)
}
  0x6c   : > { %s4824_s25 = scalar_lea.vmem %s5326_s27, 2048  ;;  %p4832_p4 = scmp.lt.s32.totalorder %s5326_s27, %s5326_s27 }
  0x6d   : > { %p4825_p5 = scmp.ne.s32.totalorder %s5326_s27, %s4824_s25  ;;  %p4833_p10 = scmp.lt.s32.totalorder %s4824_s25, %s4824_s25 }
  0x6f   : > { %p4827_p7 = pnand %p4825_p5, %p5336_p8  ;;  %p4834_p11 = por %p4833_p10, %p4832_p4 }
  0x71   : > { %p4828_p9 = pneg %p4827_p7 }
  0x73   : > { %p4835_p12 = pnand %p4834_p11, %p4828_p9 }
  0x75   : > { %4838 = shalt.err (!%p4835_p12)
}
  0x76   : > { %s7260_s22 = smov 128   ;;  %s7262_s7 = smov 8  }
  0x77   : > { %4358 = dma.hbm_to_vmem [thread:$0]  (!%p5320_p6), %s7289_s8, 2048, %s5326_s27, [#allocation12], %s7260_s22, %s7260_s22, %s7262_s7  }
  0x78   : > { %s5170_s13 = smov [#allocation14]   ;;  %s5171_s28 = smov [#allocation10]  }
  0x79   : > { %s583_s19 = sshll.u32 %s5170_s13, 4  ;;  %s535_s29 = sshll.u32 %s5171_s28, 4  ;;  %s584_s19 = int_to_ptr.vmem [resolvable:$true] %s583_s19  ;;  %s536_s29 = int_to_ptr.vmem [resolvable:$true] %s535_s29 }
  0x7a   : > { %s7290_s12 = sld [smem:[#allocation42_spill]] }
  0x80   : > { %s4839_s25 = scalar_lea.hbm %s7290_s12, 1024 }
  0x81   : > { %p4840_p13 = scmp.ne.s32.totalorder %s7290_s12, %s4839_s25  ;;  %p4846_p5 = scmp.lt.u32.totalorder %s4839_s25, %s7290_s12 }
  0x83   : > { %p4842_p0 = pnand %p4840_p13, %p5336_p8 }
  0x85   : > { %p4843_p2 = pneg %p4842_p0 }
  0x87   : > { %p4848_p7 = pnand %p4846_p5, %p4843_p2 }
  0x89   : > { %4851 = shalt.err (!%p4848_p7)
}
  0x8a   : > { %s4852_s27 = scalar_lea.vmem %s584_s19, 1024  ;;  %p4860_p11 = scmp.lt.s32.totalorder %s584_s19, %s584_s19 }
  0x8b   : > { %p4853_p9 = scmp.ne.s32.totalorder %s584_s19, %s4852_s27  ;;  %p4861_p12 = scmp.lt.s32.totalorder %s4852_s27, %s4852_s27 }
  0x8d   : > { %p4855_p4 = pnand %p4853_p9, %p5336_p8  ;;  %p4862_p1 = por %p4861_p12, %p4860_p11 }
  0x8f   : > { %p4856_p10 = pneg %p4855_p4 }
  0x91   : > { %p4863_p3 = pnand %p4862_p1, %p4856_p10 }
  0x93   : > { %4866 = shalt.err (!%p4863_p3)
}
  0x94   : > { %s7291_s18 = smov 4   ;;  %s7292_s15 = smov 64  }
  0x95   : > { %4364 = dma.hbm_to_vmem [thread:$0]  (!%p5320_p6), %s7290_s12, 1024, %s584_s19, [#allocation15], %s7292_s15, %s7292_s15, %s7291_s18  }
  0x96   : > { %s7293_s6 = sld [smem:[#allocation36_spill]] }
  0x9c   : > { %s4867_s13 = scalar_lea.hbm %s7293_s6, 1024 }
  0x9d   : > { %p4868_p1 = scmp.ne.s32.totalorder %s7293_s6, %s4867_s13  ;;  %p4874_p0 = scmp.lt.u32.totalorder %s4867_s13, %s7293_s6 }
  0x9f   : > { %p4870_p3 = pnand %p4868_p1, %p5336_p8 }
  0xa1   : > { %p4871_p13 = pneg %p4870_p3 }
  0xa3   : > { %p4876_p2 = pnand %p4874_p0, %p4871_p13 }
  0xa5   : > { %4879 = shalt.err (!%p4876_p2)
}
  0xa6   : > { %s4880_s27 = scalar_lea.vmem %s536_s29, 1024  ;;  %p4888_p4 = scmp.lt.s32.totalorder %s536_s29, %s536_s29 }
  0xa7   : > { %p4881_p5 = scmp.ne.s32.totalorder %s536_s29, %s4880_s27  ;;  %p4889_p10 = scmp.lt.s32.totalorder %s4880_s27, %s4880_s27 }
  0xa9   : > { %p4883_p7 = pnand %p4881_p5, %p5336_p8  ;;  %p4890_p11 = por %p4889_p10, %p4888_p4 }
  0xab   : > { %p4884_p9 = pneg %p4883_p7 }
  0xad   : > { %p4891_p12 = pnand %p4890_p11, %p4884_p9 }
  0xaf   : > { %4894 = shalt.err (!%p4891_p12)
}
  0xb0   : > { %4355 = dma.hbm_to_vmem [thread:$0]  (!%p5320_p6), %s7293_s6, 1024, %s536_s29, [#allocation9], %s7292_s15, %s7292_s15, %s7291_s18  }
  0xb1   : > { %s5172_s1 = smov [#allocation13]   ;;  %s5173_s11 = smov [#allocation16]  }
  0xb2   : > { %s567_s9 = sshll.u32 %s5172_s1, 4  ;;  %s599_s13 = sshll.u32 %s5173_s11, 4  ;;  %s568_s9 = int_to_ptr.vmem [resolvable:$true] %s567_s9  ;;  %s600_s13 = int_to_ptr.vmem [resolvable:$true] %s599_s13 }
  0xb3   : > { %s7294_s10 = sld [smem:[#allocation40_spill]] }
  0xb9   : > { %s4895_s17 = scalar_lea.hbm %s7294_s10, 1024 }
  0xba   : > { %p4896_p1 = scmp.ne.s32.totalorder %s7294_s10, %s4895_s17  ;;  %p4902_p0 = scmp.lt.u32.totalorder %s4895_s17, %s7294_s10 }
  0xbc   : > { %p4898_p3 = pnand %p4896_p1, %p5336_p8 }
  0xbe   : > { %p4899_p13 = pneg %p4898_p3 }
  0xc0   : > { %p4904_p2 = pnand %p4902_p0, %p4899_p13 }
  0xc2   : > { %4907 = shalt.err (!%p4904_p2)
}
  0xc3   : > { %s4908_s29 = scalar_lea.vmem %s568_s9, 1024  ;;  %p4916_p4 = scmp.lt.s32.totalorder %s568_s9, %s568_s9 }
  0xc4   : > { %p4909_p5 = scmp.ne.s32.totalorder %s568_s9, %s4908_s29  ;;  %p4917_p10 = scmp.lt.s32.totalorder %s4908_s29, %s4908_s29 }
  0xc6   : > { %p4911_p7 = pnand %p4909_p5, %p5336_p8  ;;  %p4918_p11 = por %p4917_p10, %p4916_p4 }
  0xc8   : > { %p4912_p9 = pneg %p4911_p7 }
  0xca   : > { %p4919_p12 = pnand %p4918_p11, %p4912_p9 }
  0xcc   : > { %4922 = shalt.err (!%p4919_p12)
}
  0xcd   : > { %4361 = dma.hbm_to_vmem [thread:$0]  (!%p5320_p6), %s7294_s10, 1024, %s568_s9, [#allocation12], %s7292_s15, %s7292_s15, %s7291_s18  }
  0xce   : > { %s7295_s14 = sld [smem:[#allocation44_spill]] }
  0xd4   : > { %s4923_s28 = scalar_lea.hbm %s7295_s14, 1024 }
  0xd5   : > { %p4924_p1 = scmp.ne.s32.totalorder %s7295_s14, %s4923_s28  ;;  %p4930_p0 = scmp.lt.u32.totalorder %s4923_s28, %s7295_s14 }
  0xd7   : > { %p4926_p3 = pnand %p4924_p1, %p5336_p8 }
  0xd9   : > { %p4927_p13 = pneg %p4926_p3 }
  0xdb   : > { %p4932_p2 = pnand %p4930_p0, %p4927_p13 }
  0xdd   : > { %4935 = shalt.err (!%p4932_p2)
}
  0xde   : > { %s4936_s19 = scalar_lea.vmem %s600_s13, 1024  ;;  %p4944_p4 = scmp.lt.s32.totalorder %s600_s13, %s600_s13 }
  0xdf   : > { %p4937_p5 = scmp.ne.s32.totalorder %s600_s13, %s4936_s19  ;;  %p4945_p10 = scmp.lt.s32.totalorder %s4936_s19, %s4936_s19 }
  0xe1   : > { %p4939_p7 = pnand %p4937_p5, %p5336_p8  ;;  %p4946_p11 = por %p4945_p10, %p4944_p4 }
  0xe3   : > { %p4940_p9 = pneg %p4939_p7 }
  0xe5   : > { %p4947_p12 = pnand %p4946_p11, %p4940_p9 }
  0xe7   : > { %4950 = shalt.err (!%p4947_p12)
}
  0xe8   : > { %4367 = dma.hbm_to_vmem [thread:$0]  (!%p5320_p6), %s7295_s14, 1024, %s600_s13, [#allocation15], %s7292_s15, %s7292_s15, %s7291_s18  }
  0xe9   : > { %s5174_s22 = smov [#allocation17]   ;;  %s4951_s28 = scalar_lea.hbm %s7244_s16, 2048 }
  0xea   : > { %s615_s4 = sshll.u32 %s5174_s22, 4  ;;  %p4952_p1 = scmp.ne.s32.totalorder %s7244_s16, %s4951_s28  ;;  %s616_s4 = int_to_ptr.vmem [resolvable:$true] %s615_s4 }
  0xeb   : > { %p4958_p0 = scmp.lt.u32.totalorder %s4951_s28, %s7244_s16 }
  0xec   : > { %p4954_p3 = pnand %p4952_p1, %p5336_p8 }
  0xee   : > { %p4955_p13 = pneg %p4954_p3 }
  0xf0   : > { %p4960_p2 = pnand %p4958_p0, %p4955_p13 }
  0xf2   : > { %4963 = shalt.err (!%p4960_p2)
}
  0xf3   : > { %s4964_s18 = scalar_lea.vmem %s616_s4, 2048  ;;  %p4972_p4 = scmp.lt.s32.totalorder %s616_s4, %s616_s4 }
  0xf4   : > { %p4965_p5 = scmp.ne.s32.totalorder %s616_s4, %s4964_s18  ;;  %p4973_p10 = scmp.lt.s32.totalorder %s4964_s18, %s4964_s18 }
  0xf6   : > { %p4967_p7 = pnand %p4965_p5, %p5336_p8  ;;  %p4974_p11 = por %p4973_p10, %p4972_p4 }
  0xf8   : > { %p4968_p9 = pneg %p4967_p7 }
  0xfa   : > { %p4975_p12 = pnand %p4974_p11, %p4968_p9 }
  0xfc   : > { %4978 = shalt.err (!%p4975_p12)
}
  0xfd   : > { %s7296_s15 = smov 128   ;;  %s3794_s3 = sadd.s32 4294967294, %s5161_s21  }
  0xfe   : > { %4370 = dma.hbm_to_vmem [thread:$0]  (!%p5320_p6), %s7244_s16, 2048, %s616_s4, [#allocation18], %s7296_s15, %s7296_s15, %s7262_s7  }
  0xff   : > { %s5519_s24 = sadd.s32 1, %s5161_s21   ;;  %s53_s29 = sadd.s32 1, %s5157_s20 }
 0x100   : > { %s50_s9 = ssub.s32 %s5161_s21, %s5519_s24  ;;  %p60_p1 = scmp.ne.s32.totalorder %s5157_s20, %s5153_s30 }
 0x101   : > { %p51_p8 = scmp.eq.s32.totalorder %s50_s9, 0  ;;  %p61_p3 = scmp.eq.s32.totalorder %s5161_s21, 0 }
 0x102   : > { %p66_p13 = scmp.ne.s32.totalorder %s5153_s30, %s5149_s0  ;;  %p7298_p2 = scmp.eq.s32.totalorder %s5304_s2, 0 }
 0x103   : > { %s5530_s22 = scalar_select %p51_p8, %s5157_s20, %s53_s29  }
 0x104   : > { %p5532_p0 = por %p61_p3, %p60_p1  ;;  %p5538_p6 = por %p7298_p2, %p66_p13 }
 0x105   : > { %p452_p5 = scmp.eq.s32.totalorder %s5304_s2, 1  ;;  %p458_p7 = scmp.eq.s32.totalorder %s3794_s3, 1 }
 0x106   : > { %p4393_p9 = scmp.lt.s32.totalorder %s5161_s21, 2  ;;  %s632_s11 = sand.u32 1, %s5157_s20  }
 0x107   : > { %p5545_p4 = por %p452_p5, %p60_p1  ;;  %p5549_p10 = por %p458_p7, %p66_p13 }
 0x108   : > { %s3805_s17 = sshll.u32 %s632_s11, 7  ;;  %s4014_s25 = sshll.u32 %s5161_s21, 11 }
 0x109   : > { %s7300_s28 = scalar_select %p5545_p4, 1, 0 }
 0x10a   : > { %s7301_s26 = scalar_select %p5549_p10, 1, 0 }
 0x10b   : > { %s7302_s13 = sld [smem:[#allocation31_spill]]  ;;  %s636_s3 = scalar_lea.vmem [#allocation2], %s3805_s17 }
 0x10c   : > { %s643_s9 = sshll.u32 %s636_s3, 4  ;;  %p5563_p11 = pnand %p4393_p9, %p5532_p0  ;;  %s5559_s9 = int_to_ptr.vmem [resolvable:$true] %s643_s9 }
 0x10d   : > { %s7304_s8 = sld [smem:[#allocation32_spill]]  ;;  %s657_s18 = scalar_lea.vmem [#allocation5], %s3805_s17 }
 0x10e   : > { %s5572_s10 = sshll.u32 %s657_s18, 4  ;;  %s5574_s12 = scalar_lea.sflag [#allocation3], %s632_s11  ;;  %s5606_s10 = int_to_ptr.vmem [resolvable:$true] %s5572_s10 }
 0x10f   : > { %p4981_p8 = pneg %p5563_p11 }
 0x111   : > { %s5557_s19 = scalar_lea.hbm %s7302_s13, %s4014_s25  ;;  %s4984_s6 = scalar_lea.hbm %s7302_s13, 4096 }
 0x112   : > { %s4979_s3 = scalar_lea.hbm %s5557_s19, 2048  ;;  %p4985_p13 = scmp.lt.u32.totalorder %s5557_s19, %s7302_s13 }
 0x113   : > { %s5570_s27 = scalar_lea.hbm %s7304_s8, %s4014_s25  ;;  %p4980_p12 = scmp.ne.s32.totalorder %s5557_s19, %s4979_s3 }
 0x114   : > { %p4986_p0 = scmp.lt.u32.totalorder %s4984_s6, %s4979_s3  ;;  %p4988_p5 = scmp.lt.u32.totalorder %s4979_s3, %s5557_s19 }
 0x115   : > { %p4982_p1 = pnand %p4981_p8, %p4980_p12 }
 0x116   : > { %p4987_p2 = por %p4986_p0, %p4985_p13 }
 0x117   : > { %p4983_p3 = pneg %p4982_p1 }
 0x118   : > { %p4989_p7 = por %p4988_p5, %p4987_p2 }
 0x11a   : > { %p4990_p9 = pnand %p4989_p7, %p4983_p3 }
 0x11c   : > { %4993 = shalt.err (!%p4990_p9)
}
 0x11d   : > { %s4994_s11 = scalar_lea.vmem %s5559_s9, 2048  ;;  %s5175_s14 = smov [#allocation2]  }
 0x11e   : > { %p4995_p12 = scmp.ne.s32.totalorder %s5559_s9, %s4994_s11  ;;  %s4999_s17 = sshll.u32 %s5175_s14, 4  ;;  %s5000_s17 = int_to_ptr.vmem [resolvable:$false] %s4999_s17 }
 0x11f   : > { %s5001_s18 = scalar_lea.vmem %s5000_s17, 4096  ;;  %p5002_p4 = scmp.lt.s32.totalorder %s5559_s9, %s5000_s17 }
 0x120   : > { %p4997_p1 = pnand %p4995_p12, %p4981_p8  ;;  %p5003_p13 = scmp.lt.s32.totalorder %s5001_s18, %s4994_s11 }
 0x122   : > { %p4998_p10 = pneg %p4997_p1  ;;  %p5004_p0 = por %p5003_p13, %p5002_p4 }
 0x124   : > { %p5005_p2 = pnand %p5004_p0, %p4998_p10 }
 0x126   : > { %5008 = shalt.err (!%p5005_p2)
}
 0x127   : > { %s7305_s3 = smov 8   ;;  %s653_s1 = sand.u32 1, %s5161_s21  }
 0x128   : > { %4374 = dma.hbm_to_vmem [thread:$0]  (!%p5563_p11), %s5557_s19, 2048, %s5559_s9, %s5574_s12, %s7296_s15, %s7296_s15, %s7305_s3  }
 0x129   : > { %s5609_s6 = scalar_lea.sflag [#allocation6], %s653_s1  ;;  %s5009_s7 = scalar_lea.hbm %s5570_s27, 2048 }
 0x12a   : > { %p5010_p4 = scmp.ne.s32.totalorder %s5570_s27, %s5009_s7  ;;  %s5014_s14 = scalar_lea.hbm %s7304_s8, 4096 }
 0x12b   : > { %p5015_p5 = scmp.lt.u32.totalorder %s5570_s27, %s7304_s8  ;;  %p5016_p7 = scmp.lt.u32.totalorder %s5014_s14, %s5009_s7 }
 0x12c   : > { %p5012_p10 = pnand %p5010_p4, %p4981_p8  ;;  %p5018_p12 = scmp.lt.u32.totalorder %s5009_s7, %s5570_s27 }
 0x12d   : > { %p5017_p9 = por %p5016_p7, %p5015_p5 }
 0x12e   : > { %p5013_p3 = pneg %p5012_p10 }
 0x12f   : > { %p5019_p1 = por %p5018_p12, %p5017_p9 }
 0x131   : > { %p5020_p13 = pnand %p5019_p1, %p5013_p3 }
 0x133   : > { %5023 = shalt.err (!%p5020_p13)
}
 0x134   : > { %s5024_s12 = scalar_lea.vmem %s5606_s10, 2048  ;;  %s5176_s19 = smov [#allocation5]  }
 0x135   : > { %p5025_p0 = scmp.ne.s32.totalorder %s5606_s10, %s5024_s12  ;;  %s5029_s9 = sshll.u32 %s5176_s19, 4  ;;  %s5030_s9 = int_to_ptr.vmem [resolvable:$false] %s5029_s9 }
 0x136   : > { %s5031_s1 = scalar_lea.vmem %s5030_s9, 4096  ;;  %p5032_p10 = scmp.lt.s32.totalorder %s5606_s10, %s5030_s9 }
 0x137   : > { %p5027_p2 = pnand %p5025_p0, %p4981_p8  ;;  %p5033_p5 = scmp.lt.s32.totalorder %s5031_s1, %s5024_s12 }
 0x139   : > { %p5028_p4 = pneg %p5027_p2  ;;  %p5034_p7 = por %p5033_p5, %p5032_p10 }
 0x13b   : > { %p5035_p9 = pnand %p5034_p7, %p5028_p4 }
 0x13d   : > { %5038 = shalt.err (!%p5035_p9)
}
 0x13e   : > { %4377 = dma.hbm_to_vmem [thread:$0]  (!%p5563_p11), %s5570_s27, 2048, %s5606_s10, %s5609_s6, %s7296_s15, %s7296_s15, %s7305_s3  }
 0x13f   : > { %p7306_p8 = scmp.ne.s32.totalorder %s7284_s23, 0 }
 0x140   : > { %s5641_s7 = sand.u32 (!%p7306_p8), 1, %s5153_s30  }
 0x141   : > { %676 = sbr.rel (%p7306_p8) target bundleno = 2466 (0x9a2), region = 92  ;;  %s5644_s25 = sshll.u32 (!%p7306_p8), %s5641_s7, 7 }
 0x142   : > { %s679_s29 = scalar_lea.sflag (!%p7306_p8), [#allocation3], %s5641_s7  ;;  %s5648_s11 = scalar_lea.vmem (!%p7306_p8), [#allocation2], %s5644_s25 }
 0x148   : > { %5112 = dma.done.wait (%p5538_p6), %s679_s29, 2048  }
 0x149   : > { %5114 = vsyncadd (%p5538_p6), %s679_s29, 4294965248  ;;  %s687_s10 = sand.u32 1, %s5304_s2   ;;  %s5656_s15 = scalar_lea.vmem [#allocation5], %s5644_s25 }
 0x14a   : > { %s688_s23 = scalar_lea.sflag [#allocation6], %s687_s10 }
 0x14b   : > { %5116 = dma.done.wait (%p5538_p6), %s688_s23, 2048  }
 0x14c   : > { %5118 = vsyncadd (%p5538_p6), %s688_s23, 4294965248  ;;  %p7307_p11 = scmp.eq.s32.totalorder %s5304_s2, 0 }
 0x14e   : > { %5120 = dma.done.wait (%p7307_p11), [#allocation6], 1024   ;;  %p7308_p3 = pmov %p7307_p11 }
 0x150   : > { %5122 = vsyncadd (%p7308_p3), [#allocation6], 4294966272  ;;  %p7309_p12 = pmov %p7308_p3 }
 0x151   : > { %p7310_p1 = pmov %p7308_p3 }
 0x152   : > { %5124 = dma.done.wait (%p7309_p12), [#allocation9], 2048  }
 0x153   : > { %5126 = vsyncadd (%p7310_p1), [#allocation9], 4294965248  ;;  %p7311_p13 = pmov %p7310_p1 }
 0x154   : > { %p7312_p0 = pmov %p7310_p1 }
 0x155   : > { %5128 = dma.done.wait (%p7311_p13), [#allocation12], 3072  }
 0x156   : > { %5130 = vsyncadd (%p7312_p0), [#allocation12], 4294964224  ;;  %p7313_p6 = pmov %p7312_p0 }
 0x157   : > { %p7314_p2 = pmov %p7312_p0 }
 0x158   : > { %5132 = dma.done.wait (%p7313_p6), [#allocation15], 2048  }
 0x159   : > { %5134 = vsyncadd (%p7314_p2), [#allocation15], 4294965248  ;;  %p7315_p4 = pmov %p7312_p0 }
 0x15a   : > { %p7316_p10 = pmov %p7312_p0 }
 0x15b   : > { %5136 = dma.done.wait (%p7315_p4), [#allocation18], 2048  }
 0x15c   : > { %5138 = vsyncadd (%p7316_p10), [#allocation18], 4294965248  ;;  %v4451_v0 = vld [vmem:[#allocation7] sm:$0xff]   ;;  %v4452_v1 = vld [vmem:[#allocation7 + $0x8] sm:$0xff]   ;;  %s7317_s3 = sld [smem:[#allocation34_spill]]  ;;  %s7318_s12 = sld [smem:[#allocation37_spill]] }
 0x15d   : > { %4114 = vmatprep.subr.bf16.mxu1 %v4451_v0  ;;  %v4453_v2 = vld [vmem:[#allocation7 + $0x10] sm:$0xff]   ;;  %v4454_v3 = vld [vmem:[#allocation7 + $0x18] sm:$0xff]   ;;  %v809_v4 = vld [vmem:[%s5656_s15] sm:$0xff]  ;;  %s7319_s1 = sld [smem:[#allocation39_spill]]  ;;  %s6065_s29 = scalar_lea.vmem [#allocation19], %s5644_s25 }
 0x15e   : > { %4115 = vmatpush3.bf16.msra.mxu1 %v4451_v0  ;;  %v810_v5 = vld [vmem:[%s5656_s15 + $0x8] sm:$0xff]  ;;  %v4455_v7 = vld [vmem:[#allocation7 + $0x20] sm:$0xff]   ;;  %v4457_v9 = vld [vmem:[#allocation7 + $0x30] sm:$0xff]   ;;  %s7320_s23 = sld [smem:[#allocation41_spill]]  ;;  %s7322_s17 = sld [smem:[#allocation45_spill]] }
 0x15f   : > { %4116 = vmatprep.subr.bf16.mxu1 %v4452_v1  ;;  %v825_v6 = vpack.c.bf16 %v810_v5, %v809_v4  ;;  %v4456_v8 = vld [vmem:[#allocation7 + $0x28] sm:$0xff]   ;;  %v4458_v10 = vld [vmem:[#allocation7 + $0x38] sm:$0xff]   ;;  %v811_v11 = vld [vmem:[%s5656_s15 + $0x10] sm:$0xff]  ;;  %s7323_s19 = sld [smem:[#allocation46_spill]]  ;;  %s4016_s9 = sshll.u32 %s5304_s2, 11 }
 0x160   : > { %v812_v12 = vld [vmem:[%s5656_s15 + $0x18] sm:$0xff]  ;;  %v813_v13 = vld [vmem:[%s5656_s15 + $0x20] sm:$0xff]  ;;  %v814_v14 = vld [vmem:[%s5656_s15 + $0x28] sm:$0xff]  ;;  %s7325_s10 = sld [smem:[#allocation47_spill]]  ;;  %s3574_s4 = sshll.u32 %s6065_s29, 4  ;;  %s6785_s4 = int_to_ptr.vmem [resolvable:$true] %s3574_s4 }
 0x161   : > { %4130 = vmatprep.mubr.bf16.mxu1 %v825_v6  ;;  %v4459_v15 = vld [vmem:[#allocation8] sm:$0xff]   ;;  %v826_v16 = vpack.c.bf16 %v812_v12, %v811_v11  ;;  %v4460_v17 = vld [vmem:[#allocation8 + $0x8] sm:$0xff]   ;;  %v827_v18 = vpack.c.bf16 %v814_v14, %v813_v13  ;;  %v815_v19 = vld [vmem:[%s5656_s15 + $0x30] sm:$0xff]  ;;  %s5039_s27 = scalar_lea.vmem %s6785_s4, 2048  ;;  %p7326_p7 = scmp.ne.s32.totalorder %s7300_s28, 0 }
 0x162   : > { %4117 = vmatpush3.bf16.msra.mxu1 %v4452_v1  ;;  %v816_v20 = vld [vmem:[%s5656_s15 + $0x38] sm:$0xff]  ;;  %v817_v21 = vld [vmem:[%s5656_s15 + $0x40] sm:$0xff]  ;;  %v818_v22 = vld [vmem:[%s5656_s15 + $0x48] sm:$0xff]  ;;  %p5040_p5 = scmp.ne.s32.totalorder %s6785_s4, %s5039_s27 }
 0x163   : > { %4118 = vmatprep.subr.bf16.mxu1 %v4453_v2  ;;  %v4461_v23 = vld [vmem:[#allocation8 + $0x10] sm:$0xff]   ;;  %v828_v24 = vpack.c.bf16 %v816_v20, %v815_v19  ;;  %v4462_v25 = vld [vmem:[#allocation8 + $0x18] sm:$0xff]   ;;  %v829_v26 = vpack.c.bf16 %v818_v22, %v817_v21  ;;  %v821_v29 = vld [vmem:[%s5656_s15 + $0x60] sm:$0xff] }
 0x164   : > { %v819_v27 = vld [vmem:[%s5656_s15 + $0x50] sm:$0xff]  ;;  %v820_v28 = vld [vmem:[%s5656_s15 + $0x58] sm:$0xff]  ;;  %v822_v30 = vld [vmem:[%s5656_s15 + $0x68] sm:$0xff]  ;;  %p5041_p9 = pnand %p5040_p5, %p7326_p7 }
 0x165   : > { %v4463_v31 = vld [vmem:[#allocation8 + $0x20] sm:$0xff]   ;;  %v830_v32 = vpack.c.bf16 %v820_v28, %v819_v27  ;;  %v4464_v33 = vld [vmem:[#allocation8 + $0x28] sm:$0xff]   ;;  %v831_v34 = vpack.c.bf16 %v822_v30, %v821_v29  ;;  %v823_v35 = vld [vmem:[%s5656_s15 + $0x70] sm:$0xff] }
 0x166   : > { %4119 = vmatpush3.bf16.msra.mxu1 %v4453_v2  ;;  %v824_v36 = vld [vmem:[%s5656_s15 + $0x78] sm:$0xff]  ;;  %v4465_v38 = vld [vmem:[#allocation8 + $0x30] sm:$0xff]   ;;  %v4467_v40 = vld [vmem:[#allocation10] sm:$0xff]   ;;  %p5042_p8 = pneg %p5041_p9 }
 0x167   : > { %4120 = vmatprep.subr.bf16.mxu1 %v4454_v3  ;;  %v832_v37 = vpack.c.bf16 %v824_v36, %v823_v35  ;;  %v4466_v39 = vld [vmem:[#allocation8 + $0x38] sm:$0xff]   ;;  %v4468_v41 = vld [vmem:[#allocation10 + $0x8] sm:$0xff]   ;;  %4178 = vmatprep.subr.bf16.mxu0 %v4467_v40  ;;  %v4469_v42 = vld [vmem:[#allocation10 + $0x10] sm:$0xff]  }
 0x168   : > { %4179 = vmatpush3.bf16.msra.mxu0 %v4467_v40  ;;  %v4470_v43 = vld [vmem:[#allocation10 + $0x18] sm:$0xff]   ;;  %v4471_v44 = vld [vmem:[#allocation10 + $0x20] sm:$0xff]   ;;  %v4472_v45 = vld [vmem:[#allocation10 + $0x28] sm:$0xff]  }
 0x169   : > { %4180 = vmatprep.subr.bf16.mxu0 %v4468_v41  ;;  %v3824_v46 = vld [vmem:[%s7317_s3] ss:$0 sm:$0xff]  ;;  %v4474_v40 = vld [vmem:[#allocation10 + $0x38] sm:$0xff]   ;;  %s7321_s3 = sld [smem:[#allocation43_spill]] }
 0x16a   : > { %4121 = vmatpush3.bf16.msra.mxu1 %v4454_v3 }
 0x16b   : > { %4122 = vmatprep.subr.bf16.mxu1 %v4455_v7 }
 0x16c   : > { %4181 = vmatpush3.bf16.msra.mxu0 %v4468_v41  ;;  %v4475_v41 = vld [vmem:[#allocation11] ss:$8 sps:$4 sm:$0xff]  }
 0x16d   : > { %4182 = vmatprep.subr.bf16.mxu0 %v4469_v42 }
 0x16e   : > { %4123 = vmatpush3.bf16.msra.mxu1 %v4455_v7 }
 0x16f   : > { %4124 = vmatprep.subr.bf16.mxu1 %v4456_v8 }
 0x170   : > { %4183 = vmatpush3.bf16.msra.mxu0 %v4469_v42  ;;  %v4477_v42 = vld [vmem:[#allocation11 + $0x4] ss:$8 sps:$4 sm:$0xff]  }
 0x171   : > { %4184 = vmatprep.subr.bf16.mxu0 %v4470_v43 }
 0x172   : > { %4125 = vmatpush3.bf16.msra.mxu1 %v4456_v8 }
 0x173   : > { %4126 = vmatprep.subr.bf16.mxu1 %v4457_v9 }
 0x174   : > { %4185 = vmatpush3.bf16.msra.mxu0 %v4470_v43  ;;  %v4480_v43 = vld [vmem:[#allocation11 + $0x14] ss:$8 sps:$4 sm:$0xff]  }
 0x175   : > { %4186 = vmatprep.subr.bf16.mxu0 %v4471_v44 }
 0x176   : > { %4127 = vmatpush3.bf16.msra.mxu1 %v4457_v9 }
 0x177   : > { %4128 = vmatprep.subr.bf16.mxu1 %v4458_v10 }
 0x178   : > { %4187 = vmatpush3.bf16.msra.mxu0 %v4471_v44  ;;  %v4478_v44 = vld [vmem:[#allocation11 + $0x10] ss:$8 sps:$4 sm:$0xff]  }
 0x179   : > { %4188 = vmatprep.subr.bf16.mxu0 %v4472_v45 }
 0x17a   : > { %4129 = vmatpush3.bf16.msra.mxu1 %v4458_v10 }
 0x17b   : > { %4146 = vmatprep.subr.bf16.mxu1 %v4459_v15 }
 0x17c   : > { %4189 = vmatpush3.bf16.msra.mxu0 %v4472_v45  ;;  %v4483_v45 = vld [vmem:[#allocation11 + $0x24] ss:$8 sps:$4 sm:$0xff]  }
 0x17d   : > { %4131 = vmatmul.mubr.bf16.vlgmr.msra.gmra.mrb[0].mxu1 %v826_v16 }
 0x17e   : > { %4134 = vmatprep.mubr.bf16.mxu1 %v827_v18  ;;  %4147 = vmatpush3.bf16.msra.mxu1 %v4459_v15 }
 0x17f   : > { %4148 = vmatprep.subr.bf16.mxu1 %v4460_v17 }
 0x182   : > { %4149 = vmatpush3.bf16.msra.mxu1 %v4460_v17 }
 0x183   : > { %4150 = vmatprep.subr.bf16.mxu1 %v4461_v23 }
 0x185   : > { %4135 = vmatmul.mubr.bf16.gmra.mrb[4].mxu1 %v828_v24 }
 0x186   : > { %4138 = vmatprep.mubr.bf16.mxu1 %v829_v26  ;;  %4151 = vmatpush3.bf16.msra.mxu1 %v4461_v23 }
 0x187   : > { %4152 = vmatprep.subr.bf16.mxu1 %v4462_v25 }
 0x18a   : > { %4153 = vmatpush3.bf16.msra.mxu1 %v4462_v25 }
 0x18b   : > { %4154 = vmatprep.subr.bf16.mxu1 %v4463_v31 }
 0x18d   : > { %4139 = vmatmul.mubr.bf16.gmra.mrb[8].mxu1 %v830_v32 }
 0x18e   : > { %4142 = vmatprep.mubr.bf16.mxu1 %v831_v34  ;;  %4155 = vmatpush3.bf16.msra.mxu1 %v4463_v31 }
 0x18f   : > { %4156 = vmatprep.subr.bf16.mxu1 %v4464_v33 }
 0x192   : > { %4157 = vmatpush3.bf16.msra.mxu1 %v4464_v33 }
 0x193   : > { %4158 = vmatprep.subr.bf16.mxu1 %v4465_v38 }
 0x195   : > { %4143 = vmatmul.mubr.bf16.gmra.mrb[12].mxu1 %v832_v37 }
 0x196   : > { %4159 = vmatpush3.bf16.msra.mxu1 %v4465_v38 }
 0x197   : > { %4160 = vmatprep.subr.bf16.mxu1 %v4466_v39 }
 0x19a   : > { %4161 = vmatpush3.bf16.msra.mxu1 %v4466_v39  ;;  %v4473_v39 = vld [vmem:[#allocation10 + $0x30] sm:$0xff]  }
 0x19b   : > { %4190 = vmatprep.subr.bf16.mxu0 %v4473_v39  ;;  %1517 = vmatprep.subr.bf16.mxu1 %v4477_v42 }
 0x19c   : > { %4191 = vmatpush3.bf16.msra.mxu0 %v4473_v39 }
 0x19d   : > { %4192 = vmatprep.subr.bf16.mxu0 %v4474_v40 }
 0x1a0   : > { %4193 = vmatpush3.bf16.msra.mxu0 %v4474_v40 }
 0x250   : > { %v4132_v47 = vpop.f32.mrb[0].mxu1 }
 0x251   : > { %v947_v48 = vadd.f32 %v4132_v47, %v3824_v46  ;;  %v938_v49 = vpop.f32.mrb[1].mxu1  ;;  %v4486_v47 = vld [vmem:[#allocation11 + $0x34] ss:$8 sps:$4 sm:$0xff]  }
 0x252   : > { %v939_v50 = vadd.f32 %v3824_v46, %v938_v49  ;;  %v4133_v51 = vpop.f32.mrb[2].mxu1  ;;  %v4489_v49 = vld [vmem:[#allocation11 + $0x44] ss:$8 sps:$4 sm:$0xff]  }
 0x253   : > { %v950_v52 = vadd.f32 %v4133_v51, %v3824_v46  ;;  %v941_v53 = vpop.f32.mrb[3].mxu1  ;;  %v1003_v55 = vmax.f32 %v947_v48, 0.0  ;;  %v4484_v48 = vld [vmem:[#allocation11 + $0x30] ss:$8 sps:$4 sm:$0xff]   ;;  %v4492_v51 = vld [vmem:[#allocation11 + $0x54] ss:$8 sps:$4 sm:$0xff]  }
 0x254   : > { %v942_v54 = vadd.f32 %v3824_v46, %v941_v53  ;;  %v1001_v57 = vmax.f32 %v939_v50, 0.0  ;;  %v4487_v50 = vld [vmem:[#allocation11 + $0x40] ss:$8 sps:$4 sm:$0xff]  }
 0x255   : > { %v1004_v56 = vmax.f32 %v950_v52, 0.0  ;;  %v4490_v52 = vld [vmem:[#allocation11 + $0x50] ss:$8 sps:$4 sm:$0xff]   ;;  %v3833_v53 = vld [vmem:[%s7233_s5] ss:$0 sm:$0xff] }
 0x256   : > { %v1002_v58 = vmax.f32 %v942_v54, 0.0 }
 0x257   : > { %v1018_v59 = vpack.c.bf16 %v1004_v56, %v1003_v55 }
 0x258   : > { %v1017_v60 = vpack.c.bf16 %v1002_v58, %v1001_v57  ;;  %v4136_v61 = vpop.f32.mrb[4].mxu1 }
 0x259   : > { %v963_v62 = vadd.f32 %v4136_v61, %v3824_v46  ;;  %v954_v63 = vpop.f32.mrb[5].mxu1 }
 0x25a   : > { %v955_v0 = vadd.f32 %v3824_v46, %v954_v63  ;;  %v4137_v1 = vpop.f32.mrb[6].mxu1  ;;  %4162 = vmatprep.mubr.bf16.mxu1 %v1017_v60 }
 0x25b   : > { %v1007_v2 = vmax.f32 %v963_v62, 0.0  ;;  %v966_v3 = vadd.f32 %v4137_v1, %v3824_v46  ;;  %v957_v4 = vpop.f32.mrb[7].mxu1  ;;  %4163 = vmatmul.mubr.bf16.vlgmr.msra.gmra.mrb[16].mxu1 %v1018_v59 }
 0x25c   : > { %v1005_v5 = vmax.f32 %v955_v0, 0.0  ;;  %v958_v6 = vadd.f32 %v3824_v46, %v957_v4  ;;  %1518 = vmatpush1.bf16.msra.mxu1 %v4475_v41 }
 0x25d   : > { %v1008_v7 = vmax.f32 %v966_v3, 0.0  ;;  %1519 = vmatprep.subr.bf16.mxu1 %v4480_v43 }
 0x25e   : > { %v1006_v8 = vmax.f32 %v958_v6, 0.0 }
 0x25f   : > { %v1020_v9 = vpack.c.bf16 %v1008_v7, %v1007_v2 }
 0x260   : > { %v1019_v10 = vpack.c.bf16 %v1006_v8, %v1005_v5  ;;  %v4140_v11 = vpop.f32.mrb[8].mxu1  ;;  %1520 = vmatpush1.bf16.msra.mxu1 %v4478_v44 }
 0x261   : > { %v979_v12 = vadd.f32 %v4140_v11, %v3824_v46  ;;  %v970_v13 = vpop.f32.mrb[9].mxu1  ;;  %1521 = vmatprep.subr.bf16.mxu1 %v4483_v45 }
 0x262   : > { %4166 = vmatprep.mubr.bf16.mxu1 %v1019_v10  ;;  %v971_v14 = vadd.f32 %v3824_v46, %v970_v13  ;;  %v4141_v15 = vpop.f32.mrb[10].mxu1 }
 0x263   : > { %4167 = vmatmul.mubr.bf16.gmra.mrb[20].mxu1 %v1020_v9  ;;  %v1011_v16 = vmax.f32 %v979_v12, 0.0  ;;  %v982_v17 = vadd.f32 %v4141_v15, %v3824_v46  ;;  %v973_v18 = vpop.f32.mrb[11].mxu1 }
 0x264   : > { %v1009_v19 = vmax.f32 %v971_v14, 0.0  ;;  %v974_v20 = vadd.f32 %v3824_v46, %v973_v18 }
 0x265   : > { %v1012_v21 = vmax.f32 %v982_v17, 0.0 }
 0x266   : > { %v1010_v22 = vmax.f32 %v974_v20, 0.0 }
 0x267   : > { %v1022_v23 = vpack.c.bf16 %v1012_v21, %v1011_v16 }
 0x268   : > { %v1021_v24 = vpack.c.bf16 %v1010_v22, %v1009_v19  ;;  %v4144_v25 = vpop.f32.mrb[12].mxu1 }
 0x269   : > { %v995_v26 = vadd.f32 %v4144_v25, %v3824_v46  ;;  %v986_v27 = vpop.f32.mrb[13].mxu1 }
 0x26a   : > { %4170 = vmatprep.mubr.bf16.mxu1 %v1021_v24  ;;  %v987_v28 = vadd.f32 %v3824_v46, %v986_v27  ;;  %v4145_v29 = vpop.f32.mrb[14].mxu1 }
 0x26b   : > { %4171 = vmatmul.mubr.bf16.gmra.mrb[24].mxu1 %v1022_v23  ;;  %v1015_v30 = vmax.f32 %v995_v26, 0.0  ;;  %v998_v31 = vadd.f32 %v4145_v29, %v3824_v46  ;;  %v989_v32 = vpop.f32.mrb[15].mxu1 }
 0x26c   : > { %v1013_v33 = vmax.f32 %v987_v28, 0.0  ;;  %v990_v34 = vadd.f32 %v3824_v46, %v989_v32  ;;  %v4481_v46 = vld [vmem:[#allocation11 + $0x20] ss:$8 sps:$4 sm:$0xff]  }
 0x26d   : > { %v1016_v35 = vmax.f32 %v998_v31, 0.0  ;;  %1522 = vmatpush1.bf16.msra.mxu1 %v4481_v46  ;;  %v4495_v46 = vld [vmem:[#allocation11 + $0x64] ss:$8 sps:$4 sm:$0xff]  }
 0x26e   : > { %v1014_v36 = vmax.f32 %v990_v34, 0.0  ;;  %1523 = vmatprep.subr.bf16.mxu1 %v4486_v47  ;;  %v4493_v47 = vld [vmem:[#allocation11 + $0x60] ss:$8 sps:$4 sm:$0xff]  }
 0x26f   : > { %v1024_v37 = vpack.c.bf16 %v1016_v35, %v1015_v30 }
 0x270   : > { %v1023_v38 = vpack.c.bf16 %v1014_v36, %v1013_v33 }
 0x271   : > { %1524 = vmatpush1.bf16.msra.mxu1 %v4484_v48  ;;  %v4498_v48 = vld [vmem:[#allocation11 + $0x74] ss:$8 sps:$4 sm:$0xff]  }
 0x272   : > { %4174 = vmatprep.mubr.bf16.mxu1 %v1023_v38  ;;  %1525 = vmatprep.subr.bf16.mxu1 %v4489_v49  ;;  %v4496_v49 = vld [vmem:[#allocation11 + $0x70] ss:$8 sps:$4 sm:$0xff]  }
 0x273   : > { %4175 = vmatmul.mubr.bf16.gmra.mrb[28].mxu1 %v1024_v37 }
 0x275   : > { %1526 = vmatpush1.bf16.msra.mxu1 %v4487_v50  ;;  %v5177_v50 = vmov 0  }
 0x276   : > { %1527 = vmatprep.subr.bf16.mxu1 %v4492_v51  ;;  %1549 = vmatprep.mubr.bf16.mxu1 %v5177_v50  ;;  %v3842_v51 = vld [vmem:[%s7318_s12] ss:$0 sm:$0xff] }
 0x279   : > { %1528 = vmatpush1.bf16.msra.mxu1 %v4490_v52 }
 0x27a   : > { %1529 = vmatprep.subr.bf16.mxu1 %v4495_v46  ;;  %v4501_v46 = vld [vmem:[#allocation13 + $0x10] sm:$0xff]  }
 0x27d   : > { %1530 = vmatpush1.bf16.msra.mxu1 %v4493_v47  ;;  %v1427_v47 = vlaneseq }
 0x27e   : > { %1531 = vmatprep.subr.bf16.mxu1 %v4498_v48 }
 0x27f   : > { %v5715_v48 = vshrl.u32 %v1427_v47, 7 }
 0x281   : > { %1532 = vmatpush1.bf16.msra.mxu1 %v4496_v49  ;;  %v1429_v49 = vsub.s32 0, %v5715_v48 }
 0x32e   : > { %v4164_v54 = vpop.f32.mrb[16].mxu1 }
 0x32f   : > { %v1139_v55 = vadd.f32 %v4164_v54, %v3833_v53  ;;  %v1130_v56 = vpop.f32.mrb[17].mxu1 }
 0x330   : > { %v1131_v57 = vadd.f32 %v3833_v53, %v1130_v56  ;;  %v4165_v58 = vpop.f32.mrb[18].mxu1 }
 0x331   : > { %v1142_v59 = vadd.f32 %v4165_v58, %v3833_v53  ;;  %v1133_v60 = vpop.f32.mrb[19].mxu1  ;;  %v1195_v62 = vmax.f32 %v1139_v55, 0.0 }
 0x332   : > { %v1134_v61 = vadd.f32 %v3833_v53, %v1133_v60  ;;  %v1193_v0 = vmax.f32 %v1131_v57, 0.0 }
 0x333   : > { %v1196_v63 = vmax.f32 %v1142_v59, 0.0 }
 0x334   : > { %v1194_v1 = vmax.f32 %v1134_v61, 0.0 }
 0x335   : > { %v1210_v2 = vpack.c.bf16 %v1196_v63, %v1195_v62 }
 0x336   : > { %v4168_v3 = vpop.f32.mrb[20].mxu1  ;;  %v1209_v4 = vpack.c.bf16 %v1194_v1, %v1193_v0 }
 0x337   : > { %v1155_v5 = vadd.f32 %v4168_v3, %v3833_v53  ;;  %v1146_v6 = vpop.f32.mrb[21].mxu1 }
 0x338   : > { %v1147_v7 = vadd.f32 %v3833_v53, %v1146_v6  ;;  %v4169_v8 = vpop.f32.mrb[22].mxu1  ;;  %4194 = vmatprep.mubr.bf16.mxu0 %v1209_v4 }
 0x339   : > { %v1199_v9 = vmax.f32 %v1155_v5, 0.0  ;;  %v1158_v10 = vadd.f32 %v4169_v8, %v3833_v53  ;;  %v1149_v11 = vpop.f32.mrb[23].mxu1  ;;  %4195 = vmatmul.mubr.bf16.vlgmr.msra.gmra.mrb[0].mxu0 %v1210_v2 }
 0x33a   : > { %v1197_v12 = vmax.f32 %v1147_v7, 0.0  ;;  %v1150_v13 = vadd.f32 %v3833_v53, %v1149_v11 }
 0x33b   : > { %v1200_v14 = vmax.f32 %v1158_v10, 0.0 }
 0x33c   : > { %v1198_v15 = vmax.f32 %v1150_v13, 0.0 }
 0x33d   : > { %v1212_v16 = vpack.c.bf16 %v1200_v14, %v1199_v9 }
 0x33e   : > { %v1211_v17 = vpack.c.bf16 %v1198_v15, %v1197_v12  ;;  %v4172_v18 = vpop.f32.mrb[24].mxu1 }
 0x33f   : > { %v1171_v19 = vadd.f32 %v4172_v18, %v3833_v53  ;;  %v1162_v20 = vpop.f32.mrb[25].mxu1 }
 0x340   : > { %4198 = vmatprep.mubr.bf16.mxu0 %v1211_v17  ;;  %v1163_v21 = vadd.f32 %v3833_v53, %v1162_v20  ;;  %v4173_v22 = vpop.f32.mrb[26].mxu1 }
 0x341   : > { %4199 = vmatmul.mubr.bf16.gmra.mrb[4].mxu0 %v1212_v16  ;;  %v1203_v23 = vmax.f32 %v1171_v19, 0.0  ;;  %v1174_v24 = vadd.f32 %v4173_v22, %v3833_v53  ;;  %v1165_v25 = vpop.f32.mrb[27].mxu1 }
 0x342   : > { %v1201_v26 = vmax.f32 %v1163_v21, 0.0  ;;  %v1166_v27 = vadd.f32 %v3833_v53, %v1165_v25 }
 0x343   : > { %v1204_v28 = vmax.f32 %v1174_v24, 0.0 }
 0x344   : > { %v1202_v29 = vmax.f32 %v1166_v27, 0.0 }
 0x345   : > { %v1214_v30 = vpack.c.bf16 %v1204_v28, %v1203_v23 }
 0x346   : > { %v1213_v31 = vpack.c.bf16 %v1202_v29, %v1201_v26  ;;  %v4176_v32 = vpop.f32.mrb[28].mxu1 }
 0x347   : > { %v1187_v33 = vadd.f32 %v4176_v32, %v3833_v53  ;;  %v1178_v34 = vpop.f32.mrb[29].mxu1 }
 0x348   : > { %4202 = vmatprep.mubr.bf16.mxu0 %v1213_v31  ;;  %v1179_v35 = vadd.f32 %v3833_v53, %v1178_v34  ;;  %v4177_v36 = vpop.f32.mrb[30].mxu1 }
 0x349   : > { %4203 = vmatmul.mubr.bf16.gmra.mrb[8].mxu0 %v1214_v30  ;;  %v1207_v37 = vmax.f32 %v1187_v33, 0.0  ;;  %v1190_v38 = vadd.f32 %v4177_v36, %v3833_v53  ;;  %v1181_v39 = vpop.f32.mrb[31].mxu1 }
 0x34a   : > { %v1205_v40 = vmax.f32 %v1179_v35, 0.0  ;;  %v1182_v41 = vadd.f32 %v3833_v53, %v1181_v39 }
 0x34b   : > { %v1208_v42 = vmax.f32 %v1190_v38, 0.0 }
 0x34c   : > { %v1206_v43 = vmax.f32 %v1182_v41, 0.0 }
 0x34d   : > { %v1216_v44 = vpack.c.bf16 %v1208_v42, %v1207_v37 }
 0x34e   : > { %v1215_v45 = vpack.c.bf16 %v1206_v43, %v1205_v40 }
 0x350   : > { %4206 = vmatprep.mubr.bf16.mxu0 %v1215_v45  ;;  %v4500_v45 = vld [vmem:[#allocation13 + $0x8] sm:$0xff]  }
 0x351   : > { %4207 = vmatmul.mubr.bf16.gmra.mrb[12].mxu0 %v1216_v44  ;;  %v4499_v44 = vld [vmem:[#allocation13] sm:$0xff]  }
 0x352   : > { %4210 = vmatprep.subr.bf16.mxu0 %v4499_v44 }
 0x353   : > { %4211 = vmatpush3.bf16.msra.mxu0 %v4499_v44 }
 0x354   : > { %4212 = vmatprep.subr.bf16.mxu0 %v4500_v45 }
 0x357   : > { %4213 = vmatpush3.bf16.msra.mxu0 %v4500_v45 }
 0x358   : > { %4214 = vmatprep.subr.bf16.mxu0 %v4501_v46 }
 0x35b   : > { %4215 = vmatpush3.bf16.msra.mxu0 %v4501_v46 }
 0x40c   : > { %v4196_v52 = vpop.f32.mrb[0].mxu0 }
 0x40d   : > { %v1331_v53 = vadd.f32 %v4196_v52, %v3842_v51  ;;  %v1322_v54 = vpop.f32.mrb[1].mxu0  ;;  %v4502_v52 = vld [vmem:[#allocation13 + $0x18] sm:$0xff]  }
 0x40e   : > { %v1323_v55 = vadd.f32 %v3842_v51, %v1322_v54  ;;  %v4197_v56 = vpop.f32.mrb[2].mxu0  ;;  %4216 = vmatprep.subr.bf16.mxu0 %v4502_v52 }
 0x40f   : > { %v1334_v57 = vadd.f32 %v4197_v56, %v3842_v51  ;;  %v1325_v58 = vpop.f32.mrb[3].mxu0  ;;  %v1387_v60 = vmax.f32 %v1331_v53, 0.0  ;;  %4217 = vmatpush3.bf16.msra.mxu0 %v4502_v52 }
 0x410   : > { %v1326_v59 = vadd.f32 %v3842_v51, %v1325_v58  ;;  %v1385_v62 = vmax.f32 %v1323_v55, 0.0  ;;  %v4503_v55 = vld [vmem:[#allocation13 + $0x20] sm:$0xff]  }
 0x411   : > { %v1388_v61 = vmax.f32 %v1334_v57, 0.0  ;;  %4218 = vmatprep.subr.bf16.mxu0 %v4503_v55 }
 0x412   : > { %v1386_v63 = vmax.f32 %v1326_v59, 0.0 }
 0x413   : > { %v1402_v0 = vpack.c.bf16 %v1388_v61, %v1387_v60  ;;  %4219 = vmatpush3.bf16.msra.mxu0 %v4503_v55 }
 0x414   : > { %v1401_v1 = vpack.c.bf16 %v1386_v63, %v1385_v62  ;;  %v4200_v2 = vpop.f32.mrb[4].mxu0  ;;  %v4504_v62 = vld [vmem:[#allocation13 + $0x28] sm:$0xff]  }
 0x415   : > { %v1347_v3 = vadd.f32 %v4200_v2, %v3842_v51  ;;  %v1338_v4 = vpop.f32.mrb[5].mxu0  ;;  %4220 = vmatprep.subr.bf16.mxu0 %v4504_v62 }
 0x416   : > { %v1339_v5 = vadd.f32 %v3842_v51, %v1338_v4  ;;  %v4201_v6 = vpop.f32.mrb[6].mxu0  ;;  %1550 = vmatmul.mubr.bf16.vlgmr.msra.gmra.mrb[32].mxu1 %v1401_v1 }
 0x417   : > { %v1350_v7 = vadd.f32 %v4201_v6, %v3842_v51  ;;  %v1341_v8 = vpop.f32.mrb[7].mxu0  ;;  %1559 = vmatprep.mubr.bf16.mxu1 %v5177_v50  ;;  %v1391_v10 = vmax.f32 %v1347_v3, 0.0  ;;  %4221 = vmatpush3.bf16.msra.mxu0 %v4504_v62 }
 0x418   : > { %v1342_v9 = vadd.f32 %v3842_v51, %v1341_v8  ;;  %v1389_v12 = vmax.f32 %v1339_v5, 0.0  ;;  %v4505_v5 = vld [vmem:[#allocation13 + $0x30] sm:$0xff]  }
 0x419   : > { %v1392_v11 = vmax.f32 %v1350_v7, 0.0  ;;  %4222 = vmatprep.subr.bf16.mxu0 %v4505_v5 }
 0x41a   : > { %v1390_v13 = vmax.f32 %v1342_v9, 0.0 }
 0x41b   : > { %v1404_v14 = vpack.c.bf16 %v1392_v11, %v1391_v10  ;;  %4223 = vmatpush3.bf16.msra.mxu0 %v4505_v5  ;;  %v4506_v11 = vld [vmem:[#allocation13 + $0x38] sm:$0xff]  }
 0x41c   : > { %v1403_v15 = vpack.c.bf16 %v1390_v13, %v1389_v12  ;;  %v4204_v16 = vpop.f32.mrb[8].mxu0  ;;  %4224 = vmatprep.subr.bf16.mxu0 %v4506_v11 }
 0x41d   : > { %v1363_v17 = vadd.f32 %v4204_v16, %v3842_v51  ;;  %v1354_v18 = vpop.f32.mrb[9].mxu0 }
 0x41e   : > { %1560 = vmatmul.mubr.bf16.gmra.mrb[36].mxu1 %v1402_v0  ;;  %v1355_v19 = vadd.f32 %v3842_v51, %v1354_v18  ;;  %v4205_v20 = vpop.f32.mrb[10].mxu0 }
 0x41f   : > { %v1395_v21 = vmax.f32 %v1363_v17, 0.0  ;;  %v1366_v22 = vadd.f32 %v4205_v20, %v3842_v51  ;;  %v1357_v23 = vpop.f32.mrb[11].mxu0  ;;  %1569 = vmatprep.mubr.bf16.mxu1 %v5177_v50  ;;  %4225 = vmatpush3.bf16.msra.mxu0 %v4506_v11  ;;  %v5178_v20 = vmov 0.0  }
 0x420   : > { %v1393_v24 = vmax.f32 %v1355_v19, 0.0  ;;  %v1358_v25 = vadd.f32 %v3842_v51, %v1357_v23 }
 0x421   : > { %v1396_v26 = vmax.f32 %v1366_v22, 0.0 }
 0x422   : > { %v1394_v27 = vmax.f32 %v1358_v25, 0.0 }
 0x423   : > { %v1406_v28 = vpack.c.bf16 %v1396_v26, %v1395_v21 }
 0x424   : > { %v1405_v29 = vpack.c.bf16 %v1394_v27, %v1393_v24  ;;  %v4208_v30 = vpop.f32.mrb[12].mxu0 }
 0x425   : > { %v1379_v31 = vadd.f32 %v4208_v30, %v3842_v51  ;;  %v1370_v32 = vpop.f32.mrb[13].mxu0  ;;  %v7265_v30 = vsub.s32 1, %v5715_v48 }
 0x426   : > { %1570 = vmatmul.mubr.bf16.gmra.mrb[40].mxu1 %v1403_v15  ;;  %v1371_v33 = vadd.f32 %v3842_v51, %v1370_v32  ;;  %v4209_v34 = vpop.f32.mrb[14].mxu0 }
 0x427   : > { %1579 = vmatprep.mubr.bf16.mxu1 %v5177_v50  ;;  %v1399_v35 = vmax.f32 %v1379_v31, 0.0  ;;  %v1382_v36 = vadd.f32 %v4209_v34, %v3842_v51  ;;  %v1373_v37 = vpop.f32.mrb[15].mxu0 }
 0x428   : > { %v1397_v38 = vmax.f32 %v1371_v33, 0.0  ;;  %v1374_v39 = vadd.f32 %v3842_v51, %v1373_v37  ;;  %v5721_v51 = vld [vmem:[%s7319_s1] sm:$0x3] }
 0x429   : > { %v1400_v40 = vmax.f32 %v1382_v36, 0.0  ;;  %v5726_v53 = vrot.slane %v5721_v51, %v1429_v49  ;;  %v5810_v52 = vrot.slane %v5721_v51, %v7265_v30 }
 0x42a   : > { %v1398_v41 = vmax.f32 %v1374_v39, 0.0 }
 0x42b   : > { %v1408_v42 = vpack.c.bf16 %v1400_v40, %v1399_v35 }
 0x42c   : > { %v1407_v43 = vpack.c.bf16 %v1398_v41, %v1397_v38 }
 0x42e   : > { %1580 = vmatmul.mubr.bf16.gmra.mrb[44].mxu1 %v1404_v14 }
 0x42f   : > { %1589 = vmatprep.mubr.bf16.mxu1 %v5177_v50 }
 0x436   : > { %1590 = vmatmul.mubr.bf16.gmra.mrb[48].mxu1 %v1405_v29 }
 0x437   : > { %1599 = vmatprep.mubr.bf16.mxu1 %v5177_v50 }
 0x43e   : > { %1600 = vmatmul.mubr.bf16.gmra.mrb[52].mxu1 %v1406_v28 }
 0x43f   : > { %1609 = vmatprep.mubr.bf16.mxu1 %v5177_v50 }
 0x446   : > { %1610 = vmatmul.mubr.bf16.gmra.mrb[56].mxu1 %v1407_v43 }
 0x447   : > { %1619 = vmatprep.mubr.bf16.mxu1 %v5177_v50 }
 0x44e   : > { %1620 = vmatmul.mubr.bf16.gmra.mrb[60].mxu1 %v1408_v42 }
 0x4e9   : > { %v1551_v54 = vpop.f32.mrb[32].mxu1 }
 0x4ea   : > { %v1552_v56 = vadd.f32 %v1551_v54, %v5726_v53  ;;  %v5729_v57 = vpop.f32.mrb[33].mxu1 }
 0x4eb   : > { %v1555_v58 = vpop.f32.mrb[34].mxu1 }
 0x4ec   : > { %v5731_v59 = vmul.f32 0.2, %v1552_v56  ;;  %v1556_v60 = vadd.f32 %v1555_v58, %v5726_v53  ;;  %v5734_v61 = vpop.f32.mrb[35].mxu1 }
 0x4ee   : > { %v5737_v63 = vand.u32 2147483647, %v5731_v59  ;;  %v5739_v0 = vmul.f32 0.2, %v1556_v60  ;;  %vm2046_vm9 = vcmp.lt.f32.partialorder %v5731_v59, 0.0 }
 0x4f0   : > { %v1694_v1 = vmax.f32 %v5737_v63, 1e-30  ;;  %v1758_v2 = vadd.f32 1.0, %v5737_v63  ;;  %v5744_v3 = vand.u32 2147483647, %v5739_v0  ;;  %v3867_v25 = vadd.f32 -1.0, %v5737_v63 }
 0x4f1   : > { %v1561_v4 = vpop.f32.mrb[36].mxu1  ;;  %vm1678_vm0 = vcmp.gt.f32.partialorder %v5737_v63, 0.41421357  ;;  %vm1662_vm1 = vcmp.gt.f32.partialorder %v5737_v63, 2.4142137  ;;  %vm2047_vm13 = vcmp.lt.f32.partialorder %v5739_v0, 0.0 }
 0x4f2   : > { %4547 = vrcp.f32 %v1694_v1  ;;  %v1695_v6 = vmax.f32 %v5744_v3, 1e-30  ;;  %v1759_v7 = vadd.f32 1.0, %v5744_v3  ;;  %v1562_v8 = vadd.f32 %v1561_v4, %v5726_v53  ;;  %v5749_v9 = vpop.f32.mrb[37].mxu1 }
 0x4f3   : > { %4549 = vrcp.f32 %v1758_v2  ;;  %v1565_v10 = vpop.f32.mrb[38].mxu1  ;;  %v1838_v21 = vsel %vm1678_vm0, 0.7853982, %v5178_v20  ;;  %vm1679_vm2 = vcmp.gt.f32.partialorder %v5744_v3, 0.41421357  ;;  %v3868_v38 = vadd.f32 -1.0, %v5744_v3 }
 0x4f4   : > { %4551 = vrcp.f32 %v1695_v6  ;;  %v5751_v12 = vmul.f32 0.2, %v1562_v8  ;;  %v1566_v13 = vadd.f32 %v1565_v10, %v5726_v53  ;;  %v5754_v14 = vpop.f32.mrb[39].mxu1  ;;  %v5781_v33 = vsel %vm1662_vm1, 1.5707964, %v1838_v21 }
 0x4f5   : > { %4553 = vrcp.f32 %v1759_v7  ;;  %vm1663_vm3 = vcmp.gt.f32.partialorder %v5744_v3, 2.4142137  ;;  %v1839_v43 = vsel %vm1679_vm2, 0.7853982, %v5178_v20 }
 0x4f6   : > { %v5758_v15 = vand.u32 2147483647, %v5751_v12  ;;  %v5760_v16 = vmul.f32 0.2, %v1566_v13  ;;  %vm2048_vm14 = vcmp.lt.f32.partialorder %v5751_v12, 0.0 }
 0x4f8   : > { %v1696_v18 = vmax.f32 %v5758_v15, 1e-30  ;;  %v1760_v22 = vadd.f32 1.0, %v5758_v15  ;;  %v5770_v23 = vand.u32 2147483647, %v5760_v16  ;;  %v3869_v1 = vadd.f32 -1.0, %v5758_v15 }
 0x4f9   : > { %v1571_v17 = vpop.f32.mrb[40].mxu1  ;;  %vm1664_vm4 = vcmp.gt.f32.partialorder %v5758_v15, 2.4142137  ;;  %vm1680_vm5 = vcmp.gt.f32.partialorder %v5758_v15, 0.41421357  ;;  %vm2049_vm15 = vcmp.lt.f32.partialorder %v5760_v16, 0.0 }
 0x4fa   : > { %v1572_v19 = vadd.f32 %v1571_v17, %v5726_v53  ;;  %4555 = vrcp.f32 %v1696_v18  ;;  %v5775_v27 = vpop.f32.mrb[41].mxu1  ;;  %v1697_v34 = vmax.f32 %v5770_v23, 1e-30  ;;  %v1761_v35 = vadd.f32 1.0, %v5770_v23 }
 0x4fb   : > { %4557 = vrcp.f32 %v1760_v22  ;;  %v1575_v31 = vpop.f32.mrb[42].mxu1  ;;  %vm1681_vm6 = vcmp.gt.f32.partialorder %v5770_v23, 0.41421357  ;;  %v1840_v5 = vsel %vm1680_vm5, 0.7853982, %v5178_v20 }
 0x4fc   : > { %v4548_v24 = vpop.eup %4547  ;;  %v5773_v26 = vmul.f32 0.2, %v1572_v19  ;;  %v5785_v36 = vpop.f32.mrb[43].mxu1  ;;  %4559 = vrcp.f32 %v1697_v34  ;;  %v1576_v60 = vadd.f32 %v1575_v31, %v5726_v53  ;;  %vm1665_vm7 = vcmp.gt.f32.partialorder %v5770_v23, 2.4142137 }
 0x4fd   : > { %v4550_v28 = vpop.eup %4549  ;;  %v1711_v29 = vmul.f32 -1.0, %v4548_v24  ;;  %4561 = vrcp.f32 %v1761_v35  ;;  %v1841_v10 = vsel %vm1681_vm6, 0.7853982, %v5178_v20  ;;  %v5851_v22 = vsel %vm1663_vm3, 1.5707964, %v1839_v43 }
 0x4fe   : > { %v1775_v32 = vmul.f32 %v4550_v28, %v3867_v25  ;;  %v4552_v37 = vpop.eup %4551  ;;  %v5790_v39 = vand.u32 2147483647, %v5773_v26  ;;  %v5837_v6 = vmul.f32 0.2, %v1576_v60  ;;  %v5855_v25 = vsel %vm1664_vm4, 1.5707964, %v1840_v5 }
 0x4ff   : > { %v4554_v40 = vpop.eup %4553  ;;  %v1713_v42 = vmul.f32 -1.0, %v4552_v37  ;;  %v5859_v28 = vadd.f32 %v5729_v57, %v5810_v52  ;;  %v5863_v31 = vsel %vm1665_vm7, 1.5707964, %v1841_v10  ;;  %v3870_v37 = vadd.f32 -1.0, %v5770_v23 }
 0x500   : > { %v1806_v41 = vsel %vm1678_vm0, %v1775_v32, %v5737_v63  ;;  %v1777_v45 = vmul.f32 %v4554_v40, %v3868_v38  ;;  %v1698_v54 = vmax.f32 %v5790_v39, 1e-30  ;;  %v1762_v58 = vadd.f32 1.0, %v5790_v39 }
 0x501   : > { %v5800_v44 = vsel %vm1662_vm1, %v1711_v29, %v1806_v41  ;;  %v1581_v46 = vpop.f32.mrb[44].mxu1  ;;  %v5846_v19 = vand.u32 2147483647, %v5837_v6  ;;  %vm1666_vm8 = vcmp.gt.f32.partialorder %v5790_v39, 2.4142137  ;;  %v3871_v10 = vadd.f32 -1.0, %v5790_v39 }
 0x502   : > { %v5805_v47 = vmul.f32 %v5800_v44, %v5800_v44  ;;  %v5814_v55 = vpop.f32.mrb[45].mxu1  ;;  %v1807_v56 = vsel %vm1679_vm2, %v1777_v45, %v5744_v3  ;;  %4563 = vrcp.f32 %v1698_v54  ;;  %v1582_v11 = vadd.f32 %v1581_v46, %v5726_v53 }
 0x503   : > { %v1585_v62 = vpop.f32.mrb[46].mxu1  ;;  %v5825_v63 = vsel %vm1663_vm3, %v1713_v42, %v1807_v56  ;;  %4565 = vrcp.f32 %v1762_v58  ;;  %v1699_v38 = vmax.f32 %v5846_v19, 1e-30  ;;  %v1763_v45 = vadd.f32 1.0, %v5846_v19 }
 0x504   : > { %v1886_v51 = vmul.f32 0.080537446, %v5805_v47  ;;  %v5828_v2 = vpop.f32.mrb[47].mxu1  ;;  %v5832_v4 = vmul.f32 %v5825_v63, %v5825_v63  ;;  %v4556_v7 = vpop.eup %4555  ;;  %v5865_v32 = vmul.f32 0.2, %v1582_v11  ;;  %vm2050_vm2 = vcmp.lt.f32.partialorder %v5773_v26, 0.0 }
 0x505   : > { %v4558_v13 = vpop.eup %4557  ;;  %v1715_v18 = vmul.f32 -1.0, %v4556_v7  ;;  %4567 = vrcp.f32 %v1699_v38  ;;  %vm1682_vm10 = vcmp.gt.f32.partialorder %v5790_v39, 0.41421357  ;;  %vm1667_vm11 = vcmp.gt.f32.partialorder %v5846_v19, 2.4142137 }
 0x506   : > { %v3883_v8 = vadd.f32 -0.13877685, %v1886_v51  ;;  %v1887_v17 = vmul.f32 0.080537446, %v5832_v4  ;;  %v1779_v24 = vmul.f32 %v4558_v13, %v3869_v1  ;;  %v4560_v34 = vpop.eup %4559  ;;  %4569 = vrcp.f32 %v1763_v45 }
 0x507   : > { %v4562_v57 = vpop.eup %4561  ;;  %v1717_v43 = vmul.f32 -1.0, %v4560_v34  ;;  %vm1683_vm12 = vcmp.gt.f32.partialorder %v5846_v19, 0.41421357 }
 0x508   : > { %v1918_v21 = vmul.f32 %v3883_v8, %v5805_v47  ;;  %v3884_v29 = vadd.f32 -0.13877685, %v1887_v17  ;;  %v1808_v35 = vsel %vm1680_vm5, %v1779_v24, %v5758_v15  ;;  %v1781_v58 = vmul.f32 %v4562_v57, %v3870_v37 }
 0x509   : > { %v5872_v40 = vpop.f32.mrb[48].mxu1  ;;  %v5877_v42 = vsel %vm1664_vm4, %v1715_v18, %v1808_v35  ;;  %v5891_v15 = vand.u32 2147483647, %v5865_v32  ;;  %vm2051_vm5 = vcmp.lt.f32.partialorder %v5837_v6, 0.0 }
 0x50a   : > { %v1934_v3 = vadd.f32 0.19977711, %v1918_v21  ;;  %v1919_v41 = vmul.f32 %v3884_v29, %v5832_v4  ;;  %v5880_v46 = vpop.f32.mrb[49].mxu1  ;;  %v5885_v56 = vmul.f32 %v5877_v42, %v5877_v42  ;;  %v1809_v8 = vsel %vm1681_vm6, %v1781_v58, %v5770_v23 }
 0x50b   : > { %v5887_v60 = vpop.f32.mrb[50].mxu1  ;;  %v5901_v17 = vsel %vm1665_vm7, %v1717_v43, %v1809_v8  ;;  %v1586_v21 = vadd.f32 %v1585_v62, %v5726_v53  ;;  %v5914_v23 = vadd.f32 %v5734_v61, %v5810_v52  ;;  %v1700_v62 = vmax.f32 %v5891_v15, 1e-30 }
 0x50c   : > { %v1950_v54 = vmul.f32 %v1934_v3, %v5805_v47  ;;  %v1935_v51 = vadd.f32 0.19977711, %v1919_v41  ;;  %v4564_v1 = vpop.eup %4563  ;;  %v1888_v7 = vmul.f32 0.080537446, %v5885_v56  ;;  %v5904_v24 = vpop.f32.mrb[51].mxu1  ;;  %v5909_v3 = vmul.f32 %v5901_v17, %v5901_v17 }
 0x50d   : > { %v4566_v11 = vpop.eup %4565  ;;  %v1719_v18 = vmul.f32 -1.0, %v4564_v1  ;;  %4571 = vrcp.f32 %v1700_v62  ;;  %vm1668_vm0 = vcmp.gt.f32.partialorder %v5891_v15, 2.4142137  ;;  %vm1684_vm1 = vcmp.gt.f32.partialorder %v5891_v15, 0.41421357 }
 0x50e   : > { %v3899_v5 = vadd.f32 -0.3333295, %v1950_v54  ;;  %v1951_v13 = vmul.f32 %v1935_v51, %v5832_v4  ;;  %v3885_v34 = vadd.f32 -0.13877685, %v1888_v7  ;;  %v1783_v35 = vmul.f32 %v4566_v11, %v3871_v10 }
 0x50f   : > { %v1889_v57 = vmul.f32 0.080537446, %v5909_v3  ;;  %v5931_v54 = vmul.f32 0.2, %v1586_v21  ;;  %v3872_v10 = vadd.f32 -1.0, %v5846_v19  ;;  %v1764_v11 = vadd.f32 1.0, %v5891_v15 }
 0x510   : > { %v1982_v29 = vmul.f32 %v3899_v5, %v5805_v47  ;;  %v3900_v37 = vadd.f32 -0.3333295, %v1951_v13  ;;  %v1920_v47 = vmul.f32 %v3885_v34, %v5885_v56  ;;  %v1810_v41 = vsel %vm1682_vm10, %v1783_v35, %v5790_v39 }
 0x511   : > { %v5924_v43 = vpop.f32.mrb[52].mxu1  ;;  %v5929_v61 = vsel %vm1666_vm8, %v1719_v18, %v1810_v41  ;;  %v3886_v5 = vadd.f32 -0.13877685, %v1889_v57  ;;  %v4568_v18 = vpop.eup %4567  ;;  %4573 = vrcp.f32 %v1764_v11  ;;  %vm2052_vm6 = vcmp.lt.f32.partialorder %v5865_v32, 0.0 }
 0x512   : > { %v1998_v38 = vmul.f32 %v1982_v29, %v5800_v44  ;;  %v1983_v45 = vmul.f32 %v3900_v37, %v5832_v4  ;;  %v5933_v58 = vpop.f32.mrb[53].mxu1  ;;  %v1936_v1 = vadd.f32 0.19977711, %v1920_v47  ;;  %v5938_v7 = vmul.f32 %v5929_v61, %v5929_v61  ;;  %v4570_v35 = vpop.eup %4569 }
 0x513   : > { %v5940_v8 = vpop.f32.mrb[54].mxu1  ;;  %v1921_v29 = vmul.f32 %v3886_v5, %v5909_v3  ;;  %v1721_v62 = vmul.f32 -1.0, %v4568_v18  ;;  %v1785_v41 = vmul.f32 %v4570_v35, %v3872_v10  ;;  %v1602_v6 = vadd.f32 %v5924_v43, %v5726_v53 }
 0x514   : > { %v2014_v51 = vadd.f32 %v1998_v38, %v5800_v44  ;;  %v1999_v4 = vmul.f32 %v1983_v45, %v5825_v63  ;;  %v5946_v13 = vpop.f32.mrb[55].mxu1  ;;  %v1952_v21 = vmul.f32 %v1936_v1, %v5885_v56  ;;  %v1890_v34 = vmul.f32 0.080537446, %v5938_v7 }
 0x515   : > { %v1937_v57 = vadd.f32 0.19977711, %v1921_v29  ;;  %v1811_v10 = vsel %vm1683_vm12, %v1785_v41, %v5846_v19  ;;  %v1592_v41 = vadd.f32 %v5872_v40, %v5726_v53 }
 0x516   : > { %v2030_v44 = vadd.f32 %v2014_v51, %v5781_v33  ;;  %v2015_v37 = vadd.f32 %v1999_v4, %v5825_v63  ;;  %v3901_v47 = vadd.f32 -0.3333295, %v1952_v21  ;;  %v3887_v33 = vadd.f32 -0.13877685, %v1890_v34 }
 0x517   : > { %v5957_v51 = vand.u32 2147483647, %v5931_v54  ;;  %v1953_v4 = vmul.f32 %v1937_v57, %v5909_v3  ;;  %v5974_v59 = vsel %vm1667_vm11, %v1721_v62, %v1811_v10  ;;  %v1842_v34 = vsel %vm1682_vm10, 0.7853982, %v5178_v20 }
 0x518   : > { %v2062_v38 = vsub.f32 0.0, %v2030_v44  ;;  %v2031_v45 = vadd.f32 %v2015_v37, %v5851_v22  ;;  %v1984_v5 = vmul.f32 %v3901_v47, %v5885_v56  ;;  %v1922_v21 = vmul.f32 %v3887_v33, %v5938_v7 }
 0x519   : > { %v5959_v1 = vpop.f32.mrb[56].mxu1  ;;  %v3902_v29 = vadd.f32 -0.3333295, %v1953_v4  ;;  %v5984_v35 = vmul.f32 %v5974_v59, %v5974_v59  ;;  %v1701_v0 = vmax.f32 %v5957_v51, 1e-30  ;;  %v3874_v39 = vadd.f32 -1.0, %v5957_v51 }
 0x51a   : > { %v2078_v63 = vsel %vm2046_vm9, %v2062_v38, %v2030_v44  ;;  %v5968_v22 = vpop.f32.mrb[57].mxu1  ;;  %v2063_v18 = vsub.f32 0.0, %v2031_v45  ;;  %v2000_v56 = vmul.f32 %v1984_v5, %v5877_v42  ;;  %v4572_v38 = vpop.eup %4571  ;;  %v1938_v57 = vadd.f32 0.19977711, %v1922_v21 }
 0x51b   : > { %v2094_v11 = vmul.f32 3.18, %v2078_v63  ;;  %v5976_v44 = vpop.f32.mrb[58].mxu1  ;;  %v1985_v5 = vmul.f32 %v3902_v29, %v5909_v3  ;;  %v1891_v4 = vmul.f32 0.080537446, %v5984_v35  ;;  %v1723_v3 = vmul.f32 -1.0, %v4572_v38 }
 0x51c   : > { %v5986_v37 = vpop.f32.mrb[59].mxu1  ;;  %v2079_v62 = vsel %vm2047_vm13, %v2063_v18, %v2031_v45  ;;  %v2016_v63 = vadd.f32 %v2000_v56, %v5877_v42  ;;  %v1954_v10 = vmul.f32 %v1938_v57, %v5938_v7  ;;  %v4574_v42 = vpop.eup %4573  ;;  %v1765_v29 = vadd.f32 1.0, %v5957_v51 }
 0x51d   : > { %v2110_v47 = vmul.f32 1.442695, %v2094_v11  ;;  %v2095_v33 = vmul.f32 3.18, %v2079_v62  ;;  %v3873_v11 = vadd.f32 -1.0, %v5891_v15  ;;  %v2001_v40 = vmul.f32 %v1985_v5, %v5901_v17 }
 0x51e   : > { %v2032_v18 = vadd.f32 %v2016_v63, %v5855_v25  ;;  %v3888_v21 = vadd.f32 -0.13877685, %v1891_v4  ;;  %v3903_v56 = vadd.f32 -0.3333295, %v1954_v10  ;;  %vm1685_vm3 = vcmp.gt.f32.partialorder %v5957_v51, 0.41421357 }
 0x51f   : > { %4575 = vpow2.f32 %v2110_v47  ;;  %v2112_v45 = vmul.f32 1.442695, %v2095_v33  ;;  %v2017_v57 = vadd.f32 %v2001_v40, %v5901_v17  ;;  %v1787_v63 = vmul.f32 %v4574_v42, %v3873_v11 }
 0x520   : > { %4577 = vrcp.f32 %v1701_v0  ;;  %v2064_v62 = vsub.f32 0.0, %v2032_v18  ;;  %v1923_v30 = vmul.f32 %v3888_v21, %v5984_v35  ;;  %v1986_v25 = vmul.f32 %v3903_v56, %v5938_v7 }
 0x521   : > { %v6002_v47 = vpop.f32.mrb[60].mxu1  ;;  %4579 = vpow2.f32 %v2112_v45  ;;  %v2033_v4 = vadd.f32 %v2017_v57, %v5863_v31  ;;  %v1812_v11 = vsel %vm1684_vm1, %v1787_v63, %v5891_v15  ;;  %v6022_v45 = vmul.f32 0.2, %v1592_v41  ;;  %v793_v31 = vld [vmem:[%s5648_s11] sm:$0xff] }
 0x522   : > { %v6006_v33 = vpop.f32.mrb[61].mxu1  ;;  %4581 = vrcp.f32 %v1765_v29  ;;  %v2080_v5 = vsel %vm2048_vm14, %v2064_v62, %v2032_v18  ;;  %v1939_v10 = vadd.f32 0.19977711, %v1923_v30  ;;  %v2002_v7 = vmul.f32 %v1986_v25, %v5929_v61 }
 0x523   : > { %v6010_v38 = vpop.f32.mrb[62].mxu1  ;;  %v2096_v0 = vmul.f32 3.18, %v2080_v5  ;;  %v2065_v40 = vsub.f32 0.0, %v2033_v4  ;;  %v6028_v30 = vsel %vm1668_vm0, %v1723_v3, %v1812_v11  ;;  %v1843_v42 = vsel %vm1683_vm12, 0.7853982, %v5178_v20 }
 0x524   : > { %v6016_v17 = vpop.f32.mrb[63].mxu1  ;;  %v1955_v12 = vmul.f32 %v1939_v10, %v5984_v35  ;;  %v2018_v21 = vadd.f32 %v2002_v7, %v5929_v61  ;;  %v6037_v41 = vmul.f32 %v6028_v30, %v6028_v30  ;;  %v1858_v3 = vsel %vm1666_vm8, 1.5707964, %v1842_v34  ;;  %v794_v10 = vld [vmem:[%s5648_s11 + $0x8] sm:$0xff] }
 0x525   : > { %v2114_v18 = vmul.f32 1.442695, %v2096_v0  ;;  %v2081_v56 = vsel %vm2049_vm15, %v2065_v40, %v2033_v4  ;;  %v6044_v62 = vand.u32 2147483647, %v6022_v45  ;;  %v1859_v0 = vsel %vm1667_vm11, 1.5707964, %v1843_v42 }
 0x526   : > { %v3904_v29 = vadd.f32 -0.3333295, %v1955_v12  ;;  %v2097_v61 = vmul.f32 3.18, %v2081_v56  ;;  %v2034_v25 = vadd.f32 %v2018_v21, %v1858_v3  ;;  %v1892_v63 = vmul.f32 0.080537446, %v6037_v41 }
 0x527   : > { %4583 = vpow2.f32 %v2114_v18  ;;  %v1596_v40 = vadd.f32 %v5887_v60, %v5726_v53  ;;  %v1702_v21 = vmax.f32 %v6044_v62, 1e-30  ;;  %vm1669_vm4 = vcmp.gt.f32.partialorder %v5957_v51, 2.4142137 }
 0x528   : > { %v1987_v16 = vmul.f32 %v3904_v29, %v5984_v35  ;;  %v2116_v4 = vmul.f32 1.442695, %v2097_v61  ;;  %v2066_v7 = vsub.f32 0.0, %v2034_v25  ;;  %v3889_v11 = vadd.f32 -0.13877685, %v1892_v63  ;;  %v6059_v35 = vld [vmem:[#allocation14] sm:$0xff]  }
 0x529   : > { %v4576_v57 = vpop.eup %4575  ;;  %4242 = vmatprep.subr.bf16.mxu0 %v6059_v35  ;;  %vm1686_vm7 = vcmp.gt.f32.partialorder %v6044_v62, 0.41421357  ;;  %vm1670_vm8 = vcmp.gt.f32.partialorder %v6044_v62, 2.4142137  ;;  %vm2053_vm11 = vcmp.lt.f32.partialorder %v5931_v54, 0.0  ;;  %vm2054_vm15 = vcmp.lt.f32.partialorder %v6022_v45, 0.0 }
 0x52a   : > { %v2142_v5 = vmul.f32 %v4576_v57, %v793_v31  ;;  %v4578_v34 = vpop.eup %4577  ;;  %v2003_v31 = vmul.f32 %v1987_v16, %v5974_v59  ;;  %4585 = vpow2.f32 %v2116_v4  ;;  %v2082_v3 = vsel %vm2050_vm2, %v2066_v7, %v2034_v25 }
 0x52b   : > { %v4580_v12 = vpop.eup %4579  ;;  %v1725_v19 = vmul.f32 -1.0, %v4578_v34  ;;  %v1924_v29 = vmul.f32 %v3889_v11, %v6037_v41  ;;  %4587 = vrcp.f32 %v1702_v21  ;;  %v1766_v25 = vadd.f32 1.0, %v6044_v62 }
 0x52c   : > { %v6055_v18 = vadd.f32 %v2142_v5, %v5859_v28  ;;  %v4582_v42 = vpop.eup %4581  ;;  %v2143_v56 = vmul.f32 %v4580_v12, %v794_v10  ;;  %v2098_v28 = vmul.f32 3.18, %v2082_v3  ;;  %v2019_v60 = vadd.f32 %v2003_v31, %v5974_v59  ;;  %v795_v10 = vld [vmem:[%s5648_s11 + $0x10] sm:$0xff] }
 0x52d   : > { %v1789_v57 = vmul.f32 %v4582_v42, %v3874_v39  ;;  %v1940_v26 = vadd.f32 0.19977711, %v1924_v29  ;;  %4589 = vrcp.f32 %v1766_v25  ;;  %v6088_v39 = vmul.f32 0.2, %v1596_v40  ;;  %v796_v40 = vld [vmem:[%s5648_s11 + $0x18] sm:$0xff] }
 0x52e   : > { %2174 = vst [vmem:[%s6065_s29] sm:$0xff] %v6055_v18  ;;  %v6072_v61 = vadd.f32 %v2143_v56, %v5914_v23  ;;  %v2118_v63 = vmul.f32 1.442695, %v2098_v28  ;;  %v2035_v5 = vadd.f32 %v2019_v60, %v1859_v0  ;;  %v1564_v12 = vadd.f32 %v5749_v9, %v5810_v52 }
 0x52f   : > { %v1813_v59 = vsel %vm1685_vm3, %v1789_v57, %v5957_v51  ;;  %v1956_v23 = vmul.f32 %v1940_v26, %v6037_v41  ;;  %v6094_v11 = vand.u32 2147483647, %v6088_v39  ;;  %v1844_v56 = vsel %vm1684_vm1, 0.7853982, %v5178_v20 }
 0x530   : > { %2175 = vst [vmem:[%s6065_s29 + $0x8] sm:$0xff] %v6072_v61  ;;  %v6086_v16 = vsel %vm1669_vm4, %v1725_v19, %v1813_v59  ;;  %4591 = vpow2.f32 %v2118_v63  ;;  %v2067_v0 = vsub.f32 0.0, %v2035_v5  ;;  %v1568_v9 = vadd.f32 %v5754_v14, %v5810_v52 }
 0x531   : > { %v1877_v34 = vmul.f32 %v6086_v16, %v6086_v16  ;;  %v4584_v4 = vpop.eup %4583  ;;  %v3905_v7 = vadd.f32 -0.3333295, %v1956_v23  ;;  %v1703_v60 = vmax.f32 %v6094_v11, 1e-30  ;;  %v1574_v26 = vadd.f32 %v5775_v27, %v5810_v52 }
 0x532   : > { %v2144_v31 = vmul.f32 %v4584_v4, %v795_v10  ;;  %v2083_v19 = vsel %vm2051_vm5, %v2067_v0, %v2035_v5  ;;  %v1860_v14 = vsel %vm1668_vm0, 1.5707964, %v1844_v56  ;;  %v3875_v27 = vadd.f32 -1.0, %v6044_v62  ;;  %v797_v4 = vld [vmem:[%s5648_s11 + $0x20] sm:$0xff] }
 0x533   : > { %v1893_v21 = vmul.f32 0.080537446, %v1877_v34  ;;  %v2099_v42 = vmul.f32 3.18, %v2083_v19  ;;  %v1988_v3 = vmul.f32 %v3905_v7, %v6037_v41  ;;  %v1767_v41 = vadd.f32 1.0, %v6094_v11 }
 0x534   : > { %v6105_v29 = vadd.f32 %v2144_v31, %v1564_v12  ;;  %v4586_v57 = vpop.eup %4585  ;;  %4593 = vrcp.f32 %v1703_v60  ;;  %v6120_v23 = vmul.f32 0.2, %v1602_v6  ;;  %v1606_v12 = vadd.f32 %v5940_v8, %v5726_v53 }
 0x535   : > { %v3890_v28 = vadd.f32 -0.13877685, %v1893_v21  ;;  %v2120_v25 = vmul.f32 1.442695, %v2099_v42  ;;  %v2004_v63 = vmul.f32 %v1988_v3, %v6028_v30  ;;  %v4588_v5 = vpop.eup %4587  ;;  %v2145_v43 = vmul.f32 %v4586_v57, %v796_v40 }
 0x536   : > { %2176 = vst [vmem:[%s6065_s29 + $0x10] sm:$0xff] %v6105_v29  ;;  %v1727_v19 = vmul.f32 -1.0, %v4588_v5  ;;  %v6129_v21 = vand.u32 2147483647, %v6120_v23  ;;  %v1845_v42 = vsel %vm1685_vm3, 0.7853982, %v5178_v20 }
 0x537   : > { %v1925_v59 = vmul.f32 %v3890_v28, %v1877_v34  ;;  %4595 = vpow2.f32 %v2120_v25  ;;  %v2020_v10 = vadd.f32 %v2004_v63, %v6028_v30  ;;  %v6122_v0 = vadd.f32 %v2145_v43, %v1568_v9  ;;  %v4590_v15 = vpop.eup %4589 }
 0x538   : > { %4597 = vrcp.f32 %v1767_v41  ;;  %v1791_v8 = vmul.f32 %v4590_v15, %v3875_v27  ;;  %v6139_v9 = vmul.f32 0.2, %v1606_v12  ;;  %v1704_v57 = vmax.f32 %v6129_v21, 1e-30 }
 0x539   : > { %v1941_v7 = vadd.f32 0.19977711, %v1925_v59  ;;  %v2036_v31 = vadd.f32 %v2020_v10, %v1860_v14  ;;  %2177 = vst [vmem:[%s6065_s29 + $0x18] sm:$0xff] %v6122_v0  ;;  %v2191_v40 = vpack.c.bf16 %v6122_v0, %v6105_v29  ;;  %v1768_v5 = vadd.f32 1.0, %v6129_v21  ;;  %v798_v10 = vld [vmem:[%s5648_s11 + $0x28] sm:$0xff] }
 0x53a   : > { %v4592_v30 = vpop.eup %4591  ;;  %v1814_v60 = vsel %vm1686_vm7, %v1791_v8, %v6044_v62  ;;  %4599 = vrcp.f32 %v1704_v57  ;;  %v1861_v15 = vsel %vm1669_vm4, 1.5707964, %v1845_v42  ;;  %vm1687_vm9 = vcmp.gt.f32.partialorder %v6094_v11, 0.41421357 }
 0x53b   : > { %v1957_v56 = vmul.f32 %v1941_v7, %v1877_v34  ;;  %v2146_v3 = vmul.f32 %v4592_v30, %v797_v4  ;;  %v2068_v6 = vsub.f32 0.0, %v2036_v31  ;;  %v6152_v41 = vsel %vm1670_vm8, %v1727_v19, %v1814_v60 }
 0x53c   : > { %v1878_v59 = vmul.f32 %v6152_v41, %v6152_v41  ;;  %4601 = vrcp.f32 %v1768_v5  ;;  %v3876_v19 = vadd.f32 -1.0, %v6094_v11  ;;  %vm1671_vm10 = vcmp.gt.f32.partialorder %v6094_v11, 2.4142137 }
 0x53d   : > { %v3906_v28 = vadd.f32 -0.3333295, %v1957_v56  ;;  %v6146_v25 = vadd.f32 %v2146_v3, %v1574_v26  ;;  %v2084_v63 = vsel %vm2052_vm6, %v2068_v6, %v2036_v31  ;;  %v6161_v26 = vand.u32 2147483647, %v6139_v9 }
 0x53e   : > { %v2100_v43 = vmul.f32 3.18, %v2084_v63  ;;  %v4594_v32 = vpop.eup %4593  ;;  %v1894_v7 = vmul.f32 0.080537446, %v1878_v59  ;;  %v1846_v6 = vsel %vm1686_vm7, 0.7853982, %v5178_v20  ;;  %v1612_v63 = vadd.f32 %v5959_v1, %v5726_v53 }
 0x53f   : > { %v1989_v14 = vmul.f32 %v3906_v28, %v1877_v34  ;;  %2178 = vst [vmem:[%s6065_s29 + $0x20] sm:$0xff] %v6146_v25  ;;  %v1578_v34 = vadd.f32 %v5785_v36, %v5810_v52  ;;  %v1729_v31 = vmul.f32 -1.0, %v4594_v32  ;;  %v1705_v36 = vmax.f32 %v6161_v26, 1e-30 }
 0x540   : > { %v2122_v27 = vmul.f32 1.442695, %v2100_v43  ;;  %v3891_v3 = vadd.f32 -0.13877685, %v1894_v7  ;;  %v1769_v51 = vadd.f32 1.0, %v6161_v26  ;;  %v1616_v62 = vadd.f32 %v5976_v44, %v5726_v53 }
 0x541   : > { %v2005_v4 = vmul.f32 %v1989_v14, %v6086_v16  ;;  %v4596_v12 = vpop.eup %4595  ;;  %v6197_v1 = vmul.f32 0.2, %v1612_v63  ;;  %v1862_v7 = vsel %vm1670_vm8, 1.5707964, %v1846_v6  ;;  %vm1688_vm12 = vcmp.gt.f32.partialorder %v6129_v21, 0.41421357 }
 0x542   : > { %v4598_v30 = vpop.eup %4597  ;;  %v2147_v56 = vmul.f32 %v4596_v12, %v798_v10  ;;  %4603 = vpow2.f32 %v2122_v27  ;;  %v1926_v57 = vmul.f32 %v3891_v3, %v1878_v59  ;;  %v1584_v10 = vadd.f32 %v5814_v55, %v5810_v52 }
 0x543   : > { %v2021_v8 = vadd.f32 %v2005_v4, %v6086_v16  ;;  %v1793_v28 = vmul.f32 %v4598_v30, %v3876_v19  ;;  %4605 = vrcp.f32 %v1705_v36  ;;  %v6204_v55 = vadd.f32 %v5828_v2, %v5810_v52  ;;  %v799_v30 = vld [vmem:[%s5648_s11 + $0x30] sm:$0xff] }
 0x544   : > { %v6175_v42 = vadd.f32 %v2147_v56, %v1578_v34  ;;  %v1942_v43 = vadd.f32 0.19977711, %v1926_v57  ;;  %4607 = vrcp.f32 %v1769_v51  ;;  %v4600_v27 = vpop.eup %4599  ;;  %v3877_v34 = vadd.f32 -1.0, %v6129_v21 }
 0x545   : > { %v2037_v60 = vadd.f32 %v2021_v8, %v1861_v15  ;;  %v1815_v16 = vsel %vm1687_vm9, %v1793_v28, %v6094_v11  ;;  %v1731_v19 = vmul.f32 -1.0, %v4600_v27  ;;  %v6209_v3 = vand.u32 2147483647, %v6197_v1 }
 0x546   : > { %2179 = vst [vmem:[%s6065_s29 + $0x28] sm:$0xff] %v6175_v42  ;;  %v6188_v14 = vsel %vm1671_vm10, %v1729_v31, %v1815_v16  ;;  %v1958_v12 = vmul.f32 %v1942_v43, %v1878_v59  ;;  %v4602_v15 = vpop.eup %4601  ;;  %v6215_v28 = vadd.f32 %v5880_v46, %v5810_v52  ;;  %vm1672_vm13 = vcmp.gt.f32.partialorder %v6129_v21, 2.4142137 }
 0x547   : > { %v2069_v5 = vsub.f32 0.0, %v2037_v60  ;;  %v6195_v32 = vmul.f32 %v6188_v14, %v6188_v14  ;;  %v1795_v8 = vmul.f32 %v4602_v15, %v3877_v34  ;;  %v3878_v57 = vadd.f32 -1.0, %v6161_v26 }
 0x548   : > { %v3907_v56 = vadd.f32 -0.3333295, %v1958_v12  ;;  %v6234_v43 = vmul.f32 0.2, %v1616_v62  ;;  %v1770_v34 = vadd.f32 1.0, %v6209_v3  ;;  %v1622_v15 = vadd.f32 %v6002_v47, %v5726_v53 }
 0x549   : > { %v2085_v4 = vsel %vm2053_vm11, %v2069_v5, %v2037_v60  ;;  %v1895_v54 = vmul.f32 0.080537446, %v6195_v32  ;;  %v1816_v60 = vsel %vm1688_vm12, %v1795_v8, %v6129_v21  ;;  %v1706_v5 = vmax.f32 %v6209_v3, 1e-30 }
 0x54a   : > { %v2101_v31 = vmul.f32 3.18, %v2085_v4  ;;  %v1990_v51 = vmul.f32 %v3907_v56, %v1878_v59  ;;  %v6226_v46 = vsel %vm1672_vm13, %v1731_v19, %v1816_v60  ;;  %vm1689_vm14 = vcmp.gt.f32.partialorder %v6161_v26, 0.41421357 }
 0x54b   : > { %v3892_v36 = vadd.f32 -0.13877685, %v1895_v54  ;;  %v6231_v59 = vmul.f32 %v6226_v46, %v6226_v46  ;;  %vm1673_vm0 = vcmp.gt.f32.partialorder %v6161_v26, 2.4142137  ;;  %v6263_v60 = vmul.f32 0.2, %v1622_v15 }
 0x54c   : > { %v2124_v6 = vmul.f32 1.442695, %v2101_v31  ;;  %v4604_v2 = vpop.eup %4603  ;;  %v2006_v63 = vmul.f32 %v1990_v51, %v6152_v41  ;;  %vm2055_vm1 = vcmp.lt.f32.partialorder %v6088_v39, 0.0  ;;  %vm2056_vm2 = vcmp.lt.f32.partialorder %v6120_v23, 0.0 }
 0x54d   : > { %v2148_v16 = vmul.f32 %v4604_v2, %v799_v30  ;;  %v1927_v44 = vmul.f32 %v3892_v36, %v6195_v32  ;;  %v4606_v27 = vpop.eup %4605  ;;  %v1896_v19 = vmul.f32 0.080537446, %v6231_v59  ;;  %vm1690_vm3 = vcmp.gt.f32.partialorder %v6209_v3, 0.41421357 }
 0x54e   : > { %4609 = vpow2.f32 %v2124_v6  ;;  %v4608_v31 = vpop.eup %4607  ;;  %v2022_v54 = vadd.f32 %v2006_v63, %v6152_v41  ;;  %v1733_v30 = vmul.f32 -1.0, %v4606_v27  ;;  %v6251_v41 = vand.u32 2147483647, %v6234_v43 }
 0x54f   : > { %v6236_v4 = vadd.f32 %v2148_v16, %v1584_v10  ;;  %v1943_v12 = vadd.f32 0.19977711, %v1927_v44  ;;  %4611 = vrcp.f32 %v1706_v5  ;;  %v1847_v10 = vsel %vm1687_vm9, 0.7853982, %v5178_v20 }
 0x550   : > { %v1797_v8 = vmul.f32 %v4608_v31, %v3878_v57  ;;  %4613 = vrcp.f32 %v1770_v34  ;;  %v2038_v62 = vadd.f32 %v2022_v54, %v1862_v7  ;;  %v3893_v47 = vadd.f32 -0.13877685, %v1896_v19  ;;  %v800_v57 = vld [vmem:[%s5648_s11 + $0x38] sm:$0xff] }
 0x551   : > { %2180 = vst [vmem:[%s6065_s29 + $0x30] sm:$0xff] %v6236_v4  ;;  %v1959_v56 = vmul.f32 %v1943_v12, %v6195_v32  ;;  %v1863_v45 = vsel %vm1671_vm10, 1.5707964, %v1847_v10  ;;  %v1707_v63 = vmax.f32 %v6251_v41, 1e-30  ;;  %v1771_v34 = vadd.f32 1.0, %v6251_v41 }
 0x552   : > { %v1817_v36 = vsel %vm1689_vm14, %v1797_v8, %v6161_v26  ;;  %v2070_v2 = vsub.f32 0.0, %v2038_v62  ;;  %v1928_v51 = vmul.f32 %v3893_v47, %v6231_v59  ;;  %v1848_v27 = vsel %vm1688_vm12, 0.7853982, %v5178_v20 }
 0x553   : > { %v3908_v6 = vadd.f32 -0.3333295, %v1959_v56  ;;  %v6261_v7 = vsel %vm1673_vm0, %v1733_v30, %v1817_v36  ;;  %4615 = vrcp.f32 %v1707_v63  ;;  %v6283_v30 = vand.u32 2147483647, %v6263_v60 }
 0x554   : > { %v6271_v44 = vmul.f32 %v6261_v7, %v6261_v7  ;;  %v2086_v5 = vsel %vm2054_vm15, %v2070_v2, %v2038_v62  ;;  %v1944_v12 = vadd.f32 0.19977711, %v1928_v51  ;;  %4617 = vrcp.f32 %v1771_v34 }
 0x555   : > { %v1991_v16 = vmul.f32 %v3908_v6, %v6195_v32  ;;  %v2102_v15 = vmul.f32 3.18, %v2086_v5  ;;  %v1864_v8 = vsel %vm1672_vm13, 1.5707964, %v1848_v27  ;;  %v1849_v2 = vsel %vm1689_vm14, 0.7853982, %v5178_v20 }
 0x556   : > { %v1897_v31 = vmul.f32 0.080537446, %v6271_v44  ;;  %v1960_v19 = vmul.f32 %v1944_v12, %v6231_v59  ;;  %v3879_v51 = vadd.f32 -1.0, %v6209_v3  ;;  %v1626_v27 = vadd.f32 %v6010_v38, %v5726_v53 }
 0x557   : > { %v2007_v32 = vmul.f32 %v1991_v16, %v6188_v14  ;;  %v2126_v10 = vmul.f32 1.442695, %v2102_v15  ;;  %vm1674_vm4 = vcmp.gt.f32.partialorder %v6209_v3, 2.4142137  ;;  %vm1691_vm5 = vcmp.gt.f32.partialorder %v6251_v41, 0.41421357 }
 0x558   : > { %v4610_v11 = vpop.eup %4609  ;;  %v3894_v62 = vadd.f32 -0.13877685, %v1897_v31  ;;  %v3909_v36 = vadd.f32 -0.3333295, %v1960_v19  ;;  %v6322_v19 = vmul.f32 0.2, %v1626_v27 }
 0x559   : > { %v2149_v54 = vmul.f32 %v4610_v11, %v800_v57  ;;  %v2023_v56 = vadd.f32 %v2007_v32, %v6188_v14  ;;  %v4612_v47 = vpop.eup %4611  ;;  %4619 = vpow2.f32 %v2126_v10  ;;  %vm1675_vm6 = vcmp.gt.f32.partialorder %v6251_v41, 2.4142137 }
 0x55a   : > { %v4614_v57 = vpop.eup %4613  ;;  %v1929_v14 = vmul.f32 %v3894_v62, %v6271_v44  ;;  %v1735_v63 = vmul.f32 -1.0, %v4612_v47  ;;  %v1992_v21 = vmul.f32 %v3909_v36, %v6231_v59  ;;  %v2190_v62 = vpack.c.bf16 %v6072_v61, %v6055_v18 }
 0x55b   : > { %v6289_v6 = vadd.f32 %v2149_v54, %v6204_v55  ;;  %v2039_v16 = vadd.f32 %v2023_v56, %v1863_v45  ;;  %v1799_v5 = vmul.f32 %v4614_v57, %v3879_v51  ;;  %v1708_v55 = vmax.f32 %v6283_v30, 1e-30 }
 0x55c   : > { %v1945_v34 = vadd.f32 0.19977711, %v1929_v14  ;;  %v1772_v45 = vadd.f32 1.0, %v6283_v30  ;;  %v2008_v11 = vmul.f32 %v1992_v21, %v6226_v46  ;;  %v3880_v56 = vadd.f32 -1.0, %v6251_v41  ;;  %v4508_v14 = vld [vmem:[#allocation14 + $0x8] sm:$0xff]   ;;  %4226 = vmatprep.mubr.bf16.mxu0 %v2190_v62 }
 0x55d   : > { %2181 = vst [vmem:[%s6065_s29 + $0x38] sm:$0xff] %v6289_v6  ;;  %v2071_v12 = vsub.f32 0.0, %v2039_v16  ;;  %v1818_v59 = vsel %vm1690_vm3, %v1799_v5, %v6209_v3  ;;  %4621 = vrcp.f32 %v1708_v55  ;;  %v4616_v10 = vpop.eup %4615  ;;  %v2192_v47 = vpack.c.bf16 %v6175_v42, %v6146_v25  ;;  %4227 = vmatmul.mubr.bf16.vlgmr.msra.gmra.mrb[16].mxu0 %v2191_v40 }
 0x55e   : > { %v1961_v38 = vmul.f32 %v1945_v34, %v6271_v44  ;;  %v6315_v15 = vsel %vm1674_vm4, %v1735_v63, %v1818_v59  ;;  %4623 = vrcp.f32 %v1772_v45  ;;  %v2024_v31 = vadd.f32 %v2008_v11, %v6226_v46  ;;  %v4618_v36 = vpop.eup %4617  ;;  %v801_v63 = vld [vmem:[%s5648_s11 + $0x40] sm:$0xff]  ;;  %4243 = vmatpush3.bf16.msra.mxu0 %v6059_v35 }
 0x55f   : > { %v2087_v53 = vsel %vm2055_vm1, %v2071_v12, %v2039_v16  ;;  %v6320_v54 = vmul.f32 %v6315_v15, %v6315_v15  ;;  %v1737_v16 = vmul.f32 -1.0, %v4616_v10  ;;  %v1801_v5 = vmul.f32 %v4618_v36, %v3880_v56  ;;  %4230 = vmatprep.mubr.bf16.mxu0 %v2192_v47  ;;  %4244 = vmatprep.subr.bf16.mxu0 %v4508_v14  ;;  %v802_v47 = vld [vmem:[%s5648_s11 + $0x48] sm:$0xff] }
 0x560   : > { %v2103_v32 = vmul.f32 3.18, %v2087_v53  ;;  %v3910_v39 = vadd.f32 -0.3333295, %v1961_v38  ;;  %v2040_v57 = vadd.f32 %v2024_v31, %v1864_v8  ;;  %v6334_v55 = vand.u32 2147483647, %v6322_v19 }
 0x561   : > { %v1898_v46 = vmul.f32 0.080537446, %v6320_v54  ;;  %v2193_v25 = vpack.c.bf16 %v6289_v6, %v6236_v4  ;;  %v1819_v27 = vsel %vm1691_vm5, %v1801_v5, %v6251_v41  ;;  %v4509_v4 = vld [vmem:[#allocation14 + $0x10] sm:$0xff]   ;;  %v3881_v11 = vadd.f32 -1.0, %v6283_v30 }
 0x562   : > { %v2128_v51 = vmul.f32 1.442695, %v2103_v32  ;;  %v1993_v21 = vmul.f32 %v3910_v39, %v6271_v44  ;;  %v2072_v18 = vsub.f32 0.0, %v2040_v57  ;;  %v1865_v44 = vsel %vm1673_vm0, 1.5707964, %v1849_v2  ;;  %4245 = vmatpush3.bf16.msra.mxu0 %v4508_v14  ;;  %v4510_v39 = vld [vmem:[#allocation14 + $0x18] sm:$0xff]  }
 0x563   : > { %v3895_v61 = vadd.f32 -0.13877685, %v1898_v46  ;;  %v4620_v42 = vpop.eup %4619  ;;  %v6354_v26 = vsel %vm1675_vm6, %v1737_v16, %v1819_v27  ;;  %v1709_v35 = vmax.f32 %v6334_v55, 1e-30  ;;  %v1773_v59 = vadd.f32 1.0, %v6334_v55  ;;  %4246 = vmatprep.subr.bf16.mxu0 %v4509_v4 }
 0x564   : > { %4625 = vpow2.f32 %v2128_v51  ;;  %v2009_v8 = vmul.f32 %v1993_v21, %v6261_v7  ;;  %v2150_v29 = vmul.f32 %v4620_v42, %v801_v63  ;;  %v2088_v0 = vsel %vm2056_vm2, %v2072_v18, %v2040_v57  ;;  %v4511_v18 = vld [vmem:[#allocation14 + $0x20] sm:$0xff]  }
 0x565   : > { %v1930_v40 = vmul.f32 %v3895_v61, %v6320_v54  ;;  %v2104_v6 = vmul.f32 3.18, %v2088_v0  ;;  %v6359_v12 = vmul.f32 %v6354_v26, %v6354_v26  ;;  %vm2057_vm7 = vcmp.lt.f32.partialorder %v6139_v9, 0.0  ;;  %4231 = vmatmul.mubr.bf16.gmra.mrb[20].mxu0 %v2193_v25 }
 0x566   : > { %v2025_v2 = vadd.f32 %v2009_v8, %v6261_v7  ;;  %v6363_v34 = vadd.f32 %v2150_v29, %v6215_v28  ;;  %4627 = vrcp.f32 %v1709_v35  ;;  %vm1692_vm8 = vcmp.gt.f32.partialorder %v6283_v30, 0.41421357  ;;  %4247 = vmatpush3.bf16.msra.mxu0 %v4509_v4  ;;  %v803_v4 = vld [vmem:[%s5648_s11 + $0x50] sm:$0xff] }
 0x567   : > { %v4622_v23 = vpop.eup %4621  ;;  %v1946_v45 = vadd.f32 0.19977711, %v1930_v40  ;;  %v2130_v38 = vmul.f32 1.442695, %v2104_v6  ;;  %v1899_v7 = vmul.f32 0.080537446, %v6359_v12  ;;  %4248 = vmatprep.subr.bf16.mxu0 %v4510_v39  ;;  %v1598_v9 = vadd.f32 %v5904_v24, %v5810_v52 }
 0x568   : > { %v4624_v53 = vpop.eup %4623  ;;  %v2041_v32 = vadd.f32 %v2025_v2, %v1865_v44  ;;  %v1739_v31 = vmul.f32 -1.0, %v4622_v23  ;;  %2182 = vst [vmem:[%s6065_s29 + $0x40] sm:$0xff] %v6363_v34  ;;  %vm1676_vm9 = vcmp.gt.f32.partialorder %v6283_v30, 2.4142137  ;;  %v1850_v44 = vsel %vm1690_vm3, 0.7853982, %v5178_v20 }
 0x569   : > { %v1962_v28 = vmul.f32 %v1946_v45, %v6320_v54  ;;  %v1803_v10 = vmul.f32 %v4624_v53, %v3881_v11  ;;  %4629 = vpow2.f32 %v2130_v38  ;;  %v3896_v62 = vadd.f32 -0.13877685, %v1899_v7  ;;  %v4512_v24 = vld [vmem:[#allocation14 + $0x28] sm:$0xff]  }
 0x56a   : > { %v2073_v56 = vsub.f32 0.0, %v2041_v32  ;;  %4631 = vrcp.f32 %v1773_v59  ;;  %4249 = vmatpush3.bf16.msra.mxu0 %v4510_v39  ;;  %v1866_v6 = vsel %vm1674_vm4, 1.5707964, %v1850_v44  ;;  %v1604_v53 = vadd.f32 %v5933_v58, %v5810_v52 }
 0x56b   : > { %v3911_v36 = vadd.f32 -0.3333295, %v1962_v28  ;;  %v1820_v51 = vsel %vm1692_vm8, %v1803_v10, %v6283_v30  ;;  %v1931_v46 = vmul.f32 %v3896_v62, %v6359_v12  ;;  %4250 = vmatprep.subr.bf16.mxu0 %v4511_v18  ;;  %v3882_v38 = vadd.f32 -1.0, %v6334_v55 }
 0x56c   : > { %v2089_v57 = vsel %vm2057_vm7, %v2073_v56, %v2041_v32  ;;  %v6383_v16 = vsel %vm1676_vm9, %v1739_v31, %v1820_v51  ;;  %vm2058_vm10 = vcmp.lt.f32.partialorder %v6197_v1, 0.0  ;;  %v1851_v58 = vsel %vm1691_vm5, 0.7853982, %v5178_v20 }
 0x56d   : > { %v2105_v63 = vmul.f32 3.18, %v2089_v57  ;;  %v1994_v21 = vmul.f32 %v3911_v36, %v6320_v54  ;;  %v1884_v5 = vmul.f32 %v6383_v16, %v6383_v16  ;;  %v1947_v25 = vadd.f32 0.19977711, %v1931_v46  ;;  %v804_v36 = vld [vmem:[%s5648_s11 + $0x58] sm:$0xff] }
 0x56e   : > { %v4626_v14 = vpop.eup %4625  ;;  %4251 = vmatpush3.bf16.msra.mxu0 %v4511_v18  ;;  %vm1693_vm11 = vcmp.gt.f32.partialorder %v6334_v55, 0.41421357  ;;  %vm1677_vm12 = vcmp.gt.f32.partialorder %v6334_v55, 2.4142137  ;;  %v1867_v51 = vsel %vm1675_vm6, 1.5707964, %v1851_v58  ;;  %v1608_v18 = vadd.f32 %v5946_v13, %v5810_v52 }
 0x56f   : > { %v2151_v61 = vmul.f32 %v4626_v14, %v802_v47  ;;  %v2132_v42 = vmul.f32 1.442695, %v2105_v63  ;;  %v2010_v8 = vmul.f32 %v1994_v21, %v6315_v15  ;;  %v1900_v54 = vmul.f32 0.080537446, %v1884_v5  ;;  %4252 = vmatprep.subr.bf16.mxu0 %v4512_v24 }
 0x570   : > { %v1963_v29 = vmul.f32 %v1947_v25, %v6359_v12  ;;  %v4628_v23 = vpop.eup %4627  ;;  %vm2059_vm13 = vcmp.lt.f32.partialorder %v6234_v43, 0.0  ;;  %v1852_v41 = vsel %vm1692_vm8, 0.7853982, %v5178_v20  ;;  %vm2060_vm14 = vcmp.lt.f32.partialorder %v6263_v60, 0.0 }
 0x571   : > { %v2167_v27 = vadd.f32 %v2151_v61, %v1598_v9  ;;  %4633 = vpow2.f32 %v2132_v42  ;;  %v2026_v0 = vadd.f32 %v2010_v8, %v6315_v15  ;;  %v3897_v40 = vadd.f32 -0.13877685, %v1900_v54 }
 0x572   : > { %v3912_v2 = vadd.f32 -0.3333295, %v1963_v29  ;;  %v1741_v28 = vmul.f32 -1.0, %v4628_v23  ;;  %4253 = vmatpush3.bf16.msra.mxu0 %v4512_v24  ;;  %v1614_v30 = vadd.f32 %v5968_v22, %v5810_v52  ;;  %v1618_v22 = vadd.f32 %v5986_v37, %v5810_v52 }
 0x573   : > { %2183 = vst [vmem:[%s6065_s29 + $0x48] sm:$0xff] %v2167_v27  ;;  %v2194_v35 = vpack.c.bf16 %v2167_v27, %v6363_v34  ;;  %v2042_v45 = vadd.f32 %v2026_v0, %v1866_v6  ;;  %v1932_v11 = vmul.f32 %v3897_v40, %v1884_v5  ;;  %v4630_v59 = vpop.eup %4629  ;;  %vm2061_vm15 = vcmp.lt.f32.partialorder %v6322_v19, 0.0 }
 0x574   : > { %v1995_v15 = vmul.f32 %v3912_v2, %v6359_v12  ;;  %v4632_v32 = vpop.eup %4631  ;;  %v2152_v7 = vmul.f32 %v4630_v59, %v803_v4  ;;  %v805_v2 = vld [vmem:[%s5648_s11 + $0x60] sm:$0xff]  ;;  %v1628_v19 = vadd.f32 %v6016_v17, %v5810_v52 }
 0x575   : > { %4234 = vmatprep.mubr.bf16.mxu0 %v2194_v35  ;;  %v2074_v3 = vsub.f32 0.0, %v2042_v45  ;;  %v1948_v31 = vadd.f32 0.19977711, %v1932_v11  ;;  %v1805_v34 = vmul.f32 %v4632_v32, %v3882_v38  ;;  %v1853_v32 = vsel %vm1693_vm11, 0.7853982, %v5178_v20  ;;  %v4519_v17 = vld [vmem:[#allocation16 + $0x20] sm:$0xff]  }
 0x576   : > { %v2011_v12 = vmul.f32 %v1995_v15, %v6354_v26  ;;  %v2168_v10 = vadd.f32 %v2152_v7, %v1604_v53  ;;  %v806_v7 = vld [vmem:[%s5648_s11 + $0x68] sm:$0xff] }
 0x577   : > { %v2090_v39 = vsel %vm2058_vm10, %v2074_v3, %v2042_v45  ;;  %v1964_v56 = vmul.f32 %v1948_v31, %v1884_v5  ;;  %v1821_v1 = vsel %vm1693_vm11, %v1805_v34, %v6334_v55  ;;  %v1624_v55 = vadd.f32 %v6006_v33, %v5810_v52  ;;  %v4515_v33 = vld [vmem:[#allocation16] sm:$0xff]   ;;  %v4518_v52 = vld [vmem:[#allocation16 + $0x18] sm:$0xff]  }
 0x578   : > { %v2106_v62 = vmul.f32 3.18, %v2090_v39  ;;  %v2027_v47 = vadd.f32 %v2011_v12, %v6354_v26  ;;  %2184 = vst [vmem:[%s6065_s29 + $0x50] sm:$0xff] %v2168_v10  ;;  %v1837_v46 = vsel %vm1677_vm12, %v1741_v28, %v1821_v1  ;;  %v1869_v28 = vsel %vm1677_vm12, 1.5707964, %v1853_v32  ;;  %v807_v39 = vld [vmem:[%s5648_s11 + $0x70] sm:$0xff]  ;;  %4274 = vmatprep.subr.bf16.mxu1 %v4515_v33 }
 0x579   : > { %v3913_v57 = vadd.f32 -0.3333295, %v1964_v56  ;;  %v1885_v21 = vmul.f32 %v1837_v46, %v1837_v46  ;;  %4275 = vmatpush3.bf16.msra.mxu1 %v4515_v33 }
 0x57a   : > { %v2134_v14 = vmul.f32 1.442695, %v2106_v62  ;;  %v2043_v63 = vadd.f32 %v2027_v47, %v1867_v51 }
 0x57b   : > { %v4634_v26 = vpop.eup %4633  ;;  %v1996_v9 = vmul.f32 %v3913_v57, %v1884_v5  ;;  %v1901_v42 = vmul.f32 0.080537446, %v1885_v21  ;;  %v1868_v5 = vsel %vm1676_vm9, 1.5707964, %v1852_v41  ;;  %v808_v57 = vld [vmem:[%s5648_s11 + $0x78] sm:$0xff] }
 0x57c   : > { %v2153_v61 = vmul.f32 %v4634_v26, %v804_v36  ;;  %4635 = vpow2.f32 %v2134_v14  ;;  %v2075_v25 = vsub.f32 0.0, %v2043_v63  ;;  %v4513_v26 = vld [vmem:[#allocation14 + $0x30] sm:$0xff]   ;;  %v3915_v41 = vld [vmem:[%s7320_s23] ss:$0 sm:$0xff]  ;;  %s6778_s23 = scalar_lea.hbm %s7325_s10, %s4016_s9 }
 0x57d   : > { %v2012_v44 = vmul.f32 %v1996_v9, %v6383_v16  ;;  %v3898_v27 = vadd.f32 -0.13877685, %v1901_v42  ;;  %4254 = vmatprep.subr.bf16.mxu0 %v4513_v26  ;;  %v4516_v9 = vld [vmem:[#allocation16 + $0x8] sm:$0xff]   ;;  %v4521_v42 = vld [vmem:[#allocation16 + $0x30] sm:$0xff]  }
 0x57e   : > { %v2169_v8 = vadd.f32 %v2153_v61, %v1608_v18  ;;  %v2091_v54 = vsel %vm2059_vm13, %v2075_v25, %v2043_v63  ;;  %v4514_v18 = vld [vmem:[#allocation14 + $0x38] sm:$0xff]   ;;  %4255 = vmatpush3.bf16.msra.mxu0 %v4513_v26  ;;  %4276 = vmatprep.subr.bf16.mxu1 %v4516_v9  ;;  %v4517_v61 = vld [vmem:[#allocation16 + $0x10] sm:$0xff]   ;;  %v4520_v25 = vld [vmem:[#allocation16 + $0x28] sm:$0xff]  }
 0x57f   : > { %v2107_v29 = vmul.f32 3.18, %v2091_v54  ;;  %v2028_v13 = vadd.f32 %v2012_v44, %v6383_v16  ;;  %v1933_v0 = vmul.f32 %v3898_v27, %v1885_v21  ;;  %4256 = vmatprep.subr.bf16.mxu0 %v4514_v18  ;;  %4277 = vmatpush3.bf16.msra.mxu1 %v4516_v9 }
 0x580   : > { %2185 = vst [vmem:[%s6065_s29 + $0x58] sm:$0xff] %v2169_v8  ;;  %v2195_v40 = vpack.c.bf16 %v2169_v8, %v2168_v10  ;;  %4278 = vmatprep.subr.bf16.mxu1 %v4517_v61 }
 0x581   : > { %v2136_v43 = vmul.f32 1.442695, %v2107_v29  ;;  %v2044_v24 = vadd.f32 %v2028_v13, %v1868_v5  ;;  %v1949_v4 = vadd.f32 0.19977711, %v1933_v0 }
 0x582   : > { %4235 = vmatmul.mubr.bf16.gmra.mrb[24].mxu0 %v2195_v40 }
 0x583   : > { %4637 = vpow2.f32 %v2136_v43  ;;  %v2076_v6 = vsub.f32 0.0, %v2044_v24  ;;  %v1965_v35 = vmul.f32 %v1949_v4, %v1885_v21  ;;  %4257 = vmatpush3.bf16.msra.mxu0 %v4514_v18  ;;  %4279 = vmatpush3.bf16.msra.mxu1 %v4517_v61 }
 0x584   : > { %4280 = vmatprep.subr.bf16.mxu1 %v4518_v52 }
 0x585   : > { %v2092_v23 = vsel %vm2060_vm14, %v2076_v6, %v2044_v24  ;;  %v3914_v11 = vadd.f32 -0.3333295, %v1965_v35 }
 0x586   : > { %v4636_v16 = vpop.eup %4635  ;;  %v2108_v45 = vmul.f32 3.18, %v2092_v23 }
 0x587   : > { %v2154_v59 = vmul.f32 %v4636_v16, %v805_v2  ;;  %v1997_v15 = vmul.f32 %v3914_v11, %v1885_v21  ;;  %4281 = vmatpush3.bf16.msra.mxu1 %v4518_v52 }
 0x588   : > { %v2138_v53 = vmul.f32 1.442695, %v2108_v45  ;;  %4282 = vmatprep.subr.bf16.mxu1 %v4519_v17 }
 0x589   : > { %v2170_v38 = vadd.f32 %v2154_v59, %v1614_v30  ;;  %v2013_v60 = vmul.f32 %v1997_v15, %v1837_v46 }
 0x58a   : > { %4639 = vpow2.f32 %v2138_v53 }
 0x58b   : > { %2186 = vst [vmem:[%s6065_s29 + $0x60] sm:$0xff] %v2170_v38  ;;  %v2029_v3 = vadd.f32 %v2013_v60, %v1837_v46  ;;  %4283 = vmatpush3.bf16.msra.mxu1 %v4519_v17  ;;  %v4522_v17 = vld [vmem:[#allocation16 + $0x38] sm:$0xff]  }
 0x58c   : > { %4284 = vmatprep.subr.bf16.mxu1 %v4520_v25 }
 0x58d   : > { %v4638_v31 = vpop.eup %4637  ;;  %v2045_v12 = vadd.f32 %v2029_v3, %v1869_v28 }
 0x58e   : > { %v2155_v58 = vmul.f32 %v4638_v31, %v806_v7 }
 0x58f   : > { %v2077_v10 = vsub.f32 0.0, %v2045_v12  ;;  %4285 = vmatpush3.bf16.msra.mxu1 %v4520_v25  ;;  %v4523_v25 = vld [vmem:[#allocation17] ss:$8 sps:$4 sm:$0xff]  }
 0x590   : > { %v2171_v34 = vadd.f32 %v2155_v58, %v1618_v22  ;;  %4286 = vmatprep.subr.bf16.mxu1 %v4521_v42 }
 0x591   : > { %v2093_v56 = vsel %vm2061_vm15, %v2077_v10, %v2045_v12 }
 0x592   : > { %2187 = vst [vmem:[%s6065_s29 + $0x68] sm:$0xff] %v2171_v34  ;;  %v2196_v62 = vpack.c.bf16 %v2171_v34, %v2170_v38  ;;  %v2109_v47 = vmul.f32 3.18, %v2093_v56 }
 0x593   : > { %4287 = vmatpush3.bf16.msra.mxu1 %v4521_v42  ;;  %v4525_v42 = vld [vmem:[#allocation17 + $0x4] ss:$8 sps:$4 sm:$0xff]  }
 0x594   : > { %v4640_v1 = vpop.eup %4639  ;;  %4238 = vmatprep.mubr.bf16.mxu0 %v2196_v62  ;;  %v2140_v36 = vmul.f32 1.442695, %v2109_v47  ;;  %4288 = vmatprep.subr.bf16.mxu1 %v4522_v17 }
 0x595   : > { %v2156_v37 = vmul.f32 %v4640_v1, %v807_v39  ;;  %2882 = vmatprep.subr.bf16.mxu0 %v4525_v42 }
 0x596   : > { %4641 = vpow2.f32 %v2140_v36 }
 0x597   : > { %v2172_v51 = vadd.f32 %v2156_v37, %v1624_v55  ;;  %4289 = vmatpush3.bf16.msra.mxu1 %v4522_v17 }
 0x599   : > { %2188 = vst [vmem:[%s6065_s29 + $0x70] sm:$0xff] %v2172_v51 }
 0x5a0   : > { %v4642_v46 = vpop.eup %4641 }
 0x5a1   : > { %v2157_v14 = vmul.f32 %v4642_v46, %v808_v57 }
 0x5a3   : > { %v2173_v63 = vadd.f32 %v2157_v14, %v1628_v19 }
 0x5a5   : > { %2189 = vst [vmem:[%s6065_s29 + $0x78] sm:$0xff] %v2173_v63  ;;  %v2197_v21 = vpack.c.bf16 %v2173_v63, %v2172_v51  ;;  %s3556_s29 = scalar_lea.sflag [#allocation4], %s5641_s7 }
 0x5a7   : > { %4239 = vmatmul.mubr.bf16.gmra.mrb[28].mxu0 %v2197_v21 }
 0x630   : > { %v4228_v44 = vpop.f32.mrb[16].mxu0 }
 0x631   : > { %v2312_v8 = vadd.f32 %v4228_v44, %v3915_v41  ;;  %v2303_v54 = vpop.f32.mrb[17].mxu0  ;;  %v4528_v44 = vld [vmem:[#allocation17 + $0x14] ss:$8 sps:$4 sm:$0xff]  }
 0x632   : > { %v2304_v27 = vadd.f32 %v3915_v41, %v2303_v54  ;;  %v4229_v29 = vpop.f32.mrb[18].mxu0  ;;  %v4529_v54 = vld [vmem:[#allocation17 + $0x20] ss:$8 sps:$4 sm:$0xff]  }
 0x633   : > { %v2315_v13 = vadd.f32 %v4229_v29, %v3915_v41  ;;  %v2306_v5 = vpop.f32.mrb[19].mxu0  ;;  %v2368_v40 = vmax.f32 %v2312_v8, 0.0  ;;  %v4526_v8 = vld [vmem:[#allocation17 + $0x10] ss:$8 sps:$4 sm:$0xff]  }
 0x634   : > { %v2307_v0 = vadd.f32 %v3915_v41, %v2306_v5  ;;  %v2366_v24 = vmax.f32 %v2304_v27, 0.0  ;;  %v4534_v27 = vld [vmem:[#allocation17 + $0x34] ss:$8 sps:$4 sm:$0xff]   ;;  %v4532_v29 = vld [vmem:[#allocation17 + $0x30] ss:$8 sps:$4 sm:$0xff]  }
 0x635   : > { %v2369_v43 = vmax.f32 %v2315_v13, 0.0  ;;  %v4537_v13 = vld [vmem:[#allocation17 + $0x44] ss:$8 sps:$4 sm:$0xff]   ;;  %v4535_v5 = vld [vmem:[#allocation17 + $0x40] ss:$8 sps:$4 sm:$0xff]  }
 0x636   : > { %v2367_v4 = vmax.f32 %v2307_v0, 0.0  ;;  %v4540_v0 = vld [vmem:[#allocation17 + $0x54] ss:$8 sps:$4 sm:$0xff]  }
 0x637   : > { %v2383_v6 = vpack.c.bf16 %v2369_v43, %v2368_v40  ;;  %v4538_v40 = vld [vmem:[#allocation17 + $0x50] ss:$8 sps:$4 sm:$0xff]   ;;  %v3924_v43 = vld [vmem:[%s7321_s3] ss:$0 sm:$0xff]  ;;  %s5179_s3 = smov [#allocation19]  }
 0x638   : > { %v2382_v2 = vpack.c.bf16 %v2367_v4, %v2366_v24  ;;  %v4232_v35 = vpop.f32.mrb[20].mxu0  ;;  %s5043_s6 = sshll.u32 %s5179_s3, 4  ;;  %s5044_s6 = int_to_ptr.vmem [resolvable:$false] %s5043_s6 }
 0x639   : > { %v2328_v23 = vadd.f32 %v4232_v35, %v3915_v41  ;;  %v2319_v16 = vpop.f32.mrb[21].mxu0  ;;  %s5045_s14 = scalar_lea.vmem %s5044_s6, 4096  ;;  %p5046_p11 = scmp.lt.s32.totalorder %s6785_s4, %s5044_s6 }
 0x63a   : > { %4258 = vmatprep.mubr.bf16.mxu0 %v2382_v2  ;;  %v2320_v45 = vadd.f32 %v3915_v41, %v2319_v16  ;;  %v4233_v11 = vpop.f32.mrb[22].mxu0  ;;  %p5047_p3 = scmp.lt.s32.totalorder %s5045_s14, %s5039_s27 }
 0x63b   : > { %4259 = vmatmul.mubr.bf16.vlgmr.msra.gmra.mrb[32].mxu0 %v2383_v6  ;;  %v2331_v30 = vadd.f32 %v4233_v11, %v3915_v41  ;;  %v2322_v59 = vpop.f32.mrb[23].mxu0  ;;  %v2372_v15 = vmax.f32 %v2328_v23, 0.0 }
 0x63c   : > { %v2323_v53 = vadd.f32 %v3915_v41, %v2322_v59  ;;  %v2370_v32 = vmax.f32 %v2320_v45, 0.0  ;;  %2883 = vmatpush1.bf16.msra.mxu0 %v4523_v25  ;;  %p5048_p12 = por %p5047_p3, %p5046_p11 }
 0x63d   : > { %v2373_v38 = vmax.f32 %v2331_v30, 0.0  ;;  %2884 = vmatprep.subr.bf16.mxu0 %v4528_v44 }
 0x63e   : > { %v2371_v60 = vmax.f32 %v2323_v53, 0.0  ;;  %p5049_p1 = pnand %p5048_p12, %p5042_p8 }
 0x63f   : > { %v2385_v7 = vpack.c.bf16 %v2373_v38, %v2372_v15 }
 0x640   : > { %v2384_v3 = vpack.c.bf16 %v2371_v60, %v2370_v32  ;;  %2885 = vmatpush1.bf16.msra.mxu0 %v4526_v8 }
 0x642   : > { %4262 = vmatprep.mubr.bf16.mxu0 %v2384_v3 }
 0x643   : > { %4263 = vmatmul.mubr.bf16.gmra.mrb[36].mxu0 %v2385_v7 }
 0x655   : > { %v4236_v31 = vpop.f32.mrb[24].mxu0 }
 0x656   : > { %v2344_v28 = vadd.f32 %v4236_v31, %v3915_v41  ;;  %v2335_v22 = vpop.f32.mrb[25].mxu0 }
 0x657   : > { %v2336_v58 = vadd.f32 %v3915_v41, %v2335_v22  ;;  %v4237_v12 = vpop.f32.mrb[26].mxu0 }
 0x658   : > { %v2347_v34 = vadd.f32 %v4237_v12, %v3915_v41  ;;  %v2338_v10 = vpop.f32.mrb[27].mxu0  ;;  %v2376_v56 = vmax.f32 %v2344_v28, 0.0 }
 0x659   : > { %v2339_v39 = vadd.f32 %v3915_v41, %v2338_v10  ;;  %v2374_v47 = vmax.f32 %v2336_v58, 0.0 }
 0x65a   : > { %v2377_v62 = vmax.f32 %v2347_v34, 0.0 }
 0x65b   : > { %v2375_v1 = vmax.f32 %v2339_v39, 0.0 }
 0x65c   : > { %v2387_v55 = vpack.c.bf16 %v2377_v62, %v2376_v56 }
 0x65d   : > { %v2386_v37 = vpack.c.bf16 %v2375_v1, %v2374_v47 }
 0x65f   : > { %4266 = vmatprep.mubr.bf16.mxu0 %v2386_v37 }
 0x660   : > { %4267 = vmatmul.mubr.bf16.gmra.mrb[40].mxu0 %v2387_v55 }
 0x67a   : > { %v4240_v36 = vpop.f32.mrb[28].mxu0 }
 0x67b   : > { %v2360_v51 = vadd.f32 %v4240_v36, %v3915_v41  ;;  %v2351_v57 = vpop.f32.mrb[29].mxu0 }
 0x67c   : > { %v2352_v46 = vadd.f32 %v3915_v41, %v2351_v57  ;;  %v4241_v19 = vpop.f32.mrb[30].mxu0 }
 0x67d   : > { %v2363_v14 = vadd.f32 %v4241_v19, %v3915_v41  ;;  %v2354_v63 = vpop.f32.mrb[31].mxu0  ;;  %v2380_v26 = vmax.f32 %v2360_v51, 0.0 }
 0x67e   : > { %v2355_v21 = vadd.f32 %v3915_v41, %v2354_v63  ;;  %v2378_v33 = vmax.f32 %v2352_v46, 0.0  ;;  %v4531_v41 = vld [vmem:[#allocation17 + $0x24] ss:$8 sps:$4 sm:$0xff]  }
 0x67f   : > { %v2381_v18 = vmax.f32 %v2363_v14, 0.0  ;;  %2886 = vmatprep.subr.bf16.mxu0 %v4531_v41 }
 0x680   : > { %v2379_v9 = vmax.f32 %v2355_v21, 0.0  ;;  %2887 = vmatpush1.bf16.msra.mxu0 %v4529_v54 }
 0x681   : > { %v2389_v61 = vpack.c.bf16 %v2381_v18, %v2380_v26  ;;  %2888 = vmatprep.subr.bf16.mxu0 %v4534_v27 }
 0x682   : > { %v2388_v52 = vpack.c.bf16 %v2379_v9, %v2378_v33 }
 0x684   : > { %4270 = vmatprep.mubr.bf16.mxu0 %v2388_v52  ;;  %2889 = vmatpush1.bf16.msra.mxu0 %v4532_v29 }
 0x685   : > { %4271 = vmatmul.mubr.bf16.gmra.mrb[44].mxu0 %v2389_v61  ;;  %2890 = vmatprep.subr.bf16.mxu0 %v4537_v13 }
 0x686   : > { %2914 = vmatprep.mubr.bf16.mxu0 %v5177_v50 }
 0x688   : > { %2891 = vmatpush1.bf16.msra.mxu0 %v4535_v5  ;;  %v4541_v5 = vld [vmem:[#allocation17 + $0x60] ss:$8 sps:$4 sm:$0xff]  }
 0x689   : > { %2892 = vmatprep.subr.bf16.mxu0 %v4540_v0  ;;  %v4543_v0 = vld [vmem:[#allocation17 + $0x64] ss:$8 sps:$4 sm:$0xff]  }
 0x68c   : > { %2893 = vmatpush1.bf16.msra.mxu0 %v4538_v40  ;;  %v4544_v40 = vld [vmem:[#allocation17 + $0x70] ss:$8 sps:$4 sm:$0xff]  }
 0x68d   : > { %2894 = vmatprep.subr.bf16.mxu0 %v4543_v0  ;;  %v6476_v0 = vld [vmem:[%s7323_s19] sm:$0x3] }
 0x690   : > { %2895 = vmatpush1.bf16.msra.mxu0 %v4541_v5 }
 0x70e   : > { %v4260_v24 = vpop.f32.mrb[32].mxu0 }
 0x70f   : > { %v2504_v4 = vadd.f32 %v4260_v24, %v3924_v43  ;;  %v2495_v6 = vpop.f32.mrb[33].mxu0  ;;  %v4546_v24 = vld [vmem:[#allocation17 + $0x74] ss:$8 sps:$4 sm:$0xff]  }
 0x710   : > { %v2496_v2 = vadd.f32 %v3924_v43, %v2495_v6  ;;  %v4261_v35 = vpop.f32.mrb[34].mxu0  ;;  %2896 = vmatprep.subr.bf16.mxu0 %v4546_v24 }
 0x711   : > { %v2507_v23 = vadd.f32 %v4261_v35, %v3924_v43  ;;  %v2498_v16 = vpop.f32.mrb[35].mxu0  ;;  %v2560_v11 = vmax.f32 %v2504_v4, 0.0  ;;  %2897 = vmatpush1.bf16.msra.mxu0 %v4544_v40  ;;  %v6481_v40 = vrot.slane %v6476_v0, %v1429_v49 }
 0x712   : > { %v2499_v45 = vadd.f32 %v3924_v43, %v2498_v16  ;;  %v2558_v59 = vmax.f32 %v2496_v2, 0.0 }
 0x713   : > { %v2561_v30 = vmax.f32 %v2507_v23, 0.0 }
 0x714   : > { %v2559_v53 = vmax.f32 %v2499_v45, 0.0 }
 0x715   : > { %v2575_v15 = vpack.c.bf16 %v2561_v30, %v2560_v11 }
 0x716   : > { %v2574_v38 = vpack.c.bf16 %v2559_v53, %v2558_v59  ;;  %v4264_v32 = vpop.f32.mrb[36].mxu0 }
 0x717   : > { %v2520_v60 = vadd.f32 %v4264_v32, %v3924_v43  ;;  %v2511_v7 = vpop.f32.mrb[37].mxu0 }
 0x718   : > { %4290 = vmatprep.mubr.bf16.mxu1 %v2574_v38  ;;  %v2512_v3 = vadd.f32 %v3924_v43, %v2511_v7  ;;  %v4265_v31 = vpop.f32.mrb[38].mxu0 }
 0x719   : > { %4291 = vmatmul.mubr.bf16.vlgmr.msra.gmra.mrb[64].mxu1 %v2575_v15  ;;  %v2523_v28 = vadd.f32 %v4265_v31, %v3924_v43  ;;  %v2514_v22 = vpop.f32.mrb[39].mxu0  ;;  %v2564_v12 = vmax.f32 %v2520_v60, 0.0 }
 0x71a   : > { %v2515_v58 = vadd.f32 %v3924_v43, %v2514_v22  ;;  %v2562_v10 = vmax.f32 %v2512_v3, 0.0 }
 0x71b   : > { %v2565_v34 = vmax.f32 %v2523_v28, 0.0 }
 0x71c   : > { %v2563_v39 = vmax.f32 %v2515_v58, 0.0 }
 0x71d   : > { %v2577_v56 = vpack.c.bf16 %v2565_v34, %v2564_v12 }
 0x71e   : > { %v2576_v62 = vpack.c.bf16 %v2563_v39, %v2562_v10 }
 0x720   : > { %4294 = vmatprep.mubr.bf16.mxu1 %v2576_v62 }
 0x721   : > { %4295 = vmatmul.mubr.bf16.gmra.mrb[68].mxu1 %v2577_v56 }
 0x733   : > { %v4268_v47 = vpop.f32.mrb[40].mxu0 }
 0x734   : > { %v2536_v1 = vadd.f32 %v4268_v47, %v3924_v43  ;;  %v2527_v55 = vpop.f32.mrb[41].mxu0 }
 0x735   : > { %v2528_v37 = vadd.f32 %v3924_v43, %v2527_v55  ;;  %v4269_v36 = vpop.f32.mrb[42].mxu0 }
 0x736   : > { %v2539_v51 = vadd.f32 %v4269_v36, %v3924_v43  ;;  %v2530_v57 = vpop.f32.mrb[43].mxu0  ;;  %v2568_v19 = vmax.f32 %v2536_v1, 0.0 }
 0x737   : > { %v2531_v46 = vadd.f32 %v3924_v43, %v2530_v57  ;;  %v2566_v63 = vmax.f32 %v2528_v37, 0.0 }
 0x738   : > { %v2569_v14 = vmax.f32 %v2539_v51, 0.0 }
 0x739   : > { %v2567_v21 = vmax.f32 %v2531_v46, 0.0 }
 0x73a   : > { %v2579_v26 = vpack.c.bf16 %v2569_v14, %v2568_v19 }
 0x73b   : > { %v2578_v18 = vpack.c.bf16 %v2567_v21, %v2566_v63 }
 0x73d   : > { %4298 = vmatprep.mubr.bf16.mxu1 %v2578_v18 }
 0x73e   : > { %4299 = vmatmul.mubr.bf16.gmra.mrb[72].mxu1 %v2579_v26 }
 0x758   : > { %v4272_v33 = vpop.f32.mrb[44].mxu0 }
 0x759   : > { %v2552_v9 = vadd.f32 %v4272_v33, %v3924_v43  ;;  %v2543_v61 = vpop.f32.mrb[45].mxu0 }
 0x75a   : > { %v2544_v52 = vadd.f32 %v3924_v43, %v2543_v61  ;;  %v4273_v17 = vpop.f32.mrb[46].mxu0 }
 0x75b   : > { %v2555_v25 = vadd.f32 %v4273_v17, %v3924_v43  ;;  %v2546_v42 = vpop.f32.mrb[47].mxu0  ;;  %v2572_v8 = vmax.f32 %v2552_v9, 0.0 }
 0x75c   : > { %v2547_v44 = vadd.f32 %v3924_v43, %v2546_v42  ;;  %v2570_v54 = vmax.f32 %v2544_v52, 0.0  ;;  %v3933_v43 = vld [vmem:[%s7322_s17] ss:$0 sm:$0xff] }
 0x75d   : > { %v2573_v41 = vmax.f32 %v2555_v25, 0.0 }
 0x75e   : > { %v2571_v27 = vmax.f32 %v2547_v44, 0.0 }
 0x75f   : > { %v2581_v29 = vpack.c.bf16 %v2573_v41, %v2572_v8 }
 0x760   : > { %v2580_v13 = vpack.c.bf16 %v2571_v27, %v2570_v54 }
 0x762   : > { %4302 = vmatprep.mubr.bf16.mxu1 %v2580_v13 }
 0x763   : > { %4303 = vmatmul.mubr.bf16.gmra.mrb[76].mxu1 %v2581_v29 }
 0x7ec   : > { %v4292_v4 = vpop.f32.mrb[64].mxu1 }
 0x7ed   : > { %v2696_v6 = vadd.f32 %v4292_v4, %v3933_v43  ;;  %v2687_v2 = vpop.f32.mrb[65].mxu1 }
 0x7ee   : > { %v2688_v35 = vadd.f32 %v3933_v43, %v2687_v2  ;;  %v4293_v23 = vpop.f32.mrb[66].mxu1 }
 0x7ef   : > { %v2699_v16 = vadd.f32 %v4293_v23, %v3933_v43  ;;  %v2690_v45 = vpop.f32.mrb[67].mxu1  ;;  %v2752_v30 = vmax.f32 %v2696_v6, 0.0 }
 0x7f0   : > { %v2691_v11 = vadd.f32 %v3933_v43, %v2690_v45  ;;  %v2750_v53 = vmax.f32 %v2688_v35, 0.0 }
 0x7f1   : > { %v2753_v59 = vmax.f32 %v2699_v16, 0.0 }
 0x7f2   : > { %v2751_v15 = vmax.f32 %v2691_v11, 0.0 }
 0x7f3   : > { %v2767_v38 = vpack.c.bf16 %v2753_v59, %v2752_v30 }
 0x7f4   : > { %v2766_v32 = vpack.c.bf16 %v2751_v15, %v2750_v53  ;;  %v4296_v60 = vpop.f32.mrb[68].mxu1 }
 0x7f5   : > { %v2712_v7 = vadd.f32 %v4296_v60, %v3933_v43  ;;  %v2703_v3 = vpop.f32.mrb[69].mxu1 }
 0x7f6   : > { %2915 = vmatmul.mubr.bf16.vlgmr.msra.gmra.mrb[48].mxu0 %v2766_v32  ;;  %v2704_v31 = vadd.f32 %v3933_v43, %v2703_v3  ;;  %v4297_v28 = vpop.f32.mrb[70].mxu1 }
 0x7f7   : > { %2924 = vmatprep.mubr.bf16.mxu0 %v5177_v50  ;;  %v2715_v22 = vadd.f32 %v4297_v28, %v3933_v43  ;;  %v2706_v58 = vpop.f32.mrb[71].mxu1  ;;  %v2756_v34 = vmax.f32 %v2712_v7, 0.0 }
 0x7f8   : > { %v2707_v12 = vadd.f32 %v3933_v43, %v2706_v58  ;;  %v2754_v39 = vmax.f32 %v2704_v31, 0.0 }
 0x7f9   : > { %v2757_v10 = vmax.f32 %v2715_v22, 0.0 }
 0x7fa   : > { %v2755_v56 = vmax.f32 %v2707_v12, 0.0 }
 0x7fb   : > { %v2769_v62 = vpack.c.bf16 %v2757_v10, %v2756_v34 }
 0x7fc   : > { %v2768_v47 = vpack.c.bf16 %v2755_v56, %v2754_v39 }
 0x7fe   : > { %2925 = vmatmul.mubr.bf16.gmra.mrb[52].mxu0 %v2767_v38 }
 0x7ff   : > { %2934 = vmatprep.mubr.bf16.mxu0 %v5177_v50 }
 0x806   : > { %2935 = vmatmul.mubr.bf16.gmra.mrb[56].mxu0 %v2768_v47 }
 0x807   : > { %2944 = vmatprep.mubr.bf16.mxu0 %v5177_v50 }
 0x80e   : > { %2945 = vmatmul.mubr.bf16.gmra.mrb[60].mxu0 %v2769_v62 }
 0x80f   : > { %2954 = vmatprep.mubr.bf16.mxu0 %v5177_v50 }
 0x811   : > { %v4300_v1 = vpop.f32.mrb[72].mxu1 }
 0x812   : > { %v2728_v55 = vadd.f32 %v4300_v1, %v3933_v43  ;;  %v2719_v37 = vpop.f32.mrb[73].mxu1 }
 0x813   : > { %v2720_v36 = vadd.f32 %v3933_v43, %v2719_v37  ;;  %v4301_v51 = vpop.f32.mrb[74].mxu1 }
 0x814   : > { %v2731_v57 = vadd.f32 %v4301_v51, %v3933_v43  ;;  %v2722_v46 = vpop.f32.mrb[75].mxu1  ;;  %v2760_v14 = vmax.f32 %v2728_v55, 0.0 }
 0x815   : > { %v2723_v19 = vadd.f32 %v3933_v43, %v2722_v46  ;;  %v2758_v21 = vmax.f32 %v2720_v36, 0.0 }
 0x816   : > { %v2761_v63 = vmax.f32 %v2731_v57, 0.0 }
 0x817   : > { %v2759_v26 = vmax.f32 %v2723_v19, 0.0 }
 0x818   : > { %v2771_v18 = vpack.c.bf16 %v2761_v63, %v2760_v14 }
 0x819   : > { %v2770_v33 = vpack.c.bf16 %v2759_v26, %v2758_v21 }
 0x81b   : > { %2955 = vmatmul.mubr.bf16.gmra.mrb[64].mxu0 %v2770_v33 }
 0x81c   : > { %2964 = vmatprep.mubr.bf16.mxu0 %v5177_v50 }
 0x823   : > { %2965 = vmatmul.mubr.bf16.gmra.mrb[68].mxu0 %v2771_v18 }
 0x824   : > { %2974 = vmatprep.mubr.bf16.mxu0 %v5177_v50 }
 0x836   : > { %v4304_v9 = vpop.f32.mrb[76].mxu1 }
 0x837   : > { %v2744_v61 = vadd.f32 %v4304_v9, %v3933_v43  ;;  %v2735_v52 = vpop.f32.mrb[77].mxu1 }
 0x838   : > { %v2736_v17 = vadd.f32 %v3933_v43, %v2735_v52  ;;  %v4305_v25 = vpop.f32.mrb[78].mxu1 }
 0x839   : > { %v2747_v42 = vadd.f32 %v4305_v25, %v3933_v43  ;;  %v2738_v44 = vpop.f32.mrb[79].mxu1  ;;  %v2764_v41 = vmax.f32 %v2744_v61, 0.0 }
 0x83a   : > { %v2739_v8 = vadd.f32 %v3933_v43, %v2738_v44  ;;  %v2762_v27 = vmax.f32 %v2736_v17, 0.0 }
 0x83b   : > { %v2765_v54 = vmax.f32 %v2747_v42, 0.0  ;;  %v7324_v42 = vsub.s32 1, %v5715_v48 }
 0x83c   : > { %v2763_v29 = vmax.f32 %v2739_v8, 0.0 }
 0x83d   : > { %v2773_v13 = vpack.c.bf16 %v2765_v54, %v2764_v41  ;;  %v6548_v44 = vrot.slane %v6476_v0, %v7324_v42 }
 0x83e   : > { %v2772_v5 = vpack.c.bf16 %v2763_v29, %v2762_v27 }
 0x840   : > { %2975 = vmatmul.mubr.bf16.gmra.mrb[72].mxu0 %v2772_v5 }
 0x841   : > { %2984 = vmatprep.mubr.bf16.mxu0 %v5177_v50 }
 0x848   : > { %2985 = vmatmul.mubr.bf16.gmra.mrb[76].mxu0 %v2773_v13 }
 0x8c9   : > { %v2916_v24 = vpop.f32.mrb[48].mxu0 }
 0x8ca   : > { %v2917_v43 = vadd.f32 %v2916_v24, %v6481_v40  ;;  %v6484_v4 = vpop.f32.mrb[49].mxu0 }
 0x8cb   : > { %v2920_v6 = vpop.f32.mrb[50].mxu0 }
 0x8cc   : > { %v6486_v2 = vmul.f32 0.2, %v2917_v43  ;;  %v2921_v50 = vadd.f32 %v2920_v6, %v6481_v40  ;;  %v6489_v35 = vpop.f32.mrb[51].mxu0 }
 0x8ce   : > { %v3011_v23 = vand.u32 2147483647, %v6486_v2  ;;  %v6492_v16 = vmul.f32 0.2, %v2921_v50  ;;  %vm3411_vm9 = vcmp.lt.f32.partialorder %v6486_v2, 0.0 }
 0x8d0   : > { %v3059_v45 = vmax.f32 %v3011_v23, 1e-30  ;;  %v3123_v11 = vadd.f32 1.0, %v3011_v23  ;;  %v6495_v49 = vand.u32 2147483647, %v6492_v16  ;;  %v3958_v56 = vadd.f32 -1.0, %v3011_v23 }
 0x8d1   : > { %v2926_v30 = vpop.f32.mrb[52].mxu0  ;;  %vm3043_vm0 = vcmp.gt.f32.partialorder %v3011_v23, 0.41421357  ;;  %vm3027_vm1 = vcmp.gt.f32.partialorder %v3011_v23, 2.4142137  ;;  %vm3412_vm11 = vcmp.lt.f32.partialorder %v6492_v16, 0.0 }
 0x8d2   : > { %4643 = vrcp.f32 %v3059_v45  ;;  %v3060_v59 = vmax.f32 %v6495_v49, 1e-30  ;;  %v3124_v53 = vadd.f32 1.0, %v6495_v49  ;;  %v2927_v15 = vadd.f32 %v2926_v30, %v6481_v40  ;;  %v6500_v38 = vpop.f32.mrb[53].mxu0 }
 0x8d3   : > { %4645 = vrcp.f32 %v3123_v11  ;;  %v2930_v32 = vpop.f32.mrb[54].mxu0  ;;  %v3203_v62 = vsel %vm3043_vm0, 0.7853982, %v5178_v20  ;;  %v3959_v21 = vadd.f32 -1.0, %v6495_v49  ;;  %vm3044_vm2 = vcmp.gt.f32.partialorder %v6495_v49, 0.41421357 }
 0x8d4   : > { %4647 = vrcp.f32 %v3060_v59  ;;  %v6502_v60 = vmul.f32 0.2, %v2927_v15  ;;  %v2931_v7 = vadd.f32 %v2930_v32, %v6481_v40  ;;  %v6505_v3 = vpop.f32.mrb[55].mxu0  ;;  %v6529_v63 = vsel %vm3027_vm1, 1.5707964, %v3203_v62 }
 0x8d5   : > { %4649 = vrcp.f32 %v3124_v53  ;;  %vm3028_vm3 = vcmp.gt.f32.partialorder %v6495_v49, 2.4142137  ;;  %v3204_v27 = vsel %vm3044_vm2, 0.7853982, %v5178_v20  ;;  %v6585_v15 = vadd.f32 %v6484_v4, %v6548_v44 }
 0x8d6   : > { %v6508_v31 = vand.u32 2147483647, %v6502_v60  ;;  %v6510_v28 = vmul.f32 0.2, %v2931_v7  ;;  %v6579_v11 = vsel %vm3028_vm3, 1.5707964, %v3204_v27  ;;  %v6599_v4 = vadd.f32 %v6489_v35, %v6548_v44 }
 0x8d7   : > { %vm3413_vm14 = vcmp.lt.f32.partialorder %v6502_v60, 0.0 }
 0x8d8   : > { %v3061_v58 = vmax.f32 %v6508_v31, 1e-30  ;;  %v3125_v34 = vadd.f32 1.0, %v6508_v31  ;;  %v6516_v10 = vand.u32 2147483647, %v6510_v28  ;;  %v3960_v30 = vadd.f32 -1.0, %v6508_v31 }
 0x8d9   : > { %v2936_v22 = vpop.f32.mrb[56].mxu0  ;;  %vm3045_vm4 = vcmp.gt.f32.partialorder %v6508_v31, 0.41421357  ;;  %vm3029_vm5 = vcmp.gt.f32.partialorder %v6508_v31, 2.4142137  ;;  %vm3414_vm15 = vcmp.lt.f32.partialorder %v6510_v28, 0.0 }
 0x8da   : > { %v2937_v12 = vadd.f32 %v2936_v22, %v6481_v40  ;;  %4651 = vrcp.f32 %v3061_v58  ;;  %v6522_v1 = vpop.f32.mrb[57].mxu0  ;;  %v3062_v57 = vmax.f32 %v6516_v10, 1e-30  ;;  %v3126_v46 = vadd.f32 1.0, %v6516_v10 }
 0x8db   : > { %4653 = vrcp.f32 %v3125_v34  ;;  %v2940_v36 = vpop.f32.mrb[58].mxu0  ;;  %v3205_v6 = vsel %vm3045_vm4, 0.7853982, %v5178_v20  ;;  %vm3030_vm6 = vcmp.gt.f32.partialorder %v6516_v10, 2.4142137 }
 0x8dc   : > { %v4644_v39 = vpop.eup %4643  ;;  %v6520_v47 = vmul.f32 0.2, %v2937_v12  ;;  %v6526_v19 = vpop.f32.mrb[59].mxu0  ;;  %4655 = vrcp.f32 %v3062_v57  ;;  %v2941_v13 = vadd.f32 %v2940_v36, %v6481_v40  ;;  %v6594_v12 = vsel %vm3029_vm5, 1.5707964, %v3205_v6 }
 0x8dd   : > { %v4646_v55 = vpop.eup %4645  ;;  %v3076_v37 = vmul.f32 -1.0, %v4644_v39  ;;  %4657 = vrcp.f32 %v3126_v46  ;;  %vm3046_vm7 = vcmp.gt.f32.partialorder %v6516_v10, 0.41421357 }
 0x8de   : > { %v3140_v51 = vmul.f32 %v4646_v55, %v3958_v56  ;;  %v4648_v14 = vpop.eup %4647  ;;  %v6533_v26 = vand.u32 2147483647, %v6520_v47  ;;  %v6575_v50 = vmul.f32 0.2, %v2941_v13 }
 0x8df   : > { %v4650_v18 = vpop.eup %4649  ;;  %v3078_v9 = vmul.f32 -1.0, %v4648_v14 }
 0x8e0   : > { %v3171_v33 = vsel %vm3043_vm0, %v3140_v51, %v3011_v23  ;;  %v3142_v52 = vmul.f32 %v4650_v18, %v3959_v21  ;;  %v3063_v8 = vmax.f32 %v6533_v26, 1e-30  ;;  %v3127_v29 = vadd.f32 1.0, %v6533_v26 }
 0x8e1   : > { %v6538_v61 = vsel %vm3027_vm1, %v3076_v37, %v3171_v33  ;;  %v2946_v17 = vpop.f32.mrb[60].mxu0  ;;  %v6589_v22 = vand.u32 2147483647, %v6575_v50  ;;  %v3961_v37 = vadd.f32 -1.0, %v6516_v10  ;;  %vm3031_vm8 = vcmp.gt.f32.partialorder %v6533_v26, 2.4142137 }
 0x8e2   : > { %v6543_v25 = vmul.f32 %v6538_v61, %v6538_v61  ;;  %v6552_v41 = vpop.f32.mrb[61].mxu0  ;;  %v3172_v54 = vsel %vm3044_vm2, %v3142_v52, %v6495_v49  ;;  %4659 = vrcp.f32 %v3063_v8  ;;  %v2947_v59 = vadd.f32 %v2946_v17, %v6481_v40 }
 0x8e3   : > { %v6558_v5 = vpop.f32.mrb[62].mxu0  ;;  %v6563_v0 = vsel %vm3028_vm3, %v3078_v9, %v3172_v54  ;;  %4661 = vrcp.f32 %v3127_v29  ;;  %v3064_v36 = vmax.f32 %v6589_v22, 1e-30  ;;  %v3128_v21 = vadd.f32 1.0, %v6589_v22 }
 0x8e4   : > { %v3251_v48 = vmul.f32 0.080537446, %v6543_v25  ;;  %v6566_v24 = vpop.f32.mrb[63].mxu0  ;;  %v6570_v43 = vmul.f32 %v6563_v0, %v6563_v0  ;;  %v4652_v23 = vpop.eup %4651  ;;  %v6602_v39 = vmul.f32 0.2, %v2947_v59  ;;  %vm3415_vm2 = vcmp.lt.f32.partialorder %v6520_v47, 0.0 }
 0x8e5   : > { %v4654_v53 = vpop.eup %4653  ;;  %v3080_v7 = vmul.f32 -1.0, %v4652_v23  ;;  %4663 = vrcp.f32 %v3064_v36  ;;  %vm3047_vm10 = vcmp.gt.f32.partialorder %v6533_v26, 0.41421357  ;;  %vm3032_vm12 = vcmp.gt.f32.partialorder %v6589_v22, 2.4142137 }
 0x8e6   : > { %v3974_v45 = vadd.f32 -0.13877685, %v3251_v48  ;;  %v3252_v32 = vmul.f32 0.080537446, %v6570_v43  ;;  %v3144_v49 = vmul.f32 %v4654_v53, %v3960_v30  ;;  %v4656_v56 = vpop.eup %4655  ;;  %4665 = vrcp.f32 %v3128_v21 }
 0x8e7   : > { %v4658_v57 = vpop.eup %4657  ;;  %v3082_v14 = vmul.f32 -1.0, %v4656_v56  ;;  %v6630_v8 = vand.u32 2147483647, %v6602_v39  ;;  %v3962_v48 = vadd.f32 -1.0, %v6533_v26  ;;  %v2951_v56 = vadd.f32 %v6558_v5, %v6481_v40 }
 0x8e8   : > { %v3283_v58 = vmul.f32 %v3974_v45, %v6543_v25  ;;  %v3975_v34 = vadd.f32 -0.13877685, %v3252_v32  ;;  %v3173_v55 = vsel %vm3045_vm4, %v3144_v49, %v6508_v31  ;;  %v3146_v52 = vmul.f32 %v4658_v57, %v3961_v37 }
 0x8e9   : > { %v6614_v46 = vsel %vm3029_vm5, %v3080_v7, %v3173_v55  ;;  %v3206_v31 = vsel %vm3046_vm7, 0.7853982, %v5178_v20  ;;  %vm3048_vm13 = vcmp.gt.f32.partialorder %v6589_v22, 0.41421357  ;;  %vm3033_vm0 = vcmp.gt.f32.partialorder %v6630_v8, 2.4142137 }
 0x8ea   : > { %v3299_v62 = vadd.f32 0.19977711, %v3283_v58  ;;  %v3284_v35 = vmul.f32 %v3975_v34, %v6570_v43  ;;  %v6622_v9 = vmul.f32 %v6614_v46, %v6614_v46  ;;  %v3174_v13 = vsel %vm3046_vm7, %v3146_v52, %v6516_v10 }
 0x8eb   : > { %v6640_v45 = vsel %vm3030_vm6, %v3082_v14, %v3174_v13  ;;  %v3065_v34 = vmax.f32 %v6630_v8, 1e-30  ;;  %vm3049_vm1 = vcmp.gt.f32.partialorder %v6630_v8, 0.41421357 }
 0x8ec   : > { %v3315_v33 = vmul.f32 %v3299_v62, %v6543_v25  ;;  %v3300_v42 = vadd.f32 0.19977711, %v3284_v35  ;;  %v4660_v54 = vpop.eup %4659  ;;  %v3253_v29 = vmul.f32 0.080537446, %v6622_v9  ;;  %v6648_v7 = vmul.f32 %v6640_v45, %v6640_v45 }
 0x8ed   : > { %v4662_v6 = vpop.eup %4661  ;;  %v3084_v30 = vmul.f32 -1.0, %v4660_v54  ;;  %v6666_v35 = vsel %vm3030_vm6, 1.5707964, %v3206_v31  ;;  %4667 = vrcp.f32 %v3065_v34  ;;  %v3963_v31 = vadd.f32 -1.0, %v6589_v22 }
 0x8ee   : > { %v6609_v51 = vpop.f32.mrb[64].mxu0  ;;  %v3990_v27 = vadd.f32 -0.3333295, %v3315_v33  ;;  %v3316_v23 = vmul.f32 %v3300_v42, %v6570_v43  ;;  %v3976_v32 = vadd.f32 -0.13877685, %v3253_v29  ;;  %v3148_v58 = vmul.f32 %v4662_v6, %v3962_v48 }
 0x8ef   : > { %v6617_v18 = vpop.f32.mrb[65].mxu0  ;;  %v3254_v55 = vmul.f32 0.080537446, %v6648_v7  ;;  %v3129_v54 = vadd.f32 1.0, %v6630_v8 }
 0x8f0   : > { %v6624_v17 = vpop.f32.mrb[66].mxu0  ;;  %v3347_v53 = vmul.f32 %v3990_v27, %v6543_v25  ;;  %v3991_v49 = vadd.f32 -0.3333295, %v3316_v23  ;;  %v3285_v25 = vmul.f32 %v3976_v32, %v6622_v9  ;;  %v3175_v37 = vsel %vm3047_vm10, %v3148_v58, %v6533_v26 }
 0x8f1   : > { %v6643_v59 = vpop.f32.mrb[67].mxu0  ;;  %v6670_v5 = vsel %vm3031_vm8, %v3084_v30, %v3175_v37  ;;  %v3977_v52 = vadd.f32 -0.13877685, %v3254_v55  ;;  %v6685_v27 = vmul.f32 0.2, %v2951_v56  ;;  %4669 = vrcp.f32 %v3129_v54 }
 0x8f2   : > { %v3363_v62 = vmul.f32 %v3347_v53, %v6538_v61  ;;  %v3348_v57 = vmul.f32 %v3991_v49, %v6570_v43  ;;  %v3301_v33 = vadd.f32 0.19977711, %v3285_v25  ;;  %v6678_v43 = vmul.f32 %v6670_v5, %v6670_v5 }
 0x8f3   : > { %v3286_v6 = vmul.f32 %v3977_v52, %v6648_v7  ;;  %v6698_v25 = vand.u32 2147483647, %v6685_v27 }
 0x8f4   : > { %v3379_v21 = vadd.f32 %v3363_v62, %v6538_v61  ;;  %v3364_v42 = vmul.f32 %v3348_v57, %v6563_v0  ;;  %v4664_v61 = vpop.eup %4663  ;;  %v3317_v48 = vmul.f32 %v3301_v33, %v6622_v9  ;;  %v3255_v23 = vmul.f32 0.080537446, %v6678_v43 }
 0x8f5   : > { %v4666_v30 = vpop.eup %4665  ;;  %v3086_v32 = vmul.f32 -1.0, %v4664_v61  ;;  %v3302_v34 = vadd.f32 0.19977711, %v3286_v6  ;;  %v2957_v6 = vadd.f32 %v6609_v51, %v6481_v40  ;;  %v3066_v16 = vmax.f32 %v6698_v25, 1e-30 }
 0x8f6   : > { %v6661_v36 = vpop.f32.mrb[68].mxu0  ;;  %v3395_v13 = vadd.f32 %v3379_v21, %v6529_v63  ;;  %v3380_v53 = vadd.f32 %v3364_v42, %v6563_v0  ;;  %v3992_v49 = vadd.f32 -0.3333295, %v3317_v48  ;;  %v3150_v56 = vmul.f32 %v4666_v30, %v3963_v31 }
 0x8f7   : > { %v6672_v14 = vpop.f32.mrb[69].mxu0  ;;  %v3978_v63 = vadd.f32 -0.13877685, %v3255_v23  ;;  %v3318_v37 = vmul.f32 %v3302_v34, %v6648_v7  ;;  %v4668_v54 = vpop.eup %4667 }
 0x8f8   : > { %v6680_v10 = vpop.f32.mrb[70].mxu0  ;;  %v3427_v58 = vsub.f32 0.0, %v3395_v13  ;;  %v3396_v62 = vadd.f32 %v3380_v53, %v6579_v11  ;;  %v3349_v0 = vmul.f32 %v3992_v49, %v6622_v9  ;;  %v3176_v57 = vsel %vm3048_vm13, %v3150_v56, %v6589_v22 }
 0x8f9   : > { %v6687_v29 = vpop.f32.mrb[71].mxu0  ;;  %v3287_v11 = vmul.f32 %v3978_v63, %v6678_v43  ;;  %v6711_v52 = vsel %vm3032_vm12, %v3086_v32, %v3176_v57  ;;  %v3993_v42 = vadd.f32 -0.3333295, %v3318_v37  ;;  %v3207_v9 = vsel %vm3047_vm10, 0.7853982, %v5178_v20 }
 0x8fa   : > { %v3443_v55 = vsel %vm3411_vm9, %v3427_v58, %v3395_v13  ;;  %v3428_v33 = vsub.f32 0.0, %v3396_v62  ;;  %v3365_v2 = vmul.f32 %v3349_v0, %v6614_v46  ;;  %v3240_v31 = vmul.f32 %v6711_v52, %v6711_v52 }
 0x8fb   : > { %v3459_v21 = vmul.f32 3.18, %v3443_v55  ;;  %v3303_v48 = vadd.f32 0.19977711, %v3287_v11  ;;  %v3350_v53 = vmul.f32 %v3993_v42, %v6648_v7  ;;  %v3964_v49 = vadd.f32 -1.0, %v6630_v8  ;;  %v4670_v63 = vpop.eup %4669 }
 0x8fc   : > { %v3444_v13 = vsel %vm3412_vm11, %v3428_v33, %v3396_v62  ;;  %v3381_v30 = vadd.f32 %v3365_v2, %v6614_v46  ;;  %v3256_v32 = vmul.f32 0.080537446, %v3240_v31  ;;  %v3088_v55 = vmul.f32 -1.0, %v4668_v54 }
 0x8fd   : > { %v3475_v61 = vmul.f32 1.442695, %v3459_v21  ;;  %v3460_v23 = vmul.f32 3.18, %v3444_v13  ;;  %v3319_v58 = vmul.f32 %v3303_v48, %v6678_v43  ;;  %v3366_v51 = vmul.f32 %v3350_v53, %v6640_v45 }
 0x8fe   : > { %v3397_v56 = vadd.f32 %v3381_v30, %v6594_v12  ;;  %v3979_v62 = vadd.f32 -0.13877685, %v3256_v32  ;;  %v3130_v7 = vadd.f32 1.0, %v6698_v25  ;;  %v3152_v33 = vmul.f32 %v4670_v63, %v3964_v49 }
 0x8ff   : > { %4671 = vpow2.f32 %v3475_v61  ;;  %v3477_v34 = vmul.f32 1.442695, %v3460_v23  ;;  %v3994_v46 = vadd.f32 -0.3333295, %v3319_v58  ;;  %v3382_v37 = vadd.f32 %v3366_v51, %v6640_v45 }
 0x900   : > { %4673 = vrcp.f32 %v3066_v16  ;;  %v3429_v0 = vsub.f32 0.0, %v3397_v56  ;;  %v3288_v57 = vmul.f32 %v3979_v62, %v3240_v31  ;;  %v3177_v45 = vsel %vm3049_vm1, %v3152_v33, %v6630_v8  ;;  %v4740_v33 = vld [vmem:[%s5656_s15 + $0x8] sm:$0xff] }
 0x901   : > { %4675 = vpow2.f32 %v3477_v34  ;;  %v3351_v21 = vmul.f32 %v3994_v46, %v6678_v43  ;;  %v3398_v11 = vadd.f32 %v3382_v37, %v6666_v35  ;;  %v6743_v43 = vmul.f32 0.2, %v2957_v6 }
 0x902   : > { %4677 = vrcp.f32 %v3130_v7  ;;  %v3445_v12 = vsel %vm3413_vm14, %v3429_v0, %v3397_v56  ;;  %v3304_v2 = vadd.f32 0.19977711, %v3288_v57  ;;  %v6748_v35 = vsel %vm3033_vm0, %v3088_v55, %v3177_v45  ;;  %v4739_v56 = vld [vmem:[%s5656_s15] sm:$0xff] }
 0x903   : > { %v3461_v42 = vmul.f32 3.18, %v3445_v12  ;;  %v3367_v54 = vmul.f32 %v3351_v21, %v6670_v5  ;;  %v3430_v61 = vsub.f32 0.0, %v3398_v11  ;;  %v3208_v23 = vsel %vm3048_vm13, 0.7853982, %v5178_v20 }
 0x904   : > { %v3320_v60 = vmul.f32 %v3304_v2, %v3240_v31  ;;  %v6756_v6 = vmul.f32 %v6748_v35, %v6748_v35  ;;  %v3223_v53 = vsel %vm3031_vm8, 1.5707964, %v3207_v9  ;;  %v6763_v58 = vand.u32 2147483647, %v6743_v43 }
 0x905   : > { %v3479_v13 = vmul.f32 1.442695, %v3461_v42  ;;  %v3383_v48 = vadd.f32 %v3367_v54, %v6670_v5  ;;  %v3446_v30 = vsel %vm3414_vm15, %v3430_v61, %v3398_v11  ;;  %v6770_v28 = vsel %vm3032_vm12, 1.5707964, %v3208_v23 }
 0x906   : > { %v3995_v32 = vadd.f32 -0.3333295, %v3320_v60  ;;  %v3462_v49 = vmul.f32 3.18, %v3446_v30  ;;  %v3257_v34 = vmul.f32 0.080537446, %v6756_v6  ;;  %v6783_v22 = vadd.f32 %v6624_v17, %v6481_v40 }
 0x907   : > { %4679 = vpow2.f32 %v3479_v13  ;;  %v3399_v16 = vadd.f32 %v3383_v48, %v3223_v53  ;;  %v3965_v9 = vadd.f32 -1.0, %v6698_v25  ;;  %v3067_v57 = vmax.f32 %v6763_v58, 1e-30 }
 0x908   : > { %v3352_v26 = vmul.f32 %v3995_v32, %v3240_v31  ;;  %v3481_v63 = vmul.f32 1.442695, %v3462_v49  ;;  %v3980_v55 = vadd.f32 -0.13877685, %v3257_v34 }
 0x909   : > { %v4672_v5 = vpop.eup %4671  ;;  %v3431_v46 = vsub.f32 0.0, %v3399_v16 }
 0x90a   : > { %v3507_v51 = vmul.f32 %v4739_v56, %v4672_v5  ;;  %v4674_v62 = vpop.eup %4673  ;;  %v3368_v0 = vmul.f32 %v3352_v26, %v6711_v52  ;;  %4681 = vpow2.f32 %v3481_v63  ;;  %v3289_v11 = vmul.f32 %v3980_v55, %v6756_v6 }
 0x90b   : > { %v4676_v31 = vpop.eup %4675  ;;  %v3090_v37 = vmul.f32 -1.0, %v4674_v62  ;;  %v3447_v17 = vsel %vm3415_vm2, %v3431_v46, %v3399_v16 }
 0x90c   : > { %v3523_v7 = vadd.f32 %v3507_v51, %v6585_v15  ;;  %v4678_v21 = vpop.eup %4677  ;;  %v3508_v12 = vmul.f32 %v4740_v33, %v4676_v31 }
 0x90d   : > { %5052 = shalt.err (!%p5049_p1)
}
 0x90e   : > { %s5053_s17 = scalar_lea.hbm %s6778_s23, 2048  ;;  %s5057_s19 = scalar_lea.hbm %s7325_s10, 4096 }
 0x90f   : > { %p5054_p13 = scmp.ne.s32.totalorder %s6778_s23, %s5053_s17  ;;  %p5058_p2 = scmp.lt.u32.totalorder %s6778_s23, %s7325_s10 }
 0x910   : > { %p5059_p4 = scmp.lt.u32.totalorder %s5057_s19, %s5053_s17  ;;  %p5061_p5 = scmp.lt.u32.totalorder %s5053_s17, %s6778_s23 }
 0x911   : > { %p5055_p0 = pnand %p5054_p13, %p7326_p7 }
 0x912   : > { %p5060_p10 = por %p5059_p4, %p5058_p2 }
 0x913   : > { %p5056_p6 = pneg %p5055_p0 }
 0x914   : > { %p5062_p9 = por %p5061_p5, %p5060_p10 }
 0x916   : > { %p5063_p8 = pnand %p5062_p9, %p5056_p6 }
 0x918   : > { %5066 = shalt.err (!%p5063_p8)
}
 0x919   : > { %s5180_s27 = smov 128   ;;  %s5181_s3 = smov 8   ;;  %v3463_v47 = vmul.f32 3.18, %v3447_v17  ;;  %v3384_v15 = vadd.f32 %v3368_v0, %v6711_v52  ;;  %v3154_v2 = vmul.f32 %v4678_v21, %v3965_v9  ;;  %4683 = vrcp.f32 %v3067_v57  ;;  %v6826_v42 = vpop.f32.mrb[72].mxu0  ;;  %v4680_v16 = vpop.eup %4679 }
 0x91a   : > { %4342 = dma.vmem_to_hbm [thread:$0]  (%p7326_p7), %s6785_s4, 2048, %s6778_s23, %s3556_s29, %s5180_s27, %s5180_s27, %s5181_s3   ;;  %v3524_v54 = vadd.f32 %v3508_v12, %v6599_v4  ;;  %v3305_v45 = vadd.f32 0.19977711, %v3289_v11  ;;  %vm3050_vm3 = vcmp.gt.f32.partialorder %v6698_v25, 0.41421357  ;;  %v3131_v61 = vadd.f32 1.0, %v6763_v58  ;;  %v4682_v0 = vpop.eup %4681 }
 0x91b   : > { %s6822_s6 = scalar_lea.vmem [#allocation20], %s5644_s25  ;;  %v6831_v60 = vpop.f32.mrb[73].mxu0  ;;  %v3483_v13 = vmul.f32 1.442695, %v3463_v47  ;;  %v3400_v48 = vadd.f32 %v3384_v15, %v6770_v28  ;;  %v3178_v52 = vsel %vm3050_vm3, %v3154_v2, %v6698_v25  ;;  %vm3416_vm5 = vcmp.lt.f32.partialorder %v6575_v50, 0.0  ;;  %v4741_v28 = vld [vmem:[%s5656_s15 + $0x10] sm:$0xff] }
 0x91c   : > { %3539 = vst [vmem:[%s6822_s6] sm:$0xff] %v3523_v7  ;;  %vm3034_vm4 = vcmp.gt.f32.partialorder %v6698_v25, 2.4142137  ;;  %v6838_v23 = vpop.f32.mrb[74].mxu0  ;;  %3540 = vst [vmem:[%s6822_s6 + $0x8] sm:$0xff] %v3524_v54  ;;  %v3321_v4 = vmul.f32 %v3305_v45, %v6756_v6  ;;  %4685 = vrcp.f32 %v3131_v61  ;;  %v6847_v53 = vmul.f32 0.2, %v6783_v22 }
 0x91d   : > { %v6844_v30 = vsel %vm3034_vm4, %v3090_v37, %v3178_v52  ;;  %v6849_v32 = vpop.f32.mrb[75].mxu0  ;;  %4687 = vpow2.f32 %v3483_v13  ;;  %v3432_v5 = vsub.f32 0.0, %v3400_v48  ;;  %v2929_v51 = vadd.f32 %v6500_v38, %v6548_v44  ;;  %s3590_s25 = sshll.u32 %s6822_s6, 4  ;;  %s7327_s29 = sld [smem:[#allocation48_spill]]  ;;  %s7180_s25 = int_to_ptr.vmem [resolvable:$true] %s3590_s25 }
 0x91e   : > { %v6853_v49 = vmul.f32 %v6844_v30, %v6844_v30  ;;  %v3996_v34 = vadd.f32 -0.3333295, %v3321_v4  ;;  %v6857_v56 = vand.u32 2147483647, %v6847_v53  ;;  %v3509_v26 = vmul.f32 %v4741_v28, %v4680_v16  ;;  %v6870_v7 = vpop.f32.mrb[76].mxu0  ;;  %v4743_v28 = vld [vmem:[%s5656_s15 + $0x20] sm:$0xff] }
 0x91f   : > { %v3448_v9 = vsel %vm3416_vm5, %v3432_v5, %v3400_v48  ;;  %v3209_v46 = vsel %vm3049_vm1, 0.7853982, %v5178_v20  ;;  %v2967_v55 = vadd.f32 %v6661_v36, %v6481_v40  ;;  %v2933_v37 = vadd.f32 %v6505_v3, %v6548_v44  ;;  %v6876_v12 = vpop.f32.mrb[77].mxu0  ;;  %v4742_v36 = vld [vmem:[%s5656_s15 + $0x18] sm:$0xff]  ;;  %s3561_s17 = scalar_lea.sflag [#allocation21], %s5641_s7  ;;  %s5067_s18 = scalar_lea.vmem %s7180_s25, 2048 }
 0x920   : > { %v3258_v62 = vmul.f32 0.080537446, %v6853_v49  ;;  %v3464_v63 = vmul.f32 3.18, %v3448_v9  ;;  %v3353_v50 = vmul.f32 %v3996_v34, %v6756_v6  ;;  %v3525_v22 = vadd.f32 %v3509_v26, %v2929_v51  ;;  %v6883_v15 = vpop.f32.mrb[78].mxu0  ;;  %p5068_p11 = scmp.ne.s32.totalorder %s7180_s25, %s5067_s18 }
 0x921   : > { %v3068_v38 = vmax.f32 %v6857_v56, 1e-30  ;;  %v3132_v33 = vadd.f32 1.0, %v6857_v56  ;;  %v3510_v17 = vmul.f32 %v4742_v36, %v4682_v0  ;;  %v3225_v11 = vsel %vm3033_vm0, 1.5707964, %v3209_v46  ;;  %v6889_v45 = vpop.f32.mrb[79].mxu0 }
 0x922   : > { %v3981_v31 = vadd.f32 -0.13877685, %v3258_v62  ;;  %v3485_v57 = vmul.f32 1.442695, %v3464_v63  ;;  %v3369_v21 = vmul.f32 %v3353_v50, %v6748_v35  ;;  %3541 = vst [vmem:[%s6822_s6 + $0x10] sm:$0xff] %v3525_v22  ;;  %v3966_v2 = vadd.f32 -1.0, %v6763_v58  ;;  %p5069_p3 = pnand %p5068_p11, %p7326_p7 }
 0x923   : > { %v4684_v6 = vpop.eup %4683  ;;  %4689 = vrcp.f32 %v3068_v38  ;;  %v6887_v54 = vmul.f32 0.2, %v2967_v55  ;;  %v3526_v61 = vadd.f32 %v3510_v17, %v2933_v37  ;;  %v2971_v8 = vadd.f32 %v6680_v10, %v6481_v40  ;;  %s7178_s14 = scalar_lea.hbm %s7327_s29, %s4016_s9 }
 0x924   : > { %v3290_v47 = vmul.f32 %v3981_v31, %v6853_v49  ;;  %4691 = vpow2.f32 %v3485_v57  ;;  %v3385_v3 = vadd.f32 %v3369_v21, %v6748_v35  ;;  %v3092_v4 = vmul.f32 -1.0, %v4684_v6  ;;  %p5070_p12 = pneg %p5069_p3 }
 0x925   : > { %4693 = vrcp.f32 %v3132_v33  ;;  %v6894_v5 = vand.u32 2147483647, %v6887_v54  ;;  %3542 = vst [vmem:[%s6822_s6 + $0x18] sm:$0xff] %v3526_v61  ;;  %v2939_v16 = vadd.f32 %v6522_v1, %v6548_v44  ;;  %vm3417_vm6 = vcmp.lt.f32.partialorder %v6602_v39, 0.0 }
 0x926   : > { %v3306_v13 = vadd.f32 0.19977711, %v3290_v47  ;;  %v4686_v48 = vpop.eup %4685  ;;  %v3401_v52 = vadd.f32 %v3385_v3, %v3225_v11  ;;  %vm3051_vm7 = vcmp.gt.f32.partialorder %v6763_v58, 0.41421357  ;;  %v6903_v9 = vmul.f32 0.2, %v2971_v8 }
 0x927   : > { %v4688_v35 = vpop.eup %4687  ;;  %v3156_v51 = vmul.f32 %v4686_v48, %v3966_v2  ;;  %vm3035_vm8 = vcmp.gt.f32.partialorder %v6763_v58, 2.4142137  ;;  %v3069_v39 = vmax.f32 %v6894_v5, 1e-30  ;;  %v3133_v55 = vadd.f32 1.0, %v6894_v5  ;;  %v4744_v2 = vld [vmem:[%s5656_s15 + $0x28] sm:$0xff] }
 0x928   : > { %v3322_v34 = vmul.f32 %v3306_v13, %v6853_v49  ;;  %v3511_v26 = vmul.f32 %v4743_v28, %v4688_v35  ;;  %v3433_v10 = vsub.f32 0.0, %v3401_v52  ;;  %v2943_v0 = vadd.f32 %v6526_v19, %v6548_v44 }
 0x929   : > { %v3179_v1 = vsel %vm3051_vm7, %v3156_v51, %v6763_v58  ;;  %4695 = vrcp.f32 %v3069_v39  ;;  %v6922_v37 = vand.u32 2147483647, %v6903_v9  ;;  %v3210_v33 = vsel %vm3050_vm3, 0.7853982, %v5178_v20 }
 0x92a   : > { %v3997_v62 = vadd.f32 -0.3333295, %v3322_v34  ;;  %v3527_v63 = vadd.f32 %v3511_v26, %v2939_v16  ;;  %v3449_v46 = vsel %vm3417_vm6, %v3433_v10, %v3401_v52  ;;  %v6912_v50 = vsel %vm3035_vm8, %v3092_v4, %v3179_v1 }
 0x92b   : > { %v3465_v22 = vmul.f32 3.18, %v3449_v46  ;;  %v3243_v38 = vmul.f32 %v6912_v50, %v6912_v50  ;;  %4697 = vrcp.f32 %v3133_v55  ;;  %v6930_v17 = vadd.f32 %v6552_v41, %v6548_v44 }
 0x92c   : > { %v3354_v31 = vmul.f32 %v3997_v62, %v6853_v49  ;;  %3543 = vst [vmem:[%s6822_s6 + $0x20] sm:$0xff] %v3527_v63  ;;  %v3967_v19 = vadd.f32 -1.0, %v6857_v56  ;;  %v2977_v47 = vadd.f32 %v6826_v42, %v6481_v40  ;;  %v3226_v48 = vsel %vm3034_vm4, 1.5707964, %v3210_v33 }
 0x92d   : > { %v4690_v57 = vpop.eup %4689  ;;  %v3487_v21 = vmul.f32 1.442695, %v3465_v22  ;;  %v3259_v6 = vmul.f32 0.080537446, %v3243_v38  ;;  %v3070_v41 = vmax.f32 %v6922_v37, 1e-30  ;;  %v6956_v26 = vadd.f32 %v6566_v24, %v6548_v44 }
 0x92e   : > { %v3370_v49 = vmul.f32 %v3354_v31, %v6844_v30  ;;  %v4692_v36 = vpop.eup %4691  ;;  %v3094_v11 = vmul.f32 -1.0, %v4690_v57  ;;  %v3134_v4 = vadd.f32 1.0, %v6922_v37  ;;  %vm3052_vm9 = vcmp.gt.f32.partialorder %v6857_v56, 0.41421357 }
 0x92f   : > { %v4694_v3 = vpop.eup %4693  ;;  %v3512_v61 = vmul.f32 %v4744_v2, %v4692_v36  ;;  %4699 = vpow2.f32 %v3487_v21  ;;  %v3982_v8 = vadd.f32 -0.13877685, %v3259_v6  ;;  %vm3036_vm10 = vcmp.gt.f32.partialorder %v6857_v56, 2.4142137  ;;  %v4745_v2 = vld [vmem:[%s5656_s15 + $0x30] sm:$0xff] }
 0x930   : > { %v3386_v13 = vadd.f32 %v3370_v49, %v6844_v30  ;;  %v3158_v52 = vmul.f32 %v4694_v3, %v3967_v19  ;;  %4701 = vrcp.f32 %v3070_v41  ;;  %v6946_v30 = vmul.f32 0.2, %v2977_v47 }
 0x931   : > { %v3528_v35 = vadd.f32 %v3512_v61, %v2943_v0  ;;  %v3291_v34 = vmul.f32 %v3982_v8, %v3243_v38  ;;  %4703 = vrcp.f32 %v3134_v4  ;;  %vm3418_vm11 = vcmp.lt.f32.partialorder %v6685_v27, 0.0 }
 0x932   : > { %v3402_v16 = vadd.f32 %v3386_v13, %v3226_v48  ;;  %v3180_v42 = vsel %vm3052_vm9, %v3158_v52, %v6857_v56  ;;  %v6961_v62 = vand.u32 2147483647, %v6946_v30  ;;  %v3211_v63 = vsel %vm3051_vm7, 0.7853982, %v5178_v20 }
 0x933   : > { %3544 = vst [vmem:[%s6822_s6 + $0x28] sm:$0xff] %v3528_v35  ;;  %v3307_v51 = vadd.f32 0.19977711, %v3291_v34  ;;  %v6951_v28 = vsel %vm3036_vm10, %v3094_v11, %v3180_v42  ;;  %v4696_v1 = vpop.eup %4695  ;;  %v3968_v55 = vadd.f32 -1.0, %v6894_v5  ;;  %v6969_v24 = vadd.f32 %v6617_v18, %v6548_v44 }
 0x934   : > { %v3434_v25 = vsub.f32 0.0, %v3402_v16  ;;  %v3244_v10 = vmul.f32 %v6951_v28, %v6951_v28  ;;  %v3096_v0 = vmul.f32 -1.0, %v4696_v1  ;;  %vm3037_vm12 = vcmp.gt.f32.partialorder %v6894_v5, 2.4142137 }
 0x935   : > { %v3323_v46 = vmul.f32 %v3307_v51, %v3243_v38  ;;  %v4698_v27 = vpop.eup %4697  ;;  %vm3053_vm13 = vcmp.gt.f32.partialorder %v6894_v5, 0.41421357  ;;  %v3071_v6 = vmax.f32 %v6961_v62, 1e-30  ;;  %v2981_v36 = vadd.f32 %v6838_v23, %v6481_v40 }
 0x936   : > { %v3450_v39 = vsel %vm3418_vm11, %v3434_v25, %v3402_v16  ;;  %v3260_v31 = vmul.f32 0.080537446, %v3244_v10  ;;  %v3160_v21 = vmul.f32 %v4698_v27, %v3968_v55  ;;  %v3969_v47 = vadd.f32 -1.0, %v6922_v37 }
 0x937   : > { %v3466_v22 = vmul.f32 3.18, %v3450_v39  ;;  %v3998_v57 = vadd.f32 -0.3333295, %v3323_v46  ;;  %v3135_v3 = vadd.f32 1.0, %v6961_v62  ;;  %v2987_v48 = vadd.f32 %v6870_v7, %v6481_v40 }
 0x938   : > { %v3983_v49 = vadd.f32 -0.13877685, %v3260_v31  ;;  %v3181_v18 = vsel %vm3053_vm13, %v3160_v21, %v6894_v5  ;;  %v6994_v35 = vmul.f32 0.2, %v2981_v36  ;;  %v3227_v34 = vsel %vm3035_vm8, 1.5707964, %v3211_v63 }
 0x939   : > { %v3489_v33 = vmul.f32 1.442695, %v3466_v22  ;;  %v4700_v11 = vpop.eup %4699  ;;  %v3355_v19 = vmul.f32 %v3998_v57, %v3243_v38  ;;  %v6984_v8 = vsel %vm3037_vm12, %v3096_v0, %v3181_v18  ;;  %v3212_v7 = vsel %vm3052_vm9, 0.7853982, %v5178_v20 }
 0x93a   : > { %v3513_v61 = vmul.f32 %v4745_v2, %v4700_v11  ;;  %v3292_v13 = vmul.f32 %v3983_v49, %v3244_v10  ;;  %v6989_v38 = vmul.f32 %v6984_v8, %v6984_v8  ;;  %v4702_v52 = vpop.eup %4701  ;;  %v7005_v39 = vand.u32 2147483647, %v6994_v35 }
 0x93b   : > { %4705 = vpow2.f32 %v3489_v33  ;;  %v3371_v23 = vmul.f32 %v3355_v19, %v6912_v50  ;;  %v4704_v16 = vpop.eup %4703  ;;  %v3098_v51 = vmul.f32 -1.0, %v4702_v52  ;;  %vm3054_vm14 = vcmp.gt.f32.partialorder %v6922_v37, 0.41421357 }
 0x93c   : > { %4707 = vrcp.f32 %v3071_v6  ;;  %v3529_v41 = vadd.f32 %v3513_v61, %v6930_v17  ;;  %v3308_v4 = vadd.f32 0.19977711, %v3292_v13  ;;  %v3261_v25 = vmul.f32 0.080537446, %v6989_v38 }
 0x93d   : > { %4709 = vrcp.f32 %v3135_v3  ;;  %v3387_v42 = vadd.f32 %v3371_v23, %v6912_v50  ;;  %v3162_v17 = vmul.f32 %v4704_v16, %v3969_v47  ;;  %v7008_v58 = vmul.f32 0.2, %v2987_v48  ;;  %v4746_v47 = vld [vmem:[%s5656_s15 + $0x38] sm:$0xff] }
 0x93e   : > { %3545 = vst [vmem:[%s6822_s6 + $0x30] sm:$0xff] %v3529_v41  ;;  %v3324_v1 = vmul.f32 %v3308_v4, %v3244_v10  ;;  %v3984_v55 = vadd.f32 -0.13877685, %v3261_v25  ;;  %vm3419_vm15 = vcmp.lt.f32.partialorder %v6743_v43, 0.0  ;;  %vm3038_vm0 = vcmp.gt.f32.partialorder %v6922_v37, 2.4142137 }
 0x93f   : > { %v3403_v46 = vadd.f32 %v3387_v42, %v3227_v34  ;;  %v3182_v63 = vsel %vm3054_vm14, %v3162_v17, %v6922_v37  ;;  %v3072_v0 = vmax.f32 %v7005_v39, 1e-30  ;;  %v3228_v43 = vsel %vm3036_vm10, 1.5707964, %v3212_v7 }
 0x940   : > { %v3999_v50 = vadd.f32 -0.3333295, %v3324_v1  ;;  %v3293_v22 = vmul.f32 %v3984_v55, %v6989_v38  ;;  %v7018_v31 = vsel %vm3038_vm0, %v3098_v51, %v3182_v63  ;;  %v3136_v33 = vadd.f32 1.0, %v7005_v39 }
 0x941   : > { %v3435_v27 = vsub.f32 0.0, %v3403_v46  ;;  %v3246_v21 = vmul.f32 %v7018_v31, %v7018_v31  ;;  %vm3420_vm1 = vcmp.lt.f32.partialorder %v6847_v53, 0.0  ;;  %4711 = vrcp.f32 %v3072_v0 }
 0x942   : > { %v3356_v57 = vmul.f32 %v3999_v50, %v3244_v10  ;;  %v3309_v6 = vadd.f32 0.19977711, %v3293_v22  ;;  %v7028_v36 = vand.u32 2147483647, %v7008_v58  ;;  %4713 = vrcp.f32 %v3136_v33 }
 0x943   : > { %v3451_v49 = vsel %vm3419_vm15, %v3435_v27, %v3403_v46  ;;  %v3262_v18 = vmul.f32 0.080537446, %v3246_v21  ;;  %v3213_v2 = vsel %vm3053_vm13, 0.7853982, %v5178_v20  ;;  %v3970_v13 = vadd.f32 -1.0, %v6961_v62 }
 0x944   : > { %v3467_v19 = vmul.f32 3.18, %v3451_v49  ;;  %v3372_v56 = vmul.f32 %v3356_v57, %v6951_v28  ;;  %v3325_v61 = vmul.f32 %v3309_v6, %v6989_v38  ;;  %vm3055_vm2 = vcmp.gt.f32.partialorder %v6961_v62, 0.41421357 }
 0x945   : > { %v4706_v11 = vpop.eup %4705  ;;  %v3985_v41 = vadd.f32 -0.13877685, %v3262_v18  ;;  %v3073_v7 = vmax.f32 %v7028_v36, 1e-30  ;;  %vm3039_vm3 = vcmp.gt.f32.partialorder %v6961_v62, 2.4142137 }
 0x946   : > { %v4708_v10 = vpop.eup %4707  ;;  %v3514_v3 = vmul.f32 %v4746_v47, %v4706_v11  ;;  %v3491_v48 = vmul.f32 1.442695, %v3467_v19  ;;  %v3388_v52 = vadd.f32 %v3372_v56, %v6951_v28  ;;  %v4000_v34 = vadd.f32 -0.3333295, %v3325_v61 }
 0x947   : > { %v4710_v23 = vpop.eup %4709  ;;  %v3100_v4 = vmul.f32 -1.0, %v4708_v10  ;;  %v3294_v51 = vmul.f32 %v3985_v41, %v3246_v21  ;;  %v3229_v50 = vsel %vm3037_vm12, 1.5707964, %v3213_v2  ;;  %v3214_v22 = vsel %vm3054_vm14, 0.7853982, %v5178_v20 }
 0x948   : > { %v3530_v16 = vadd.f32 %v3514_v3, %v6956_v26  ;;  %v3164_v42 = vmul.f32 %v4710_v23, %v3970_v13  ;;  %4715 = vpow2.f32 %v3491_v48  ;;  %v3404_v25 = vadd.f32 %v3388_v52, %v3228_v43  ;;  %v4747_v52 = vld [vmem:[%s5656_s15 + $0x40] sm:$0xff] }
 0x949   : > { %v3357_v1 = vmul.f32 %v4000_v34, %v6989_v38  ;;  %v3137_v26 = vadd.f32 1.0, %v7028_v36  ;;  %v3310_v46 = vadd.f32 0.19977711, %v3294_v51  ;;  %4717 = vrcp.f32 %v3073_v7 }
 0x94a   : > { %3546 = vst [vmem:[%s6822_s6 + $0x38] sm:$0xff] %v3530_v16  ;;  %v3183_v28 = vsel %vm3055_vm2, %v3164_v42, %v6961_v62  ;;  %v3436_v17 = vsub.f32 0.0, %v3404_v25  ;;  %v2991_v43 = vadd.f32 %v6883_v15, %v6481_v40  ;;  %v3971_v6 = vadd.f32 -1.0, %v7005_v39 }
 0x94b   : > { %v7050_v55 = vsel %vm3039_vm3, %v3100_v4, %v3183_v28  ;;  %v3373_v38 = vmul.f32 %v3357_v1, %v6984_v8  ;;  %4719 = vrcp.f32 %v3137_v26  ;;  %v3326_v0 = vmul.f32 %v3310_v46, %v3246_v21  ;;  %v4712_v57 = vpop.eup %4711 }
 0x94c   : > { %v3247_v63 = vmul.f32 %v7050_v55, %v7050_v55  ;;  %v3452_v27 = vsel %vm3420_vm1, %v3436_v17, %v3404_v25  ;;  %v4714_v11 = vpop.eup %4713  ;;  %vm3421_vm4 = vcmp.lt.f32.partialorder %v6887_v54, 0.0  ;;  %v3102_v19 = vmul.f32 -1.0, %v4712_v57 }
 0x94d   : > { %v3468_v5 = vmul.f32 3.18, %v3452_v27  ;;  %v3389_v33 = vadd.f32 %v3373_v38, %v6984_v8  ;;  %v4001_v53 = vadd.f32 -0.3333295, %v3326_v0  ;;  %v7067_v56 = vmul.f32 0.2, %v2991_v43 }
 0x94e   : > { %v3263_v49 = vmul.f32 0.080537446, %v3247_v63  ;;  %v3166_v3 = vmul.f32 %v4714_v11, %v3971_v6  ;;  %vm3040_vm5 = vcmp.gt.f32.partialorder %v7005_v39, 2.4142137  ;;  %vm3056_vm6 = vcmp.gt.f32.partialorder %v7005_v39, 0.41421357 }
 0x94f   : > { %v3493_v18 = vmul.f32 1.442695, %v3468_v5  ;;  %v3405_v10 = vadd.f32 %v3389_v33, %v3229_v50  ;;  %v3358_v40 = vmul.f32 %v4001_v53, %v3246_v21  ;;  %v7072_v15 = vand.u32 2147483647, %v7067_v56 }
 0x950   : > { %v3986_v47 = vadd.f32 -0.13877685, %v3263_v49  ;;  %v3184_v61 = vsel %vm3056_vm6, %v3166_v3, %v7005_v39  ;;  %v3230_v23 = vsel %vm3038_vm0, 1.5707964, %v3214_v22  ;;  %vm3057_vm7 = vcmp.gt.f32.partialorder %v7028_v36, 0.41421357 }
 0x951   : > { %4721 = vpow2.f32 %v3493_v18  ;;  %v3437_v8 = vsub.f32 0.0, %v3405_v10  ;;  %v3374_v21 = vmul.f32 %v3358_v40, %v7018_v31  ;;  %v7082_v48 = vsel %vm3040_vm5, %v3102_v19, %v3184_v61  ;;  %v4748_v18 = vld [vmem:[%s5656_s15 + $0x48] sm:$0xff] }
 0x952   : > { %v3295_v2 = vmul.f32 %v3986_v47, %v3247_v63  ;;  %v4716_v13 = vpop.eup %4715  ;;  %v3248_v34 = vmul.f32 %v7082_v48, %v7082_v48  ;;  %v3972_v51 = vadd.f32 -1.0, %v7028_v36  ;;  %v3074_v7 = vmax.f32 %v7072_v15, 1e-30 }
 0x953   : > { %v3515_v41 = vmul.f32 %v4747_v52, %v4716_v13  ;;  %v3453_v4 = vsel %vm3421_vm4, %v3437_v8, %v3405_v10  ;;  %v4718_v37 = vpop.eup %4717  ;;  %v3390_v25 = vadd.f32 %v3374_v21, %v7018_v31  ;;  %vm3422_vm8 = vcmp.lt.f32.partialorder %v6903_v9, 0.0 }
 0x954   : > { %v3311_v16 = vadd.f32 0.19977711, %v3295_v2  ;;  %v3469_v42 = vmul.f32 3.18, %v3453_v4  ;;  %v3264_v17 = vmul.f32 0.080537446, %v3248_v34  ;;  %4723 = vrcp.f32 %v3074_v7 }
 0x955   : > { %v4720_v1 = vpop.eup %4719  ;;  %v3531_v28 = vadd.f32 %v3515_v41, %v6969_v24  ;;  %v3104_v54 = vmul.f32 -1.0, %v4718_v37  ;;  %v3406_v50 = vadd.f32 %v3390_v25, %v3230_v23  ;;  %v3138_v31 = vadd.f32 1.0, %v7072_v15 }
 0x956   : > { %v3327_v26 = vmul.f32 %v3311_v16, %v3247_v63  ;;  %v3495_v46 = vmul.f32 1.442695, %v3469_v42  ;;  %v3168_v38 = vmul.f32 %v4720_v1, %v3972_v51  ;;  %v3987_v22 = vadd.f32 -0.13877685, %v3264_v17  ;;  %v4749_v51 = vld [vmem:[%s5656_s15 + $0x50] sm:$0xff] }
 0x957   : > { %3547 = vst [vmem:[%s6822_s6 + $0x40] sm:$0xff] %v3531_v28  ;;  %v3438_v0 = vsub.f32 0.0, %v3406_v50  ;;  %vm3041_vm9 = vcmp.gt.f32.partialorder %v7028_v36, 2.4142137  ;;  %v3215_v11 = vsel %vm3055_vm2, 0.7853982, %v5178_v20  ;;  %v2963_v19 = vadd.f32 %v6643_v59, %v6548_v44 }
 0x958   : > { %v4002_v27 = vadd.f32 -0.3333295, %v3327_v26  ;;  %4725 = vpow2.f32 %v3495_v46  ;;  %v3185_v24 = vsel %vm3057_vm7, %v3168_v38, %v7028_v36  ;;  %v3296_v57 = vmul.f32 %v3987_v22, %v3248_v34 }
 0x959   : > { %v7103_v5 = vsel %vm3041_vm9, %v3104_v54, %v3185_v24  ;;  %4727 = vrcp.f32 %v3138_v31  ;;  %v3454_v9 = vsel %vm3422_vm8, %v3438_v0, %v3406_v50  ;;  %v3231_v61 = vsel %vm3039_vm3, 1.5707964, %v3215_v11 }
 0x95a   : > { %v3359_v43 = vmul.f32 %v4002_v27, %v3247_v63  ;;  %v3249_v33 = vmul.f32 %v7103_v5, %v7103_v5  ;;  %v3470_v6 = vmul.f32 3.18, %v3454_v9  ;;  %v3312_v63 = vadd.f32 0.19977711, %v3296_v57  ;;  %v4750_v57 = vld [vmem:[%s5656_s15 + $0x58] sm:$0xff] }
 0x95b   : > { %v4722_v49 = vpop.eup %4721  ;;  %v2969_v59 = vadd.f32 %v6672_v14, %v6548_v44  ;;  %vm3423_vm10 = vcmp.lt.f32.partialorder %v6946_v30, 0.0  ;;  %v3216_v62 = vsel %vm3056_vm6, 0.7853982, %v5178_v20  ;;  %v3973_v42 = vadd.f32 -1.0, %v7072_v15 }
 0x95c   : > { %v3375_v53 = vmul.f32 %v3359_v43, %v7050_v55  ;;  %v3516_v10 = vmul.f32 %v4748_v18, %v4722_v49  ;;  %v3265_v47 = vmul.f32 0.080537446, %v3249_v33  ;;  %v3497_v3 = vmul.f32 1.442695, %v3470_v6 }
 0x95d   : > { %v3328_v8 = vmul.f32 %v3312_v63, %v3248_v34  ;;  %v3232_v30 = vsel %vm3040_vm5, 1.5707964, %v3216_v62  ;;  %vm3058_vm11 = vcmp.gt.f32.partialorder %v7072_v15, 0.41421357  ;;  %vm3042_vm12 = vcmp.gt.f32.partialorder %v7072_v15, 2.4142137 }
 0x95e   : > { %v3391_v40 = vadd.f32 %v3375_v53, %v7050_v55  ;;  %v3532_v2 = vadd.f32 %v3516_v10, %v2963_v19  ;;  %v3988_v13 = vadd.f32 -0.13877685, %v3265_v47  ;;  %4729 = vpow2.f32 %v3497_v3  ;;  %v4724_v52 = vpop.eup %4723  ;;  %v4752_v62 = vld [vmem:[%s5656_s15 + $0x68] sm:$0xff] }
 0x95f   : > { %v4003_v21 = vadd.f32 -0.3333295, %v3328_v8  ;;  %v3106_v14 = vmul.f32 -1.0, %v4724_v52  ;;  %v2973_v24 = vadd.f32 %v6687_v29, %v6548_v44  ;;  %vm3424_vm13 = vcmp.lt.f32.partialorder %v6994_v35, 0.0 }
 0x960   : > { %v3407_v23 = vadd.f32 %v3391_v40, %v3231_v61  ;;  %3548 = vst [vmem:[%s6822_s6 + $0x48] sm:$0xff] %v3532_v2  ;;  %v3297_v41 = vmul.f32 %v3988_v13, %v3249_v33  ;;  %v3217_v49 = vsel %vm3057_vm7, 0.7853982, %v5178_v20  ;;  %vm3425_vm14 = vcmp.lt.f32.partialorder %v7008_v58, 0.0  ;;  %v4751_v13 = vld [vmem:[%s5656_s15 + $0x60] sm:$0xff] }
 0x961   : > { %v3360_v16 = vmul.f32 %v4003_v21, %v3248_v34  ;;  %v3233_v29 = vsel %vm3041_vm9, 1.5707964, %v3217_v49  ;;  %v3218_v58 = vsel %vm3058_vm11, 0.7853982, %v5178_v20  ;;  %vm3426_vm15 = vcmp.lt.f32.partialorder %v7067_v56, 0.0 }
 0x962   : > { %v3439_v4 = vsub.f32 0.0, %v3407_v23  ;;  %v4726_v37 = vpop.eup %4725  ;;  %v3313_v55 = vadd.f32 0.19977711, %v3297_v41  ;;  %v2993_v56 = vadd.f32 %v6889_v45, %v6548_v44 }
 0x963   : > { %v4728_v25 = vpop.eup %4727  ;;  %v3517_v7 = vmul.f32 %v4749_v51, %v4726_v37  ;;  %v3376_v28 = vmul.f32 %v3360_v16, %v7082_v48 }
 0x964   : > { %v3455_v1 = vsel %vm3423_vm10, %v3439_v4, %v3407_v23  ;;  %v3329_v34 = vmul.f32 %v3313_v55, %v3249_v33  ;;  %v3170_v17 = vmul.f32 %v4728_v25, %v3973_v42  ;;  %v3234_v42 = vsel %vm3042_vm12, 1.5707964, %v3218_v58 }
 0x965   : > { %v3471_v26 = vmul.f32 3.18, %v3455_v1  ;;  %v3533_v54 = vadd.f32 %v3517_v7, %v2969_v59  ;;  %v3392_v46 = vadd.f32 %v3376_v28, %v7082_v48 }
 0x966   : > { %v4004_v38 = vadd.f32 -0.3333295, %v3329_v34  ;;  %v3186_v27 = vsel %vm3058_vm11, %v3170_v17, %v7072_v15  ;;  %v4753_v15 = vld [vmem:[%s5656_s15 + $0x70] sm:$0xff] }
 0x967   : > { %v3499_v50 = vmul.f32 1.442695, %v3471_v26  ;;  %3549 = vst [vmem:[%s6822_s6 + $0x50] sm:$0xff] %v3533_v54  ;;  %v3408_v22 = vadd.f32 %v3392_v46, %v3232_v30  ;;  %v3202_v31 = vsel %vm3042_vm12, %v3106_v14, %v3186_v27  ;;  %v4754_v54 = vld [vmem:[%s5656_s15 + $0x78] sm:$0xff]  ;;  %s5182_s15 = smov [#allocation20]  }
 0x968   : > { %v3361_v39 = vmul.f32 %v4004_v38, %v3249_v33  ;;  %v3250_v0 = vmul.f32 %v3202_v31, %v3202_v31  ;;  %v4730_v48 = vpop.eup %4729  ;;  %s5071_s2 = sshll.u32 %s5182_s15, 4  ;;  %s5072_s2 = int_to_ptr.vmem [resolvable:$false] %s5071_s2 }
 0x969   : > { %4731 = vpow2.f32 %v3499_v50  ;;  %v3440_v43 = vsub.f32 0.0, %v3408_v22  ;;  %v3518_v9 = vmul.f32 %v4750_v57, %v4730_v48  ;;  %s5073_s12 = scalar_lea.vmem %s5072_s2, 4096  ;;  %p5074_p1 = scmp.lt.s32.totalorder %s7180_s25, %s5072_s2 }
 0x96a   : > { %v3377_v6 = vmul.f32 %v3361_v39, %v7103_v5  ;;  %v3266_v11 = vmul.f32 0.080537446, %v3250_v0  ;;  %p5075_p13 = scmp.lt.s32.totalorder %s5073_s12, %s5067_s18 }
 0x96b   : > { %v3456_v53 = vsel %vm3424_vm13, %v3440_v43, %v3408_v22  ;;  %v3534_v33 = vadd.f32 %v3518_v9, %v2973_v24 }
 0x96c   : > { %v3472_v63 = vmul.f32 3.18, %v3456_v53  ;;  %v3393_v19 = vadd.f32 %v3377_v6, %v7103_v5  ;;  %v3989_v18 = vadd.f32 -0.13877685, %v3266_v11  ;;  %v2979_v5 = vadd.f32 %v6831_v60, %v6548_v44  ;;  %p5076_p0 = por %p5075_p13, %p5074_p1 }
 0x96d   : > { %3550 = vst [vmem:[%s6822_s6 + $0x58] sm:$0xff] %v3534_v33  ;;  %v2983_v60 = vadd.f32 %v6849_v32, %v6548_v44  ;;  %v2989_v32 = vadd.f32 %v6876_v12, %v6548_v44 }
 0x96e   : > { %v3501_v35 = vmul.f32 1.442695, %v3472_v63  ;;  %v3409_v10 = vadd.f32 %v3393_v19, %v3233_v29  ;;  %v3298_v47 = vmul.f32 %v3989_v18, %v3250_v0  ;;  %p5077_p6 = pnand %p5076_p0, %p5070_p12 }
 0x970   : > { %4733 = vpow2.f32 %v3501_v35  ;;  %v3441_v3 = vsub.f32 0.0, %v3409_v10  ;;  %v3314_v40 = vadd.f32 0.19977711, %v3298_v47 }
 0x972   : > { %v3457_v2 = vsel %vm3425_vm14, %v3441_v3, %v3409_v10  ;;  %v3330_v61 = vmul.f32 %v3314_v40, %v3250_v0 }
 0x973   : > { %v4732_v8 = vpop.eup %4731  ;;  %v3473_v23 = vmul.f32 3.18, %v3457_v2 }
 0x974   : > { %v3519_v36 = vmul.f32 %v4751_v13, %v4732_v8  ;;  %v4005_v21 = vadd.f32 -0.3333295, %v3330_v61 }
 0x975   : > { %v3503_v41 = vmul.f32 1.442695, %v3473_v23 }
 0x976   : > { %v3535_v52 = vadd.f32 %v3519_v36, %v2979_v5  ;;  %v3362_v59 = vmul.f32 %v4005_v21, %v3250_v0 }
 0x977   : > { %4735 = vpow2.f32 %v3503_v41 }
 0x978   : > { %3551 = vst [vmem:[%s6822_s6 + $0x60] sm:$0xff] %v3535_v52  ;;  %v3378_v4 = vmul.f32 %v3362_v59, %v3202_v31 }
 0x97a   : > { %v4734_v16 = vpop.eup %4733  ;;  %v3394_v37 = vadd.f32 %v3378_v4, %v3202_v31 }
 0x97b   : > { %v3520_v55 = vmul.f32 %v4752_v62, %v4734_v16 }
 0x97c   : > { %v3410_v25 = vadd.f32 %v3394_v37, %v3234_v42 }
 0x97d   : > { %v3536_v51 = vadd.f32 %v3520_v55, %v2983_v60 }
 0x97e   : > { %v3442_v7 = vsub.f32 0.0, %v3410_v25 }
 0x97f   : > { %3552 = vst [vmem:[%s6822_s6 + $0x68] sm:$0xff] %v3536_v51 }
 0x980   : > { %v3458_v20 = vsel %vm3426_vm15, %v3442_v7, %v3410_v25 }
 0x981   : > { %v4736_v1 = vpop.eup %4735  ;;  %v3474_v28 = vmul.f32 3.18, %v3458_v20 }
 0x982   : > { %v3521_v14 = vmul.f32 %v4753_v15, %v4736_v1 }
 0x983   : > { %v3505_v26 = vmul.f32 1.442695, %v3474_v28 }
 0x984   : > { %v3537_v34 = vadd.f32 %v3521_v14, %v2989_v32 }
 0x985   : > { %4737 = vpow2.f32 %v3505_v26 }
 0x986   : > { %3553 = vst [vmem:[%s6822_s6 + $0x70] sm:$0xff] %v3537_v34 }
 0x98f   : > { %v4738_v17 = vpop.eup %4737 }
 0x990   : > { %v3522_v30 = vmul.f32 %v4754_v54, %v4738_v17 }
 0x992   : > { %v3538_v12 = vadd.f32 %v3522_v30, %v2993_v56 }
 0x994   : > { %3554 = vst [vmem:[%s6822_s6 + $0x78] sm:$0xff] %v3538_v12 }
 0x995   : > { %5080 = shalt.err (!%p5077_p6)
}
 0x996   : > { %s5081_s9 = scalar_lea.hbm %s7178_s14, 2048  ;;  %s5085_s11 = scalar_lea.hbm %s7327_s29, 4096 }
 0x997   : > { %p5082_p2 = scmp.ne.s32.totalorder %s7178_s14, %s5081_s9  ;;  %p5086_p5 = scmp.lt.u32.totalorder %s7178_s14, %s7327_s29 }
 0x998   : > { %p5087_p9 = scmp.lt.u32.totalorder %s5085_s11, %s5081_s9  ;;  %p5089_p11 = scmp.lt.u32.totalorder %s5081_s9, %s7178_s14 }
 0x999   : > { %p5083_p4 = pnand %p5082_p2, %p7326_p7 }
 0x99a   : > { %p5088_p8 = por %p5087_p9, %p5086_p5 }
 0x99b   : > { %p5084_p10 = pneg %p5083_p4 }
 0x99c   : > { %p5090_p3 = por %p5089_p11, %p5088_p8 }
 0x99e   : > { %p5091_p12 = pnand %p5090_p3, %p5084_p10 }
 0x9a0   : > { %5094 = shalt.err (!%p5091_p12)
}
 0x9a1   : > { %4343 = dma.vmem_to_hbm [thread:$0]  (%p7326_p7), %s7180_s25, 2048, %s7178_s14, %s3561_s17, %s5180_s27, %s5180_s27, %s5181_s3  }
 0x9a2 PF: > { %s3605_s4 = sand.u32 1, %s5149_s0   ;;  %p7328_p1 = scmp.ne.s32.totalorder %s7301_s26, 0 }
 0x9a3   : > { %p7329_p13 = scmp.ge.s32.totalorder %s5161_s21, 2  ;;  %s3606_s18 = scalar_lea.sflag [#allocation4], %s3605_s4 }
 0x9a5   : > { %p4379_p0 = pnand %p7329_p13, %p7328_p1 }
 0x9a7   : > { %5140 = dma.done.wait (!%p4379_p0), %s3606_s18, 2048  }
 0x9a8   : > { %5142 = vsyncadd (!%p4379_p0), %s3606_s18, 4294965248  ;;  %s3615_s28 = scalar_lea.sflag [#allocation21], %s3605_s4 }
 0x9a9   : > { %5144 = dma.done.wait (!%p4379_p0), %s3615_s28, 2048  }
 0x9aa   : > { %5146 = vsyncadd (!%p4379_p0), %s3615_s28, 4294965248  ;;  %p43_p7 = scmp.ge.s32.totalorder %s5519_s24, 4   ;;  %s7330_s0 = smov %s5153_s30 }
 0x9ab   : > { %s7331_s30 = smov %s5157_s20  ;;  %s7332_s20 = smov %s5530_s22 }
 0x9ac   : > { %s7333_s21 = smov %s5519_s24  ;;  %45 = sbr.rel (!%p43_p7) target bundleno = 32 (0x20), region = 199 }
 0x9b3   :  { %3620 = vsyncpa [#allocation3], 1 }
 0x9b4   :  { %3622 = vsyncpa [#allocation3 + $0x1], 1 }
 0x9b5   :  { %3623 = vsyncpa [#allocation6], 1 }
 0x9b6   :  { %3625 = vsyncpa [#allocation6 + $0x1], 1 }
 0x9b7   :  { %3626 = vsyncpa [#allocation9], 1 }
 0x9b8   :  { %3627 = vsyncpa [#allocation12], 1 }
 0x9b9   :  { %3628 = vsyncpa [#allocation15], 1 }
 0x9ba   :  { %3629 = vsyncpa [#allocation18], 1 }
 0x9bb   :  { %3630 = vsyncpa [#allocation4], 1 }
 0x9bc   :  { %3632 = vsyncpa [#allocation4 + $0x1], 1 }
 0x9bd   :  { %3633 = vsyncpa [#allocation21], 1 }
 0x9be   :  { %3635 = vsyncpa [#allocation21 + $0x1], 1 }

// kernel: tpu_custom_call.1
= control target key start
LH: loop header
LB: loop body
LE: loop exit
PB: predicated region body
PF: predicated region fallthrough
CT: control target
= control target key end

     0   :  { %s7228_s0 = inlined_call_operand.hbm [shape: f32[256,128], index: 0, kind: input, shape index: {}]   ;;  %s7229_s1 = inlined_call_operand.hbm [shape: f32[256,128], index: 1, kind: input, shape index: {}]   ;;  %s7230_s2 = inlined_call_operand.hbm [shape: bf16[128,128], index: 2, kind: input, shape index: {}]   ;;  %s7231_s3 = inlined_call_operand.vmem [shape: f32[1,128], index: 3, kind: input, shape index: {}]   ;;  %s7232_s4 = inlined_call_operand.hbm [shape: bf16[128,128], index: 4, kind: input, shape index: {}]   ;;  %s7233_s5 = inlined_call_operand.vmem [shape: f32[1,128], index: 5, kind: input, shape index: {}]   ;;  %s7234_s6 = inlined_call_operand.hbm [shape: bf16[128,128], index: 6, kind: input, shape index: {}]   ;;  %s7235_s7 = inlined_call_operand.vmem [shape: f32[1,128], index: 7, kind: input, shape index: {}]   ;;  %s7236_s8 = inlined_call_operand.hbm [shape: bf16[128,256], index: 8, kind: input, shape index: {}]   ;;  %s7237_s9 = inlined_call_operand.vmem [shape: f32[1,256], index: 9, kind: input, shape index: {}]   ;;  %s7238_s10 = inlined_call_operand.hbm [shape: bf16[128,128], index: 10, kind: input, shape index: {}]   ;;  %s7239_s11 = inlined_call_operand.vmem [shape: f32[1,128], index: 11, kind: input, shape index: {}]   ;;  %s7240_s12 = inlined_call_operand.hbm [shape: bf16[128,128], index: 12, kind: input, shape index: {}]   ;;  %s7241_s13 = inlined_call_operand.vmem [shape: f32[1,128], index: 13, kind: input, shape index: {}]   ;;  %s7242_s14 = inlined_call_operand.hbm [shape: bf16[128,128], index: 14, kind: input, shape index: {}]   ;;  %s7243_s15 = inlined_call_operand.vmem [shape: f32[1,128], index: 15, kind: input, shape index: {}]   ;;  %s7244_s16 = inlined_call_operand.hbm [shape: bf16[128,256], index: 16, kind: input, shape index: {}]   ;;  %s7245_s17 = inlined_call_operand.vmem [shape: f32[1,256], index: 17, kind: input, shape index: {}]   ;;  %s7246_s18 = inlined_call_operand.hbm [shape: f32[256,128], index: 18, kind: output, shape index: {0}]   ;;  %s7247_s19 = inlined_call_operand.hbm [shape: f32[256,128], index: 19, kind: output, shape index: {1}]  }
   0x1   :  { %7266 = sst [smem:[#allocation31_spill]] %s7228_s0 }
   0x2   :  { %7267 = sst [smem:[#allocation32_spill]] %s7229_s1 }
   0x3   :  { %7268 = sst [smem:[#allocation33_spill]] %s7230_s2 }
   0x4   :  { %7269 = sst [smem:[#allocation34_spill]] %s7231_s3 }
   0x5   :  { %7270 = sst [smem:[#allocation35_spill]] %s7232_s4 }
   0x6   :  { %7271 = sst [smem:[#allocation36_spill]] %s7234_s6 }
   0x7   :  { %7272 = sst [smem:[#allocation37_spill]] %s7235_s7 }
   0x8   :  { %7273 = sst [smem:[#allocation38_spill]] %s7236_s8 }
   0x9   :  { %7274 = sst [smem:[#allocation39_spill]] %s7237_s9 }
   0xa   :  { %7275 = sst [smem:[#allocation40_spill]] %s7238_s10 }
   0xb   :  { %7276 = sst [smem:[#allocation41_spill]] %s7239_s11 }
   0xc   :  { %7277 = sst [smem:[#allocation42_spill]] %s7240_s12 }
   0xd   :  { %7278 = sst [smem:[#allocation43_spill]] %s7241_s13 }
   0xe   :  { %7279 = sst [smem:[#allocation44_spill]] %s7242_s14 }
   0xf   :  { %7280 = sst [smem:[#allocation45_spill]] %s7243_s15 }
  0x10   :  { %7281 = sst [smem:[#allocation46_spill]] %s7245_s17 }
  0x11   :  { %7282 = sst [smem:[#allocation47_spill]] %s7246_s18 }
  0x12   :  { %7283 = sst [smem:[#allocation48_spill]] %s7247_s19 }
  0x13   :  { %25 = vsyncpa [#allocation3], 0 }
  0x14   :  { %27 = vsyncpa [#allocation3 + $0x1], 0 }
  0x15   :  { %28 = vsyncpa [#allocation6], 0 }
  0x16   :  { %30 = vsyncpa [#allocation6 + $0x1], 0 }
  0x17   :  { %31 = vsyncpa [#allocation9], 0 }
  0x18   :  { %32 = vsyncpa [#allocation12], 0 }
  0x19   :  { %33 = vsyncpa [#allocation15], 0 }
  0x1a   :  { %34 = vsyncpa [#allocation18], 0 }
  0x1b   :  { %35 = vsyncpa [#allocation4], 0 }
  0x1c   :  { %37 = vsyncpa [#allocation4 + $0x1], 0 }
  0x1d   :  { %38 = vsyncpa [#allocation21], 0 }
  0x1e   :  { %40 = vsyncpa [#allocation21 + $0x1], 0  ;;  %s5283_s0 = smov 0   ;;  %s5285_s30 = smov 0  }
  0x1f   :  { %s5287_s20 = smov 0   ;;  %s5289_s21 = smov 0  }
  0x20 LB: > { %s5163_s1 = smov [#allocation7]   ;;  %s5304_s2 = sadd.s32 4294967295, %s5161_s21   ;;  %s5161_s21 = sphi %s5289_s21, %s7333_s21   ;;  %s5157_s20 = sphi %s5287_s20, %s7332_s20   ;;  %s5153_s30 = sphi %s5285_s30, %s7331_s30   ;;  %s5149_s0 = sphi %s5283_s0, %s7330_s0  }
  0x21   : > { %s503_s22 = sshll.u32 %s5163_s1, 4  ;;  %p3795_p0 = scmp.ge.s32.totalorder %s5161_s21, 1  ;;  %s5309_s22 = int_to_ptr.vmem [resolvable:$true] %s503_s22 }
  0x22   : > { %p7258_p1 = scmp.eq.s32.totalorder %s5304_s2, 0  ;;  %p491_p2 = scmp.lt.s32.totalorder %s5161_s21, 3 }
  0x23   : > { %s5164_s24 = smov [#allocation8]   ;;  %s5165_s26 = smov [#allocation11]  }
  0x24   : > { %p5311_p3 = pnand %p3795_p0, %p491_p2  ;;  %s519_s25 = sshll.u32 %s5164_s24, 4  ;;  %s5324_s25 = int_to_ptr.vmem [resolvable:$true] %s519_s25 }
  0x25   : > { %s551_s27 = sshll.u32 %s5165_s26, 4  ;;  %s7286_s1 = sld [smem:[#allocation33_spill]]  ;;  %s5326_s27 = int_to_ptr.vmem [resolvable:$true] %s551_s27 }
  0x26   : > { %s7284_s23 = scalar_select %p5311_p3, 1, 0 }
  0x27   : > { %p4346_p5 = pneg %p5311_p3 }
  0x29   : > { %p5320_p6 = pnand %p4346_p5, %p7258_p1 }
  0x2b   : > { %s4755_s19 = scalar_lea.hbm %s7286_s1, 1024  ;;  %p5336_p8 = pneg %p5320_p6 }
  0x2c   : > { %p4756_p7 = scmp.ne.s32.totalorder %s7286_s1, %s4755_s19  ;;  %p4762_p11 = scmp.lt.u32.totalorder %s4755_s19, %s7286_s1 }
  0x2e   : > { %p4758_p9 = pnand %p5336_p8, %p4756_p7 }
  0x30   : > { %p4759_p10 = pneg %p4758_p9 }
  0x32   : > { %p4764_p12 = pnand %p4762_p11, %p4759_p10 }
  0x34   : > { %4767 = shalt.err (!%p4764_p12)
}
  0x35   : > { %s4768_s17 = scalar_lea.vmem %s5309_s22, 1024  ;;  %p4776_p5 = scmp.lt.s32.totalorder %s5309_s22, %s5309_s22 }
  0x36   : > { %p4769_p13 = scmp.ne.s32.totalorder %s5309_s22, %s4768_s17  ;;  %p4777_p4 = scmp.lt.s32.totalorder %s4768_s17, %s4768_s17 }
  0x38   : > { %p4771_p0 = pnand %p4769_p13, %p5336_p8  ;;  %p4778_p7 = por %p4777_p4, %p4776_p5 }
  0x3a   : > { %p4772_p2 = pneg %p4771_p0 }
  0x3c   : > { %p4779_p9 = pnand %p4778_p7, %p4772_p2 }
  0x3e   : > { %4782 = shalt.err (!%p4779_p9)
}
  0x3f   : > { %s7253_s18 = smov 64   ;;  %s7255_s15 = smov 4  }
  0x40   : > { %4349 = dma.hbm_to_vmem [thread:$0]  (!%p5320_p6), %s7286_s1, 1024, %s5309_s22, [#allocation6], %s7253_s18, %s7253_s18, %s7255_s15  }
  0x41   : > { %s7288_s4 = sld [smem:[#allocation35_spill]] }
  0x47   : > { %s4783_s17 = scalar_lea.hbm %s7288_s4, 1024 }
  0x48   : > { %p4784_p4 = scmp.ne.s32.totalorder %s7288_s4, %s4783_s17  ;;  %p4790_p12 = scmp.lt.u32.totalorder %s4783_s17, %s7288_s4 }
  0x4a   : > { %p4786_p10 = pnand %p4784_p4, %p5336_p8 }
  0x4c   : > { %p4787_p11 = pneg %p4786_p10 }
  0x4e   : > { %p4792_p13 = pnand %p4790_p12, %p4787_p11 }
  0x50   : > { %4795 = shalt.err (!%p4792_p13)
}
  0x51   : > { %s4796_s22 = scalar_lea.vmem %s5324_s25, 1024  ;;  %p4804_p7 = scmp.lt.s32.totalorder %s5324_s25, %s5324_s25 }
  0x52   : > { %p4797_p0 = scmp.ne.s32.totalorder %s5324_s25, %s4796_s22  ;;  %p4805_p9 = scmp.lt.s32.totalorder %s4796_s22, %s4796_s22 }
  0x54   : > { %p4799_p2 = pnand %p4797_p0, %p5336_p8  ;;  %p4806_p4 = por %p4805_p9, %p4804_p7 }
  0x56   : > { %p4800_p5 = pneg %p4799_p2 }
  0x58   : > { %p4807_p10 = pnand %p4806_p4, %p4800_p5 }
  0x5a   : > { %4810 = shalt.err (!%p4807_p10)
}
  0x5b   : > { %4352 = dma.hbm_to_vmem [thread:$0]  (!%p5320_p6), %s7288_s4, 1024, %s5324_s25, [#allocation9], %s7253_s18, %s7253_s18, %s7255_s15  }
  0x5c   : > { %s7289_s8 = sld [smem:[#allocation38_spill]] }
  0x62   : > { %s4811_s19 = scalar_lea.hbm %s7289_s8, 2048 }
  0x63   : > { %p4812_p11 = scmp.ne.s32.totalorder %s7289_s8, %s4811_s19  ;;  %p4818_p0 = scmp.lt.u32.totalorder %s4811_s19, %s7289_s8 }
  0x65   : > { %p4814_p12 = pnand %p4812_p11, %p5336_p8 }
  0x67   : > { %p4815_p13 = pneg %p4814_p12 }
  0x69   : > { %p4820_p2 = pnand %p4818_p0, %p4815_p13 }
  0x6b   : > { %4823 = shalt.err (!%p4820_p2)
}
  0x6c   : > { %s4824_s25 = scalar_lea.vmem %s5326_s27, 2048  ;;  %p4832_p4 = scmp.lt.s32.totalorder %s5326_s27, %s5326_s27 }
  0x6d   : > { %p4825_p5 = scmp.ne.s32.totalorder %s5326_s27, %s4824_s25  ;;  %p4833_p10 = scmp.lt.s32.totalorder %s4824_s25, %s4824_s25 }
  0x6f   : > { %p4827_p7 = pnand %p4825_p5, %p5336_p8  ;;  %p4834_p11 = por %p4833_p10, %p4832_p4 }
  0x71   : > { %p4828_p9 = pneg %p4827_p7 }
  0x73   : > { %p4835_p12 = pnand %p4834_p11, %p4828_p9 }
  0x75   : > { %4838 = shalt.err (!%p4835_p12)
}
  0x76   : > { %s7260_s22 = smov 128   ;;  %s7262_s7 = smov 8  }
  0x77   : > { %4358 = dma.hbm_to_vmem [thread:$0]  (!%p5320_p6), %s7289_s8, 2048, %s5326_s27, [#allocation12], %s7260_s22, %s7260_s22, %s7262_s7  }
  0x78   : > { %s5170_s13 = smov [#allocation14]   ;;  %s5171_s28 = smov [#allocation10]  }
  0x79   : > { %s583_s19 = sshll.u32 %s5170_s13, 4  ;;  %s535_s29 = sshll.u32 %s5171_s28, 4  ;;  %s584_s19 = int_to_ptr.vmem [resolvable:$true] %s583_s19  ;;  %s536_s29 = int_to_ptr.vmem [resolvable:$true] %s535_s29 }
  0x7a   : > { %s7290_s12 = sld [smem:[#allocation42_spill]] }
  0x80   : > { %s4839_s25 = scalar_lea.hbm %s7290_s12, 1024 }
  0x81   : > { %p4840_p13 = scmp.ne.s32.totalorder %s7290_s12, %s4839_s25  ;;  %p4846_p5 = scmp.lt.u32.totalorder %s4839_s25, %s7290_s12 }
  0x83   : > { %p4842_p0 = pnand %p4840_p13, %p5336_p8 }
  0x85   : > { %p4843_p2 = pneg %p4842_p0 }
  0x87   : > { %p4848_p7 = pnand %p4846_p5, %p4843_p2 }
  0x89   : > { %4851 = shalt.err (!%p4848_p7)
}
  0x8a   : > { %s4852_s27 = scalar_lea.vmem %s584_s19, 1024  ;;  %p4860_p11 = scmp.lt.s32.totalorder %s584_s19, %s584_s19 }
  0x8b   : > { %p4853_p9 = scmp.ne.s32.totalorder %s584_s19, %s4852_s27  ;;  %p4861_p12 = scmp.lt.s32.totalorder %s4852_s27, %s4852_s27 }
  0x8d   : > { %p4855_p4 = pnand %p4853_p9, %p5336_p8  ;;  %p4862_p1 = por %p4861_p12, %p4860_p11 }
  0x8f   : > { %p4856_p10 = pneg %p4855_p4 }
  0x91   : > { %p4863_p3 = pnand %p4862_p1, %p4856_p10 }
  0x93   : > { %4866 = shalt.err (!%p4863_p3)
}
  0x94   : > { %s7291_s18 = smov 4   ;;  %s7292_s15 = smov 64  }
  0x95   : > { %4364 = dma.hbm_to_vmem [thread:$0]  (!%p5320_p6), %s7290_s12, 1024, %s584_s19, [#allocation15], %s7292_s15, %s7292_s15, %s7291_s18  }
  0x96   : > { %s7293_s6 = sld [smem:[#allocation36_spill]] }
  0x9c   : > { %s4867_s13 = scalar_lea.hbm %s7293_s6, 1024 }
  0x9d   : > { %p4868_p1 = scmp.ne.s32.totalorder %s7293_s6, %s4867_s13  ;;  %p4874_p0 = scmp.lt.u32.totalorder %s4867_s13, %s7293_s6 }
  0x9f   : > { %p4870_p3 = pnand %p4868_p1, %p5336_p8 }
  0xa1   : > { %p4871_p13 = pneg %p4870_p3 }
  0xa3   : > { %p4876_p2 = pnand %p4874_p0, %p4871_p13 }
  0xa5   : > { %4879 = shalt.err (!%p4876_p2)
}
  0xa6   : > { %s4880_s27 = scalar_lea.vmem %s536_s29, 1024  ;;  %p4888_p4 = scmp.lt.s32.totalorder %s536_s29, %s536_s29 }
  0xa7   : > { %p4881_p5 = scmp.ne.s32.totalorder %s536_s29, %s4880_s27  ;;  %p4889_p10 = scmp.lt.s32.totalorder %s4880_s27, %s4880_s27 }
  0xa9   : > { %p4883_p7 = pnand %p4881_p5, %p5336_p8  ;;  %p4890_p11 = por %p4889_p10, %p4888_p4 }
  0xab   : > { %p4884_p9 = pneg %p4883_p7 }
  0xad   : > { %p4891_p12 = pnand %p4890_p11, %p4884_p9 }
  0xaf   : > { %4894 = shalt.err (!%p4891_p12)
}
  0xb0   : > { %4355 = dma.hbm_to_vmem [thread:$0]  (!%p5320_p6), %s7293_s6, 1024, %s536_s29, [#allocation9], %s7292_s15, %s7292_s15, %s7291_s18  }
  0xb1   : > { %s5172_s1 = smov [#allocation13]   ;;  %s5173_s11 = smov [#allocation16]  }
  0xb2   : > { %s567_s9 = sshll.u32 %s5172_s1, 4  ;;  %s599_s13 = sshll.u32 %s5173_s11, 4  ;;  %s568_s9 = int_to_ptr.vmem [resolvable:$true] %s567_s9  ;;  %s600_s13 = int_to_ptr.vmem [resolvable:$true] %s599_s13 }
  0xb3   : > { %s7294_s10 = sld [smem:[#allocation40_spill]] }
  0xb9   : > { %s4895_s17 = scalar_lea.hbm %s7294_s10, 1024 }
  0xba   : > { %p4896_p1 = scmp.ne.s32.totalorder %s7294_s10, %s4895_s17  ;;  %p4902_p0 = scmp.lt.u32.totalorder %s4895_s17, %s7294_s10 }
  0xbc   : > { %p4898_p3 = pnand %p4896_p1, %p5336_p8 }
  0xbe   : > { %p4899_p13 = pneg %p4898_p3 }
  0xc0   : > { %p4904_p2 = pnand %p4902_p0, %p4899_p13 }
  0xc2   : > { %4907 = shalt.err (!%p4904_p2)
}
  0xc3   : > { %s4908_s29 = scalar_lea.vmem %s568_s9, 1024  ;;  %p4916_p4 = scmp.lt.s32.totalorder %s568_s9, %s568_s9 }
  0xc4   : > { %p4909_p5 = scmp.ne.s32.totalorder %s568_s9, %s4908_s29  ;;  %p4917_p10 = scmp.lt.s32.totalorder %s4908_s29, %s4908_s29 }
  0xc6   : > { %p4911_p7 = pnand %p4909_p5, %p5336_p8  ;;  %p4918_p11 = por %p4917_p10, %p4916_p4 }
  0xc8   : > { %p4912_p9 = pneg %p4911_p7 }
  0xca   : > { %p4919_p12 = pnand %p4918_p11, %p4912_p9 }
  0xcc   : > { %4922 = shalt.err (!%p4919_p12)
}
  0xcd   : > { %4361 = dma.hbm_to_vmem [thread:$0]  (!%p5320_p6), %s7294_s10, 1024, %s568_s9, [#allocation12], %s7292_s15, %s7292_s15, %s7291_s18  }
  0xce   : > { %s7295_s14 = sld [smem:[#allocation44_spill]] }
  0xd4   : > { %s4923_s28 = scalar_lea.hbm %s7295_s14, 1024 }
  0xd5   : > { %p4924_p1 = scmp.ne.s32.totalorder %s7295_s14, %s4923_s28  ;;  %p4930_p0 = scmp.lt.u32.totalorder %s4923_s28, %s7295_s14 }
  0xd7   : > { %p4926_p3 = pnand %p4924_p1, %p5336_p8 }
  0xd9   : > { %p4927_p13 = pneg %p4926_p3 }
  0xdb   : > { %p4932_p2 = pnand %p4930_p0, %p4927_p13 }
  0xdd   : > { %4935 = shalt.err (!%p4932_p2)
}
  0xde   : > { %s4936_s19 = scalar_lea.vmem %s600_s13, 1024  ;;  %p4944_p4 = scmp.lt.s32.totalorder %s600_s13, %s600_s13 }
  0xdf   : > { %p4937_p5 = scmp.ne.s32.totalorder %s600_s13, %s4936_s19  ;;  %p4945_p10 = scmp.lt.s32.totalorder %s4936_s19, %s4936_s19 }
  0xe1   : > { %p4939_p7 = pnand %p4937_p5, %p5336_p8  ;;  %p4946_p11 = por %p4945_p10, %p4944_p4 }
  0xe3   : > { %p4940_p9 = pneg %p4939_p7 }
  0xe5   : > { %p4947_p12 = pnand %p4946_p11, %p4940_p9 }
  0xe7   : > { %4950 = shalt.err (!%p4947_p12)
}
  0xe8   : > { %4367 = dma.hbm_to_vmem [thread:$0]  (!%p5320_p6), %s7295_s14, 1024, %s600_s13, [#allocation15], %s7292_s15, %s7292_s15, %s7291_s18  }
  0xe9   : > { %s5174_s22 = smov [#allocation17]   ;;  %s4951_s28 = scalar_lea.hbm %s7244_s16, 2048 }
  0xea   : > { %s615_s4 = sshll.u32 %s5174_s22, 4  ;;  %p4952_p1 = scmp.ne.s32.totalorder %s7244_s16, %s4951_s28  ;;  %s616_s4 = int_to_ptr.vmem [resolvable:$true] %s615_s4 }
  0xeb   : > { %p4958_p0 = scmp.lt.u32.totalorder %s4951_s28, %s7244_s16 }
  0xec   : > { %p4954_p3 = pnand %p4952_p1, %p5336_p8 }
  0xee   : > { %p4955_p13 = pneg %p4954_p3 }
  0xf0   : > { %p4960_p2 = pnand %p4958_p0, %p4955_p13 }
  0xf2   : > { %4963 = shalt.err (!%p4960_p2)
}
  0xf3   : > { %s4964_s18 = scalar_lea.vmem %s616_s4, 2048  ;;  %p4972_p4 = scmp.lt.s32.totalorder %s616_s4, %s616_s4 }
  0xf4   : > { %p4965_p5 = scmp.ne.s32.totalorder %s616_s4, %s4964_s18  ;;  %p4973_p10 = scmp.lt.s32.totalorder %s4964_s18, %s4964_s18 }
  0xf6   : > { %p4967_p7 = pnand %p4965_p5, %p5336_p8  ;;  %p4974_p11 = por %p4973_p10, %p4972_p4 }
  0xf8   : > { %p4968_p9 = pneg %p4967_p7 }
  0xfa   : > { %p4975_p12 = pnand %p4974_p11, %p4968_p9 }
  0xfc   : > { %4978 = shalt.err (!%p4975_p12)
}
  0xfd   : > { %s7296_s15 = smov 128   ;;  %s3794_s3 = sadd.s32 4294967294, %s5161_s21  }
  0xfe   : > { %4370 = dma.hbm_to_vmem [thread:$0]  (!%p5320_p6), %s7244_s16, 2048, %s616_s4, [#allocation18], %s7296_s15, %s7296_s15, %s7262_s7  }
  0xff   : > { %s5519_s24 = sadd.s32 1, %s5161_s21   ;;  %s53_s29 = sadd.s32 1, %s5157_s20 }
 0x100   : > { %s50_s9 = ssub.s32 %s5161_s21, %s5519_s24  ;;  %p60_p1 = scmp.ne.s32.totalorder %s5157_s20, %s5153_s30 }
 0x101   : > { %p51_p8 = scmp.eq.s32.totalorder %s50_s9, 0  ;;  %p61_p3 = scmp.eq.s32.totalorder %s5161_s21, 0 }
 0x102   : > { %p66_p13 = scmp.ne.s32.totalorder %s5153_s30, %s5149_s0  ;;  %p7298_p2 = scmp.eq.s32.totalorder %s5304_s2, 0 }
 0x103   : > { %s5530_s22 = scalar_select %p51_p8, %s5157_s20, %s53_s29  }
 0x104   : > { %p5532_p0 = por %p61_p3, %p60_p1  ;;  %p5538_p6 = por %p7298_p2, %p66_p13 }
 0x105   : > { %p452_p5 = scmp.eq.s32.totalorder %s5304_s2, 1  ;;  %p458_p7 = scmp.eq.s32.totalorder %s3794_s3, 1 }
 0x106   : > { %p4393_p9 = scmp.lt.s32.totalorder %s5161_s21, 2  ;;  %s632_s11 = sand.u32 1, %s5157_s20  }
 0x107   : > { %p5545_p4 = por %p452_p5, %p60_p1  ;;  %p5549_p10 = por %p458_p7, %p66_p13 }
 0x108   : > { %s3805_s17 = sshll.u32 %s632_s11, 7  ;;  %s4014_s25 = sshll.u32 %s5161_s21, 11 }
 0x109   : > { %s7300_s28 = scalar_select %p5545_p4, 1, 0 }
 0x10a   : > { %s7301_s26 = scalar_select %p5549_p10, 1, 0 }
 0x10b   : > { %s7302_s13 = sld [smem:[#allocation31_spill]]  ;;  %s636_s3 = scalar_lea.vmem [#allocation2], %s3805_s17 }
 0x10c   : > { %s643_s9 = sshll.u32 %s636_s3, 4  ;;  %p5563_p11 = pnand %p4393_p9, %p5532_p0  ;;  %s5559_s9 = int_to_ptr.vmem [resolvable:$true] %s643_s9 }
 0x10d   : > { %s7304_s8 = sld [smem:[#allocation32_spill]]  ;;  %s657_s18 = scalar_lea.vmem [#allocation5], %s3805_s17 }
 0x10e   : > { %s5572_s10 = sshll.u32 %s657_s18, 4  ;;  %s5574_s12 = scalar_lea.sflag [#allocation3], %s632_s11  ;;  %s5606_s10 = int_to_ptr.vmem [resolvable:$true] %s5572_s10 }
 0x10f   : > { %p4981_p8 = pneg %p5563_p11 }
 0x111   : > { %s5557_s19 = scalar_lea.hbm %s7302_s13, %s4014_s25  ;;  %s4984_s6 = scalar_lea.hbm %s7302_s13, 4096 }
 0x112   : > { %s4979_s3 = scalar_lea.hbm %s5557_s19, 2048  ;;  %p4985_p13 = scmp.lt.u32.totalorder %s5557_s19, %s7302_s13 }
 0x113   : > { %s5570_s27 = scalar_lea.hbm %s7304_s8, %s4014_s25  ;;  %p4980_p12 = scmp.ne.s32.totalorder %s5557_s19, %s4979_s3 }
 0x114   : > { %p4986_p0 = scmp.lt.u32.totalorder %s4984_s6, %s4979_s3  ;;  %p4988_p5 = scmp.lt.u32.totalorder %s4979_s3, %s5557_s19 }
 0x115   : > { %p4982_p1 = pnand %p4981_p8, %p4980_p12 }
 0x116   : > { %p4987_p2 = por %p4986_p0, %p4985_p13 }
 0x117   : > { %p4983_p3 = pneg %p4982_p1 }
 0x118   : > { %p4989_p7 = por %p4988_p5, %p4987_p2 }
 0x11a   : > { %p4990_p9 = pnand %p4989_p7, %p4983_p3 }
 0x11c   : > { %4993 = shalt.err (!%p4990_p9)
}
 0x11d   : > { %s4994_s11 = scalar_lea.vmem %s5559_s9, 2048  ;;  %s5175_s14 = smov [#allocation2]  }
 0x11e   : > { %p4995_p12 = scmp.ne.s32.totalorder %s5559_s9, %s4994_s11  ;;  %s4999_s17 = sshll.u32 %s5175_s14, 4  ;;  %s5000_s17 = int_to_ptr.vmem [resolvable:$false] %s4999_s17 }
 0x11f   : > { %s5001_s18 = scalar_lea.vmem %s5000_s17, 4096  ;;  %p5002_p4 = scmp.lt.s32.totalorder %s5559_s9, %s5000_s17 }
 0x120   : > { %p4997_p1 = pnand %p4995_p12, %p4981_p8  ;;  %p5003_p13 = scmp.lt.s32.totalorder %s5001_s18, %s4994_s11 }
 0x122   : > { %p4998_p10 = pneg %p4997_p1  ;;  %p5004_p0 = por %p5003_p13, %p5002_p4 }
 0x124   : > { %p5005_p2 = pnand %p5004_p0, %p4998_p10 }
 0x126   : > { %5008 = shalt.err (!%p5005_p2)
}
 0x127   : > { %s7305_s3 = smov 8   ;;  %s653_s1 = sand.u32 1, %s5161_s21  }
 0x128   : > { %4374 = dma.hbm_to_vmem [thread:$0]  (!%p5563_p11), %s5557_s19, 2048, %s5559_s9, %s5574_s12, %s7296_s15, %s7296_s15, %s7305_s3  }
 0x129   : > { %s5609_s6 = scalar_lea.sflag [#allocation6], %s653_s1  ;;  %s5009_s7 = scalar_lea.hbm %s5570_s27, 2048 }
 0x12a   : > { %p5010_p4 = scmp.ne.s32.totalorder %s5570_s27, %s5009_s7  ;;  %s5014_s14 = scalar_lea.hbm %s7304_s8, 4096 }
 0x12b   : > { %p5015_p5 = scmp.lt.u32.totalorder %s5570_s27, %s7304_s8  ;;  %p5016_p7 = scmp.lt.u32.totalorder %s5014_s14, %s5009_s7 }
 0x12c   : > { %p5012_p10 = pnand %p5010_p4, %p4981_p8  ;;  %p5018_p12 = scmp.lt.u32.totalorder %s5009_s7, %s5570_s27 }
 0x12d   : > { %p5017_p9 = por %p5016_p7, %p5015_p5 }
 0x12e   : > { %p5013_p3 = pneg %p5012_p10 }
 0x12f   : > { %p5019_p1 = por %p5018_p12, %p5017_p9 }
 0x131   : > { %p5020_p13 = pnand %p5019_p1, %p5013_p3 }
 0x133   : > { %5023 = shalt.err (!%p5020_p13)
}
 0x134   : > { %s5024_s12 = scalar_lea.vmem %s5606_s10, 2048  ;;  %s5176_s19 = smov [#allocation5]  }
 0x135   : > { %p5025_p0 = scmp.ne.s32.totalorder %s5606_s10, %s5024_s12  ;;  %s5029_s9 = sshll.u32 %s5176_s19, 4  ;;  %s5030_s9 = int_to_ptr.vmem [resolvable:$false] %s5029_s9 }
 0x136   : > { %s5031_s1 = scalar_lea.vmem %s5030_s9, 4096  ;;  %p5032_p10 = scmp.lt.s32.totalorder %s5606_s10, %s5030_s9 }
 0x137   : > { %p5027_p2 = pnand %p5025_p0, %p4981_p8  ;;  %p5033_p5 = scmp.lt.s32.totalorder %s5031_s1, %s5024_s12 }
 0x139   : > { %p5028_p4 = pneg %p5027_p2  ;;  %p5034_p7 = por %p5033_p5, %p5032_p10 }
 0x13b   : > { %p5035_p9 = pnand %p5034_p7, %p5028_p4 }
 0x13d   : > { %5038 = shalt.err (!%p5035_p9)
}
 0x13e   : > { %4377 = dma.hbm_to_vmem [thread:$0]  (!%p5563_p11), %s5570_s27, 2048, %s5606_s10, %s5609_s6, %s7296_s15, %s7296_s15, %s7305_s3  }
 0x13f   : > { %p7306_p8 = scmp.ne.s32.totalorder %s7284_s23, 0 }
 0x140   : > { %s5641_s7 = sand.u32 (!%p7306_p8), 1, %s5153_s30  }
 0x141   : > { %676 = sbr.rel (%p7306_p8) target bundleno = 2466 (0x9a2), region = 92  ;;  %s5644_s25 = sshll.u32 (!%p7306_p8), %s5641_s7, 7 }
 0x142   : > { %s679_s29 = scalar_lea.sflag (!%p7306_p8), [#allocation3], %s5641_s7  ;;  %s5648_s11 = scalar_lea.vmem (!%p7306_p8), [#allocation2], %s5644_s25 }
 0x148   : > { %5112 = dma.done.wait (%p5538_p6), %s679_s29, 2048  }
 0x149   : > { %5114 = vsyncadd (%p5538_p6), %s679_s29, 4294965248  ;;  %s687_s10 = sand.u32 1, %s5304_s2   ;;  %s5656_s15 = scalar_lea.vmem [#allocation5], %s5644_s25 }
 0x14a   : > { %s688_s23 = scalar_lea.sflag [#allocation6], %s687_s10 }
 0x14b   : > { %5116 = dma.done.wait (%p5538_p6), %s688_s23, 2048  }
 0x14c   : > { %5118 = vsyncadd (%p5538_p6), %s688_s23, 4294965248  ;;  %p7307_p11 = scmp.eq.s32.totalorder %s5304_s2, 0 }
 0x14e   : > { %5120 = dma.done.wait (%p7307_p11), [#allocation6], 1024   ;;  %p7308_p3 = pmov %p7307_p11 }
 0x150   : > { %5122 = vsyncadd (%p7308_p3), [#allocation6], 4294966272  ;;  %p7309_p12 = pmov %p7308_p3 }
 0x151   : > { %p7310_p1 = pmov %p7308_p3 }
 0x152   : > { %5124 = dma.done.wait (%p7309_p12), [#allocation9], 2048  }
 0x153   : > { %5126 = vsyncadd (%p7310_p1), [#allocation9], 4294965248  ;;  %p7311_p13 = pmov %p7310_p1 }
 0x154   : > { %p7312_p0 = pmov %p7310_p1 }
 0x155   : > { %5128 = dma.done.wait (%p7311_p13), [#allocation12], 3072  }
 0x156   : > { %5130 = vsyncadd (%p7312_p0), [#allocation12], 4294964224  ;;  %p7313_p6 = pmov %p7312_p0 }
 0x157   : > { %p7314_p2 = pmov %p7312_p0 }
 0x158   : > { %5132 = dma.done.wait (%p7313_p6), [#allocation15], 2048  }
 0x159   : > { %5134 = vsyncadd (%p7314_p2), [#allocation15], 4294965248  ;;  %p7315_p4 = pmov %p7312_p0 }
 0x15a   : > { %p7316_p10 = pmov %p7312_p0 }
 0x15b   : > { %5136 = dma.done.wait (%p7315_p4), [#allocation18], 2048  }
 0x15c   : > { %5138 = vsyncadd (%p7316_p10), [#allocation18], 4294965248  ;;  %v4451_v0 = vld [vmem:[#allocation7] sm:$0xff]   ;;  %v4452_v1 = vld [vmem:[#allocation7 + $0x8] sm:$0xff]   ;;  %s7317_s3 = sld [smem:[#allocation34_spill]]  ;;  %s7318_s12 = sld [smem:[#allocation37_spill]] }
 0x15d   : > { %4114 = vmatprep.subr.bf16.mxu1 %v4451_v0  ;;  %v4453_v2 = vld [vmem:[#allocation7 + $0x10] sm:$0xff]   ;;  %v4454_v3 = vld [vmem:[#allocation7 + $0x18] sm:$0xff]   ;;  %v809_v4 = vld [vmem:[%s5656_s15] sm:$0xff]  ;;  %s7319_s1 = sld [smem:[#allocation39_spill]]  ;;  %s6065_s29 = scalar_lea.vmem [#allocation19], %s5644_s25 }
 0x15e   : > { %4115 = vmatpush3.bf16.msra.mxu1 %v4451_v0  ;;  %v810_v5 = vld [vmem:[%s5656_s15 + $0x8] sm:$0xff]  ;;  %v4455_v7 = vld [vmem:[#allocation7 + $0x20] sm:$0xff]   ;;  %v4457_v9 = vld [vmem:[#allocation7 + $0x30] sm:$0xff]   ;;  %s7320_s23 = sld [smem:[#allocation41_spill]]  ;;  %s7322_s17 = sld [smem:[#allocation45_spill]] }
 0x15f   : > { %4116 = vmatprep.subr.bf16.mxu1 %v4452_v1  ;;  %v825_v6 = vpack.c.bf16 %v810_v5, %v809_v4  ;;  %v4456_v8 = vld [vmem:[#allocation7 + $0x28] sm:$0xff]   ;;  %v4458_v10 = vld [vmem:[#allocation7 + $0x38] sm:$0xff]   ;;  %v811_v11 = vld [vmem:[%s5656_s15 + $0x10] sm:$0xff]  ;;  %s7323_s19 = sld [smem:[#allocation46_spill]]  ;;  %s4016_s9 = sshll.u32 %s5304_s2, 11 }
 0x160   : > { %v812_v12 = vld [vmem:[%s5656_s15 + $0x18] sm:$0xff]  ;;  %v813_v13 = vld [vmem:[%s5656_s15 + $0x20] sm:$0xff]  ;;  %v814_v14 = vld [vmem:[%s5656_s15 + $0x28] sm:$0xff]  ;;  %s7325_s10 = sld [smem:[#allocation47_spill]]  ;;  %s3574_s4 = sshll.u32 %s6065_s29, 4  ;;  %s6785_s4 = int_to_ptr.vmem [resolvable:$true] %s3574_s4 }
 0x161   : > { %4130 = vmatprep.mubr.bf16.mxu1 %v825_v6  ;;  %v4459_v15 = vld [vmem:[#allocation8] sm:$0xff]   ;;  %v826_v16 = vpack.c.bf16 %v812_v12, %v811_v11  ;;  %v4460_v17 = vld [vmem:[#allocation8 + $0x8] sm:$0xff]   ;;  %v827_v18 = vpack.c.bf16 %v814_v14, %v813_v13  ;;  %v815_v19 = vld [vmem:[%s5656_s15 + $0x30] sm:$0xff]  ;;  %s5039_s27 = scalar_lea.vmem %s6785_s4, 2048  ;;  %p7326_p7 = scmp.ne.s32.totalorder %s7300_s28, 0 }
 0x162   : > { %4117 = vmatpush3.bf16.msra.mxu1 %v4452_v1  ;;  %v816_v20 = vld [vmem:[%s5656_s15 + $0x38] sm:$0xff]  ;;  %v817_v21 = vld [vmem:[%s5656_s15 + $0x40] sm:$0xff]  ;;  %v818_v22 = vld [vmem:[%s5656_s15 + $0x48] sm:$0xff]  ;;  %p5040_p5 = scmp.ne.s32.totalorder %s6785_s4, %s5039_s27 }
 0x163   : > { %4118 = vmatprep.subr.bf16.mxu1 %v4453_v2  ;;  %v4461_v23 = vld [vmem:[#allocation8 + $0x10] sm:$0xff]   ;;  %v828_v24 = vpack.c.bf16 %v816_v20, %v815_v19  ;;  %v4462_v25 = vld [vmem:[#allocation8 + $0x18] sm:$0xff]   ;;  %v829_v26 = vpack.c.bf16 %v818_v22, %v817_v21  ;;  %v821_v29 = vld [vmem:[%s5656_s15 + $0x60] sm:$0xff] }
 0x164   : > { %v819_v27 = vld [vmem:[%s5656_s15 + $0x50] sm:$0xff]  ;;  %v820_v28 = vld [vmem:[%s5656_s15 + $0x58] sm:$0xff]  ;;  %v822_v30 = vld [vmem:[%s5656_s15 + $0x68] sm:$0xff]  ;;  %p5041_p9 = pnand %p5040_p5, %p7326_p7 }
 0x165   : > { %v4463_v31 = vld [vmem:[#allocation8 + $0x20] sm:$0xff]   ;;  %v830_v32 = vpack.c.bf16 %v820_v28, %v819_v27  ;;  %v4464_v33 = vld [vmem:[#allocation8 + $0x28] sm:$0xff]   ;;  %v831_v34 = vpack.c.bf16 %v822_v30, %v821_v29  ;;  %v823_v35 = vld [vmem:[%s5656_s15 + $0x70] sm:$0xff] }
 0x166   : > { %4119 = vmatpush3.bf16.msra.mxu1 %v4453_v2  ;;  %v824_v36 = vld [vmem:[%s5656_s15 + $0x78] sm:$0xff]  ;;  %v4465_v38 = vld [vmem:[#allocation8 + $0x30] sm:$0xff]   ;;  %v4467_v40 = vld [vmem:[#allocation10] sm:$0xff]   ;;  %p5042_p8 = pneg %p5041_p9 }
 0x167   : > { %4120 = vmatprep.subr.bf16.mxu1 %v4454_v3  ;;  %v832_v37 = vpack.c.bf16 %v824_v36, %v823_v35  ;;  %v4466_v39 = vld [vmem:[#allocation8 + $0x38] sm:$0xff]   ;;  %v4468_v41 = vld [vmem:[#allocation10 + $0x8] sm:$0xff]   ;;  %4178 = vmatprep.subr.bf16.mxu0 %v4467_v40  ;;  %v4469_v42 = vld [vmem:[#allocation10 + $0x10] sm:$0xff]  }
 0x168   : > { %4179 = vmatpush3.bf16.msra.mxu0 %v4467_v40  ;;  %v4470_v43 = vld [vmem:[#allocation10 + $0x18] sm:$0xff]   ;;  %v4471_v44 = vld [vmem:[#allocation10 + $0x20] sm:$0xff]   ;;  %v4472_v45 = vld [vmem:[#allocation10 + $0x28] sm:$0xff]  }
 0x169   : > { %4180 = vmatprep.subr.bf16.mxu0 %v4468_v41  ;;  %v3824_v46 = vld [vmem:[%s7317_s3] ss:$0 sm:$0xff]  ;;  %v4474_v40 = vld [vmem:[#allocation10 + $0x38] sm:$0xff]   ;;  %s7321_s3 = sld [smem:[#allocation43_spill]] }
 0x16a   : > { %4121 = vmatpush3.bf16.msra.mxu1 %v4454_v3 }
 0x16b   : > { %4122 = vmatprep.subr.bf16.mxu1 %v4455_v7 }
 0x16c   : > { %4181 = vmatpush3.bf16.msra.mxu0 %v4468_v41  ;;  %v4475_v41 = vld [vmem:[#allocation11] ss:$8 sps:$4 sm:$0xff]  }
 0x16d   : > { %4182 = vmatprep.subr.bf16.mxu0 %v4469_v42 }
 0x16e   : > { %4123 = vmatpush3.bf16.msra.mxu1 %v4455_v7 }
 0x16f   : > { %4124 = vmatprep.subr.bf16.mxu1 %v4456_v8 }
 0x170   : > { %4183 = vmatpush3.bf16.msra.mxu0 %v4469_v42  ;;  %v4477_v42 = vld [vmem:[#allocation11 + $0x4] ss:$8 sps:$4 sm:$0xff]  }
 0x171   : > { %4184 = vmatprep.subr.bf16.mxu0 %v4470_v43 }
 0x172   : > { %4125 = vmatpush3.bf16.msra.mxu1 %v4456_v8 }
 0x173   : > { %4126 = vmatprep.subr.bf16.mxu1 %v4457_v9 }
 0x174   : > { %4185 = vmatpush3.bf16.msra.mxu0 %v4470_v43  ;;  %v4480_v43 = vld [vmem:[#allocation11 + $0x14] ss:$8 sps:$4 sm:$0xff]  }
 0x175   : > { %4186 = vmatprep.subr.bf16.mxu0 %v4471_v44 }
 0x176   : > { %4127 = vmatpush3.bf16.msra.mxu1 %v4457_v9 }
 0x177   : > { %4128 = vmatprep.subr.bf16.mxu1 %v4458_v10 }
 0x178   : > { %4187 = vmatpush3.bf16.msra.mxu0 %v4471_v44  ;;  %v4478_v44 = vld [vmem:[#allocation11 + $0x10] ss:$8 sps:$4 sm:$0xff]  }
 0x179   : > { %4188 = vmatprep.subr.bf16.mxu0 %v4472_v45 }
 0x17a   : > { %4129 = vmatpush3.bf16.msra.mxu1 %v4458_v10 }
 0x17b   : > { %4146 = vmatprep.subr.bf16.mxu1 %v4459_v15 }
 0x17c   : > { %4189 = vmatpush3.bf16.msra.mxu0 %v4472_v45  ;;  %v4483_v45 = vld [vmem:[#allocation11 + $0x24] ss:$8 sps:$4 sm:$0xff]  }
 0x17d   : > { %4131 = vmatmul.mubr.bf16.vlgmr.msra.gmra.mrb[0].mxu1 %v826_v16 }
 0x17e   : > { %4134 = vmatprep.mubr.bf16.mxu1 %v827_v18  ;;  %4147 = vmatpush3.bf16.msra.mxu1 %v4459_v15 }
 0x17f   : > { %4148 = vmatprep.subr.bf16.mxu1 %v4460_v17 }
 0x182   : > { %4149 = vmatpush3.bf16.msra.mxu1 %v4460_v17 }
 0x183   : > { %4150 = vmatprep.subr.bf16.mxu1 %v4461_v23 }
 0x185   : > { %4135 = vmatmul.mubr.bf16.gmra.mrb[4].mxu1 %v828_v24 }
 0x186   : > { %4138 = vmatprep.mubr.bf16.mxu1 %v829_v26  ;;  %4151 = vmatpush3.bf16.msra.mxu1 %v4461_v23 }
 0x187   : > { %4152 = vmatprep.subr.bf16.mxu1 %v4462_v25 }
 0x18a   : > { %4153 = vmatpush3.bf16.msra.mxu1 %v4462_v25 }
 0x18b   : > { %4154 = vmatprep.subr.bf16.mxu1 %v4463_v31 }
 0x18d   : > { %4139 = vmatmul.mubr.bf16.gmra.mrb[8].mxu1 %v830_v32 }
 0x18e   : > { %4142 = vmatprep.mubr.bf16.mxu1 %v831_v34  ;;  %4155 = vmatpush3.bf16.msra.mxu1 %v4463_v31 }
 0x18f   : > { %4156 = vmatprep.subr.bf16.mxu1 %v4464_v33 }
 0x192   : > { %4157 = vmatpush3.bf16.msra.mxu1 %v4464_v33 }
 0x193   : > { %4158 = vmatprep.subr.bf16.mxu1 %v4465_v38 }
 0x195   : > { %4143 = vmatmul.mubr.bf16.gmra.mrb[12].mxu1 %v832_v37 }
 0x196   : > { %4159 = vmatpush3.bf16.msra.mxu1 %v4465_v38 }
 0x197   : > { %4160 = vmatprep.subr.bf16.mxu1 %v4466_v39 }
 0x19a   : > { %4161 = vmatpush3.bf16.msra.mxu1 %v4466_v39  ;;  %v4473_v39 = vld [vmem:[#allocation10 + $0x30] sm:$0xff]  }
 0x19b   : > { %4190 = vmatprep.subr.bf16.mxu0 %v4473_v39  ;;  %1517 = vmatprep.subr.bf16.mxu1 %v4477_v42 }
 0x19c   : > { %4191 = vmatpush3.bf16.msra.mxu0 %v4473_v39 }
 0x19d   : > { %4192 = vmatprep.subr.bf16.mxu0 %v4474_v40 }
 0x1a0   : > { %4193 = vmatpush3.bf16.msra.mxu0 %v4474_v40 }
 0x250   : > { %v4132_v47 = vpop.f32.mrb[0].mxu1 }
 0x251   : > { %v947_v48 = vadd.f32 %v4132_v47, %v3824_v46  ;;  %v938_v49 = vpop.f32.mrb[1].mxu1  ;;  %v4486_v47 = vld [vmem:[#allocation11 + $0x34] ss:$8 sps:$4 sm:$0xff]  }
 0x252   : > { %v939_v50 = vadd.f32 %v3824_v46, %v938_v49  ;;  %v4133_v51 = vpop.f32.mrb[2].mxu1  ;;  %v4489_v49 = vld [vmem:[#allocation11 + $0x44] ss:$8 sps:$4 sm:$0xff]  }
 0x253   : > { %v950_v52 = vadd.f32 %v4133_v51, %v3824_v46  ;;  %v941_v53 = vpop.f32.mrb[3].mxu1  ;;  %v1003_v55 = vmax.f32 %v947_v48, 0.0  ;;  %v4484_v48 = vld [vmem:[#allocation11 + $0x30] ss:$8 sps:$4 sm:$0xff]   ;;  %v4492_v51 = vld [vmem:[#allocation11 + $0x54] ss:$8 sps:$4 sm:$0xff]  }
 0x254   : > { %v942_v54 = vadd.f32 %v3824_v46, %v941_v53  ;;  %v1001_v57 = vmax.f32 %v939_v50, 0.0  ;;  %v4487_v50 = vld [vmem:[#allocation11 + $0x40] ss:$8 sps:$4 sm:$0xff]  }
 0x255   : > { %v1004_v56 = vmax.f32 %v950_v52, 0.0  ;;  %v4490_v52 = vld [vmem:[#allocation11 + $0x50] ss:$8 sps:$4 sm:$0xff]   ;;  %v3833_v53 = vld [vmem:[%s7233_s5] ss:$0 sm:$0xff] }
 0x256   : > { %v1002_v58 = vmax.f32 %v942_v54, 0.0 }
 0x257   : > { %v1018_v59 = vpack.c.bf16 %v1004_v56, %v1003_v55 }
 0x258   : > { %v1017_v60 = vpack.c.bf16 %v1002_v58, %v1001_v57  ;;  %v4136_v61 = vpop.f32.mrb[4].mxu1 }
 0x259   : > { %v963_v62 = vadd.f32 %v4136_v61, %v3824_v46  ;;  %v954_v63 = vpop.f32.mrb[5].mxu1 }
 0x25a   : > { %v955_v0 = vadd.f32 %v3824_v46, %v954_v63  ;;  %v4137_v1 = vpop.f32.mrb[6].mxu1  ;;  %4162 = vmatprep.mubr.bf16.mxu1 %v1017_v60 }
 0x25b   : > { %v1007_v2 = vmax.f32 %v963_v62, 0.0  ;;  %v966_v3 = vadd.f32 %v4137_v1, %v3824_v46  ;;  %v957_v4 = vpop.f32.mrb[7].mxu1  ;;  %4163 = vmatmul.mubr.bf16.vlgmr.msra.gmra.mrb[16].mxu1 %v1018_v59 }
 0x25c   : > { %v1005_v5 = vmax.f32 %v955_v0, 0.0  ;;  %v958_v6 = vadd.f32 %v3824_v46, %v957_v4  ;;  %1518 = vmatpush1.bf16.msra.mxu1 %v4475_v41 }
 0x25d   : > { %v1008_v7 = vmax.f32 %v966_v3, 0.0  ;;  %1519 = vmatprep.subr.bf16.mxu1 %v4480_v43 }
 0x25e   : > { %v1006_v8 = vmax.f32 %v958_v6, 0.0 }
 0x25f   : > { %v1020_v9 = vpack.c.bf16 %v1008_v7, %v1007_v2 }
 0x260   : > { %v1019_v10 = vpack.c.bf16 %v1006_v8, %v1005_v5  ;;  %v4140_v11 = vpop.f32.mrb[8].mxu1  ;;  %1520 = vmatpush1.bf16.msra.mxu1 %v4478_v44 }
 0x261   : > { %v979_v12 = vadd.f32 %v4140_v11, %v3824_v46  ;;  %v970_v13 = vpop.f32.mrb[9].mxu1  ;;  %1521 = vmatprep.subr.bf16.mxu1 %v4483_v45 }
 0x262   : > { %4166 = vmatprep.mubr.bf16.mxu1 %v1019_v10  ;;  %v971_v14 = vadd.f32 %v3824_v46, %v970_v13  ;;  %v4141_v15 = vpop.f32.mrb[10].mxu1 }
 0x263   : > { %4167 = vmatmul.mubr.bf16.gmra.mrb[20].mxu1 %v1020_v9  ;;  %v1011_v16 = vmax.f32 %v979_v12, 0.0  ;;  %v982_v17 = vadd.f32 %v4141_v15, %v3824_v46  ;;  %v973_v18 = vpop.f32.mrb[11].mxu1 }
 0x264   : > { %v1009_v19 = vmax.f32 %v971_v14, 0.0  ;;  %v974_v20 = vadd.f32 %v3824_v46, %v973_v18 }
 0x265   : > { %v1012_v21 = vmax.f32 %v982_v17, 0.0 }
 0x266   : > { %v1010_v22 = vmax.f32 %v974_v20, 0.0 }
 0x267   : > { %v1022_v23 = vpack.c.bf16 %v1012_v21, %v1011_v16 }
 0x268   : > { %v1021_v24 = vpack.c.bf16 %v1010_v22, %v1009_v19  ;;  %v4144_v25 = vpop.f32.mrb[12].mxu1 }
 0x269   : > { %v995_v26 = vadd.f32 %v4144_v25, %v3824_v46  ;;  %v986_v27 = vpop.f32.mrb[13].mxu1 }
 0x26a   : > { %4170 = vmatprep.mubr.bf16.mxu1 %v1021_v24  ;;  %v987_v28 = vadd.f32 %v3824_v46, %v986_v27  ;;  %v4145_v29 = vpop.f32.mrb[14].mxu1 }
 0x26b   : > { %4171 = vmatmul.mubr.bf16.gmra.mrb[24].mxu1 %v1022_v23  ;;  %v1015_v30 = vmax.f32 %v995_v26, 0.0  ;;  %v998_v31 = vadd.f32 %v4145_v29, %v3824_v46  ;;  %v989_v32 = vpop.f32.mrb[15].mxu1 }
 0x26c   : > { %v1013_v33 = vmax.f32 %v987_v28, 0.0  ;;  %v990_v34 = vadd.f32 %v3824_v46, %v989_v32  ;;  %v4481_v46 = vld [vmem:[#allocation11 + $0x20] ss:$8 sps:$4 sm:$0xff]  }
 0x26d   : > { %v1016_v35 = vmax.f32 %v998_v31, 0.0  ;;  %1522 = vmatpush1.bf16.msra.mxu1 %v4481_v46  ;;  %v4495_v46 = vld [vmem:[#allocation11 + $0x64] ss:$8 sps:$4 sm:$0xff]  }
 0x26e   : > { %v1014_v36 = vmax.f32 %v990_v34, 0.0  ;;  %1523 = vmatprep.subr.bf16.mxu1 %v4486_v47  ;;  %v4493_v47 = vld [vmem:[#allocation11 + $0x60] ss:$8 sps:$4 sm:$0xff]  }
 0x26f   : > { %v1024_v37 = vpack.c.bf16 %v1016_v35, %v1015_v30 }
 0x270   : > { %v1023_v38 = vpack.c.bf16 %v1014_v36, %v1013_v33 }
 0x271   : > { %1524 = vmatpush1.bf16.msra.mxu1 %v4484_v48  ;;  %v4498_v48 = vld [vmem:[#allocation11 + $0x74] ss:$8 sps:$4 sm:$0xff]  }
 0x272   : > { %4174 = vmatprep.mubr.bf16.mxu1 %v1023_v38  ;;  %1525 = vmatprep.subr.bf16.mxu1 %v4489_v49  ;;  %v4496_v49 = vld [vmem:[#allocation11 + $0x70] ss:$8 sps:$4 sm:$0xff]  }
 0x273   : > { %4175 = vmatmul.mubr.bf16.gmra.mrb[28].mxu1 %v1024_v37 }
 0x275   : > { %1526 = vmatpush1.bf16.msra.mxu1 %v4487_v50  ;;  %v5177_v50 = vmov 0  }
 0x276   : > { %1527 = vmatprep.subr.bf16.mxu1 %v4492_v51  ;;  %1549 = vmatprep.mubr.bf16.mxu1 %v5177_v50  ;;  %v3842_v51 = vld [vmem:[%s7318_s12] ss:$0 sm:$0xff] }
 0x279   : > { %1528 = vmatpush1.bf16.msra.mxu1 %v4490_v52 }
 0x27a   : > { %1529 = vmatprep.subr.bf16.mxu1 %v4495_v46  ;;  %v4501_v46 = vld [vmem:[#allocation13 + $0x10] sm:$0xff]  }
 0x27d   : > { %1530 = vmatpush1.bf16.msra.mxu1 %v4493_v47  ;;  %v1427_v47 = vlaneseq }
 0x27e   : > { %1531 = vmatprep.subr.bf16.mxu1 %v4498_v48 }
 0x27f   : > { %v5715_v48 = vshrl.u32 %v1427_v47, 7 }
 0x281   : > { %1532 = vmatpush1.bf16.msra.mxu1 %v4496_v49  ;;  %v1429_v49 = vsub.s32 0, %v5715_v48 }
 0x32e   : > { %v4164_v54 = vpop.f32.mrb[16].mxu1 }
 0x32f   : > { %v1139_v55 = vadd.f32 %v4164_v54, %v3833_v53  ;;  %v1130_v56 = vpop.f32.mrb[17].mxu1 }
 0x330   : > { %v1131_v57 = vadd.f32 %v3833_v53, %v1130_v56  ;;  %v4165_v58 = vpop.f32.mrb[18].mxu1 }
 0x331   : > { %v1142_v59 = vadd.f32 %v4165_v58, %v3833_v53  ;;  %v1133_v60 = vpop.f32.mrb[19].mxu1  ;;  %v1195_v62 = vmax.f32 %v1139_v55, 0.0 }
 0x332   : > { %v1134_v61 = vadd.f32 %v3833_v53, %v1133_v60  ;;  %v1193_v0 = vmax.f32 %v1131_v57, 0.0 }
 0x333   : > { %v1196_v63 = vmax.f32 %v1142_v59, 0.0 }
 0x334   : > { %v1194_v1 = vmax.f32 %v1134_v61, 0.0 }
 0x335   : > { %v1210_v2 = vpack.c.bf16 %v1196_v63, %v1195_v62 }
 0x336   : > { %v4168_v3 = vpop.f32.mrb[20].mxu1  ;;  %v1209_v4 = vpack.c.bf16 %v1194_v1, %v1193_v0 }
 0x337   : > { %v1155_v5 = vadd.f32 %v4168_v3, %v3833_v53  ;;  %v1146_v6 = vpop.f32.mrb[21].mxu1 }
 0x338   : > { %v1147_v7 = vadd.f32 %v3833_v53, %v1146_v6  ;;  %v4169_v8 = vpop.f32.mrb[22].mxu1  ;;  %4194 = vmatprep.mubr.bf16.mxu0 %v1209_v4 }
 0x339   : > { %v1199_v9 = vmax.f32 %v1155_v5, 0.0  ;;  %v1158_v10 = vadd.f32 %v4169_v8, %v3833_v53  ;;  %v1149_v11 = vpop.f32.mrb[23].mxu1  ;;  %4195 = vmatmul.mubr.bf16.vlgmr.msra.gmra.mrb[0].mxu0 %v1210_v2 }
 0x33a   : > { %v1197_v12 = vmax.f32 %v1147_v7, 0.0  ;;  %v1150_v13 = vadd.f32 %v3833_v53, %v1149_v11 }
 0x33b   : > { %v1200_v14 = vmax.f32 %v1158_v10, 0.0 }
 0x33c   : > { %v1198_v15 = vmax.f32 %v1150_v13, 0.0 }
 0x33d   : > { %v1212_v16 = vpack.c.bf16 %v1200_v14, %v1199_v9 }
 0x33e   : > { %v1211_v17 = vpack.c.bf16 %v1198_v15, %v1197_v12  ;;  %v4172_v18 = vpop.f32.mrb[24].mxu1 }
 0x33f   : > { %v1171_v19 = vadd.f32 %v4172_v18, %v3833_v53  ;;  %v1162_v20 = vpop.f32.mrb[25].mxu1 }
 0x340   : > { %4198 = vmatprep.mubr.bf16.mxu0 %v1211_v17  ;;  %v1163_v21 = vadd.f32 %v3833_v53, %v1162_v20  ;;  %v4173_v22 = vpop.f32.mrb[26].mxu1 }
 0x341   : > { %4199 = vmatmul.mubr.bf16.gmra.mrb[4].mxu0 %v1212_v16  ;;  %v1203_v23 = vmax.f32 %v1171_v19, 0.0  ;;  %v1174_v24 = vadd.f32 %v4173_v22, %v3833_v53  ;;  %v1165_v25 = vpop.f32.mrb[27].mxu1 }
 0x342   : > { %v1201_v26 = vmax.f32 %v1163_v21, 0.0  ;;  %v1166_v27 = vadd.f32 %v3833_v53, %v1165_v25 }
 0x343   : > { %v1204_v28 = vmax.f32 %v1174_v24, 0.0 }
 0x344   : > { %v1202_v29 = vmax.f32 %v1166_v27, 0.0 }
 0x345   : > { %v1214_v30 = vpack.c.bf16 %v1204_v28, %v1203_v23 }
 0x346   : > { %v1213_v31 = vpack.c.bf16 %v1202_v29, %v1201_v26  ;;  %v4176_v32 = vpop.f32.mrb[28].mxu1 }
 0x347   : > { %v1187_v33 = vadd.f32 %v4176_v32, %v3833_v53  ;;  %v1178_v34 = vpop.f32.mrb[29].mxu1 }
 0x348   : > { %4202 = vmatprep.mubr.bf16.mxu0 %v1213_v31  ;;  %v1179_v35 = vadd.f32 %v3833_v53, %v1178_v34  ;;  %v4177_v36 = vpop.f32.mrb[30].mxu1 }
 0x349   : > { %4203 = vmatmul.mubr.bf16.gmra.mrb[8].mxu0 %v1214_v30  ;;  %v1207_v37 = vmax.f32 %v1187_v33, 0.0  ;;  %v1190_v38 = vadd.f32 %v4177_v36, %v3833_v53  ;;  %v1181_v39 = vpop.f32.mrb[31].mxu1 }
 0x34a   : > { %v1205_v40 = vmax.f32 %v1179_v35, 0.0  ;;  %v1182_v41 = vadd.f32 %v3833_v53, %v1181_v39 }
 0x34b   : > { %v1208_v42 = vmax.f32 %v1190_v38, 0.0 }
 0x34c   : > { %v1206_v43 = vmax.f32 %v1182_v41, 0.0 }
 0x34d   : > { %v1216_v44 = vpack.c.bf16 %v1208_v42, %v1207_v37 }
 0x34e   : > { %v1215_v45 = vpack.c.bf16 %v1206_v43, %v1205_v40 }
 0x350   : > { %4206 = vmatprep.mubr.bf16.mxu0 %v1215_v45  ;;  %v4500_v45 = vld [vmem:[#allocation13 + $0x8] sm:$0xff]  }
 0x351   : > { %4207 = vmatmul.mubr.bf16.gmra.mrb[12].mxu0 %v1216_v44  ;;  %v4499_v44 = vld [vmem:[#allocation13] sm:$0xff]  }
 0x352   : > { %4210 = vmatprep.subr.bf16.mxu0 %v4499_v44 }
 0x353   : > { %4211 = vmatpush3.bf16.msra.mxu0 %v4499_v44 }
 0x354   : > { %4212 = vmatprep.subr.bf16.mxu0 %v4500_v45 }
 0x357   : > { %4213 = vmatpush3.bf16.msra.mxu0 %v4500_v45 }
 0x358   : > { %4214 = vmatprep.subr.bf16.mxu0 %v4501_v46 }
 0x35b   : > { %4215 = vmatpush3.bf16.msra.mxu0 %v4501_v46 }
 0x40c   : > { %v4196_v52 = vpop.f32.mrb[0].mxu0 }
 0x40d   : > { %v1331_v53 = vadd.f32 %v4196_v52, %v3842_v51  ;;  %v1322_v54 = vpop.f32.mrb[1].mxu0  ;;  %v4502_v52 = vld [vmem:[#allocation13 + $0x18] sm:$0xff]  }
 0x40e   : > { %v1323_v55 = vadd.f32 %v3842_v51, %v1322_v54  ;;  %v4197_v56 = vpop.f32.mrb[2].mxu0  ;;  %4216 = vmatprep.subr.bf16.mxu0 %v4502_v52 }
 0x40f   : > { %v1334_v57 = vadd.f32 %v4197_v56, %v3842_v51  ;;  %v1325_v58 = vpop.f32.mrb[3].mxu0  ;;  %v1387_v60 = vmax.f32 %v1331_v53, 0.0  ;;  %4217 = vmatpush3.bf16.msra.mxu0 %v4502_v52 }
 0x410   : > { %v1326_v59 = vadd.f32 %v3842_v51, %v1325_v58  ;;  %v1385_v62 = vmax.f32 %v1323_v55, 0.0  ;;  %v4503_v55 = vld [vmem:[#allocation13 + $0x20] sm:$0xff]  }
 0x411   : > { %v1388_v61 = vmax.f32 %v1334_v57, 0.0  ;;  %4218 = vmatprep.subr.bf16.mxu0 %v4503_v55 }
 0x412   : > { %v1386_v63 = vmax.f32 %v1326_v59, 0.0 }
 0x413   : > { %v1402_v0 = vpack.c.bf16 %v1388_v61, %v1387_v60  ;;  %4219 = vmatpush3.bf16.msra.mxu0 %v4503_v55 }
 0x414   : > { %v1401_v1 = vpack.c.bf16 %v1386_v63, %v1385_v62  ;;  %v4200_v2 = vpop.f32.mrb[4].mxu0  ;;  %v4504_v62 = vld [vmem:[#allocation13 + $0x28] sm:$0xff]  }
 0x415   : > { %v1347_v3 = vadd.f32 %v4200_v2, %v3842_v51  ;;  %v1338_v4 = vpop.f32.mrb[5].mxu0  ;;  %4220 = vmatprep.subr.bf16.mxu0 %v4504_v62 }
 0x416   : > { %v1339_v5 = vadd.f32 %v3842_v51, %v1338_v4  ;;  %v4201_v6 = vpop.f32.mrb[6].mxu0  ;;  %1550 = vmatmul.mubr.bf16.vlgmr.msra.gmra.mrb[32].mxu1 %v1401_v1 }
 0x417   : > { %v1350_v7 = vadd.f32 %v4201_v6, %v3842_v51  ;;  %v1341_v8 = vpop.f32.mrb[7].mxu0  ;;  %1559 = vmatprep.mubr.bf16.mxu1 %v5177_v50  ;;  %v1391_v10 = vmax.f32 %v1347_v3, 0.0  ;;  %4221 = vmatpush3.bf16.msra.mxu0 %v4504_v62 }
 0x418   : > { %v1342_v9 = vadd.f32 %v3842_v51, %v1341_v8  ;;  %v1389_v12 = vmax.f32 %v1339_v5, 0.0  ;;  %v4505_v5 = vld [vmem:[#allocation13 + $0x30] sm:$0xff]  }
 0x419   : > { %v1392_v11 = vmax.f32 %v1350_v7, 0.0  ;;  %4222 = vmatprep.subr.bf16.mxu0 %v4505_v5 }
 0x41a   : > { %v1390_v13 = vmax.f32 %v1342_v9, 0.0 }
 0x41b   : > { %v1404_v14 = vpack.c.bf16 %v1392_v11, %v1391_v10  ;;  %4223 = vmatpush3.bf16.msra.mxu0 %v4505_v5  ;;  %v4506_v11 = vld [vmem:[#allocation13 + $0x38] sm:$0xff]  }
 0x41c   : > { %v1403_v15 = vpack.c.bf16 %v1390_v13, %v1389_v12  ;;  %v4204_v16 = vpop.f32.mrb[8].mxu0  ;;  %4224 = vmatprep.subr.bf16.mxu0 %v4506_v11 }
 0x41d   : > { %v1363_v17 = vadd.f32 %v4204_v16, %v3842_v51  ;;  %v1354_v18 = vpop.f32.mrb[9].mxu0 }
 0x41e   : > { %1560 = vmatmul.mubr.bf16.gmra.mrb[36].mxu1 %v1402_v0  ;;  %v1355_v19 = vadd.f32 %v3842_v51, %v1354_v18  ;;  %v4205_v20 = vpop.f32.mrb[10].mxu0 }
 0x41f   : > { %v1395_v21 = vmax.f32 %v1363_v17, 0.0  ;;  %v1366_v22 = vadd.f32 %v4205_v20, %v3842_v51  ;;  %v1357_v23 = vpop.f32.mrb[11].mxu0  ;;  %1569 = vmatprep.mubr.bf16.mxu1 %v5177_v50  ;;  %4225 = vmatpush3.bf16.msra.mxu0 %v4506_v11  ;;  %v5178_v20 = vmov 0.0  }
 0x420   : > { %v1393_v24 = vmax.f32 %v1355_v19, 0.0  ;;  %v1358_v25 = vadd.f32 %v3842_v51, %v1357_v23 }
 0x421   : > { %v1396_v26 = vmax.f32 %v1366_v22, 0.0 }
 0x422   : > { %v1394_v27 = vmax.f32 %v1358_v25, 0.0 }
 0x423   : > { %v1406_v28 = vpack.c.bf16 %v1396_v26, %v1395_v21 }
 0x424   : > { %v1405_v29 = vpack.c.bf16 %v1394_v27, %v1393_v24  ;;  %v4208_v30 = vpop.f32.mrb[12].mxu0 }
 0x425   : > { %v1379_v31 = vadd.f32 %v4208_v30, %v3842_v51  ;;  %v1370_v32 = vpop.f32.mrb[13].mxu0  ;;  %v7265_v30 = vsub.s32 1, %v5715_v48 }
 0x426   : > { %1570 = vmatmul.mubr.bf16.gmra.mrb[40].mxu1 %v1403_v15  ;;  %v1371_v33 = vadd.f32 %v3842_v51, %v1370_v32  ;;  %v4209_v34 = vpop.f32.mrb[14].mxu0 }
 0x427   : > { %1579 = vmatprep.mubr.bf16.mxu1 %v5177_v50  ;;  %v1399_v35 = vmax.f32 %v1379_v31, 0.0  ;;  %v1382_v36 = vadd.f32 %v4209_v34, %v3842_v51  ;;  %v1373_v37 = vpop.f32.mrb[15].mxu0 }
 0x428   : > { %v1397_v38 = vmax.f32 %v1371_v33, 0.0  ;;  %v1374_v39 = vadd.f32 %v3842_v51, %v1373_v37  ;;  %v5721_v51 = vld [vmem:[%s7319_s1] sm:$0x3] }
 0x429   : > { %v1400_v40 = vmax.f32 %v1382_v36, 0.0  ;;  %v5726_v53 = vrot.slane %v5721_v51, %v1429_v49  ;;  %v5810_v52 = vrot.slane %v5721_v51, %v7265_v30 }
 0x42a   : > { %v1398_v41 = vmax.f32 %v1374_v39, 0.0 }
 0x42b   : > { %v1408_v42 = vpack.c.bf16 %v1400_v40, %v1399_v35 }
 0x42c   : > { %v1407_v43 = vpack.c.bf16 %v1398_v41, %v1397_v38 }
 0x42e   : > { %1580 = vmatmul.mubr.bf16.gmra.mrb[44].mxu1 %v1404_v14 }
 0x42f   : > { %1589 = vmatprep.mubr.bf16.mxu1 %v5177_v50 }
 0x436   : > { %1590 = vmatmul.mubr.bf16.gmra.mrb[48].mxu1 %v1405_v29 }
 0x437   : > { %1599 = vmatprep.mubr.bf16.mxu1 %v5177_v50 }
 0x43e   : > { %1600 = vmatmul.mubr.bf16.gmra.mrb[52].mxu1 %v1406_v28 }
 0x43f   : > { %1609 = vmatprep.mubr.bf16.mxu1 %v5177_v50 }
 0x446   : > { %1610 = vmatmul.mubr.bf16.gmra.mrb[56].mxu1 %v1407_v43 }
 0x447   : > { %1619 = vmatprep.mubr.bf16.mxu1 %v5177_v50 }
 0x44e   : > { %1620 = vmatmul.mubr.bf16.gmra.mrb[60].mxu1 %v1408_v42 }
 0x4e9   : > { %v1551_v54 = vpop.f32.mrb[32].mxu1 }
 0x4ea   : > { %v1552_v56 = vadd.f32 %v1551_v54, %v5726_v53  ;;  %v5729_v57 = vpop.f32.mrb[33].mxu1 }
 0x4eb   : > { %v1555_v58 = vpop.f32.mrb[34].mxu1 }
 0x4ec   : > { %v5731_v59 = vmul.f32 0.2, %v1552_v56  ;;  %v1556_v60 = vadd.f32 %v1555_v58, %v5726_v53  ;;  %v5734_v61 = vpop.f32.mrb[35].mxu1 }
 0x4ee   : > { %v5737_v63 = vand.u32 2147483647, %v5731_v59  ;;  %v5739_v0 = vmul.f32 0.2, %v1556_v60  ;;  %vm2046_vm9 = vcmp.lt.f32.partialorder %v5731_v59, 0.0 }
 0x4f0   : > { %v1694_v1 = vmax.f32 %v5737_v63, 1e-30  ;;  %v1758_v2 = vadd.f32 1.0, %v5737_v63  ;;  %v5744_v3 = vand.u32 2147483647, %v5739_v0  ;;  %v3867_v25 = vadd.f32 -1.0, %v5737_v63 }
 0x4f1   : > { %v1561_v4 = vpop.f32.mrb[36].mxu1  ;;  %vm1678_vm0 = vcmp.gt.f32.partialorder %v5737_v63, 0.41421357  ;;  %vm1662_vm1 = vcmp.gt.f32.partialorder %v5737_v63, 2.4142137  ;;  %vm2047_vm13 = vcmp.lt.f32.partialorder %v5739_v0, 0.0 }
 0x4f2   : > { %4547 = vrcp.f32 %v1694_v1  ;;  %v1695_v6 = vmax.f32 %v5744_v3, 1e-30  ;;  %v1759_v7 = vadd.f32 1.0, %v5744_v3  ;;  %v1562_v8 = vadd.f32 %v1561_v4, %v5726_v53  ;;  %v5749_v9 = vpop.f32.mrb[37].mxu1 }
 0x4f3   : > { %4549 = vrcp.f32 %v1758_v2  ;;  %v1565_v10 = vpop.f32.mrb[38].mxu1  ;;  %v1838_v21 = vsel %vm1678_vm0, 0.7853982, %v5178_v20  ;;  %vm1679_vm2 = vcmp.gt.f32.partialorder %v5744_v3, 0.41421357  ;;  %v3868_v38 = vadd.f32 -1.0, %v5744_v3 }
 0x4f4   : > { %4551 = vrcp.f32 %v1695_v6  ;;  %v5751_v12 = vmul.f32 0.2, %v1562_v8  ;;  %v1566_v13 = vadd.f32 %v1565_v10, %v5726_v53  ;;  %v5754_v14 = vpop.f32.mrb[39].mxu1  ;;  %v5781_v33 = vsel %vm1662_vm1, 1.5707964, %v1838_v21 }
 0x4f5   : > { %4553 = vrcp.f32 %v1759_v7  ;;  %vm1663_vm3 = vcmp.gt.f32.partialorder %v5744_v3, 2.4142137  ;;  %v1839_v43 = vsel %vm1679_vm2, 0.7853982, %v5178_v20 }
 0x4f6   : > { %v5758_v15 = vand.u32 2147483647, %v5751_v12  ;;  %v5760_v16 = vmul.f32 0.2, %v1566_v13  ;;  %vm2048_vm14 = vcmp.lt.f32.partialorder %v5751_v12, 0.0 }
 0x4f8   : > { %v1696_v18 = vmax.f32 %v5758_v15, 1e-30  ;;  %v1760_v22 = vadd.f32 1.0, %v5758_v15  ;;  %v5770_v23 = vand.u32 2147483647, %v5760_v16  ;;  %v3869_v1 = vadd.f32 -1.0, %v5758_v15 }
 0x4f9   : > { %v1571_v17 = vpop.f32.mrb[40].mxu1  ;;  %vm1664_vm4 = vcmp.gt.f32.partialorder %v5758_v15, 2.4142137  ;;  %vm1680_vm5 = vcmp.gt.f32.partialorder %v5758_v15, 0.41421357  ;;  %vm2049_vm15 = vcmp.lt.f32.partialorder %v5760_v16, 0.0 }
 0x4fa   : > { %v1572_v19 = vadd.f32 %v1571_v17, %v5726_v53  ;;  %4555 = vrcp.f32 %v1696_v18  ;;  %v5775_v27 = vpop.f32.mrb[41].mxu1  ;;  %v1697_v34 = vmax.f32 %v5770_v23, 1e-30  ;;  %v1761_v35 = vadd.f32 1.0, %v5770_v23 }
 0x4fb   : > { %4557 = vrcp.f32 %v1760_v22  ;;  %v1575_v31 = vpop.f32.mrb[42].mxu1  ;;  %vm1681_vm6 = vcmp.gt.f32.partialorder %v5770_v23, 0.41421357  ;;  %v1840_v5 = vsel %vm1680_vm5, 0.7853982, %v5178_v20 }
 0x4fc   : > { %v4548_v24 = vpop.eup %4547  ;;  %v5773_v26 = vmul.f32 0.2, %v1572_v19  ;;  %v5785_v36 = vpop.f32.mrb[43].mxu1  ;;  %4559 = vrcp.f32 %v1697_v34  ;;  %v1576_v60 = vadd.f32 %v1575_v31, %v5726_v53  ;;  %vm1665_vm7 = vcmp.gt.f32.partialorder %v5770_v23, 2.4142137 }
 0x4fd   : > { %v4550_v28 = vpop.eup %4549  ;;  %v1711_v29 = vmul.f32 -1.0, %v4548_v24  ;;  %4561 = vrcp.f32 %v1761_v35  ;;  %v1841_v10 = vsel %vm1681_vm6, 0.7853982, %v5178_v20  ;;  %v5851_v22 = vsel %vm1663_vm3, 1.5707964, %v1839_v43 }
 0x4fe   : > { %v1775_v32 = vmul.f32 %v4550_v28, %v3867_v25  ;;  %v4552_v37 = vpop.eup %4551  ;;  %v5790_v39 = vand.u32 2147483647, %v5773_v26  ;;  %v5837_v6 = vmul.f32 0.2, %v1576_v60  ;;  %v5855_v25 = vsel %vm1664_vm4, 1.5707964, %v1840_v5 }
 0x4ff   : > { %v4554_v40 = vpop.eup %4553  ;;  %v1713_v42 = vmul.f32 -1.0, %v4552_v37  ;;  %v5859_v28 = vadd.f32 %v5729_v57, %v5810_v52  ;;  %v5863_v31 = vsel %vm1665_vm7, 1.5707964, %v1841_v10  ;;  %v3870_v37 = vadd.f32 -1.0, %v5770_v23 }
 0x500   : > { %v1806_v41 = vsel %vm1678_vm0, %v1775_v32, %v5737_v63  ;;  %v1777_v45 = vmul.f32 %v4554_v40, %v3868_v38  ;;  %v1698_v54 = vmax.f32 %v5790_v39, 1e-30  ;;  %v1762_v58 = vadd.f32 1.0, %v5790_v39 }
 0x501   : > { %v5800_v44 = vsel %vm1662_vm1, %v1711_v29, %v1806_v41  ;;  %v1581_v46 = vpop.f32.mrb[44].mxu1  ;;  %v5846_v19 = vand.u32 2147483647, %v5837_v6  ;;  %vm1666_vm8 = vcmp.gt.f32.partialorder %v5790_v39, 2.4142137  ;;  %v3871_v10 = vadd.f32 -1.0, %v5790_v39 }
 0x502   : > { %v5805_v47 = vmul.f32 %v5800_v44, %v5800_v44  ;;  %v5814_v55 = vpop.f32.mrb[45].mxu1  ;;  %v1807_v56 = vsel %vm1679_vm2, %v1777_v45, %v5744_v3  ;;  %4563 = vrcp.f32 %v1698_v54  ;;  %v1582_v11 = vadd.f32 %v1581_v46, %v5726_v53 }
 0x503   : > { %v1585_v62 = vpop.f32.mrb[46].mxu1  ;;  %v5825_v63 = vsel %vm1663_vm3, %v1713_v42, %v1807_v56  ;;  %4565 = vrcp.f32 %v1762_v58  ;;  %v1699_v38 = vmax.f32 %v5846_v19, 1e-30  ;;  %v1763_v45 = vadd.f32 1.0, %v5846_v19 }
 0x504   : > { %v1886_v51 = vmul.f32 0.080537446, %v5805_v47  ;;  %v5828_v2 = vpop.f32.mrb[47].mxu1  ;;  %v5832_v4 = vmul.f32 %v5825_v63, %v5825_v63  ;;  %v4556_v7 = vpop.eup %4555  ;;  %v5865_v32 = vmul.f32 0.2, %v1582_v11  ;;  %vm2050_vm2 = vcmp.lt.f32.partialorder %v5773_v26, 0.0 }
 0x505   : > { %v4558_v13 = vpop.eup %4557  ;;  %v1715_v18 = vmul.f32 -1.0, %v4556_v7  ;;  %4567 = vrcp.f32 %v1699_v38  ;;  %vm1682_vm10 = vcmp.gt.f32.partialorder %v5790_v39, 0.41421357  ;;  %vm1667_vm11 = vcmp.gt.f32.partialorder %v5846_v19, 2.4142137 }
 0x506   : > { %v3883_v8 = vadd.f32 -0.13877685, %v1886_v51  ;;  %v1887_v17 = vmul.f32 0.080537446, %v5832_v4  ;;  %v1779_v24 = vmul.f32 %v4558_v13, %v3869_v1  ;;  %v4560_v34 = vpop.eup %4559  ;;  %4569 = vrcp.f32 %v1763_v45 }
 0x507   : > { %v4562_v57 = vpop.eup %4561  ;;  %v1717_v43 = vmul.f32 -1.0, %v4560_v34  ;;  %vm1683_vm12 = vcmp.gt.f32.partialorder %v5846_v19, 0.41421357 }
 0x508   : > { %v1918_v21 = vmul.f32 %v3883_v8, %v5805_v47  ;;  %v3884_v29 = vadd.f32 -0.13877685, %v1887_v17  ;;  %v1808_v35 = vsel %vm1680_vm5, %v1779_v24, %v5758_v15  ;;  %v1781_v58 = vmul.f32 %v4562_v57, %v3870_v37 }
 0x509   : > { %v5872_v40 = vpop.f32.mrb[48].mxu1  ;;  %v5877_v42 = vsel %vm1664_vm4, %v1715_v18, %v1808_v35  ;;  %v5891_v15 = vand.u32 2147483647, %v5865_v32  ;;  %vm2051_vm5 = vcmp.lt.f32.partialorder %v5837_v6, 0.0 }
 0x50a   : > { %v1934_v3 = vadd.f32 0.19977711, %v1918_v21  ;;  %v1919_v41 = vmul.f32 %v3884_v29, %v5832_v4  ;;  %v5880_v46 = vpop.f32.mrb[49].mxu1  ;;  %v5885_v56 = vmul.f32 %v5877_v42, %v5877_v42  ;;  %v1809_v8 = vsel %vm1681_vm6, %v1781_v58, %v5770_v23 }
 0x50b   : > { %v5887_v60 = vpop.f32.mrb[50].mxu1  ;;  %v5901_v17 = vsel %vm1665_vm7, %v1717_v43, %v1809_v8  ;;  %v1586_v21 = vadd.f32 %v1585_v62, %v5726_v53  ;;  %v5914_v23 = vadd.f32 %v5734_v61, %v5810_v52  ;;  %v1700_v62 = vmax.f32 %v5891_v15, 1e-30 }
 0x50c   : > { %v1950_v54 = vmul.f32 %v1934_v3, %v5805_v47  ;;  %v1935_v51 = vadd.f32 0.19977711, %v1919_v41  ;;  %v4564_v1 = vpop.eup %4563  ;;  %v1888_v7 = vmul.f32 0.080537446, %v5885_v56  ;;  %v5904_v24 = vpop.f32.mrb[51].mxu1  ;;  %v5909_v3 = vmul.f32 %v5901_v17, %v5901_v17 }
 0x50d   : > { %v4566_v11 = vpop.eup %4565  ;;  %v1719_v18 = vmul.f32 -1.0, %v4564_v1  ;;  %4571 = vrcp.f32 %v1700_v62  ;;  %vm1668_vm0 = vcmp.gt.f32.partialorder %v5891_v15, 2.4142137  ;;  %vm1684_vm1 = vcmp.gt.f32.partialorder %v5891_v15, 0.41421357 }
 0x50e   : > { %v3899_v5 = vadd.f32 -0.3333295, %v1950_v54  ;;  %v1951_v13 = vmul.f32 %v1935_v51, %v5832_v4  ;;  %v3885_v34 = vadd.f32 -0.13877685, %v1888_v7  ;;  %v1783_v35 = vmul.f32 %v4566_v11, %v3871_v10 }
 0x50f   : > { %v1889_v57 = vmul.f32 0.080537446, %v5909_v3  ;;  %v5931_v54 = vmul.f32 0.2, %v1586_v21  ;;  %v3872_v10 = vadd.f32 -1.0, %v5846_v19  ;;  %v1764_v11 = vadd.f32 1.0, %v5891_v15 }
 0x510   : > { %v1982_v29 = vmul.f32 %v3899_v5, %v5805_v47  ;;  %v3900_v37 = vadd.f32 -0.3333295, %v1951_v13  ;;  %v1920_v47 = vmul.f32 %v3885_v34, %v5885_v56  ;;  %v1810_v41 = vsel %vm1682_vm10, %v1783_v35, %v5790_v39 }
 0x511   : > { %v5924_v43 = vpop.f32.mrb[52].mxu1  ;;  %v5929_v61 = vsel %vm1666_vm8, %v1719_v18, %v1810_v41  ;;  %v3886_v5 = vadd.f32 -0.13877685, %v1889_v57  ;;  %v4568_v18 = vpop.eup %4567  ;;  %4573 = vrcp.f32 %v1764_v11  ;;  %vm2052_vm6 = vcmp.lt.f32.partialorder %v5865_v32, 0.0 }
 0x512   : > { %v1998_v38 = vmul.f32 %v1982_v29, %v5800_v44  ;;  %v1983_v45 = vmul.f32 %v3900_v37, %v5832_v4  ;;  %v5933_v58 = vpop.f32.mrb[53].mxu1  ;;  %v1936_v1 = vadd.f32 0.19977711, %v1920_v47  ;;  %v5938_v7 = vmul.f32 %v5929_v61, %v5929_v61  ;;  %v4570_v35 = vpop.eup %4569 }
 0x513   : > { %v5940_v8 = vpop.f32.mrb[54].mxu1  ;;  %v1921_v29 = vmul.f32 %v3886_v5, %v5909_v3  ;;  %v1721_v62 = vmul.f32 -1.0, %v4568_v18  ;;  %v1785_v41 = vmul.f32 %v4570_v35, %v3872_v10  ;;  %v1602_v6 = vadd.f32 %v5924_v43, %v5726_v53 }
 0x514   : > { %v2014_v51 = vadd.f32 %v1998_v38, %v5800_v44  ;;  %v1999_v4 = vmul.f32 %v1983_v45, %v5825_v63  ;;  %v5946_v13 = vpop.f32.mrb[55].mxu1  ;;  %v1952_v21 = vmul.f32 %v1936_v1, %v5885_v56  ;;  %v1890_v34 = vmul.f32 0.080537446, %v5938_v7 }
 0x515   : > { %v1937_v57 = vadd.f32 0.19977711, %v1921_v29  ;;  %v1811_v10 = vsel %vm1683_vm12, %v1785_v41, %v5846_v19  ;;  %v1592_v41 = vadd.f32 %v5872_v40, %v5726_v53 }
 0x516   : > { %v2030_v44 = vadd.f32 %v2014_v51, %v5781_v33  ;;  %v2015_v37 = vadd.f32 %v1999_v4, %v5825_v63  ;;  %v3901_v47 = vadd.f32 -0.3333295, %v1952_v21  ;;  %v3887_v33 = vadd.f32 -0.13877685, %v1890_v34 }
 0x517   : > { %v5957_v51 = vand.u32 2147483647, %v5931_v54  ;;  %v1953_v4 = vmul.f32 %v1937_v57, %v5909_v3  ;;  %v5974_v59 = vsel %vm1667_vm11, %v1721_v62, %v1811_v10  ;;  %v1842_v34 = vsel %vm1682_vm10, 0.7853982, %v5178_v20 }
 0x518   : > { %v2062_v38 = vsub.f32 0.0, %v2030_v44  ;;  %v2031_v45 = vadd.f32 %v2015_v37, %v5851_v22  ;;  %v1984_v5 = vmul.f32 %v3901_v47, %v5885_v56  ;;  %v1922_v21 = vmul.f32 %v3887_v33, %v5938_v7 }
 0x519   : > { %v5959_v1 = vpop.f32.mrb[56].mxu1  ;;  %v3902_v29 = vadd.f32 -0.3333295, %v1953_v4  ;;  %v5984_v35 = vmul.f32 %v5974_v59, %v5974_v59  ;;  %v1701_v0 = vmax.f32 %v5957_v51, 1e-30  ;;  %v3874_v39 = vadd.f32 -1.0, %v5957_v51 }
 0x51a   : > { %v2078_v63 = vsel %vm2046_vm9, %v2062_v38, %v2030_v44  ;;  %v5968_v22 = vpop.f32.mrb[57].mxu1  ;;  %v2063_v18 = vsub.f32 0.0, %v2031_v45  ;;  %v2000_v56 = vmul.f32 %v1984_v5, %v5877_v42  ;;  %v4572_v38 = vpop.eup %4571  ;;  %v1938_v57 = vadd.f32 0.19977711, %v1922_v21 }
 0x51b   : > { %v2094_v11 = vmul.f32 3.18, %v2078_v63  ;;  %v5976_v44 = vpop.f32.mrb[58].mxu1  ;;  %v1985_v5 = vmul.f32 %v3902_v29, %v5909_v3  ;;  %v1891_v4 = vmul.f32 0.080537446, %v5984_v35  ;;  %v1723_v3 = vmul.f32 -1.0, %v4572_v38 }
 0x51c   : > { %v5986_v37 = vpop.f32.mrb[59].mxu1  ;;  %v2079_v62 = vsel %vm2047_vm13, %v2063_v18, %v2031_v45  ;;  %v2016_v63 = vadd.f32 %v2000_v56, %v5877_v42  ;;  %v1954_v10 = vmul.f32 %v1938_v57, %v5938_v7  ;;  %v4574_v42 = vpop.eup %4573  ;;  %v1765_v29 = vadd.f32 1.0, %v5957_v51 }
 0x51d   : > { %v2110_v47 = vmul.f32 1.442695, %v2094_v11  ;;  %v2095_v33 = vmul.f32 3.18, %v2079_v62  ;;  %v3873_v11 = vadd.f32 -1.0, %v5891_v15  ;;  %v2001_v40 = vmul.f32 %v1985_v5, %v5901_v17 }
 0x51e   : > { %v2032_v18 = vadd.f32 %v2016_v63, %v5855_v25  ;;  %v3888_v21 = vadd.f32 -0.13877685, %v1891_v4  ;;  %v3903_v56 = vadd.f32 -0.3333295, %v1954_v10  ;;  %vm1685_vm3 = vcmp.gt.f32.partialorder %v5957_v51, 0.41421357 }
 0x51f   : > { %4575 = vpow2.f32 %v2110_v47  ;;  %v2112_v45 = vmul.f32 1.442695, %v2095_v33  ;;  %v2017_v57 = vadd.f32 %v2001_v40, %v5901_v17  ;;  %v1787_v63 = vmul.f32 %v4574_v42, %v3873_v11 }
 0x520   : > { %4577 = vrcp.f32 %v1701_v0  ;;  %v2064_v62 = vsub.f32 0.0, %v2032_v18  ;;  %v1923_v30 = vmul.f32 %v3888_v21, %v5984_v35  ;;  %v1986_v25 = vmul.f32 %v3903_v56, %v5938_v7 }
 0x521   : > { %v6002_v47 = vpop.f32.mrb[60].mxu1  ;;  %4579 = vpow2.f32 %v2112_v45  ;;  %v2033_v4 = vadd.f32 %v2017_v57, %v5863_v31  ;;  %v1812_v11 = vsel %vm1684_vm1, %v1787_v63, %v5891_v15  ;;  %v6022_v45 = vmul.f32 0.2, %v1592_v41  ;;  %v793_v31 = vld [vmem:[%s5648_s11] sm:$0xff] }
 0x522   : > { %v6006_v33 = vpop.f32.mrb[61].mxu1  ;;  %4581 = vrcp.f32 %v1765_v29  ;;  %v2080_v5 = vsel %vm2048_vm14, %v2064_v62, %v2032_v18  ;;  %v1939_v10 = vadd.f32 0.19977711, %v1923_v30  ;;  %v2002_v7 = vmul.f32 %v1986_v25, %v5929_v61 }
 0x523   : > { %v6010_v38 = vpop.f32.mrb[62].mxu1  ;;  %v2096_v0 = vmul.f32 3.18, %v2080_v5  ;;  %v2065_v40 = vsub.f32 0.0, %v2033_v4  ;;  %v6028_v30 = vsel %vm1668_vm0, %v1723_v3, %v1812_v11  ;;  %v1843_v42 = vsel %vm1683_vm12, 0.7853982, %v5178_v20 }
 0x524   : > { %v6016_v17 = vpop.f32.mrb[63].mxu1  ;;  %v1955_v12 = vmul.f32 %v1939_v10, %v5984_v35  ;;  %v2018_v21 = vadd.f32 %v2002_v7, %v5929_v61  ;;  %v6037_v41 = vmul.f32 %v6028_v30, %v6028_v30  ;;  %v1858_v3 = vsel %vm1666_vm8, 1.5707964, %v1842_v34  ;;  %v794_v10 = vld [vmem:[%s5648_s11 + $0x8] sm:$0xff] }
 0x525   : > { %v2114_v18 = vmul.f32 1.442695, %v2096_v0  ;;  %v2081_v56 = vsel %vm2049_vm15, %v2065_v40, %v2033_v4  ;;  %v6044_v62 = vand.u32 2147483647, %v6022_v45  ;;  %v1859_v0 = vsel %vm1667_vm11, 1.5707964, %v1843_v42 }
 0x526   : > { %v3904_v29 = vadd.f32 -0.3333295, %v1955_v12  ;;  %v2097_v61 = vmul.f32 3.18, %v2081_v56  ;;  %v2034_v25 = vadd.f32 %v2018_v21, %v1858_v3  ;;  %v1892_v63 = vmul.f32 0.080537446, %v6037_v41 }
 0x527   : > { %4583 = vpow2.f32 %v2114_v18  ;;  %v1596_v40 = vadd.f32 %v5887_v60, %v5726_v53  ;;  %v1702_v21 = vmax.f32 %v6044_v62, 1e-30  ;;  %vm1669_vm4 = vcmp.gt.f32.partialorder %v5957_v51, 2.4142137 }
 0x528   : > { %v1987_v16 = vmul.f32 %v3904_v29, %v5984_v35  ;;  %v2116_v4 = vmul.f32 1.442695, %v2097_v61  ;;  %v2066_v7 = vsub.f32 0.0, %v2034_v25  ;;  %v3889_v11 = vadd.f32 -0.13877685, %v1892_v63  ;;  %v6059_v35 = vld [vmem:[#allocation14] sm:$0xff]  }
 0x529   : > { %v4576_v57 = vpop.eup %4575  ;;  %4242 = vmatprep.subr.bf16.mxu0 %v6059_v35  ;;  %vm1686_vm7 = vcmp.gt.f32.partialorder %v6044_v62, 0.41421357  ;;  %vm1670_vm8 = vcmp.gt.f32.partialorder %v6044_v62, 2.4142137  ;;  %vm2053_vm11 = vcmp.lt.f32.partialorder %v5931_v54, 0.0  ;;  %vm2054_vm15 = vcmp.lt.f32.partialorder %v6022_v45, 0.0 }
 0x52a   : > { %v2142_v5 = vmul.f32 %v4576_v57, %v793_v31  ;;  %v4578_v34 = vpop.eup %4577  ;;  %v2003_v31 = vmul.f32 %v1987_v16, %v5974_v59  ;;  %4585 = vpow2.f32 %v2116_v4  ;;  %v2082_v3 = vsel %vm2050_vm2, %v2066_v7, %v2034_v25 }
 0x52b   : > { %v4580_v12 = vpop.eup %4579  ;;  %v1725_v19 = vmul.f32 -1.0, %v4578_v34  ;;  %v1924_v29 = vmul.f32 %v3889_v11, %v6037_v41  ;;  %4587 = vrcp.f32 %v1702_v21  ;;  %v1766_v25 = vadd.f32 1.0, %v6044_v62 }
 0x52c   : > { %v6055_v18 = vadd.f32 %v2142_v5, %v5859_v28  ;;  %v4582_v42 = vpop.eup %4581  ;;  %v2143_v56 = vmul.f32 %v4580_v12, %v794_v10  ;;  %v2098_v28 = vmul.f32 3.18, %v2082_v3  ;;  %v2019_v60 = vadd.f32 %v2003_v31, %v5974_v59  ;;  %v795_v10 = vld [vmem:[%s5648_s11 + $0x10] sm:$0xff] }
 0x52d   : > { %v1789_v57 = vmul.f32 %v4582_v42, %v3874_v39  ;;  %v1940_v26 = vadd.f32 0.19977711, %v1924_v29  ;;  %4589 = vrcp.f32 %v1766_v25  ;;  %v6088_v39 = vmul.f32 0.2, %v1596_v40  ;;  %v796_v40 = vld [vmem:[%s5648_s11 + $0x18] sm:$0xff] }
 0x52e   : > { %2174 = vst [vmem:[%s6065_s29] sm:$0xff] %v6055_v18  ;;  %v6072_v61 = vadd.f32 %v2143_v56, %v5914_v23  ;;  %v2118_v63 = vmul.f32 1.442695, %v2098_v28  ;;  %v2035_v5 = vadd.f32 %v2019_v60, %v1859_v0  ;;  %v1564_v12 = vadd.f32 %v5749_v9, %v5810_v52 }
 0x52f   : > { %v1813_v59 = vsel %vm1685_vm3, %v1789_v57, %v5957_v51  ;;  %v1956_v23 = vmul.f32 %v1940_v26, %v6037_v41  ;;  %v6094_v11 = vand.u32 2147483647, %v6088_v39  ;;  %v1844_v56 = vsel %vm1684_vm1, 0.7853982, %v5178_v20 }
 0x530   : > { %2175 = vst [vmem:[%s6065_s29 + $0x8] sm:$0xff] %v6072_v61  ;;  %v6086_v16 = vsel %vm1669_vm4, %v1725_v19, %v1813_v59  ;;  %4591 = vpow2.f32 %v2118_v63  ;;  %v2067_v0 = vsub.f32 0.0, %v2035_v5  ;;  %v1568_v9 = vadd.f32 %v5754_v14, %v5810_v52 }
 0x531   : > { %v1877_v34 = vmul.f32 %v6086_v16, %v6086_v16  ;;  %v4584_v4 = vpop.eup %4583  ;;  %v3905_v7 = vadd.f32 -0.3333295, %v1956_v23  ;;  %v1703_v60 = vmax.f32 %v6094_v11, 1e-30  ;;  %v1574_v26 = vadd.f32 %v5775_v27, %v5810_v52 }
 0x532   : > { %v2144_v31 = vmul.f32 %v4584_v4, %v795_v10  ;;  %v2083_v19 = vsel %vm2051_vm5, %v2067_v0, %v2035_v5  ;;  %v1860_v14 = vsel %vm1668_vm0, 1.5707964, %v1844_v56  ;;  %v3875_v27 = vadd.f32 -1.0, %v6044_v62  ;;  %v797_v4 = vld [vmem:[%s5648_s11 + $0x20] sm:$0xff] }
 0x533   : > { %v1893_v21 = vmul.f32 0.080537446, %v1877_v34  ;;  %v2099_v42 = vmul.f32 3.18, %v2083_v19  ;;  %v1988_v3 = vmul.f32 %v3905_v7, %v6037_v41  ;;  %v1767_v41 = vadd.f32 1.0, %v6094_v11 }
 0x534   : > { %v6105_v29 = vadd.f32 %v2144_v31, %v1564_v12  ;;  %v4586_v57 = vpop.eup %4585  ;;  %4593 = vrcp.f32 %v1703_v60  ;;  %v6120_v23 = vmul.f32 0.2, %v1602_v6  ;;  %v1606_v12 = vadd.f32 %v5940_v8, %v5726_v53 }
 0x535   : > { %v3890_v28 = vadd.f32 -0.13877685, %v1893_v21  ;;  %v2120_v25 = vmul.f32 1.442695, %v2099_v42  ;;  %v2004_v63 = vmul.f32 %v1988_v3, %v6028_v30  ;;  %v4588_v5 = vpop.eup %4587  ;;  %v2145_v43 = vmul.f32 %v4586_v57, %v796_v40 }
 0x536   : > { %2176 = vst [vmem:[%s6065_s29 + $0x10] sm:$0xff] %v6105_v29  ;;  %v1727_v19 = vmul.f32 -1.0, %v4588_v5  ;;  %v6129_v21 = vand.u32 2147483647, %v6120_v23  ;;  %v1845_v42 = vsel %vm1685_vm3, 0.7853982, %v5178_v20 }
 0x537   : > { %v1925_v59 = vmul.f32 %v3890_v28, %v1877_v34  ;;  %4595 = vpow2.f32 %v2120_v25  ;;  %v2020_v10 = vadd.f32 %v2004_v63, %v6028_v30  ;;  %v6122_v0 = vadd.f32 %v2145_v43, %v1568_v9  ;;  %v4590_v15 = vpop.eup %4589 }
 0x538   : > { %4597 = vrcp.f32 %v1767_v41  ;;  %v1791_v8 = vmul.f32 %v4590_v15, %v3875_v27  ;;  %v6139_v9 = vmul.f32 0.2, %v1606_v12  ;;  %v1704_v57 = vmax.f32 %v6129_v21, 1e-30 }
 0x539   : > { %v1941_v7 = vadd.f32 0.19977711, %v1925_v59  ;;  %v2036_v31 = vadd.f32 %v2020_v10, %v1860_v14  ;;  %2177 = vst [vmem:[%s6065_s29 + $0x18] sm:$0xff] %v6122_v0  ;;  %v2191_v40 = vpack.c.bf16 %v6122_v0, %v6105_v29  ;;  %v1768_v5 = vadd.f32 1.0, %v6129_v21  ;;  %v798_v10 = vld [vmem:[%s5648_s11 + $0x28] sm:$0xff] }
 0x53a   : > { %v4592_v30 = vpop.eup %4591  ;;  %v1814_v60 = vsel %vm1686_vm7, %v1791_v8, %v6044_v62  ;;  %4599 = vrcp.f32 %v1704_v57  ;;  %v1861_v15 = vsel %vm1669_vm4, 1.5707964, %v1845_v42  ;;  %vm1687_vm9 = vcmp.gt.f32.partialorder %v6094_v11, 0.41421357 }
 0x53b   : > { %v1957_v56 = vmul.f32 %v1941_v7, %v1877_v34  ;;  %v2146_v3 = vmul.f32 %v4592_v30, %v797_v4  ;;  %v2068_v6 = vsub.f32 0.0, %v2036_v31  ;;  %v6152_v41 = vsel %vm1670_vm8, %v1727_v19, %v1814_v60 }
 0x53c   : > { %v1878_v59 = vmul.f32 %v6152_v41, %v6152_v41  ;;  %4601 = vrcp.f32 %v1768_v5  ;;  %v3876_v19 = vadd.f32 -1.0, %v6094_v11  ;;  %vm1671_vm10 = vcmp.gt.f32.partialorder %v6094_v11, 2.4142137 }
 0x53d   : > { %v3906_v28 = vadd.f32 -0.3333295, %v1957_v56  ;;  %v6146_v25 = vadd.f32 %v2146_v3, %v1574_v26  ;;  %v2084_v63 = vsel %vm2052_vm6, %v2068_v6, %v2036_v31  ;;  %v6161_v26 = vand.u32 2147483647, %v6139_v9 }
 0x53e   : > { %v2100_v43 = vmul.f32 3.18, %v2084_v63  ;;  %v4594_v32 = vpop.eup %4593  ;;  %v1894_v7 = vmul.f32 0.080537446, %v1878_v59  ;;  %v1846_v6 = vsel %vm1686_vm7, 0.7853982, %v5178_v20  ;;  %v1612_v63 = vadd.f32 %v5959_v1, %v5726_v53 }
 0x53f   : > { %v1989_v14 = vmul.f32 %v3906_v28, %v1877_v34  ;;  %2178 = vst [vmem:[%s6065_s29 + $0x20] sm:$0xff] %v6146_v25  ;;  %v1578_v34 = vadd.f32 %v5785_v36, %v5810_v52  ;;  %v1729_v31 = vmul.f32 -1.0, %v4594_v32  ;;  %v1705_v36 = vmax.f32 %v6161_v26, 1e-30 }
 0x540   : > { %v2122_v27 = vmul.f32 1.442695, %v2100_v43  ;;  %v3891_v3 = vadd.f32 -0.13877685, %v1894_v7  ;;  %v1769_v51 = vadd.f32 1.0, %v6161_v26  ;;  %v1616_v62 = vadd.f32 %v5976_v44, %v5726_v53 }
 0x541   : > { %v2005_v4 = vmul.f32 %v1989_v14, %v6086_v16  ;;  %v4596_v12 = vpop.eup %4595  ;;  %v6197_v1 = vmul.f32 0.2, %v1612_v63  ;;  %v1862_v7 = vsel %vm1670_vm8, 1.5707964, %v1846_v6  ;;  %vm1688_vm12 = vcmp.gt.f32.partialorder %v6129_v21, 0.41421357 }
 0x542   : > { %v4598_v30 = vpop.eup %4597  ;;  %v2147_v56 = vmul.f32 %v4596_v12, %v798_v10  ;;  %4603 = vpow2.f32 %v2122_v27  ;;  %v1926_v57 = vmul.f32 %v3891_v3, %v1878_v59  ;;  %v1584_v10 = vadd.f32 %v5814_v55, %v5810_v52 }
 0x543   : > { %v2021_v8 = vadd.f32 %v2005_v4, %v6086_v16  ;;  %v1793_v28 = vmul.f32 %v4598_v30, %v3876_v19  ;;  %4605 = vrcp.f32 %v1705_v36  ;;  %v6204_v55 = vadd.f32 %v5828_v2, %v5810_v52  ;;  %v799_v30 = vld [vmem:[%s5648_s11 + $0x30] sm:$0xff] }
 0x544   : > { %v6175_v42 = vadd.f32 %v2147_v56, %v1578_v34  ;;  %v1942_v43 = vadd.f32 0.19977711, %v1926_v57  ;;  %4607 = vrcp.f32 %v1769_v51  ;;  %v4600_v27 = vpop.eup %4599  ;;  %v3877_v34 = vadd.f32 -1.0, %v6129_v21 }
 0x545   : > { %v2037_v60 = vadd.f32 %v2021_v8, %v1861_v15  ;;  %v1815_v16 = vsel %vm1687_vm9, %v1793_v28, %v6094_v11  ;;  %v1731_v19 = vmul.f32 -1.0, %v4600_v27  ;;  %v6209_v3 = vand.u32 2147483647, %v6197_v1 }
 0x546   : > { %2179 = vst [vmem:[%s6065_s29 + $0x28] sm:$0xff] %v6175_v42  ;;  %v6188_v14 = vsel %vm1671_vm10, %v1729_v31, %v1815_v16  ;;  %v1958_v12 = vmul.f32 %v1942_v43, %v1878_v59  ;;  %v4602_v15 = vpop.eup %4601  ;;  %v6215_v28 = vadd.f32 %v5880_v46, %v5810_v52  ;;  %vm1672_vm13 = vcmp.gt.f32.partialorder %v6129_v21, 2.4142137 }
 0x547   : > { %v2069_v5 = vsub.f32 0.0, %v2037_v60  ;;  %v6195_v32 = vmul.f32 %v6188_v14, %v6188_v14  ;;  %v1795_v8 = vmul.f32 %v4602_v15, %v3877_v34  ;;  %v3878_v57 = vadd.f32 -1.0, %v6161_v26 }
 0x548   : > { %v3907_v56 = vadd.f32 -0.3333295, %v1958_v12  ;;  %v6234_v43 = vmul.f32 0.2, %v1616_v62  ;;  %v1770_v34 = vadd.f32 1.0, %v6209_v3  ;;  %v1622_v15 = vadd.f32 %v6002_v47, %v5726_v53 }
 0x549   : > { %v2085_v4 = vsel %vm2053_vm11, %v2069_v5, %v2037_v60  ;;  %v1895_v54 = vmul.f32 0.080537446, %v6195_v32  ;;  %v1816_v60 = vsel %vm1688_vm12, %v1795_v8, %v6129_v21  ;;  %v1706_v5 = vmax.f32 %v6209_v3, 1e-30 }
 0x54a   : > { %v2101_v31 = vmul.f32 3.18, %v2085_v4  ;;  %v1990_v51 = vmul.f32 %v3907_v56, %v1878_v59  ;;  %v6226_v46 = vsel %vm1672_vm13, %v1731_v19, %v1816_v60  ;;  %vm1689_vm14 = vcmp.gt.f32.partialorder %v6161_v26, 0.41421357 }
 0x54b   : > { %v3892_v36 = vadd.f32 -0.13877685, %v1895_v54  ;;  %v6231_v59 = vmul.f32 %v6226_v46, %v6226_v46  ;;  %vm1673_vm0 = vcmp.gt.f32.partialorder %v6161_v26, 2.4142137  ;;  %v6263_v60 = vmul.f32 0.2, %v1622_v15 }
 0x54c   : > { %v2124_v6 = vmul.f32 1.442695, %v2101_v31  ;;  %v4604_v2 = vpop.eup %4603  ;;  %v2006_v63 = vmul.f32 %v1990_v51, %v6152_v41  ;;  %vm2055_vm1 = vcmp.lt.f32.partialorder %v6088_v39, 0.0  ;;  %vm2056_vm2 = vcmp.lt.f32.partialorder %v6120_v23, 0.0 }
 0x54d   : > { %v2148_v16 = vmul.f32 %v4604_v2, %v799_v30  ;;  %v1927_v44 = vmul.f32 %v3892_v36, %v6195_v32  ;;  %v4606_v27 = vpop.eup %4605  ;;  %v1896_v19 = vmul.f32 0.080537446, %v6231_v59  ;;  %vm1690_vm3 = vcmp.gt.f32.partialorder %v6209_v3, 0.41421357 }
 0x54e   : > { %4609 = vpow2.f32 %v2124_v6  ;;  %v4608_v31 = vpop.eup %4607  ;;  %v2022_v54 = vadd.f32 %v2006_v63, %v6152_v41  ;;  %v1733_v30 = vmul.f32 -1.0, %v4606_v27  ;;  %v6251_v41 = vand.u32 2147483647, %v6234_v43 }
 0x54f   : > { %v6236_v4 = vadd.f32 %v2148_v16, %v1584_v10  ;;  %v1943_v12 = vadd.f32 0.19977711, %v1927_v44  ;;  %4611 = vrcp.f32 %v1706_v5  ;;  %v1847_v10 = vsel %vm1687_vm9, 0.7853982, %v5178_v20 }
 0x550   : > { %v1797_v8 = vmul.f32 %v4608_v31, %v3878_v57  ;;  %4613 = vrcp.f32 %v1770_v34  ;;  %v2038_v62 = vadd.f32 %v2022_v54, %v1862_v7  ;;  %v3893_v47 = vadd.f32 -0.13877685, %v1896_v19  ;;  %v800_v57 = vld [vmem:[%s5648_s11 + $0x38] sm:$0xff] }
 0x551   : > { %2180 = vst [vmem:[%s6065_s29 + $0x30] sm:$0xff] %v6236_v4  ;;  %v1959_v56 = vmul.f32 %v1943_v12, %v6195_v32  ;;  %v1863_v45 = vsel %vm1671_vm10, 1.5707964, %v1847_v10  ;;  %v1707_v63 = vmax.f32 %v6251_v41, 1e-30  ;;  %v1771_v34 = vadd.f32 1.0, %v6251_v41 }
 0x552   : > { %v1817_v36 = vsel %vm1689_vm14, %v1797_v8, %v6161_v26  ;;  %v2070_v2 = vsub.f32 0.0, %v2038_v62  ;;  %v1928_v51 = vmul.f32 %v3893_v47, %v6231_v59  ;;  %v1848_v27 = vsel %vm1688_vm12, 0.7853982, %v5178_v20 }
 0x553   : > { %v3908_v6 = vadd.f32 -0.3333295, %v1959_v56  ;;  %v6261_v7 = vsel %vm1673_vm0, %v1733_v30, %v1817_v36  ;;  %4615 = vrcp.f32 %v1707_v63  ;;  %v6283_v30 = vand.u32 2147483647, %v6263_v60 }
 0x554   : > { %v6271_v44 = vmul.f32 %v6261_v7, %v6261_v7  ;;  %v2086_v5 = vsel %vm2054_vm15, %v2070_v2, %v2038_v62  ;;  %v1944_v12 = vadd.f32 0.19977711, %v1928_v51  ;;  %4617 = vrcp.f32 %v1771_v34 }
 0x555   : > { %v1991_v16 = vmul.f32 %v3908_v6, %v6195_v32  ;;  %v2102_v15 = vmul.f32 3.18, %v2086_v5  ;;  %v1864_v8 = vsel %vm1672_vm13, 1.5707964, %v1848_v27  ;;  %v1849_v2 = vsel %vm1689_vm14, 0.7853982, %v5178_v20 }
 0x556   : > { %v1897_v31 = vmul.f32 0.080537446, %v6271_v44  ;;  %v1960_v19 = vmul.f32 %v1944_v12, %v6231_v59  ;;  %v3879_v51 = vadd.f32 -1.0, %v6209_v3  ;;  %v1626_v27 = vadd.f32 %v6010_v38, %v5726_v53 }
 0x557   : > { %v2007_v32 = vmul.f32 %v1991_v16, %v6188_v14  ;;  %v2126_v10 = vmul.f32 1.442695, %v2102_v15  ;;  %vm1674_vm4 = vcmp.gt.f32.partialorder %v6209_v3, 2.4142137  ;;  %vm1691_vm5 = vcmp.gt.f32.partialorder %v6251_v41, 0.41421357 }
 0x558   : > { %v4610_v11 = vpop.eup %4609  ;;  %v3894_v62 = vadd.f32 -0.13877685, %v1897_v31  ;;  %v3909_v36 = vadd.f32 -0.3333295, %v1960_v19  ;;  %v6322_v19 = vmul.f32 0.2, %v1626_v27 }
 0x559   : > { %v2149_v54 = vmul.f32 %v4610_v11, %v800_v57  ;;  %v2023_v56 = vadd.f32 %v2007_v32, %v6188_v14  ;;  %v4612_v47 = vpop.eup %4611  ;;  %4619 = vpow2.f32 %v2126_v10  ;;  %vm1675_vm6 = vcmp.gt.f32.partialorder %v6251_v41, 2.4142137 }
 0x55a   : > { %v4614_v57 = vpop.eup %4613  ;;  %v1929_v14 = vmul.f32 %v3894_v62, %v6271_v44  ;;  %v1735_v63 = vmul.f32 -1.0, %v4612_v47  ;;  %v1992_v21 = vmul.f32 %v3909_v36, %v6231_v59  ;;  %v2190_v62 = vpack.c.bf16 %v6072_v61, %v6055_v18 }
 0x55b   : > { %v6289_v6 = vadd.f32 %v2149_v54, %v6204_v55  ;;  %v2039_v16 = vadd.f32 %v2023_v56, %v1863_v45  ;;  %v1799_v5 = vmul.f32 %v4614_v57, %v3879_v51  ;;  %v1708_v55 = vmax.f32 %v6283_v30, 1e-30 }
 0x55c   : > { %v1945_v34 = vadd.f32 0.19977711, %v1929_v14  ;;  %v1772_v45 = vadd.f32 1.0, %v6283_v30  ;;  %v2008_v11 = vmul.f32 %v1992_v21, %v6226_v46  ;;  %v3880_v56 = vadd.f32 -1.0, %v6251_v41  ;;  %v4508_v14 = vld [vmem:[#allocation14 + $0x8] sm:$0xff]   ;;  %4226 = vmatprep.mubr.bf16.mxu0 %v2190_v62 }
 0x55d   : > { %2181 = vst [vmem:[%s6065_s29 + $0x38] sm:$0xff] %v6289_v6  ;;  %v2071_v12 = vsub.f32 0.0, %v2039_v16  ;;  %v1818_v59 = vsel %vm1690_vm3, %v1799_v5, %v6209_v3  ;;  %4621 = vrcp.f32 %v1708_v55  ;;  %v4616_v10 = vpop.eup %4615  ;;  %v2192_v47 = vpack.c.bf16 %v6175_v42, %v6146_v25  ;;  %4227 = vmatmul.mubr.bf16.vlgmr.msra.gmra.mrb[16].mxu0 %v2191_v40 }
 0x55e   : > { %v1961_v38 = vmul.f32 %v1945_v34, %v6271_v44  ;;  %v6315_v15 = vsel %vm1674_vm4, %v1735_v63, %v1818_v59  ;;  %4623 = vrcp.f32 %v1772_v45  ;;  %v2024_v31 = vadd.f32 %v2008_v11, %v6226_v46  ;;  %v4618_v36 = vpop.eup %4617  ;;  %v801_v63 = vld [vmem:[%s5648_s11 + $0x40] sm:$0xff]  ;;  %4243 = vmatpush3.bf16.msra.mxu0 %v6059_v35 }
 0x55f   : > { %v2087_v53 = vsel %vm2055_vm1, %v2071_v12, %v2039_v16  ;;  %v6320_v54 = vmul.f32 %v6315_v15, %v6315_v15  ;;  %v1737_v16 = vmul.f32 -1.0, %v4616_v10  ;;  %v1801_v5 = vmul.f32 %v4618_v36, %v3880_v56  ;;  %4230 = vmatprep.mubr.bf16.mxu0 %v2192_v47  ;;  %4244 = vmatprep.subr.bf16.mxu0 %v4508_v14  ;;  %v802_v47 = vld [vmem:[%s5648_s11 + $0x48] sm:$0xff] }
 0x560   : > { %v2103_v32 = vmul.f32 3.18, %v2087_v53  ;;  %v3910_v39 = vadd.f32 -0.3333295, %v1961_v38  ;;  %v2040_v57 = vadd.f32 %v2024_v31, %v1864_v8  ;;  %v6334_v55 = vand.u32 2147483647, %v6322_v19 }
 0x561   : > { %v1898_v46 = vmul.f32 0.080537446, %v6320_v54  ;;  %v2193_v25 = vpack.c.bf16 %v6289_v6, %v6236_v4  ;;  %v1819_v27 = vsel %vm1691_vm5, %v1801_v5, %v6251_v41  ;;  %v4509_v4 = vld [vmem:[#allocation14 + $0x10] sm:$0xff]   ;;  %v3881_v11 = vadd.f32 -1.0, %v6283_v30 }
 0x562   : > { %v2128_v51 = vmul.f32 1.442695, %v2103_v32  ;;  %v1993_v21 = vmul.f32 %v3910_v39, %v6271_v44  ;;  %v2072_v18 = vsub.f32 0.0, %v2040_v57  ;;  %v1865_v44 = vsel %vm1673_vm0, 1.5707964, %v1849_v2  ;;  %4245 = vmatpush3.bf16.msra.mxu0 %v4508_v14  ;;  %v4510_v39 = vld [vmem:[#allocation14 + $0x18] sm:$0xff]  }
 0x563   : > { %v3895_v61 = vadd.f32 -0.13877685, %v1898_v46  ;;  %v4620_v42 = vpop.eup %4619  ;;  %v6354_v26 = vsel %vm1675_vm6, %v1737_v16, %v1819_v27  ;;  %v1709_v35 = vmax.f32 %v6334_v55, 1e-30  ;;  %v1773_v59 = vadd.f32 1.0, %v6334_v55  ;;  %4246 = vmatprep.subr.bf16.mxu0 %v4509_v4 }
 0x564   : > { %4625 = vpow2.f32 %v2128_v51  ;;  %v2009_v8 = vmul.f32 %v1993_v21, %v6261_v7  ;;  %v2150_v29 = vmul.f32 %v4620_v42, %v801_v63  ;;  %v2088_v0 = vsel %vm2056_vm2, %v2072_v18, %v2040_v57  ;;  %v4511_v18 = vld [vmem:[#allocation14 + $0x20] sm:$0xff]  }
 0x565   : > { %v1930_v40 = vmul.f32 %v3895_v61, %v6320_v54  ;;  %v2104_v6 = vmul.f32 3.18, %v2088_v0  ;;  %v6359_v12 = vmul.f32 %v6354_v26, %v6354_v26  ;;  %vm2057_vm7 = vcmp.lt.f32.partialorder %v6139_v9, 0.0  ;;  %4231 = vmatmul.mubr.bf16.gmra.mrb[20].mxu0 %v2193_v25 }
 0x566   : > { %v2025_v2 = vadd.f32 %v2009_v8, %v6261_v7  ;;  %v6363_v34 = vadd.f32 %v2150_v29, %v6215_v28  ;;  %4627 = vrcp.f32 %v1709_v35  ;;  %vm1692_vm8 = vcmp.gt.f32.partialorder %v6283_v30, 0.41421357  ;;  %4247 = vmatpush3.bf16.msra.mxu0 %v4509_v4  ;;  %v803_v4 = vld [vmem:[%s5648_s11 + $0x50] sm:$0xff] }
 0x567   : > { %v4622_v23 = vpop.eup %4621  ;;  %v1946_v45 = vadd.f32 0.19977711, %v1930_v40  ;;  %v2130_v38 = vmul.f32 1.442695, %v2104_v6  ;;  %v1899_v7 = vmul.f32 0.080537446, %v6359_v12  ;;  %4248 = vmatprep.subr.bf16.mxu0 %v4510_v39  ;;  %v1598_v9 = vadd.f32 %v5904_v24, %v5810_v52 }
 0x568   : > { %v4624_v53 = vpop.eup %4623  ;;  %v2041_v32 = vadd.f32 %v2025_v2, %v1865_v44  ;;  %v1739_v31 = vmul.f32 -1.0, %v4622_v23  ;;  %2182 = vst [vmem:[%s6065_s29 + $0x40] sm:$0xff] %v6363_v34  ;;  %vm1676_vm9 = vcmp.gt.f32.partialorder %v6283_v30, 2.4142137  ;;  %v1850_v44 = vsel %vm1690_vm3, 0.7853982, %v5178_v20 }
 0x569   : > { %v1962_v28 = vmul.f32 %v1946_v45, %v6320_v54  ;;  %v1803_v10 = vmul.f32 %v4624_v53, %v3881_v11  ;;  %4629 = vpow2.f32 %v2130_v38  ;;  %v3896_v62 = vadd.f32 -0.13877685, %v1899_v7  ;;  %v4512_v24 = vld [vmem:[#allocation14 + $0x28] sm:$0xff]  }
 0x56a   : > { %v2073_v56 = vsub.f32 0.0, %v2041_v32  ;;  %4631 = vrcp.f32 %v1773_v59  ;;  %4249 = vmatpush3.bf16.msra.mxu0 %v4510_v39  ;;  %v1866_v6 = vsel %vm1674_vm4, 1.5707964, %v1850_v44  ;;  %v1604_v53 = vadd.f32 %v5933_v58, %v5810_v52 }
 0x56b   : > { %v3911_v36 = vadd.f32 -0.3333295, %v1962_v28  ;;  %v1820_v51 = vsel %vm1692_vm8, %v1803_v10, %v6283_v30  ;;  %v1931_v46 = vmul.f32 %v3896_v62, %v6359_v12  ;;  %4250 = vmatprep.subr.bf16.mxu0 %v4511_v18  ;;  %v3882_v38 = vadd.f32 -1.0, %v6334_v55 }
 0x56c   : > { %v2089_v57 = vsel %vm2057_vm7, %v2073_v56, %v2041_v32  ;;  %v6383_v16 = vsel %vm1676_vm9, %v1739_v31, %v1820_v51  ;;  %vm2058_vm10 = vcmp.lt.f32.partialorder %v6197_v1, 0.0  ;;  %v1851_v58 = vsel %vm1691_vm5, 0.7853982, %v5178_v20 }
 0x56d   : > { %v2105_v63 = vmul.f32 3.18, %v2089_v57  ;;  %v1994_v21 = vmul.f32 %v3911_v36, %v6320_v54  ;;  %v1884_v5 = vmul.f32 %v6383_v16, %v6383_v16  ;;  %v1947_v25 = vadd.f32 0.19977711, %v1931_v46  ;;  %v804_v36 = vld [vmem:[%s5648_s11 + $0x58] sm:$0xff] }
 0x56e   : > { %v4626_v14 = vpop.eup %4625  ;;  %4251 = vmatpush3.bf16.msra.mxu0 %v4511_v18  ;;  %vm1693_vm11 = vcmp.gt.f32.partialorder %v6334_v55, 0.41421357  ;;  %vm1677_vm12 = vcmp.gt.f32.partialorder %v6334_v55, 2.4142137  ;;  %v1867_v51 = vsel %vm1675_vm6, 1.5707964, %v1851_v58  ;;  %v1608_v18 = vadd.f32 %v5946_v13, %v5810_v52 }
 0x56f   : > { %v2151_v61 = vmul.f32 %v4626_v14, %v802_v47  ;;  %v2132_v42 = vmul.f32 1.442695, %v2105_v63  ;;  %v2010_v8 = vmul.f32 %v1994_v21, %v6315_v15  ;;  %v1900_v54 = vmul.f32 0.080537446, %v1884_v5  ;;  %4252 = vmatprep.subr.bf16.mxu0 %v4512_v24 }
 0x570   : > { %v1963_v29 = vmul.f32 %v1947_v25, %v6359_v12  ;;  %v4628_v23 = vpop.eup %4627  ;;  %vm2059_vm13 = vcmp.lt.f32.partialorder %v6234_v43, 0.0  ;;  %v1852_v41 = vsel %vm1692_vm8, 0.7853982, %v5178_v20  ;;  %vm2060_vm14 = vcmp.lt.f32.partialorder %v6263_v60, 0.0 }
 0x571   : > { %v2167_v27 = vadd.f32 %v2151_v61, %v1598_v9  ;;  %4633 = vpow2.f32 %v2132_v42  ;;  %v2026_v0 = vadd.f32 %v2010_v8, %v6315_v15  ;;  %v3897_v40 = vadd.f32 -0.13877685, %v1900_v54 }
 0x572   : > { %v3912_v2 = vadd.f32 -0.3333295, %v1963_v29  ;;  %v1741_v28 = vmul.f32 -1.0, %v4628_v23  ;;  %4253 = vmatpush3.bf16.msra.mxu0 %v4512_v24  ;;  %v1614_v30 = vadd.f32 %v5968_v22, %v5810_v52  ;;  %v1618_v22 = vadd.f32 %v5986_v37, %v5810_v52 }
 0x573   : > { %2183 = vst [vmem:[%s6065_s29 + $0x48] sm:$0xff] %v2167_v27  ;;  %v2194_v35 = vpack.c.bf16 %v2167_v27, %v6363_v34  ;;  %v2042_v45 = vadd.f32 %v2026_v0, %v1866_v6  ;;  %v1932_v11 = vmul.f32 %v3897_v40, %v1884_v5  ;;  %v4630_v59 = vpop.eup %4629  ;;  %vm2061_vm15 = vcmp.lt.f32.partialorder %v6322_v19, 0.0 }
 0x574   : > { %v1995_v15 = vmul.f32 %v3912_v2, %v6359_v12  ;;  %v4632_v32 = vpop.eup %4631  ;;  %v2152_v7 = vmul.f32 %v4630_v59, %v803_v4  ;;  %v805_v2 = vld [vmem:[%s5648_s11 + $0x60] sm:$0xff]  ;;  %v1628_v19 = vadd.f32 %v6016_v17, %v5810_v52 }
 0x575   : > { %4234 = vmatprep.mubr.bf16.mxu0 %v2194_v35  ;;  %v2074_v3 = vsub.f32 0.0, %v2042_v45  ;;  %v1948_v31 = vadd.f32 0.19977711, %v1932_v11  ;;  %v1805_v34 = vmul.f32 %v4632_v32, %v3882_v38  ;;  %v1853_v32 = vsel %vm1693_vm11, 0.7853982, %v5178_v20  ;;  %v4519_v17 = vld [vmem:[#allocation16 + $0x20] sm:$0xff]  }
 0x576   : > { %v2011_v12 = vmul.f32 %v1995_v15, %v6354_v26  ;;  %v2168_v10 = vadd.f32 %v2152_v7, %v1604_v53  ;;  %v806_v7 = vld [vmem:[%s5648_s11 + $0x68] sm:$0xff] }
 0x577   : > { %v2090_v39 = vsel %vm2058_vm10, %v2074_v3, %v2042_v45  ;;  %v1964_v56 = vmul.f32 %v1948_v31, %v1884_v5  ;;  %v1821_v1 = vsel %vm1693_vm11, %v1805_v34, %v6334_v55  ;;  %v1624_v55 = vadd.f32 %v6006_v33, %v5810_v52  ;;  %v4515_v33 = vld [vmem:[#allocation16] sm:$0xff]   ;;  %v4518_v52 = vld [vmem:[#allocation16 + $0x18] sm:$0xff]  }
 0x578   : > { %v2106_v62 = vmul.f32 3.18, %v2090_v39  ;;  %v2027_v47 = vadd.f32 %v2011_v12, %v6354_v26  ;;  %2184 = vst [vmem:[%s6065_s29 + $0x50] sm:$0xff] %v2168_v10  ;;  %v1837_v46 = vsel %vm1677_vm12, %v1741_v28, %v1821_v1  ;;  %v1869_v28 = vsel %vm1677_vm12, 1.5707964, %v1853_v32  ;;  %v807_v39 = vld [vmem:[%s5648_s11 + $0x70] sm:$0xff]  ;;  %4274 = vmatprep.subr.bf16.mxu1 %v4515_v33 }
 0x579   : > { %v3913_v57 = vadd.f32 -0.3333295, %v1964_v56  ;;  %v1885_v21 = vmul.f32 %v1837_v46, %v1837_v46  ;;  %4275 = vmatpush3.bf16.msra.mxu1 %v4515_v33 }
 0x57a   : > { %v2134_v14 = vmul.f32 1.442695, %v2106_v62  ;;  %v2043_v63 = vadd.f32 %v2027_v47, %v1867_v51 }
 0x57b   : > { %v4634_v26 = vpop.eup %4633  ;;  %v1996_v9 = vmul.f32 %v3913_v57, %v1884_v5  ;;  %v1901_v42 = vmul.f32 0.080537446, %v1885_v21  ;;  %v1868_v5 = vsel %vm1676_vm9, 1.5707964, %v1852_v41  ;;  %v808_v57 = vld [vmem:[%s5648_s11 + $0x78] sm:$0xff] }
 0x57c   : > { %v2153_v61 = vmul.f32 %v4634_v26, %v804_v36  ;;  %4635 = vpow2.f32 %v2134_v14  ;;  %v2075_v25 = vsub.f32 0.0, %v2043_v63  ;;  %v4513_v26 = vld [vmem:[#allocation14 + $0x30] sm:$0xff]   ;;  %v3915_v41 = vld [vmem:[%s7320_s23] ss:$0 sm:$0xff]  ;;  %s6778_s23 = scalar_lea.hbm %s7325_s10, %s4016_s9 }
 0x57d   : > { %v2012_v44 = vmul.f32 %v1996_v9, %v6383_v16  ;;  %v3898_v27 = vadd.f32 -0.13877685, %v1901_v42  ;;  %4254 = vmatprep.subr.bf16.mxu0 %v4513_v26  ;;  %v4516_v9 = vld [vmem:[#allocation16 + $0x8] sm:$0xff]   ;;  %v4521_v42 = vld [vmem:[#allocation16 + $0x30] sm:$0xff]  }
 0x57e   : > { %v2169_v8 = vadd.f32 %v2153_v61, %v1608_v18  ;;  %v2091_v54 = vsel %vm2059_vm13, %v2075_v25, %v2043_v63  ;;  %v4514_v18 = vld [vmem:[#allocation14 + $0x38] sm:$0xff]   ;;  %4255 = vmatpush3.bf16.msra.mxu0 %v4513_v26  ;;  %4276 = vmatprep.subr.bf16.mxu1 %v4516_v9  ;;  %v4517_v61 = vld [vmem:[#allocation16 + $0x10] sm:$0xff]   ;;  %v4520_v25 = vld [vmem:[#allocation16 + $0x28] sm:$0xff]  }
 0x57f   : > { %v2107_v29 = vmul.f32 3.18, %v2091_v54  ;;  %v2028_v13 = vadd.f32 %v2012_v44, %v6383_v16  ;;  %v1933_v0 = vmul.f32 %v3898_v27, %v1885_v21  ;;  %4256 = vmatprep.subr.bf16.mxu0 %v4514_v18  ;;  %4277 = vmatpush3.bf16.msra.mxu1 %v4516_v9 }
 0x580   : > { %2185 = vst [vmem:[%s6065_s29 + $0x58] sm:$0xff] %v2169_v8  ;;  %v2195_v40 = vpack.c.bf16 %v2169_v8, %v2168_v10  ;;  %4278 = vmatprep.subr.bf16.mxu1 %v4517_v61 }
 0x581   : > { %v2136_v43 = vmul.f32 1.442695, %v2107_v29  ;;  %v2044_v24 = vadd.f32 %v2028_v13, %v1868_v5  ;;  %v1949_v4 = vadd.f32 0.19977711, %v1933_v0 }
 0x582   : > { %4235 = vmatmul.mubr.bf16.gmra.mrb[24].mxu0 %v2195_v40 }
 0x583   : > { %4637 = vpow2.f32 %v2136_v43  ;;  %v2076_v6 = vsub.f32 0.0, %v2044_v24  ;;  %v1965_v35 = vmul.f32 %v1949_v4, %v1885_v21  ;;  %4257 = vmatpush3.bf16.msra.mxu0 %v4514_v18  ;;  %4279 = vmatpush3.bf16.msra.mxu1 %v4517_v61 }
 0x584   : > { %4280 = vmatprep.subr.bf16.mxu1 %v4518_v52 }
 0x585   : > { %v2092_v23 = vsel %vm2060_vm14, %v2076_v6, %v2044_v24  ;;  %v3914_v11 = vadd.f32 -0.3333295, %v1965_v35 }
 0x586   : > { %v4636_v16 = vpop.eup %4635  ;;  %v2108_v45 = vmul.f32 3.18, %v2092_v23 }
 0x587   : > { %v2154_v59 = vmul.f32 %v4636_v16, %v805_v2  ;;  %v1997_v15 = vmul.f32 %v3914_v11, %v1885_v21  ;;  %4281 = vmatpush3.bf16.msra.mxu1 %v4518_v52 }
 0x588   : > { %v2138_v53 = vmul.f32 1.442695, %v2108_v45  ;;  %4282 = vmatprep.subr.bf16.mxu1 %v4519_v17 }
 0x589   : > { %v2170_v38 = vadd.f32 %v2154_v59, %v1614_v30  ;;  %v2013_v60 = vmul.f32 %v1997_v15, %v1837_v46 }
 0x58a   : > { %4639 = vpow2.f32 %v2138_v53 }
 0x58b   : > { %2186 = vst [vmem:[%s6065_s29 + $0x60] sm:$0xff] %v2170_v38  ;;  %v2029_v3 = vadd.f32 %v2013_v60, %v1837_v46  ;;  %4283 = vmatpush3.bf16.msra.mxu1 %v4519_v17  ;;  %v4522_v17 = vld [vmem:[#allocation16 + $0x38] sm:$0xff]  }
 0x58c   : > { %4284 = vmatprep.subr.bf16.mxu1 %v4520_v25 }
 0x58d   : > { %v4638_v31 = vpop.eup %4637  ;;  %v2045_v12 = vadd.f32 %v2029_v3, %v1869_v28 }
 0x58e   : > { %v2155_v58 = vmul.f32 %v4638_v31, %v806_v7 }
 0x58f   : > { %v2077_v10 = vsub.f32 0.0, %v2045_v12  ;;  %4285 = vmatpush3.bf16.msra.mxu1 %v4520_v25  ;;  %v4523_v25 = vld [vmem:[#allocation17] ss:$8 sps:$4 sm:$0xff]  }
 0x590   : > { %v2171_v34 = vadd.f32 %v2155_v58, %v1618_v22  ;;  %4286 = vmatprep.subr.bf16.mxu1 %v4521_v42 }
 0x591   : > { %v2093_v56 = vsel %vm2061_vm15, %v2077_v10, %v2045_v12 }
 0x592   : > { %2187 = vst [vmem:[%s6065_s29 + $0x68] sm:$0xff] %v2171_v34  ;;  %v2196_v62 = vpack.c.bf16 %v2171_v34, %v2170_v38  ;;  %v2109_v47 = vmul.f32 3.18, %v2093_v56 }
 0x593   : > { %4287 = vmatpush3.bf16.msra.mxu1 %v4521_v42  ;;  %v4525_v42 = vld [vmem:[#allocation17 + $0x4] ss:$8 sps:$4 sm:$0xff]  }
 0x594   : > { %v4640_v1 = vpop.eup %4639  ;;  %4238 = vmatprep.mubr.bf16.mxu0 %v2196_v62  ;;  %v2140_v36 = vmul.f32 1.442695, %v2109_v47  ;;  %4288 = vmatprep.subr.bf16.mxu1 %v4522_v17 }
 0x595   : > { %v2156_v37 = vmul.f32 %v4640_v1, %v807_v39  ;;  %2882 = vmatprep.subr.bf16.mxu0 %v4525_v42 }
 0x596   : > { %4641 = vpow2.f32 %v2140_v36 }
 0x597   : > { %v2172_v51 = vadd.f32 %v2156_v37, %v1624_v55  ;;  %4289 = vmatpush3.bf16.msra.mxu1 %v4522_v17 }
 0x599   : > { %2188 = vst [vmem:[%s6065_s29 + $0x70] sm:$0xff] %v2172_v51 }
 0x5a0   : > { %v4642_v46 = vpop.eup %4641 }
 0x5a1   : > { %v2157_v14 = vmul.f32 %v4642_v46, %v808_v57 }
 0x5a3   : > { %v2173_v63 = vadd.f32 %v2157_v14, %v1628_v19 }
 0x5a5   : > { %2189 = vst [vmem:[%s6065_s29 + $0x78] sm:$0xff] %v2173_v63  ;;  %v2197_v21 = vpack.c.bf16 %v2173_v63, %v2172_v51  ;;  %s3556_s29 = scalar_lea.sflag [#allocation4], %s5641_s7 }
 0x5a7   : > { %4239 = vmatmul.mubr.bf16.gmra.mrb[28].mxu0 %v2197_v21 }
 0x630   : > { %v4228_v44 = vpop.f32.mrb[16].mxu0 }
 0x631   : > { %v2312_v8 = vadd.f32 %v4228_v44, %v3915_v41  ;;  %v2303_v54 = vpop.f32.mrb[17].mxu0  ;;  %v4528_v44 = vld [vmem:[#allocation17 + $0x14] ss:$8 sps:$4 sm:$0xff]  }
 0x632   : > { %v2304_v27 = vadd.f32 %v3915_v41, %v2303_v54  ;;  %v4229_v29 = vpop.f32.mrb[18].mxu0  ;;  %v4529_v54 = vld [vmem:[#allocation17 + $0x20] ss:$8 sps:$4 sm:$0xff]  }
 0x633   : > { %v2315_v13 = vadd.f32 %v4229_v29, %v3915_v41  ;;  %v2306_v5 = vpop.f32.mrb[19].mxu0  ;;  %v2368_v40 = vmax.f32 %v2312_v8, 0.0  ;;  %v4526_v8 = vld [vmem:[#allocation17 + $0x10] ss:$8 sps:$4 sm:$0xff]  }
 0x634   : > { %v2307_v0 = vadd.f32 %v3915_v41, %v2306_v5  ;;  %v2366_v24 = vmax.f32 %v2304_v27, 0.0  ;;  %v4534_v27 = vld [vmem:[#allocation17 + $0x34] ss:$8 sps:$4 sm:$0xff]   ;;  %v4532_v29 = vld [vmem:[#allocation17 + $0x30] ss:$8 sps:$4 sm:$0xff]  }
 0x635   : > { %v2369_v43 = vmax.f32 %v2315_v13, 0.0  ;;  %v4537_v13 = vld [vmem:[#allocation17 + $0x44] ss:$8 sps:$4 sm:$0xff]   ;;  %v4535_v5 = vld [vmem:[#allocation17 + $0x40] ss:$8 sps:$4 sm:$0xff]  }
 0x636   : > { %v2367_v4 = vmax.f32 %v2307_v0, 0.0  ;;  %v4540_v0 = vld [vmem:[#allocation17 + $0x54] ss:$8 sps:$4 sm:$0xff]  }
 0x637   : > { %v2383_v6 = vpack.c.bf16 %v2369_v43, %v2368_v40  ;;  %v4538_v40 = vld [vmem:[#allocation17 + $0x50] ss:$8 sps:$4 sm:$0xff]   ;;  %v3924_v43 = vld [vmem:[%s7321_s3] ss:$0 sm:$0xff]  ;;  %s5179_s3 = smov [#allocation19]  }
 0x638   : > { %v2382_v2 = vpack.c.bf16 %v2367_v4, %v2366_v24  ;;  %v4232_v35 = vpop.f32.mrb[20].mxu0  ;;  %s5043_s6 = sshll.u32 %s5179_s3, 4  ;;  %s5044_s6 = int_to_ptr.vmem [resolvable:$false] %s5043_s6 }
 0x639   : > { %v2328_v23 = vadd.f32 %v4232_v35, %v3915_v41  ;;  %v2319_v16 = vpop.f32.mrb[21].mxu0  ;;  %s5045_s14 = scalar_lea.vmem %s5044_s6, 4096  ;;  %p5046_p11 = scmp.lt.s32.totalorder %s6785_s4, %s5044_s6 }
 0x63a   : > { %4258 = vmatprep.mubr.bf16.mxu0 %v2382_v2  ;;  %v2320_v45 = vadd.f32 %v3915_v41, %v2319_v16  ;;  %v4233_v11 = vpop.f32.mrb[22].mxu0  ;;  %p5047_p3 = scmp.lt.s32.totalorder %s5045_s14, %s5039_s27 }
 0x63b   : > { %4259 = vmatmul.mubr.bf16.vlgmr.msra.gmra.mrb[32].mxu0 %v2383_v6  ;;  %v2331_v30 = vadd.f32 %v4233_v11, %v3915_v41  ;;  %v2322_v59 = vpop.f32.mrb[23].mxu0  ;;  %v2372_v15 = vmax.f32 %v2328_v23, 0.0 }
 0x63c   : > { %v2323_v53 = vadd.f32 %v3915_v41, %v2322_v59  ;;  %v2370_v32 = vmax.f32 %v2320_v45, 0.0  ;;  %2883 = vmatpush1.bf16.msra.mxu0 %v4523_v25  ;;  %p5048_p12 = por %p5047_p3, %p5046_p11 }
 0x63d   : > { %v2373_v38 = vmax.f32 %v2331_v30, 0.0  ;;  %2884 = vmatprep.subr.bf16.mxu0 %v4528_v44 }
 0x63e   : > { %v2371_v60 = vmax.f32 %v2323_v53, 0.0  ;;  %p5049_p1 = pnand %p5048_p12, %p5042_p8 }
 0x63f   : > { %v2385_v7 = vpack.c.bf16 %v2373_v38, %v2372_v15 }
 0x640   : > { %v2384_v3 = vpack.c.bf16 %v2371_v60, %v2370_v32  ;;  %2885 = vmatpush1.bf16.msra.mxu0 %v4526_v8 }
 0x642   : > { %4262 = vmatprep.mubr.bf16.mxu0 %v2384_v3 }
 0x643   : > { %4263 = vmatmul.mubr.bf16.gmra.mrb[36].mxu0 %v2385_v7 }
 0x655   : > { %v4236_v31 = vpop.f32.mrb[24].mxu0 }
 0x656   : > { %v2344_v28 = vadd.f32 %v4236_v31, %v3915_v41  ;;  %v2335_v22 = vpop.f32.mrb[25].mxu0 }
 0x657   : > { %v2336_v58 = vadd.f32 %v3915_v41, %v2335_v22  ;;  %v4237_v12 = vpop.f32.mrb[26].mxu0 }
 0x658   : > { %v2347_v34 = vadd.f32 %v4237_v12, %v3915_v41  ;;  %v2338_v10 = vpop.f32.mrb[27].mxu0  ;;  %v2376_v56 = vmax.f32 %v2344_v28, 0.0 }
 0x659   : > { %v2339_v39 = vadd.f32 %v3915_v41, %v2338_v10  ;;  %v2374_v47 = vmax.f32 %v2336_v58, 0.0 }
 0x65a   : > { %v2377_v62 = vmax.f32 %v2347_v34, 0.0 }
 0x65b   : > { %v2375_v1 = vmax.f32 %v2339_v39, 0.0 }
 0x65c   : > { %v2387_v55 = vpack.c.bf16 %v2377_v62, %v2376_v56 }
 0x65d   : > { %v2386_v37 = vpack.c.bf16 %v2375_v1, %v2374_v47 }
 0x65f   : > { %4266 = vmatprep.mubr.bf16.mxu0 %v2386_v37 }
 0x660   : > { %4267 = vmatmul.mubr.bf16.gmra.mrb[40].mxu0 %v2387_v55 }
 0x67a   : > { %v4240_v36 = vpop.f32.mrb[28].mxu0 }
 0x67b   : > { %v2360_v51 = vadd.f32 %v4240_v36, %v3915_v41  ;;  %v2351_v57 = vpop.f32.mrb[29].mxu0 }
 0x67c   : > { %v2352_v46 = vadd.f32 %v3915_v41, %v2351_v57  ;;  %v4241_v19 = vpop.f32.mrb[30].mxu0 }
 0x67d   : > { %v2363_v14 = vadd.f32 %v4241_v19, %v3915_v41  ;;  %v2354_v63 = vpop.f32.mrb[31].mxu0  ;;  %v2380_v26 = vmax.f32 %v2360_v51, 0.0 }
 0x67e   : > { %v2355_v21 = vadd.f32 %v3915_v41, %v2354_v63  ;;  %v2378_v33 = vmax.f32 %v2352_v46, 0.0  ;;  %v4531_v41 = vld [vmem:[#allocation17 + $0x24] ss:$8 sps:$4 sm:$0xff]  }
 0x67f   : > { %v2381_v18 = vmax.f32 %v2363_v14, 0.0  ;;  %2886 = vmatprep.subr.bf16.mxu0 %v4531_v41 }
 0x680   : > { %v2379_v9 = vmax.f32 %v2355_v21, 0.0  ;;  %2887 = vmatpush1.bf16.msra.mxu0 %v4529_v54 }
 0x681   : > { %v2389_v61 = vpack.c.bf16 %v2381_v18, %v2380_v26  ;;  %2888 = vmatprep.subr.bf16.mxu0 %v4534_v27 }
 0x682   : > { %v2388_v52 = vpack.c.bf16 %v2379_v9, %v2378_v33 }
 0x684   : > { %4270 = vmatprep.mubr.bf16.mxu0 %v2388_v52  ;;  %2889 = vmatpush1.bf16.msra.mxu0 %v4532_v29 }
 0x685   : > { %4271 = vmatmul.mubr.bf16.gmra.mrb[44].mxu0 %v2389_v61  ;;  %2890 = vmatprep.subr.bf16.mxu0 %v4537_v13 }
 0x686   : > { %2914 = vmatprep.mubr.bf16.mxu0 %v5177_v50 }
 0x688   : > { %2891 = vmatpush1.bf16.msra.mxu0 %v4535_v5  ;;  %v4541_v5 = vld [vmem:[#allocation17 + $0x60] ss:$8 sps:$4 sm:$0xff]  }
 0x689   : > { %2892 = vmatprep.subr.bf16.mxu0 %v4540_v0  ;;  %v4543_v0 = vld [vmem:[#allocation17 + $0x64] ss:$8 sps:$4 sm:$0xff]  }
 0x68c   : > { %2893 = vmatpush1.bf16.msra.mxu0 %v4538_v40  ;;  %v4544_v40 = vld [vmem:[#allocation17 + $0x70] ss:$8 sps:$4 sm:$0xff]  }
 0x68d   : > { %2894 = vmatprep.subr.bf16.mxu0 %v4543_v0  ;;  %v6476_v0 = vld [vmem:[%s7323_s19] sm:$0x3] }
 0x690   : > { %2895 = vmatpush1.bf16.msra.mxu0 %v4541_v5 }
 0x70e   : > { %v4260_v24 = vpop.f32.mrb[32].mxu0 }
 0x70f   : > { %v2504_v4 = vadd.f32 %v4260_v24, %v3924_v43  ;;  %v2495_v6 = vpop.f32.mrb[33].mxu0  ;;  %v4546_v24 = vld [vmem:[#allocation17 + $0x74] ss:$8 sps:$4 sm:$0xff]  }
 0x710   : > { %v2496_v2 = vadd.f32 %v3924_v43, %v2495_v6  ;;  %v4261_v35 = vpop.f32.mrb[34].mxu0  ;;  %2896 = vmatprep.subr.bf16.mxu0 %v4546_v24 }
 0x711   : > { %v2507_v23 = vadd.f32 %v4261_v35, %v3924_v43  ;;  %v2498_v16 = vpop.f32.mrb[35].mxu0  ;;  %v2560_v11 = vmax.f32 %v2504_v4, 0.0  ;;  %2897 = vmatpush1.bf16.msra.mxu0 %v4544_v40  ;;  %v6481_v40 = vrot.slane %v6476_v0, %v1429_v49 }
 0x712   : > { %v2499_v45 = vadd.f32 %v3924_v43, %v2498_v16  ;;  %v2558_v59 = vmax.f32 %v2496_v2, 0.0 }
 0x713   : > { %v2561_v30 = vmax.f32 %v2507_v23, 0.0 }
 0x714   : > { %v2559_v53 = vmax.f32 %v2499_v45, 0.0 }
 0x715   : > { %v2575_v15 = vpack.c.bf16 %v2561_v30, %v2560_v11 }
 0x716   : > { %v2574_v38 = vpack.c.bf16 %v2559_v53, %v2558_v59  ;;  %v4264_v32 = vpop.f32.mrb[36].mxu0 }
 0x717   : > { %v2520_v60 = vadd.f32 %v4264_v32, %v3924_v43  ;;  %v2511_v7 = vpop.f32.mrb[37].mxu0 }
 0x718   : > { %4290 = vmatprep.mubr.bf16.mxu1 %v2574_v38  ;;  %v2512_v3 = vadd.f32 %v3924_v43, %v2511_v7  ;;  %v4265_v31 = vpop.f32.mrb[38].mxu0 }
 0x719   : > { %4291 = vmatmul.mubr.bf16.vlgmr.msra.gmra.mrb[64].mxu1 %v2575_v15  ;;  %v2523_v28 = vadd.f32 %v4265_v31, %v3924_v43  ;;  %v2514_v22 = vpop.f32.mrb[39].mxu0  ;;  %v2564_v12 = vmax.f32 %v2520_v60, 0.0 }
 0x71a   : > { %v2515_v58 = vadd.f32 %v3924_v43, %v2514_v22  ;;  %v2562_v10 = vmax.f32 %v2512_v3, 0.0 }
 0x71b   : > { %v2565_v34 = vmax.f32 %v2523_v28, 0.0 }
 0x71c   : > { %v2563_v39 = vmax.f32 %v2515_v58, 0.0 }
 0x71d   : > { %v2577_v56 = vpack.c.bf16 %v2565_v34, %v2564_v12 }
 0x71e   : > { %v2576_v62 = vpack.c.bf16 %v2563_v39, %v2562_v10 }
 0x720   : > { %4294 = vmatprep.mubr.bf16.mxu1 %v2576_v62 }
 0x721   : > { %4295 = vmatmul.mubr.bf16.gmra.mrb[68].mxu1 %v2577_v56 }
 0x733   : > { %v4268_v47 = vpop.f32.mrb[40].mxu0 }
 0x734   : > { %v2536_v1 = vadd.f32 %v4268_v47, %v3924_v43  ;;  %v2527_v55 = vpop.f32.mrb[41].mxu0 }
 0x735   : > { %v2528_v37 = vadd.f32 %v3924_v43, %v2527_v55  ;;  %v4269_v36 = vpop.f32.mrb[42].mxu0 }
 0x736   : > { %v2539_v51 = vadd.f32 %v4269_v36, %v3924_v43  ;;  %v2530_v57 = vpop.f32.mrb[43].mxu0  ;;  %v2568_v19 = vmax.f32 %v2536_v1, 0.0 }
 0x737   : > { %v2531_v46 = vadd.f32 %v3924_v43, %v2530_v57  ;;  %v2566_v63 = vmax.f32 %v2528_v37, 0.0 }
 0x738   : > { %v2569_v14 = vmax.f32 %v2539_v51, 0.0 }
 0x739   : > { %v2567_v21 = vmax.f32 %v2531_v46, 0.0 }
 0x73a   : > { %v2579_v26 = vpack.c.bf16 %v2569_v14, %v2568_v19 }
 0x73b   : > { %v2578_v18 = vpack.c.bf16 %v2567_v21, %v2566_v63 }
 0x73d   : > { %4298 = vmatprep.mubr.bf16.mxu1 %v2578_v18 }
 0x73e   : > { %4299 = vmatmul.mubr.bf16.gmra.mrb[72].mxu1 %v2579_v26 }
 0x758   : > { %v4272_v33 = vpop.f32.mrb[44].mxu0 }
 0x759   : > { %v2552_v9 = vadd.f32 %v4272_v33, %v3924_v43  ;;  %v2543_v61 = vpop.f32.mrb[45].mxu0 }
 0x75a   : > { %v2544_v52 = vadd.f32 %v3924_v43, %v2543_v61  ;;  %v4273_v17 = vpop.f32.mrb[46].mxu0 }
 0x75b   : > { %v2555_v25 = vadd.f32 %v4273_v17, %v3924_v43  ;;  %v2546_v42 = vpop.f32.mrb[47].mxu0  ;;  %v2572_v8 = vmax.f32 %v2552_v9, 0.0 }
 0x75c   : > { %v2547_v44 = vadd.f32 %v3924_v43, %v2546_v42  ;;  %v2570_v54 = vmax.f32 %v2544_v52, 0.0  ;;  %v3933_v43 = vld [vmem:[%s7322_s17] ss:$0 sm:$0xff] }
 0x75d   : > { %v2573_v41 = vmax.f32 %v2555_v25, 0.0 }
 0x75e   : > { %v2571_v27 = vmax.f32 %v2547_v44, 0.0 }
 0x75f   : > { %v2581_v29 = vpack.c.bf16 %v2573_v41, %v2572_v8 }
 0x760   : > { %v2580_v13 = vpack.c.bf16 %v2571_v27, %v2570_v54 }
 0x762   : > { %4302 = vmatprep.mubr.bf16.mxu1 %v2580_v13 }
 0x763   : > { %4303 = vmatmul.mubr.bf16.gmra.mrb[76].mxu1 %v2581_v29 }
 0x7ec   : > { %v4292_v4 = vpop.f32.mrb[64].mxu1 }
 0x7ed   : > { %v2696_v6 = vadd.f32 %v4292_v4, %v3933_v43  ;;  %v2687_v2 = vpop.f32.mrb[65].mxu1 }
 0x7ee   : > { %v2688_v35 = vadd.f32 %v3933_v43, %v2687_v2  ;;  %v4293_v23 = vpop.f32.mrb[66].mxu1 }
 0x7ef   : > { %v2699_v16 = vadd.f32 %v4293_v23, %v3933_v43  ;;  %v2690_v45 = vpop.f32.mrb[67].mxu1  ;;  %v2752_v30 = vmax.f32 %v2696_v6, 0.0 }
 0x7f0   : > { %v2691_v11 = vadd.f32 %v3933_v43, %v2690_v45  ;;  %v2750_v53 = vmax.f32 %v2688_v35, 0.0 }
 0x7f1   : > { %v2753_v59 = vmax.f32 %v2699_v16, 0.0 }
 0x7f2   : > { %v2751_v15 = vmax.f32 %v2691_v11, 0.0 }
 0x7f3   : > { %v2767_v38 = vpack.c.bf16 %v2753_v59, %v2752_v30 }
 0x7f4   : > { %v2766_v32 = vpack.c.bf16 %v2751_v15, %v2750_v53  ;;  %v4296_v60 = vpop.f32.mrb[68].mxu1 }
 0x7f5   : > { %v2712_v7 = vadd.f32 %v4296_v60, %v3933_v43  ;;  %v2703_v3 = vpop.f32.mrb[69].mxu1 }
 0x7f6   : > { %2915 = vmatmul.mubr.bf16.vlgmr.msra.gmra.mrb[48].mxu0 %v2766_v32  ;;  %v2704_v31 = vadd.f32 %v3933_v43, %v2703_v3  ;;  %v4297_v28 = vpop.f32.mrb[70].mxu1 }
 0x7f7   : > { %2924 = vmatprep.mubr.bf16.mxu0 %v5177_v50  ;;  %v2715_v22 = vadd.f32 %v4297_v28, %v3933_v43  ;;  %v2706_v58 = vpop.f32.mrb[71].mxu1  ;;  %v2756_v34 = vmax.f32 %v2712_v7, 0.0 }
 0x7f8   : > { %v2707_v12 = vadd.f32 %v3933_v43, %v2706_v58  ;;  %v2754_v39 = vmax.f32 %v2704_v31, 0.0 }
 0x7f9   : > { %v2757_v10 = vmax.f32 %v2715_v22, 0.0 }
 0x7fa   : > { %v2755_v56 = vmax.f32 %v2707_v12, 0.0 }
 0x7fb   : > { %v2769_v62 = vpack.c.bf16 %v2757_v10, %v2756_v34 }
 0x7fc   : > { %v2768_v47 = vpack.c.bf16 %v2755_v56, %v2754_v39 }
 0x7fe   : > { %2925 = vmatmul.mubr.bf16.gmra.mrb[52].mxu0 %v2767_v38 }
 0x7ff   : > { %2934 = vmatprep.mubr.bf16.mxu0 %v5177_v50 }
 0x806   : > { %2935 = vmatmul.mubr.bf16.gmra.mrb[56].mxu0 %v2768_v47 }
 0x807   : > { %2944 = vmatprep.mubr.bf16.mxu0 %v5177_v50 }
 0x80e   : > { %2945 = vmatmul.mubr.bf16.gmra.mrb[60].mxu0 %v2769_v62 }
 0x80f   : > { %2954 = vmatprep.mubr.bf16.mxu0 %v5177_v50 }
 0x811   : > { %v4300_v1 = vpop.f32.mrb[72].mxu1 }
 0x812   : > { %v2728_v55 = vadd.f32 %v4300_v1, %v3933_v43  ;;  %v2719_v37 = vpop.f32.mrb[73].mxu1 }
 0x813   : > { %v2720_v36 = vadd.f32 %v3933_v43, %v2719_v37  ;;  %v4301_v51 = vpop.f32.mrb[74].mxu1 }
 0x814   : > { %v2731_v57 = vadd.f32 %v4301_v51, %v3933_v43  ;;  %v2722_v46 = vpop.f32.mrb[75].mxu1  ;;  %v2760_v14 = vmax.f32 %v2728_v55, 0.0 }
 0x815   : > { %v2723_v19 = vadd.f32 %v3933_v43, %v2722_v46  ;;  %v2758_v21 = vmax.f32 %v2720_v36, 0.0 }
 0x816   : > { %v2761_v63 = vmax.f32 %v2731_v57, 0.0 }
 0x817   : > { %v2759_v26 = vmax.f32 %v2723_v19, 0.0 }
 0x818   : > { %v2771_v18 = vpack.c.bf16 %v2761_v63, %v2760_v14 }
 0x819   : > { %v2770_v33 = vpack.c.bf16 %v2759_v26, %v2758_v21 }
 0x81b   : > { %2955 = vmatmul.mubr.bf16.gmra.mrb[64].mxu0 %v2770_v33 }
 0x81c   : > { %2964 = vmatprep.mubr.bf16.mxu0 %v5177_v50 }
 0x823   : > { %2965 = vmatmul.mubr.bf16.gmra.mrb[68].mxu0 %v2771_v18 }
 0x824   : > { %2974 = vmatprep.mubr.bf16.mxu0 %v5177_v50 }
 0x836   : > { %v4304_v9 = vpop.f32.mrb[76].mxu1 }
 0x837   : > { %v2744_v61 = vadd.f32 %v4304_v9, %v3933_v43  ;;  %v2735_v52 = vpop.f32.mrb[77].mxu1 }
 0x838   : > { %v2736_v17 = vadd.f32 %v3933_v43, %v2735_v52  ;;  %v4305_v25 = vpop.f32.mrb[78].mxu1 }
 0x839   : > { %v2747_v42 = vadd.f32 %v4305_v25, %v3933_v43  ;;  %v2738_v44 = vpop.f32.mrb[79].mxu1  ;;  %v2764_v41 = vmax.f32 %v2744_v61, 0.0 }
 0x83a   : > { %v2739_v8 = vadd.f32 %v3933_v43, %v2738_v44  ;;  %v2762_v27 = vmax.f32 %v2736_v17, 0.0 }
 0x83b   : > { %v2765_v54 = vmax.f32 %v2747_v42, 0.0  ;;  %v7324_v42 = vsub.s32 1, %v5715_v48 }
 0x83c   : > { %v2763_v29 = vmax.f32 %v2739_v8, 0.0 }
 0x83d   : > { %v2773_v13 = vpack.c.bf16 %v2765_v54, %v2764_v41  ;;  %v6548_v44 = vrot.slane %v6476_v0, %v7324_v42 }
 0x83e   : > { %v2772_v5 = vpack.c.bf16 %v2763_v29, %v2762_v27 }
 0x840   : > { %2975 = vmatmul.mubr.bf16.gmra.mrb[72].mxu0 %v2772_v5 }
 0x841   : > { %2984 = vmatprep.mubr.bf16.mxu0 %v5177_v50 }
 0x848   : > { %2985 = vmatmul.mubr.bf16.gmra.mrb[76].mxu0 %v2773_v13 }
 0x8c9   : > { %v2916_v24 = vpop.f32.mrb[48].mxu0 }
 0x8ca   : > { %v2917_v43 = vadd.f32 %v2916_v24, %v6481_v40  ;;  %v6484_v4 = vpop.f32.mrb[49].mxu0 }
 0x8cb   : > { %v2920_v6 = vpop.f32.mrb[50].mxu0 }
 0x8cc   : > { %v6486_v2 = vmul.f32 0.2, %v2917_v43  ;;  %v2921_v50 = vadd.f32 %v2920_v6, %v6481_v40  ;;  %v6489_v35 = vpop.f32.mrb[51].mxu0 }
 0x8ce   : > { %v3011_v23 = vand.u32 2147483647, %v6486_v2  ;;  %v6492_v16 = vmul.f32 0.2, %v2921_v50  ;;  %vm3411_vm9 = vcmp.lt.f32.partialorder %v6486_v2, 0.0 }
 0x8d0   : > { %v3059_v45 = vmax.f32 %v3011_v23, 1e-30  ;;  %v3123_v11 = vadd.f32 1.0, %v3011_v23  ;;  %v6495_v49 = vand.u32 2147483647, %v6492_v16  ;;  %v3958_v56 = vadd.f32 -1.0, %v3011_v23 }
 0x8d1   : > { %v2926_v30 = vpop.f32.mrb[52].mxu0  ;;  %vm3043_vm0 = vcmp.gt.f32.partialorder %v3011_v23, 0.41421357  ;;  %vm3027_vm1 = vcmp.gt.f32.partialorder %v3011_v23, 2.4142137  ;;  %vm3412_vm11 = vcmp.lt.f32.partialorder %v6492_v16, 0.0 }
 0x8d2   : > { %4643 = vrcp.f32 %v3059_v45  ;;  %v3060_v59 = vmax.f32 %v6495_v49, 1e-30  ;;  %v3124_v53 = vadd.f32 1.0, %v6495_v49  ;;  %v2927_v15 = vadd.f32 %v2926_v30, %v6481_v40  ;;  %v6500_v38 = vpop.f32.mrb[53].mxu0 }
 0x8d3   : > { %4645 = vrcp.f32 %v3123_v11  ;;  %v2930_v32 = vpop.f32.mrb[54].mxu0  ;;  %v3203_v62 = vsel %vm3043_vm0, 0.7853982, %v5178_v20  ;;  %v3959_v21 = vadd.f32 -1.0, %v6495_v49  ;;  %vm3044_vm2 = vcmp.gt.f32.partialorder %v6495_v49, 0.41421357 }
 0x8d4   : > { %4647 = vrcp.f32 %v3060_v59  ;;  %v6502_v60 = vmul.f32 0.2, %v2927_v15  ;;  %v2931_v7 = vadd.f32 %v2930_v32, %v6481_v40  ;;  %v6505_v3 = vpop.f32.mrb[55].mxu0  ;;  %v6529_v63 = vsel %vm3027_vm1, 1.5707964, %v3203_v62 }
 0x8d5   : > { %4649 = vrcp.f32 %v3124_v53  ;;  %vm3028_vm3 = vcmp.gt.f32.partialorder %v6495_v49, 2.4142137  ;;  %v3204_v27 = vsel %vm3044_vm2, 0.7853982, %v5178_v20  ;;  %v6585_v15 = vadd.f32 %v6484_v4, %v6548_v44 }
 0x8d6   : > { %v6508_v31 = vand.u32 2147483647, %v6502_v60  ;;  %v6510_v28 = vmul.f32 0.2, %v2931_v7  ;;  %v6579_v11 = vsel %vm3028_vm3, 1.5707964, %v3204_v27  ;;  %v6599_v4 = vadd.f32 %v6489_v35, %v6548_v44 }
 0x8d7   : > { %vm3413_vm14 = vcmp.lt.f32.partialorder %v6502_v60, 0.0 }
 0x8d8   : > { %v3061_v58 = vmax.f32 %v6508_v31, 1e-30  ;;  %v3125_v34 = vadd.f32 1.0, %v6508_v31  ;;  %v6516_v10 = vand.u32 2147483647, %v6510_v28  ;;  %v3960_v30 = vadd.f32 -1.0, %v6508_v31 }
 0x8d9   : > { %v2936_v22 = vpop.f32.mrb[56].mxu0  ;;  %vm3045_vm4 = vcmp.gt.f32.partialorder %v6508_v31, 0.41421357  ;;  %vm3029_vm5 = vcmp.gt.f32.partialorder %v6508_v31, 2.4142137  ;;  %vm3414_vm15 = vcmp.lt.f32.partialorder %v6510_v28, 0.0 }
 0x8da   : > { %v2937_v12 = vadd.f32 %v2936_v22, %v6481_v40  ;;  %4651 = vrcp.f32 %v3061_v58  ;;  %v6522_v1 = vpop.f32.mrb[57].mxu0  ;;  %v3062_v57 = vmax.f32 %v6516_v10, 1e-30  ;;  %v3126_v46 = vadd.f32 1.0, %v6516_v10 }
 0x8db   : > { %4653 = vrcp.f32 %v3125_v34  ;;  %v2940_v36 = vpop.f32.mrb[58].mxu0  ;;  %v3205_v6 = vsel %vm3045_vm4, 0.7853982, %v5178_v20  ;;  %vm3030_vm6 = vcmp.gt.f32.partialorder %v6516_v10, 2.4142137 }
 0x8dc   : > { %v4644_v39 = vpop.eup %4643  ;;  %v6520_v47 = vmul.f32 0.2, %v2937_v12  ;;  %v6526_v19 = vpop.f32.mrb[59].mxu0  ;;  %4655 = vrcp.f32 %v3062_v57  ;;  %v2941_v13 = vadd.f32 %v2940_v36, %v6481_v40  ;;  %v6594_v12 = vsel %vm3029_vm5, 1.5707964, %v3205_v6 }
 0x8dd   : > { %v4646_v55 = vpop.eup %4645  ;;  %v3076_v37 = vmul.f32 -1.0, %v4644_v39  ;;  %4657 = vrcp.f32 %v3126_v46  ;;  %vm3046_vm7 = vcmp.gt.f32.partialorder %v6516_v10, 0.41421357 }
 0x8de   : > { %v3140_v51 = vmul.f32 %v4646_v55, %v3958_v56  ;;  %v4648_v14 = vpop.eup %4647  ;;  %v6533_v26 = vand.u32 2147483647, %v6520_v47  ;;  %v6575_v50 = vmul.f32 0.2, %v2941_v13 }
 0x8df   : > { %v4650_v18 = vpop.eup %4649  ;;  %v3078_v9 = vmul.f32 -1.0, %v4648_v14 }
 0x8e0   : > { %v3171_v33 = vsel %vm3043_vm0, %v3140_v51, %v3011_v23  ;;  %v3142_v52 = vmul.f32 %v4650_v18, %v3959_v21  ;;  %v3063_v8 = vmax.f32 %v6533_v26, 1e-30  ;;  %v3127_v29 = vadd.f32 1.0, %v6533_v26 }
 0x8e1   : > { %v6538_v61 = vsel %vm3027_vm1, %v3076_v37, %v3171_v33  ;;  %v2946_v17 = vpop.f32.mrb[60].mxu0  ;;  %v6589_v22 = vand.u32 2147483647, %v6575_v50  ;;  %v3961_v37 = vadd.f32 -1.0, %v6516_v10  ;;  %vm3031_vm8 = vcmp.gt.f32.partialorder %v6533_v26, 2.4142137 }
 0x8e2   : > { %v6543_v25 = vmul.f32 %v6538_v61, %v6538_v61  ;;  %v6552_v41 = vpop.f32.mrb[61].mxu0  ;;  %v3172_v54 = vsel %vm3044_vm2, %v3142_v52, %v6495_v49  ;;  %4659 = vrcp.f32 %v3063_v8  ;;  %v2947_v59 = vadd.f32 %v2946_v17, %v6481_v40 }
 0x8e3   : > { %v6558_v5 = vpop.f32.mrb[62].mxu0  ;;  %v6563_v0 = vsel %vm3028_vm3, %v3078_v9, %v3172_v54  ;;  %4661 = vrcp.f32 %v3127_v29  ;;  %v3064_v36 = vmax.f32 %v6589_v22, 1e-30  ;;  %v3128_v21 = vadd.f32 1.0, %v6589_v22 }
 0x8e4   : > { %v3251_v48 = vmul.f32 0.080537446, %v6543_v25  ;;  %v6566_v24 = vpop.f32.mrb[63].mxu0  ;;  %v6570_v43 = vmul.f32 %v6563_v0, %v6563_v0  ;;  %v4652_v23 = vpop.eup %4651  ;;  %v6602_v39 = vmul.f32 0.2, %v2947_v59  ;;  %vm3415_vm2 = vcmp.lt.f32.partialorder %v6520_v47, 0.0 }
 0x8e5   : > { %v4654_v53 = vpop.eup %4653  ;;  %v3080_v7 = vmul.f32 -1.0, %v4652_v23  ;;  %4663 = vrcp.f32 %v3064_v36  ;;  %vm3047_vm10 = vcmp.gt.f32.partialorder %v6533_v26, 0.41421357  ;;  %vm3032_vm12 = vcmp.gt.f32.partialorder %v6589_v22, 2.4142137 }
 0x8e6   : > { %v3974_v45 = vadd.f32 -0.13877685, %v3251_v48  ;;  %v3252_v32 = vmul.f32 0.080537446, %v6570_v43  ;;  %v3144_v49 = vmul.f32 %v4654_v53, %v3960_v30  ;;  %v4656_v56 = vpop.eup %4655  ;;  %4665 = vrcp.f32 %v3128_v21 }
 0x8e7   : > { %v4658_v57 = vpop.eup %4657  ;;  %v3082_v14 = vmul.f32 -1.0, %v4656_v56  ;;  %v6630_v8 = vand.u32 2147483647, %v6602_v39  ;;  %v3962_v48 = vadd.f32 -1.0, %v6533_v26  ;;  %v2951_v56 = vadd.f32 %v6558_v5, %v6481_v40 }
 0x8e8   : > { %v3283_v58 = vmul.f32 %v3974_v45, %v6543_v25  ;;  %v3975_v34 = vadd.f32 -0.13877685, %v3252_v32  ;;  %v3173_v55 = vsel %vm3045_vm4, %v3144_v49, %v6508_v31  ;;  %v3146_v52 = vmul.f32 %v4658_v57, %v3961_v37 }
 0x8e9   : > { %v6614_v46 = vsel %vm3029_vm5, %v3080_v7, %v3173_v55  ;;  %v3206_v31 = vsel %vm3046_vm7, 0.7853982, %v5178_v20  ;;  %vm3048_vm13 = vcmp.gt.f32.partialorder %v6589_v22, 0.41421357  ;;  %vm3033_vm0 = vcmp.gt.f32.partialorder %v6630_v8, 2.4142137 }
 0x8ea   : > { %v3299_v62 = vadd.f32 0.19977711, %v3283_v58  ;;  %v3284_v35 = vmul.f32 %v3975_v34, %v6570_v43  ;;  %v6622_v9 = vmul.f32 %v6614_v46, %v6614_v46  ;;  %v3174_v13 = vsel %vm3046_vm7, %v3146_v52, %v6516_v10 }
 0x8eb   : > { %v6640_v45 = vsel %vm3030_vm6, %v3082_v14, %v3174_v13  ;;  %v3065_v34 = vmax.f32 %v6630_v8, 1e-30  ;;  %vm3049_vm1 = vcmp.gt.f32.partialorder %v6630_v8, 0.41421357 }
 0x8ec   : > { %v3315_v33 = vmul.f32 %v3299_v62, %v6543_v25  ;;  %v3300_v42 = vadd.f32 0.19977711, %v3284_v35  ;;  %v4660_v54 = vpop.eup %4659  ;;  %v3253_v29 = vmul.f32 0.080537446, %v6622_v9  ;;  %v6648_v7 = vmul.f32 %v6640_v45, %v6640_v45 }
 0x8ed   : > { %v4662_v6 = vpop.eup %4661  ;;  %v3084_v30 = vmul.f32 -1.0, %v4660_v54  ;;  %v6666_v35 = vsel %vm3030_vm6, 1.5707964, %v3206_v31  ;;  %4667 = vrcp.f32 %v3065_v34  ;;  %v3963_v31 = vadd.f32 -1.0, %v6589_v22 }
 0x8ee   : > { %v6609_v51 = vpop.f32.mrb[64].mxu0  ;;  %v3990_v27 = vadd.f32 -0.3333295, %v3315_v33  ;;  %v3316_v23 = vmul.f32 %v3300_v42, %v6570_v43  ;;  %v3976_v32 = vadd.f32 -0.13877685, %v3253_v29  ;;  %v3148_v58 = vmul.f32 %v4662_v6, %v3962_v48 }
 0x8ef   : > { %v6617_v18 = vpop.f32.mrb[65].mxu0  ;;  %v3254_v55 = vmul.f32 0.080537446, %v6648_v7  ;;  %v3129_v54 = vadd.f32 1.0, %v6630_v8 }
 0x8f0   : > { %v6624_v17 = vpop.f32.mrb[66].mxu0  ;;  %v3347_v53 = vmul.f32 %v3990_v27, %v6543_v25  ;;  %v3991_v49 = vadd.f32 -0.3333295, %v3316_v23  ;;  %v3285_v25 = vmul.f32 %v3976_v32, %v6622_v9  ;;  %v3175_v37 = vsel %vm3047_vm10, %v3148_v58, %v6533_v26 }
 0x8f1   : > { %v6643_v59 = vpop.f32.mrb[67].mxu0  ;;  %v6670_v5 = vsel %vm3031_vm8, %v3084_v30, %v3175_v37  ;;  %v3977_v52 = vadd.f32 -0.13877685, %v3254_v55  ;;  %v6685_v27 = vmul.f32 0.2, %v2951_v56  ;;  %4669 = vrcp.f32 %v3129_v54 }
 0x8f2   : > { %v3363_v62 = vmul.f32 %v3347_v53, %v6538_v61  ;;  %v3348_v57 = vmul.f32 %v3991_v49, %v6570_v43  ;;  %v3301_v33 = vadd.f32 0.19977711, %v3285_v25  ;;  %v6678_v43 = vmul.f32 %v6670_v5, %v6670_v5 }
 0x8f3   : > { %v3286_v6 = vmul.f32 %v3977_v52, %v6648_v7  ;;  %v6698_v25 = vand.u32 2147483647, %v6685_v27 }
 0x8f4   : > { %v3379_v21 = vadd.f32 %v3363_v62, %v6538_v61  ;;  %v3364_v42 = vmul.f32 %v3348_v57, %v6563_v0  ;;  %v4664_v61 = vpop.eup %4663  ;;  %v3317_v48 = vmul.f32 %v3301_v33, %v6622_v9  ;;  %v3255_v23 = vmul.f32 0.080537446, %v6678_v43 }
 0x8f5   : > { %v4666_v30 = vpop.eup %4665  ;;  %v3086_v32 = vmul.f32 -1.0, %v4664_v61  ;;  %v3302_v34 = vadd.f32 0.19977711, %v3286_v6  ;;  %v2957_v6 = vadd.f32 %v6609_v51, %v6481_v40  ;;  %v3066_v16 = vmax.f32 %v6698_v25, 1e-30 }
 0x8f6   : > { %v6661_v36 = vpop.f32.mrb[68].mxu0  ;;  %v3395_v13 = vadd.f32 %v3379_v21, %v6529_v63  ;;  %v3380_v53 = vadd.f32 %v3364_v42, %v6563_v0  ;;  %v3992_v49 = vadd.f32 -0.3333295, %v3317_v48  ;;  %v3150_v56 = vmul.f32 %v4666_v30, %v3963_v31 }
 0x8f7   : > { %v6672_v14 = vpop.f32.mrb[69].mxu0  ;;  %v3978_v63 = vadd.f32 -0.13877685, %v3255_v23  ;;  %v3318_v37 = vmul.f32 %v3302_v34, %v6648_v7  ;;  %v4668_v54 = vpop.eup %4667 }
 0x8f8   : > { %v6680_v10 = vpop.f32.mrb[70].mxu0  ;;  %v3427_v58 = vsub.f32 0.0, %v3395_v13  ;;  %v3396_v62 = vadd.f32 %v3380_v53, %v6579_v11  ;;  %v3349_v0 = vmul.f32 %v3992_v49, %v6622_v9  ;;  %v3176_v57 = vsel %vm3048_vm13, %v3150_v56, %v6589_v22 }
 0x8f9   : > { %v6687_v29 = vpop.f32.mrb[71].mxu0  ;;  %v3287_v11 = vmul.f32 %v3978_v63, %v6678_v43  ;;  %v6711_v52 = vsel %vm3032_vm12, %v3086_v32, %v3176_v57  ;;  %v3993_v42 = vadd.f32 -0.3333295, %v3318_v37  ;;  %v3207_v9 = vsel %vm3047_vm10, 0.7853982, %v5178_v20 }
 0x8fa   : > { %v3443_v55 = vsel %vm3411_vm9, %v3427_v58, %v3395_v13  ;;  %v3428_v33 = vsub.f32 0.0, %v3396_v62  ;;  %v3365_v2 = vmul.f32 %v3349_v0, %v6614_v46  ;;  %v3240_v31 = vmul.f32 %v6711_v52, %v6711_v52 }
 0x8fb   : > { %v3459_v21 = vmul.f32 3.18, %v3443_v55  ;;  %v3303_v48 = vadd.f32 0.19977711, %v3287_v11  ;;  %v3350_v53 = vmul.f32 %v3993_v42, %v6648_v7  ;;  %v3964_v49 = vadd.f32 -1.0, %v6630_v8  ;;  %v4670_v63 = vpop.eup %4669 }
 0x8fc   : > { %v3444_v13 = vsel %vm3412_vm11, %v3428_v33, %v3396_v62  ;;  %v3381_v30 = vadd.f32 %v3365_v2, %v6614_v46  ;;  %v3256_v32 = vmul.f32 0.080537446, %v3240_v31  ;;  %v3088_v55 = vmul.f32 -1.0, %v4668_v54 }
 0x8fd   : > { %v3475_v61 = vmul.f32 1.442695, %v3459_v21  ;;  %v3460_v23 = vmul.f32 3.18, %v3444_v13  ;;  %v3319_v58 = vmul.f32 %v3303_v48, %v6678_v43  ;;  %v3366_v51 = vmul.f32 %v3350_v53, %v6640_v45 }
 0x8fe   : > { %v3397_v56 = vadd.f32 %v3381_v30, %v6594_v12  ;;  %v3979_v62 = vadd.f32 -0.13877685, %v3256_v32  ;;  %v3130_v7 = vadd.f32 1.0, %v6698_v25  ;;  %v3152_v33 = vmul.f32 %v4670_v63, %v3964_v49 }
 0x8ff   : > { %4671 = vpow2.f32 %v3475_v61  ;;  %v3477_v34 = vmul.f32 1.442695, %v3460_v23  ;;  %v3994_v46 = vadd.f32 -0.3333295, %v3319_v58  ;;  %v3382_v37 = vadd.f32 %v3366_v51, %v6640_v45 }
 0x900   : > { %4673 = vrcp.f32 %v3066_v16  ;;  %v3429_v0 = vsub.f32 0.0, %v3397_v56  ;;  %v3288_v57 = vmul.f32 %v3979_v62, %v3240_v31  ;;  %v3177_v45 = vsel %vm3049_vm1, %v3152_v33, %v6630_v8  ;;  %v4740_v33 = vld [vmem:[%s5656_s15 + $0x8] sm:$0xff] }
 0x901   : > { %4675 = vpow2.f32 %v3477_v34  ;;  %v3351_v21 = vmul.f32 %v3994_v46, %v6678_v43  ;;  %v3398_v11 = vadd.f32 %v3382_v37, %v6666_v35  ;;  %v6743_v43 = vmul.f32 0.2, %v2957_v6 }
 0x902   : > { %4677 = vrcp.f32 %v3130_v7  ;;  %v3445_v12 = vsel %vm3413_vm14, %v3429_v0, %v3397_v56  ;;  %v3304_v2 = vadd.f32 0.19977711, %v3288_v57  ;;  %v6748_v35 = vsel %vm3033_vm0, %v3088_v55, %v3177_v45  ;;  %v4739_v56 = vld [vmem:[%s5656_s15] sm:$0xff] }
 0x903   : > { %v3461_v42 = vmul.f32 3.18, %v3445_v12  ;;  %v3367_v54 = vmul.f32 %v3351_v21, %v6670_v5  ;;  %v3430_v61 = vsub.f32 0.0, %v3398_v11  ;;  %v3208_v23 = vsel %vm3048_vm13, 0.7853982, %v5178_v20 }
 0x904   : > { %v3320_v60 = vmul.f32 %v3304_v2, %v3240_v31  ;;  %v6756_v6 = vmul.f32 %v6748_v35, %v6748_v35  ;;  %v3223_v53 = vsel %vm3031_vm8, 1.5707964, %v3207_v9  ;;  %v6763_v58 = vand.u32 2147483647, %v6743_v43 }
 0x905   : > { %v3479_v13 = vmul.f32 1.442695, %v3461_v42  ;;  %v3383_v48 = vadd.f32 %v3367_v54, %v6670_v5  ;;  %v3446_v30 = vsel %vm3414_vm15, %v3430_v61, %v3398_v11  ;;  %v6770_v28 = vsel %vm3032_vm12, 1.5707964, %v3208_v23 }
 0x906   : > { %v3995_v32 = vadd.f32 -0.3333295, %v3320_v60  ;;  %v3462_v49 = vmul.f32 3.18, %v3446_v30  ;;  %v3257_v34 = vmul.f32 0.080537446, %v6756_v6  ;;  %v6783_v22 = vadd.f32 %v6624_v17, %v6481_v40 }
 0x907   : > { %4679 = vpow2.f32 %v3479_v13  ;;  %v3399_v16 = vadd.f32 %v3383_v48, %v3223_v53  ;;  %v3965_v9 = vadd.f32 -1.0, %v6698_v25  ;;  %v3067_v57 = vmax.f32 %v6763_v58, 1e-30 }
 0x908   : > { %v3352_v26 = vmul.f32 %v3995_v32, %v3240_v31  ;;  %v3481_v63 = vmul.f32 1.442695, %v3462_v49  ;;  %v3980_v55 = vadd.f32 -0.13877685, %v3257_v34 }
 0x909   : > { %v4672_v5 = vpop.eup %4671  ;;  %v3431_v46 = vsub.f32 0.0, %v3399_v16 }
 0x90a   : > { %v3507_v51 = vmul.f32 %v4739_v56, %v4672_v5  ;;  %v4674_v62 = vpop.eup %4673  ;;  %v3368_v0 = vmul.f32 %v3352_v26, %v6711_v52  ;;  %4681 = vpow2.f32 %v3481_v63  ;;  %v3289_v11 = vmul.f32 %v3980_v55, %v6756_v6 }
 0x90b   : > { %v4676_v31 = vpop.eup %4675  ;;  %v3090_v37 = vmul.f32 -1.0, %v4674_v62  ;;  %v3447_v17 = vsel %vm3415_vm2, %v3431_v46, %v3399_v16 }
 0x90c   : > { %v3523_v7 = vadd.f32 %v3507_v51, %v6585_v15  ;;  %v4678_v21 = vpop.eup %4677  ;;  %v3508_v12 = vmul.f32 %v4740_v33, %v4676_v31 }
 0x90d   : > { %5052 = shalt.err (!%p5049_p1)
}
 0x90e   : > { %s5053_s17 = scalar_lea.hbm %s6778_s23, 2048  ;;  %s5057_s19 = scalar_lea.hbm %s7325_s10, 4096 }
 0x90f   : > { %p5054_p13 = scmp.ne.s32.totalorder %s6778_s23, %s5053_s17  ;;  %p5058_p2 = scmp.lt.u32.totalorder %s6778_s23, %s7325_s10 }
 0x910   : > { %p5059_p4 = scmp.lt.u32.totalorder %s5057_s19, %s5053_s17  ;;  %p5061_p5 = scmp.lt.u32.totalorder %s5053_s17, %s6778_s23 }
 0x911   : > { %p5055_p0 = pnand %p5054_p13, %p7326_p7 }
 0x912   : > { %p5060_p10 = por %p5059_p4, %p5058_p2 }
 0x913   : > { %p5056_p6 = pneg %p5055_p0 }
 0x914   : > { %p5062_p9 = por %p5061_p5, %p5060_p10 }
 0x916   : > { %p5063_p8 = pnand %p5062_p9, %p5056_p6 }
 0x918   : > { %5066 = shalt.err (!%p5063_p8)
}
 0x919   : > { %s5180_s27 = smov 128   ;;  %s5181_s3 = smov 8   ;;  %v3463_v47 = vmul.f32 3.18, %v3447_v17  ;;  %v3384_v15 = vadd.f32 %v3368_v0, %v6711_v52  ;;  %v3154_v2 = vmul.f32 %v4678_v21, %v3965_v9  ;;  %4683 = vrcp.f32 %v3067_v57  ;;  %v6826_v42 = vpop.f32.mrb[72].mxu0  ;;  %v4680_v16 = vpop.eup %4679 }
 0x91a   : > { %4342 = dma.vmem_to_hbm [thread:$0]  (%p7326_p7), %s6785_s4, 2048, %s6778_s23, %s3556_s29, %s5180_s27, %s5180_s27, %s5181_s3   ;;  %v3524_v54 = vadd.f32 %v3508_v12, %v6599_v4  ;;  %v3305_v45 = vadd.f32 0.19977711, %v3289_v11  ;;  %vm3050_vm3 = vcmp.gt.f32.partialorder %v6698_v25, 0.41421357  ;;  %v3131_v61 = vadd.f32 1.0, %v6763_v58  ;;  %v4682_v0 = vpop.eup %4681 }
 0x91b   : > { %s6822_s6 = scalar_lea.vmem [#allocation20], %s5644_s25  ;;  %v6831_v60 = vpop.f32.mrb[73].mxu0  ;;  %v3483_v13 = vmul.f32 1.442695, %v3463_v47  ;;  %v3400_v48 = vadd.f32 %v3384_v15, %v6770_v28  ;;  %v3178_v52 = vsel %vm3050_vm3, %v3154_v2, %v6698_v25  ;;  %vm3416_vm5 = vcmp.lt.f32.partialorder %v6575_v50, 0.0  ;;  %v4741_v28 = vld [vmem:[%s5656_s15 + $0x10] sm:$0xff] }
 0x91c   : > { %3539 = vst [vmem:[%s6822_s6] sm:$0xff] %v3523_v7  ;;  %vm3034_vm4 = vcmp.gt.f32.partialorder %v6698_v25, 2.4142137  ;;  %v6838_v23 = vpop.f32.mrb[74].mxu0  ;;  %3540 = vst [vmem:[%s6822_s6 + $0x8] sm:$0xff] %v3524_v54  ;;  %v3321_v4 = vmul.f32 %v3305_v45, %v6756_v6  ;;  %4685 = vrcp.f32 %v3131_v61  ;;  %v6847_v53 = vmul.f32 0.2, %v6783_v22 }
 0x91d   : > { %v6844_v30 = vsel %vm3034_vm4, %v3090_v37, %v3178_v52  ;;  %v6849_v32 = vpop.f32.mrb[75].mxu0  ;;  %4687 = vpow2.f32 %v3483_v13  ;;  %v3432_v5 = vsub.f32 0.0, %v3400_v48  ;;  %v2929_v51 = vadd.f32 %v6500_v38, %v6548_v44  ;;  %s3590_s25 = sshll.u32 %s6822_s6, 4  ;;  %s7327_s29 = sld [smem:[#allocation48_spill]]  ;;  %s7180_s25 = int_to_ptr.vmem [resolvable:$true] %s3590_s25 }
 0x91e   : > { %v6853_v49 = vmul.f32 %v6844_v30, %v6844_v30  ;;  %v3996_v34 = vadd.f32 -0.3333295, %v3321_v4  ;;  %v6857_v56 = vand.u32 2147483647, %v6847_v53  ;;  %v3509_v26 = vmul.f32 %v4741_v28, %v4680_v16  ;;  %v6870_v7 = vpop.f32.mrb[76].mxu0  ;;  %v4743_v28 = vld [vmem:[%s5656_s15 + $0x20] sm:$0xff] }
 0x91f   : > { %v3448_v9 = vsel %vm3416_vm5, %v3432_v5, %v3400_v48  ;;  %v3209_v46 = vsel %vm3049_vm1, 0.7853982, %v5178_v20  ;;  %v2967_v55 = vadd.f32 %v6661_v36, %v6481_v40  ;;  %v2933_v37 = vadd.f32 %v6505_v3, %v6548_v44  ;;  %v6876_v12 = vpop.f32.mrb[77].mxu0  ;;  %v4742_v36 = vld [vmem:[%s5656_s15 + $0x18] sm:$0xff]  ;;  %s3561_s17 = scalar_lea.sflag [#allocation21], %s5641_s7  ;;  %s5067_s18 = scalar_lea.vmem %s7180_s25, 2048 }
 0x920   : > { %v3258_v62 = vmul.f32 0.080537446, %v6853_v49  ;;  %v3464_v63 = vmul.f32 3.18, %v3448_v9  ;;  %v3353_v50 = vmul.f32 %v3996_v34, %v6756_v6  ;;  %v3525_v22 = vadd.f32 %v3509_v26, %v2929_v51  ;;  %v6883_v15 = vpop.f32.mrb[78].mxu0  ;;  %p5068_p11 = scmp.ne.s32.totalorder %s7180_s25, %s5067_s18 }
 0x921   : > { %v3068_v38 = vmax.f32 %v6857_v56, 1e-30  ;;  %v3132_v33 = vadd.f32 1.0, %v6857_v56  ;;  %v3510_v17 = vmul.f32 %v4742_v36, %v4682_v0  ;;  %v3225_v11 = vsel %vm3033_vm0, 1.5707964, %v3209_v46  ;;  %v6889_v45 = vpop.f32.mrb[79].mxu0 }
 0x922   : > { %v3981_v31 = vadd.f32 -0.13877685, %v3258_v62  ;;  %v3485_v57 = vmul.f32 1.442695, %v3464_v63  ;;  %v3369_v21 = vmul.f32 %v3353_v50, %v6748_v35  ;;  %3541 = vst [vmem:[%s6822_s6 + $0x10] sm:$0xff] %v3525_v22  ;;  %v3966_v2 = vadd.f32 -1.0, %v6763_v58  ;;  %p5069_p3 = pnand %p5068_p11, %p7326_p7 }
 0x923   : > { %v4684_v6 = vpop.eup %4683  ;;  %4689 = vrcp.f32 %v3068_v38  ;;  %v6887_v54 = vmul.f32 0.2, %v2967_v55  ;;  %v3526_v61 = vadd.f32 %v3510_v17, %v2933_v37  ;;  %v2971_v8 = vadd.f32 %v6680_v10, %v6481_v40  ;;  %s7178_s14 = scalar_lea.hbm %s7327_s29, %s4016_s9 }
 0x924   : > { %v3290_v47 = vmul.f32 %v3981_v31, %v6853_v49  ;;  %4691 = vpow2.f32 %v3485_v57  ;;  %v3385_v3 = vadd.f32 %v3369_v21, %v6748_v35  ;;  %v3092_v4 = vmul.f32 -1.0, %v4684_v6  ;;  %p5070_p12 = pneg %p5069_p3 }
 0x925   : > { %4693 = vrcp.f32 %v3132_v33  ;;  %v6894_v5 = vand.u32 2147483647, %v6887_v54  ;;  %3542 = vst [vmem:[%s6822_s6 + $0x18] sm:$0xff] %v3526_v61  ;;  %v2939_v16 = vadd.f32 %v6522_v1, %v6548_v44  ;;  %vm3417_vm6 = vcmp.lt.f32.partialorder %v6602_v39, 0.0 }
 0x926   : > { %v3306_v13 = vadd.f32 0.19977711, %v3290_v47  ;;  %v4686_v48 = vpop.eup %4685  ;;  %v3401_v52 = vadd.f32 %v3385_v3, %v3225_v11  ;;  %vm3051_vm7 = vcmp.gt.f32.partialorder %v6763_v58, 0.41421357  ;;  %v6903_v9 = vmul.f32 0.2, %v2971_v8 }
 0x927   : > { %v4688_v35 = vpop.eup %4687  ;;  %v3156_v51 = vmul.f32 %v4686_v48, %v3966_v2  ;;  %vm3035_vm8 = vcmp.gt.f32.partialorder %v6763_v58, 2.4142137  ;;  %v3069_v39 = vmax.f32 %v6894_v5, 1e-30  ;;  %v3133_v55 = vadd.f32 1.0, %v6894_v5  ;;  %v4744_v2 = vld [vmem:[%s5656_s15 + $0x28] sm:$0xff] }
 0x928   : > { %v3322_v34 = vmul.f32 %v3306_v13, %v6853_v49  ;;  %v3511_v26 = vmul.f32 %v4743_v28, %v4688_v35  ;;  %v3433_v10 = vsub.f32 0.0, %v3401_v52  ;;  %v2943_v0 = vadd.f32 %v6526_v19, %v6548_v44 }
 0x929   : > { %v3179_v1 = vsel %vm3051_vm7, %v3156_v51, %v6763_v58  ;;  %4695 = vrcp.f32 %v3069_v39  ;;  %v6922_v37 = vand.u32 2147483647, %v6903_v9  ;;  %v3210_v33 = vsel %vm3050_vm3, 0.7853982, %v5178_v20 }
 0x92a   : > { %v3997_v62 = vadd.f32 -0.3333295, %v3322_v34  ;;  %v3527_v63 = vadd.f32 %v3511_v26, %v2939_v16  ;;  %v3449_v46 = vsel %vm3417_vm6, %v3433_v10, %v3401_v52  ;;  %v6912_v50 = vsel %vm3035_vm8, %v3092_v4, %v3179_v1 }
 0x92b   : > { %v3465_v22 = vmul.f32 3.18, %v3449_v46  ;;  %v3243_v38 = vmul.f32 %v6912_v50, %v6912_v50  ;;  %4697 = vrcp.f32 %v3133_v55  ;;  %v6930_v17 = vadd.f32 %v6552_v41, %v6548_v44 }
 0x92c   : > { %v3354_v31 = vmul.f32 %v3997_v62, %v6853_v49  ;;  %3543 = vst [vmem:[%s6822_s6 + $0x20] sm:$0xff] %v3527_v63  ;;  %v3967_v19 = vadd.f32 -1.0, %v6857_v56  ;;  %v2977_v47 = vadd.f32 %v6826_v42, %v6481_v40  ;;  %v3226_v48 = vsel %vm3034_vm4, 1.5707964, %v3210_v33 }
 0x92d   : > { %v4690_v57 = vpop.eup %4689  ;;  %v3487_v21 = vmul.f32 1.442695, %v3465_v22  ;;  %v3259_v6 = vmul.f32 0.080537446, %v3243_v38  ;;  %v3070_v41 = vmax.f32 %v6922_v37, 1e-30  ;;  %v6956_v26 = vadd.f32 %v6566_v24, %v6548_v44 }
 0x92e   : > { %v3370_v49 = vmul.f32 %v3354_v31, %v6844_v30  ;;  %v4692_v36 = vpop.eup %4691  ;;  %v3094_v11 = vmul.f32 -1.0, %v4690_v57  ;;  %v3134_v4 = vadd.f32 1.0, %v6922_v37  ;;  %vm3052_vm9 = vcmp.gt.f32.partialorder %v6857_v56, 0.41421357 }
 0x92f   : > { %v4694_v3 = vpop.eup %4693  ;;  %v3512_v61 = vmul.f32 %v4744_v2, %v4692_v36  ;;  %4699 = vpow2.f32 %v3487_v21  ;;  %v3982_v8 = vadd.f32 -0.13877685, %v3259_v6  ;;  %vm3036_vm10 = vcmp.gt.f32.partialorder %v6857_v56, 2.4142137  ;;  %v4745_v2 = vld [vmem:[%s5656_s15 + $0x30] sm:$0xff] }
 0x930   : > { %v3386_v13 = vadd.f32 %v3370_v49, %v6844_v30  ;;  %v3158_v52 = vmul.f32 %v4694_v3, %v3967_v19  ;;  %4701 = vrcp.f32 %v3070_v41  ;;  %v6946_v30 = vmul.f32 0.2, %v2977_v47 }
 0x931   : > { %v3528_v35 = vadd.f32 %v3512_v61, %v2943_v0  ;;  %v3291_v34 = vmul.f32 %v3982_v8, %v3243_v38  ;;  %4703 = vrcp.f32 %v3134_v4  ;;  %vm3418_vm11 = vcmp.lt.f32.partialorder %v6685_v27, 0.0 }
 0x932   : > { %v3402_v16 = vadd.f32 %v3386_v13, %v3226_v48  ;;  %v3180_v42 = vsel %vm3052_vm9, %v3158_v52, %v6857_v56  ;;  %v6961_v62 = vand.u32 2147483647, %v6946_v30  ;;  %v3211_v63 = vsel %vm3051_vm7, 0.7853982, %v5178_v20 }
 0x933   : > { %3544 = vst [vmem:[%s6822_s6 + $0x28] sm:$0xff] %v3528_v35  ;;  %v3307_v51 = vadd.f32 0.19977711, %v3291_v34  ;;  %v6951_v28 = vsel %vm3036_vm10, %v3094_v11, %v3180_v42  ;;  %v4696_v1 = vpop.eup %4695  ;;  %v3968_v55 = vadd.f32 -1.0, %v6894_v5  ;;  %v6969_v24 = vadd.f32 %v6617_v18, %v6548_v44 }
 0x934   : > { %v3434_v25 = vsub.f32 0.0, %v3402_v16  ;;  %v3244_v10 = vmul.f32 %v6951_v28, %v6951_v28  ;;  %v3096_v0 = vmul.f32 -1.0, %v4696_v1  ;;  %vm3037_vm12 = vcmp.gt.f32.partialorder %v6894_v5, 2.4142137 }
 0x935   : > { %v3323_v46 = vmul.f32 %v3307_v51, %v3243_v38  ;;  %v4698_v27 = vpop.eup %4697  ;;  %vm3053_vm13 = vcmp.gt.f32.partialorder %v6894_v5, 0.41421357  ;;  %v3071_v6 = vmax.f32 %v6961_v62, 1e-30  ;;  %v2981_v36 = vadd.f32 %v6838_v23, %v6481_v40 }
 0x936   : > { %v3450_v39 = vsel %vm3418_vm11, %v3434_v25, %v3402_v16  ;;  %v3260_v31 = vmul.f32 0.080537446, %v3244_v10  ;;  %v3160_v21 = vmul.f32 %v4698_v27, %v3968_v55  ;;  %v3969_v47 = vadd.f32 -1.0, %v6922_v37 }
 0x937   : > { %v3466_v22 = vmul.f32 3.18, %v3450_v39  ;;  %v3998_v57 = vadd.f32 -0.3333295, %v3323_v46  ;;  %v3135_v3 = vadd.f32 1.0, %v6961_v62  ;;  %v2987_v48 = vadd.f32 %v6870_v7, %v6481_v40 }
 0x938   : > { %v3983_v49 = vadd.f32 -0.13877685, %v3260_v31  ;;  %v3181_v18 = vsel %vm3053_vm13, %v3160_v21, %v6894_v5  ;;  %v6994_v35 = vmul.f32 0.2, %v2981_v36  ;;  %v3227_v34 = vsel %vm3035_vm8, 1.5707964, %v3211_v63 }
 0x939   : > { %v3489_v33 = vmul.f32 1.442695, %v3466_v22  ;;  %v4700_v11 = vpop.eup %4699  ;;  %v3355_v19 = vmul.f32 %v3998_v57, %v3243_v38  ;;  %v6984_v8 = vsel %vm3037_vm12, %v3096_v0, %v3181_v18  ;;  %v3212_v7 = vsel %vm3052_vm9, 0.7853982, %v5178_v20 }
 0x93a   : > { %v3513_v61 = vmul.f32 %v4745_v2, %v4700_v11  ;;  %v3292_v13 = vmul.f32 %v3983_v49, %v3244_v10  ;;  %v6989_v38 = vmul.f32 %v6984_v8, %v6984_v8  ;;  %v4702_v52 = vpop.eup %4701  ;;  %v7005_v39 = vand.u32 2147483647, %v6994_v35 }
 0x93b   : > { %4705 = vpow2.f32 %v3489_v33  ;;  %v3371_v23 = vmul.f32 %v3355_v19, %v6912_v50  ;;  %v4704_v16 = vpop.eup %4703  ;;  %v3098_v51 = vmul.f32 -1.0, %v4702_v52  ;;  %vm3054_vm14 = vcmp.gt.f32.partialorder %v6922_v37, 0.41421357 }
 0x93c   : > { %4707 = vrcp.f32 %v3071_v6  ;;  %v3529_v41 = vadd.f32 %v3513_v61, %v6930_v17  ;;  %v3308_v4 = vadd.f32 0.19977711, %v3292_v13  ;;  %v3261_v25 = vmul.f32 0.080537446, %v6989_v38 }
 0x93d   : > { %4709 = vrcp.f32 %v3135_v3  ;;  %v3387_v42 = vadd.f32 %v3371_v23, %v6912_v50  ;;  %v3162_v17 = vmul.f32 %v4704_v16, %v3969_v47  ;;  %v7008_v58 = vmul.f32 0.2, %v2987_v48  ;;  %v4746_v47 = vld [vmem:[%s5656_s15 + $0x38] sm:$0xff] }
 0x93e   : > { %3545 = vst [vmem:[%s6822_s6 + $0x30] sm:$0xff] %v3529_v41  ;;  %v3324_v1 = vmul.f32 %v3308_v4, %v3244_v10  ;;  %v3984_v55 = vadd.f32 -0.13877685, %v3261_v25  ;;  %vm3419_vm15 = vcmp.lt.f32.partialorder %v6743_v43, 0.0  ;;  %vm3038_vm0 = vcmp.gt.f32.partialorder %v6922_v37, 2.4142137 }
 0x93f   : > { %v3403_v46 = vadd.f32 %v3387_v42, %v3227_v34  ;;  %v3182_v63 = vsel %vm3054_vm14, %v3162_v17, %v6922_v37  ;;  %v3072_v0 = vmax.f32 %v7005_v39, 1e-30  ;;  %v3228_v43 = vsel %vm3036_vm10, 1.5707964, %v3212_v7 }
 0x940   : > { %v3999_v50 = vadd.f32 -0.3333295, %v3324_v1  ;;  %v3293_v22 = vmul.f32 %v3984_v55, %v6989_v38  ;;  %v7018_v31 = vsel %vm3038_vm0, %v3098_v51, %v3182_v63  ;;  %v3136_v33 = vadd.f32 1.0, %v7005_v39 }
 0x941   : > { %v3435_v27 = vsub.f32 0.0, %v3403_v46  ;;  %v3246_v21 = vmul.f32 %v7018_v31, %v7018_v31  ;;  %vm3420_vm1 = vcmp.lt.f32.partialorder %v6847_v53, 0.0  ;;  %4711 = vrcp.f32 %v3072_v0 }
 0x942   : > { %v3356_v57 = vmul.f32 %v3999_v50, %v3244_v10  ;;  %v3309_v6 = vadd.f32 0.19977711, %v3293_v22  ;;  %v7028_v36 = vand.u32 2147483647, %v7008_v58  ;;  %4713 = vrcp.f32 %v3136_v33 }
 0x943   : > { %v3451_v49 = vsel %vm3419_vm15, %v3435_v27, %v3403_v46  ;;  %v3262_v18 = vmul.f32 0.080537446, %v3246_v21  ;;  %v3213_v2 = vsel %vm3053_vm13, 0.7853982, %v5178_v20  ;;  %v3970_v13 = vadd.f32 -1.0, %v6961_v62 }
 0x944   : > { %v3467_v19 = vmul.f32 3.18, %v3451_v49  ;;  %v3372_v56 = vmul.f32 %v3356_v57, %v6951_v28  ;;  %v3325_v61 = vmul.f32 %v3309_v6, %v6989_v38  ;;  %vm3055_vm2 = vcmp.gt.f32.partialorder %v6961_v62, 0.41421357 }
 0x945   : > { %v4706_v11 = vpop.eup %4705  ;;  %v3985_v41 = vadd.f32 -0.13877685, %v3262_v18  ;;  %v3073_v7 = vmax.f32 %v7028_v36, 1e-30  ;;  %vm3039_vm3 = vcmp.gt.f32.partialorder %v6961_v62, 2.4142137 }
 0x946   : > { %v4708_v10 = vpop.eup %4707  ;;  %v3514_v3 = vmul.f32 %v4746_v47, %v4706_v11  ;;  %v3491_v48 = vmul.f32 1.442695, %v3467_v19  ;;  %v3388_v52 = vadd.f32 %v3372_v56, %v6951_v28  ;;  %v4000_v34 = vadd.f32 -0.3333295, %v3325_v61 }
 0x947   : > { %v4710_v23 = vpop.eup %4709  ;;  %v3100_v4 = vmul.f32 -1.0, %v4708_v10  ;;  %v3294_v51 = vmul.f32 %v3985_v41, %v3246_v21  ;;  %v3229_v50 = vsel %vm3037_vm12, 1.5707964, %v3213_v2  ;;  %v3214_v22 = vsel %vm3054_vm14, 0.7853982, %v5178_v20 }
 0x948   : > { %v3530_v16 = vadd.f32 %v3514_v3, %v6956_v26  ;;  %v3164_v42 = vmul.f32 %v4710_v23, %v3970_v13  ;;  %4715 = vpow2.f32 %v3491_v48  ;;  %v3404_v25 = vadd.f32 %v3388_v52, %v3228_v43  ;;  %v4747_v52 = vld [vmem:[%s5656_s15 + $0x40] sm:$0xff] }
 0x949   : > { %v3357_v1 = vmul.f32 %v4000_v34, %v6989_v38  ;;  %v3137_v26 = vadd.f32 1.0, %v7028_v36  ;;  %v3310_v46 = vadd.f32 0.19977711, %v3294_v51  ;;  %4717 = vrcp.f32 %v3073_v7 }
 0x94a   : > { %3546 = vst [vmem:[%s6822_s6 + $0x38] sm:$0xff] %v3530_v16  ;;  %v3183_v28 = vsel %vm3055_vm2, %v3164_v42, %v6961_v62  ;;  %v3436_v17 = vsub.f32 0.0, %v3404_v25  ;;  %v2991_v43 = vadd.f32 %v6883_v15, %v6481_v40  ;;  %v3971_v6 = vadd.f32 -1.0, %v7005_v39 }
 0x94b   : > { %v7050_v55 = vsel %vm3039_vm3, %v3100_v4, %v3183_v28  ;;  %v3373_v38 = vmul.f32 %v3357_v1, %v6984_v8  ;;  %4719 = vrcp.f32 %v3137_v26  ;;  %v3326_v0 = vmul.f32 %v3310_v46, %v3246_v21  ;;  %v4712_v57 = vpop.eup %4711 }
 0x94c   : > { %v3247_v63 = vmul.f32 %v7050_v55, %v7050_v55  ;;  %v3452_v27 = vsel %vm3420_vm1, %v3436_v17, %v3404_v25  ;;  %v4714_v11 = vpop.eup %4713  ;;  %vm3421_vm4 = vcmp.lt.f32.partialorder %v6887_v54, 0.0  ;;  %v3102_v19 = vmul.f32 -1.0, %v4712_v57 }
 0x94d   : > { %v3468_v5 = vmul.f32 3.18, %v3452_v27  ;;  %v3389_v33 = vadd.f32 %v3373_v38, %v6984_v8  ;;  %v4001_v53 = vadd.f32 -0.3333295, %v3326_v0  ;;  %v7067_v56 = vmul.f32 0.2, %v2991_v43 }
 0x94e   : > { %v3263_v49 = vmul.f32 0.080537446, %v3247_v63  ;;  %v3166_v3 = vmul.f32 %v4714_v11, %v3971_v6  ;;  %vm3040_vm5 = vcmp.gt.f32.partialorder %v7005_v39, 2.4142137  ;;  %vm3056_vm6 = vcmp.gt.f32.partialorder %v7005_v39, 0.41421357 }
 0x94f   : > { %v3493_v18 = vmul.f32 1.442695, %v3468_v5  ;;  %v3405_v10 = vadd.f32 %v3389_v33, %v3229_v50  ;;  %v3358_v40 = vmul.f32 %v4001_v53, %v3246_v21  ;;  %v7072_v15 = vand.u32 2147483647, %v7067_v56 }
 0x950   : > { %v3986_v47 = vadd.f32 -0.13877685, %v3263_v49  ;;  %v3184_v61 = vsel %vm3056_vm6, %v3166_v3, %v7005_v39  ;;  %v3230_v23 = vsel %vm3038_vm0, 1.5707964, %v3214_v22  ;;  %vm3057_vm7 = vcmp.gt.f32.partialorder %v7028_v36, 0.41421357 }
 0x951   : > { %4721 = vpow2.f32 %v3493_v18  ;;  %v3437_v8 = vsub.f32 0.0, %v3405_v10  ;;  %v3374_v21 = vmul.f32 %v3358_v40, %v7018_v31  ;;  %v7082_v48 = vsel %vm3040_vm5, %v3102_v19, %v3184_v61  ;;  %v4748_v18 = vld [vmem:[%s5656_s15 + $0x48] sm:$0xff] }
 0x952   : > { %v3295_v2 = vmul.f32 %v3986_v47, %v3247_v63  ;;  %v4716_v13 = vpop.eup %4715  ;;  %v3248_v34 = vmul.f32 %v7082_v48, %v7082_v48  ;;  %v3972_v51 = vadd.f32 -1.0, %v7028_v36  ;;  %v3074_v7 = vmax.f32 %v7072_v15, 1e-30 }
 0x953   : > { %v3515_v41 = vmul.f32 %v4747_v52, %v4716_v13  ;;  %v3453_v4 = vsel %vm3421_vm4, %v3437_v8, %v3405_v10  ;;  %v4718_v37 = vpop.eup %4717  ;;  %v3390_v25 = vadd.f32 %v3374_v21, %v7018_v31  ;;  %vm3422_vm8 = vcmp.lt.f32.partialorder %v6903_v9, 0.0 }
 0x954   : > { %v3311_v16 = vadd.f32 0.19977711, %v3295_v2  ;;  %v3469_v42 = vmul.f32 3.18, %v3453_v4  ;;  %v3264_v17 = vmul.f32 0.080537446, %v3248_v34  ;;  %4723 = vrcp.f32 %v3074_v7 }
 0x955   : > { %v4720_v1 = vpop.eup %4719  ;;  %v3531_v28 = vadd.f32 %v3515_v41, %v6969_v24  ;;  %v3104_v54 = vmul.f32 -1.0, %v4718_v37  ;;  %v3406_v50 = vadd.f32 %v3390_v25, %v3230_v23  ;;  %v3138_v31 = vadd.f32 1.0, %v7072_v15 }
 0x956   : > { %v3327_v26 = vmul.f32 %v3311_v16, %v3247_v63  ;;  %v3495_v46 = vmul.f32 1.442695, %v3469_v42  ;;  %v3168_v38 = vmul.f32 %v4720_v1, %v3972_v51  ;;  %v3987_v22 = vadd.f32 -0.13877685, %v3264_v17  ;;  %v4749_v51 = vld [vmem:[%s5656_s15 + $0x50] sm:$0xff] }
 0x957   : > { %3547 = vst [vmem:[%s6822_s6 + $0x40] sm:$0xff] %v3531_v28  ;;  %v3438_v0 = vsub.f32 0.0, %v3406_v50  ;;  %vm3041_vm9 = vcmp.gt.f32.partialorder %v7028_v36, 2.4142137  ;;  %v3215_v11 = vsel %vm3055_vm2, 0.7853982, %v5178_v20  ;;  %v2963_v19 = vadd.f32 %v6643_v59, %v6548_v44 }
 0x958   : > { %v4002_v27 = vadd.f32 -0.3333295, %v3327_v26  ;;  %4725 = vpow2.f32 %v3495_v46  ;;  %v3185_v24 = vsel %vm3057_vm7, %v3168_v38, %v7028_v36  ;;  %v3296_v57 = vmul.f32 %v3987_v22, %v3248_v34 }
 0x959   : > { %v7103_v5 = vsel %vm3041_vm9, %v3104_v54, %v3185_v24  ;;  %4727 = vrcp.f32 %v3138_v31  ;;  %v3454_v9 = vsel %vm3422_vm8, %v3438_v0, %v3406_v50  ;;  %v3231_v61 = vsel %vm3039_vm3, 1.5707964, %v3215_v11 }
 0x95a   : > { %v3359_v43 = vmul.f32 %v4002_v27, %v3247_v63  ;;  %v3249_v33 = vmul.f32 %v7103_v5, %v7103_v5  ;;  %v3470_v6 = vmul.f32 3.18, %v3454_v9  ;;  %v3312_v63 = vadd.f32 0.19977711, %v3296_v57  ;;  %v4750_v57 = vld [vmem:[%s5656_s15 + $0x58] sm:$0xff] }
 0x95b   : > { %v4722_v49 = vpop.eup %4721  ;;  %v2969_v59 = vadd.f32 %v6672_v14, %v6548_v44  ;;  %vm3423_vm10 = vcmp.lt.f32.partialorder %v6946_v30, 0.0  ;;  %v3216_v62 = vsel %vm3056_vm6, 0.7853982, %v5178_v20  ;;  %v3973_v42 = vadd.f32 -1.0, %v7072_v15 }
 0x95c   : > { %v3375_v53 = vmul.f32 %v3359_v43, %v7050_v55  ;;  %v3516_v10 = vmul.f32 %v4748_v18, %v4722_v49  ;;  %v3265_v47 = vmul.f32 0.080537446, %v3249_v33  ;;  %v3497_v3 = vmul.f32 1.442695, %v3470_v6 }
 0x95d   : > { %v3328_v8 = vmul.f32 %v3312_v63, %v3248_v34  ;;  %v3232_v30 = vsel %vm3040_vm5, 1.5707964, %v3216_v62  ;;  %vm3058_vm11 = vcmp.gt.f32.partialorder %v7072_v15, 0.41421357  ;;  %vm3042_vm12 = vcmp.gt.f32.partialorder %v7072_v15, 2.4142137 }
 0x95e   : > { %v3391_v40 = vadd.f32 %v3375_v53, %v7050_v55  ;;  %v3532_v2 = vadd.f32 %v3516_v10, %v2963_v19  ;;  %v3988_v13 = vadd.f32 -0.13877685, %v3265_v47  ;;  %4729 = vpow2.f32 %v3497_v3  ;;  %v4724_v52 = vpop.eup %4723  ;;  %v4752_v62 = vld [vmem:[%s5656_s15 + $0x68] sm:$0xff] }
 0x95f   : > { %v4003_v21 = vadd.f32 -0.3333295, %v3328_v8  ;;  %v3106_v14 = vmul.f32 -1.0, %v4724_v52  ;;  %v2973_v24 = vadd.f32 %v6687_v29, %v6548_v44  ;;  %vm3424_vm13 = vcmp.lt.f32.partialorder %v6994_v35, 0.0 }
 0x960   : > { %v3407_v23 = vadd.f32 %v3391_v40, %v3231_v61  ;;  %3548 = vst [vmem:[%s6822_s6 + $0x48] sm:$0xff] %v3532_v2  ;;  %v3297_v41 = vmul.f32 %v3988_v13, %v3249_v33  ;;  %v3217_v49 = vsel %vm3057_vm7, 0.7853982, %v5178_v20  ;;  %vm3425_vm14 = vcmp.lt.f32.partialorder %v7008_v58, 0.0  ;;  %v4751_v13 = vld [vmem:[%s5656_s15 + $0x60] sm:$0xff] }
 0x961   : > { %v3360_v16 = vmul.f32 %v4003_v21, %v3248_v34  ;;  %v3233_v29 = vsel %vm3041_vm9, 1.5707964, %v3217_v49  ;;  %v3218_v58 = vsel %vm3058_vm11, 0.7853982, %v5178_v20  ;;  %vm3426_vm15 = vcmp.lt.f32.partialorder %v7067_v56, 0.0 }
 0x962   : > { %v3439_v4 = vsub.f32 0.0, %v3407_v23  ;;  %v4726_v37 = vpop.eup %4725  ;;  %v3313_v55 = vadd.f32 0.19977711, %v3297_v41  ;;  %v2993_v56 = vadd.f32 %v6889_v45, %v6548_v44 }
 0x963   : > { %v4728_v25 = vpop.eup %4727  ;;  %v3517_v7 = vmul.f32 %v4749_v51, %v4726_v37  ;;  %v3376_v28 = vmul.f32 %v3360_v16, %v7082_v48 }
 0x964   : > { %v3455_v1 = vsel %vm3423_vm10, %v3439_v4, %v3407_v23  ;;  %v3329_v34 = vmul.f32 %v3313_v55, %v3249_v33  ;;  %v3170_v17 = vmul.f32 %v4728_v25, %v3973_v42  ;;  %v3234_v42 = vsel %vm3042_vm12, 1.5707964, %v3218_v58 }
 0x965   : > { %v3471_v26 = vmul.f32 3.18, %v3455_v1  ;;  %v3533_v54 = vadd.f32 %v3517_v7, %v2969_v59  ;;  %v3392_v46 = vadd.f32 %v3376_v28, %v7082_v48 }
 0x966   : > { %v4004_v38 = vadd.f32 -0.3333295, %v3329_v34  ;;  %v3186_v27 = vsel %vm3058_vm11, %v3170_v17, %v7072_v15  ;;  %v4753_v15 = vld [vmem:[%s5656_s15 + $0x70] sm:$0xff] }
 0x967   : > { %v3499_v50 = vmul.f32 1.442695, %v3471_v26  ;;  %3549 = vst [vmem:[%s6822_s6 + $0x50] sm:$0xff] %v3533_v54  ;;  %v3408_v22 = vadd.f32 %v3392_v46, %v3232_v30  ;;  %v3202_v31 = vsel %vm3042_vm12, %v3106_v14, %v3186_v27  ;;  %v4754_v54 = vld [vmem:[%s5656_s15 + $0x78] sm:$0xff]  ;;  %s5182_s15 = smov [#allocation20]  }
 0x968   : > { %v3361_v39 = vmul.f32 %v4004_v38, %v3249_v33  ;;  %v3250_v0 = vmul.f32 %v3202_v31, %v3202_v31  ;;  %v4730_v48 = vpop.eup %4729  ;;  %s5071_s2 = sshll.u32 %s5182_s15, 4  ;;  %s5072_s2 = int_to_ptr.vmem [resolvable:$false] %s5071_s2 }
 0x969   : > { %4731 = vpow2.f32 %v3499_v50  ;;  %v3440_v43 = vsub.f32 0.0, %v3408_v22  ;;  %v3518_v9 = vmul.f32 %v4750_v57, %v4730_v48  ;;  %s5073_s12 = scalar_lea.vmem %s5072_s2, 4096  ;;  %p5074_p1 = scmp.lt.s32.totalorder %s7180_s25, %s5072_s2 }
 0x96a   : > { %v3377_v6 = vmul.f32 %v3361_v39, %v7103_v5  ;;  %v3266_v11 = vmul.f32 0.080537446, %v3250_v0  ;;  %p5075_p13 = scmp.lt.s32.totalorder %s5073_s12, %s5067_s18 }
 0x96b   : > { %v3456_v53 = vsel %vm3424_vm13, %v3440_v43, %v3408_v22  ;;  %v3534_v33 = vadd.f32 %v3518_v9, %v2973_v24 }
 0x96c   : > { %v3472_v63 = vmul.f32 3.18, %v3456_v53  ;;  %v3393_v19 = vadd.f32 %v3377_v6, %v7103_v5  ;;  %v3989_v18 = vadd.f32 -0.13877685, %v3266_v11  ;;  %v2979_v5 = vadd.f32 %v6831_v60, %v6548_v44  ;;  %p5076_p0 = por %p5075_p13, %p5074_p1 }
 0x96d   : > { %3550 = vst [vmem:[%s6822_s6 + $0x58] sm:$0xff] %v3534_v33  ;;  %v2983_v60 = vadd.f32 %v6849_v32, %v6548_v44  ;;  %v2989_v32 = vadd.f32 %v6876_v12, %v6548_v44 }
 0x96e   : > { %v3501_v35 = vmul.f32 1.442695, %v3472_v63  ;;  %v3409_v10 = vadd.f32 %v3393_v19, %v3233_v29  ;;  %v3298_v47 = vmul.f32 %v3989_v18, %v3250_v0  ;;  %p5077_p6 = pnand %p5076_p0, %p5070_p12 }
 0x970   : > { %4733 = vpow2.f32 %v3501_v35  ;;  %v3441_v3 = vsub.f32 0.0, %v3409_v10  ;;  %v3314_v40 = vadd.f32 0.19977711, %v3298_v47 }
 0x972   : > { %v3457_v2 = vsel %vm3425_vm14, %v3441_v3, %v3409_v10  ;;  %v3330_v61 = vmul.f32 %v3314_v40, %v3250_v0 }
 0x973   : > { %v4732_v8 = vpop.eup %4731  ;;  %v3473_v23 = vmul.f32 3.18, %v3457_v2 }
 0x974   : > { %v3519_v36 = vmul.f32 %v4751_v13, %v4732_v8  ;;  %v4005_v21 = vadd.f32 -0.3333295, %v3330_v61 }
 0x975   : > { %v3503_v41 = vmul.f32 1.442695, %v3473_v23 }
 0x976   : > { %v3535_v52 = vadd.f32 %v3519_v36, %v2979_v5  ;;  %v3362_v59 = vmul.f32 %v4005_v21, %v3250_v0 }
 0x977   : > { %4735 = vpow2.f32 %v3503_v41 }
 0x978   : > { %3551 = vst [vmem:[%s6822_s6 + $0x60] sm:$0xff] %v3535_v52  ;;  %v3378_v4 = vmul.f32 %v3362_v59, %v3202_v31 }
 0x97a   : > { %v4734_v16 = vpop.eup %4733  ;;  %v3394_v37 = vadd.f32 %v3378_v4, %v3202_v31 }
 0x97b   : > { %v3520_v55 = vmul.f32 %v4752_v62, %v4734_v16 }
 0x97c   : > { %v3410_v25 = vadd.f32 %v3394_v37, %v3234_v42 }
 0x97d   : > { %v3536_v51 = vadd.f32 %v3520_v55, %v2983_v60 }
 0x97e   : > { %v3442_v7 = vsub.f32 0.0, %v3410_v25 }
 0x97f   : > { %3552 = vst [vmem:[%s6822_s6 + $0x68] sm:$0xff] %v3536_v51 }
 0x980   : > { %v3458_v20 = vsel %vm3426_vm15, %v3442_v7, %v3410_v25 }
 0x981   : > { %v4736_v1 = vpop.eup %4735  ;;  %v3474_v28 = vmul.f32 3.18, %v3458_v20 }
 0x982   : > { %v3521_v14 = vmul.f32 %v4753_v15, %v4736_v1 }
 0x983   : > { %v3505_v26 = vmul.f32 1.442695, %v3474_v28 }
 0x984   : > { %v3537_v34 = vadd.f32 %v3521_v14, %v2989_v32 }
 0x985   : > { %4737 = vpow2.f32 %v3505_v26 }
 0x986   : > { %3553 = vst [vmem:[%s6822_s6 + $0x70] sm:$0xff] %v3537_v34 }
 0x98f   : > { %v4738_v17 = vpop.eup %4737 }
 0x990   : > { %v3522_v30 = vmul.f32 %v4754_v54, %v4738_v17 }
 0x992   : > { %v3538_v12 = vadd.f32 %v3522_v30, %v2993_v56 }
 0x994   : > { %3554 = vst [vmem:[%s6822_s6 + $0x78] sm:$0xff] %v3538_v12 }
 0x995   : > { %5080 = shalt.err (!%p5077_p6)
}
 0x996   : > { %s5081_s9 = scalar_lea.hbm %s7178_s14, 2048  ;;  %s5085_s11 = scalar_lea.hbm %s7327_s29, 4096 }
 0x997   : > { %p5082_p2 = scmp.ne.s32.totalorder %s7178_s14, %s5081_s9  ;;  %p5086_p5 = scmp.lt.u32.totalorder %s7178_s14, %s7327_s29 }
 0x998   : > { %p5087_p9 = scmp.lt.u32.totalorder %s5085_s11, %s5081_s9  ;;  %p5089_p11 = scmp.lt.u32.totalorder %s5081_s9, %s7178_s14 }
 0x999   : > { %p5083_p4 = pnand %p5082_p2, %p7326_p7 }
 0x99a   : > { %p5088_p8 = por %p5087_p9, %p5086_p5 }
 0x99b   : > { %p5084_p10 = pneg %p5083_p4 }
 0x99c   : > { %p5090_p3 = por %p5089_p11, %p5088_p8 }
 0x99e   : > { %p5091_p12 = pnand %p5090_p3, %p5084_p10 }
 0x9a0   : > { %5094 = shalt.err (!%p5091_p12)
}
 0x9a1   : > { %4343 = dma.vmem_to_hbm [thread:$0]  (%p7326_p7), %s7180_s25, 2048, %s7178_s14, %s3561_s17, %s5180_s27, %s5180_s27, %s5181_s3  }
 0x9a2 PF: > { %s3605_s4 = sand.u32 1, %s5149_s0   ;;  %p7328_p1 = scmp.ne.s32.totalorder %s7301_s26, 0 }
 0x9a3   : > { %p7329_p13 = scmp.ge.s32.totalorder %s5161_s21, 2  ;;  %s3606_s18 = scalar_lea.sflag [#allocation4], %s3605_s4 }
 0x9a5   : > { %p4379_p0 = pnand %p7329_p13, %p7328_p1 }
 0x9a7   : > { %5140 = dma.done.wait (!%p4379_p0), %s3606_s18, 2048  }
 0x9a8   : > { %5142 = vsyncadd (!%p4379_p0), %s3606_s18, 4294965248  ;;  %s3615_s28 = scalar_lea.sflag [#allocation21], %s3605_s4 }
 0x9a9   : > { %5144 = dma.done.wait (!%p4379_p0), %s3615_s28, 2048  }
 0x9aa   : > { %5146 = vsyncadd (!%p4379_p0), %s3615_s28, 4294965248  ;;  %p43_p7 = scmp.ge.s32.totalorder %s5519_s24, 4   ;;  %s7330_s0 = smov %s5153_s30 }
 0x9ab   : > { %s7331_s30 = smov %s5157_s20  ;;  %s7332_s20 = smov %s5530_s22 }
 0x9ac   : > { %s7333_s21 = smov %s5519_s24  ;;  %45 = sbr.rel (!%p43_p7) target bundleno = 32 (0x20), region = 199 }
 0x9b3   :  { %3620 = vsyncpa [#allocation3], 1 }
 0x9b4   :  { %3622 = vsyncpa [#allocation3 + $0x1], 1 }
 0x9b5   :  { %3623 = vsyncpa [#allocation6], 1 }
 0x9b6   :  { %3625 = vsyncpa [#allocation6 + $0x1], 1 }
 0x9b7   :  { %3626 = vsyncpa [#allocation9], 1 }
 0x9b8   :  { %3627 = vsyncpa [#allocation12], 1 }
 0x9b9   :  { %3628 = vsyncpa [#allocation15], 1 }
 0x9ba   :  { %3629 = vsyncpa [#allocation18], 1 }
 0x9bb   :  { %3630 = vsyncpa [#allocation4], 1 }
 0x9bc   :  { %3632 = vsyncpa [#allocation4 + $0x1], 1 }
 0x9bd   :  { %3633 = vsyncpa [#allocation21], 1 }
 0x9be   :  { %3635 = vsyncpa [#allocation21 + $0x1], 1 }

</bundles_post_ra>
